<compile_context>
chip_gen: v5e
topology: v5e:2x2
jax: 0.10.0
libtpu: 0.0.40
codegen_flags: <defaults>
</compile_context>

<pallas_src>
import functools

import jax
import jax.numpy as jnp
import numpy as np
from jax.experimental import pallas as pl
from jax.experimental.pallas import tpu as pltpu

BN_EPS = 1e-5

_COMPILER_PARAMS = pltpu.CompilerParams(
    dimension_semantics=("parallel", "parallel"),   # megacore split on v7x
    vmem_limit_bytes=32 * 1024 * 1024,              # explicit scoped-VMEM budget
)


# ----------------------------- Pallas kernels ------------------------------ #

def conv3d_stats_kernel(x0_ref, x1_ref, x2_ref, w_ref, z_ref, ps_ref, ssq_ref):
    """3x3x3 / stride 1 / pad 1 conv on one depth-tile of one sample, plus
    per-tile BN / SE statistics.

    x{0,1,2}_ref : (1, td, H+2, W+2, Cin) bf16 -- depth taps kd = 0, 1, 2 of the
                   zero-padded channels-last input.
    w_ref        : (27, Cin, Cout) bf16, tap-major (kd, kh, kw).
    z_ref        : (1, td, H, W, Cout) f32 -- raw (pre-BN) conv output tile.
    ps_ref/ssq_ref : (1, 1, 1, Cout) f32 -- per-tile sum / sum-of-squares.
    """
    _, td, hp, wp, cin = x0_ref.shape
    H, W = hp - 2, wp - 2
    cout = w_ref.shape[-1]
    rows = td * H * W

    xs = (x0_ref[...], x1_ref[...], x2_ref[...])
    acc = jnp.zeros((rows, cout), jnp.float32)
    t = 0
    for kd in range(3):
        xk = xs[kd]
        for kh in range(3):
            for kw in range(3):
                patch = xk[0, :, kh:kh + H, kw:kw + W, :].reshape(rows, cin)
                acc = acc + jnp.dot(patch, w_ref[t],
                                    preferred_element_type=jnp.float32)
                t += 1

    z_ref[...] = acc.reshape(1, td, H, W, cout)
    ps_ref[...] = jnp.sum(acc, axis=0).reshape(1, 1, 1, cout)
    ssq_ref[...] = jnp.sum(acc * acc, axis=0).reshape(1, 1, 1, cout)


def bn_relu_kernel(z_ref, scale_ref, shift_ref, h_ref):
    """h = relu(z * scale + shift), streamed elementwise (BN1 apply)."""
    s = scale_ref[...].reshape(1, 1, 1, 1, -1)
    b = shift_ref[...].reshape(1, 1, 1, 1, -1)
    h_ref[...] = jnp.maximum(z_ref[...] * s + b, 0.0).astype(h_ref.dtype)


def bn_se_res_relu_kernel(z_ref, res_ref, scale_ref, shift_ref, gate_ref, o_ref):
    """out = relu(bn2(z) * se_gate + residual), streamed elementwise."""
    s = scale_ref[...].reshape(1, 1, 1, 1, -1)
    b = shift_ref[...].reshape(1, 1, 1, 1, -1)
    g = gate_ref[...].reshape(1, 1, 1, 1, -1)          # per-sample SE gate
    h = (z_ref[...] * s + b) * g
    o_ref[...] = jnp.maximum(h + res_ref[...].astype(jnp.float32), 0.0)


# ------------------------------- JAX wrappers ------------------------------- #

def _conv3x3x3_bn_stats(xpad, w_taps, td):
    """xpad: (N, D+2, H+2, W+2, Cin) bf16.  w_taps: (27, Cin, Cout) bf16.
    Returns z (N, D, H, W, Cout) f32 and per-tile partials (N, DT, 1, Cout)."""
    N, Dp, Hp, Wp, Cin = xpad.shape
    D, H, W = Dp - 2, Hp - 2, Wp - 2
    Cout = w_taps.shape[-1]
    assert D % td == 0, "depth tile must divide D"
    DT = D // td

    # Three depth-shifted views provide the kd halo without im2col.
    x0 = xpad[:, 0:D]
    x1 = xpad[:, 1:D + 1]
    x2 = xpad[:, 2:D + 2]

    xspec = pl.BlockSpec((1, td, Hp, Wp, Cin), lambda n, t: (n, t, 0, 0, 0))
    wspec = pl.BlockSpec((27, Cin, Cout), lambda n, t: (0, 0, 0))   # resident
    zspec = pl.BlockSpec((1, td, H, W, Cout), lambda n, t: (n, t, 0, 0, 0))
    sspec = pl.BlockSpec((1, 1, 1, Cout), lambda n, t: (n, t, 0, 0))

    return pl.pallas_call(
        conv3d_stats_kernel,
        out_shape=(
            jax.ShapeDtypeStruct((N, D, H, W, Cout), jnp.float32),
            jax.ShapeDtypeStruct((N, DT, 1, Cout), jnp.float32),
            jax.ShapeDtypeStruct((N, DT, 1, Cout), jnp.float32),
        ),
        grid=(N, DT),
        in_specs=[xspec, xspec, xspec, wspec],
        out_specs=(zspec, sspec, sspec),
        compiler_params=_COMPILER_PARAMS,
    )(x0, x1, x2, w_taps)


def _bn_folded(psum, pssq, gamma, beta, count):
    """Fold batch statistics into per-channel scale/shift (f32 accumulators)."""
    s = jnp.sum(psum, axis=(0, 1, 2))
    sq = jnp.sum(pssq, axis=(0, 1, 2))
    mean = s / count
    var = sq / count - mean * mean        # conv outputs are ~zero-mean here
    inv = jax.lax.rsqrt(var + BN_EPS)
    scale = gamma.reshape(-1) * inv
    shift = beta.reshape(-1) - mean * scale
    return scale.reshape(1, -1), shift.reshape(1, -1)


def _bn_relu_apply(z, scale, shift, td):
    N, D, H, W, C = z.shape
    DT = D // td
    zspec = pl.BlockSpec((1, td, H, W, C), lambda n, t: (n, t, 0, 0, 0))
    cspec = pl.BlockSpec((1, C), lambda n, t: (0, 0))
    return pl.pallas_call(
        bn_relu_kernel,
        out_shape=jax.ShapeDtypeStruct((N, D, H, W, C), jnp.bfloat16),
        grid=(N, DT),
        in_specs=[zspec, cspec, cspec],
        out_specs=zspec,
        compiler_params=_COMPILER_PARAMS,
    )(z, scale, shift)


def _bn_se_res_relu_apply(z, res, scale, shift, gate, td):
    N, D, H, W, C = z.shape
    DT = D // td
    zspec = pl.BlockSpec((1, td, H, W, C), lambda n, t: (n, t, 0, 0, 0))
    cspec = pl.BlockSpec((1, C), lambda n, t: (0, 0))
    gspec = pl.BlockSpec((1, 1, C), lambda n, t: (n, 0, 0))
    return pl.pallas_call(
        bn_se_res_relu_kernel,
        out_shape=jax.ShapeDtypeStruct((N, D, H, W, C), jnp.float32),
        grid=(N, DT),
        in_specs=[zspec, zspec, cspec, cspec, gspec],
        out_specs=zspec,
        compiler_params=_COMPILER_PARAMS,
    )(z, res, scale, shift, gate)


def init_params(key, inplanes, planes, reduction=16):
    hidden = max(planes // reduction, 1)
    k1, k2, k3, k4 = jax.random.split(key, 4)
    return dict(
        # conv weights as (kd, kh, kw, Cin, Cout) == PyTorch (Cout,Cin,kd,kh,kw)^T
        w1=(jax.random.normal(k1, (3, 3, 3, inplanes, planes), jnp.float32)
            * 0.05).astype(jnp.bfloat16),
        w2=(jax.random.normal(k2, (3, 3, 3, planes, planes), jnp.float32)
            * 0.05).astype(jnp.bfloat16),
        g1=jnp.ones((1, planes), jnp.float32),
        b1=jnp.zeros((1, planes), jnp.float32),
        g2=jnp.ones((1, planes), jnp.float32),
        b2=jnp.zeros((1, planes), jnp.float32),
        # SE fc weights pre-transposed: (C, C//r) and (C//r, C)
        fc1=(jax.random.normal(k3, (planes, hidden), jnp.float32)
             * 0.2).astype(jnp.bfloat16),
        fc2=(jax.random.normal(k4, (hidden, planes), jnp.float32)
             * 0.2).astype(jnp.bfloat16),
    )


@functools.partial(jax.jit, static_argnames=("td",))
def se_basic_block_forward(x, params, td=4):
    """x: (N, C, D, H, W) f32 (PyTorch NCDHW).  Returns same layout.

    td is the depth tile; for realistic shapes pick td so td*H*W lands around
    1024-2048 rows per grid step (the measured sweet spot for pipelined tiles).
    """
    N, Cin, D, H, W = x.shape
    C = params['w1'].shape[-1]
    DHW = D * H * W
    M = N * DHW

    xl = jnp.transpose(x, (0, 2, 3, 4, 1)).astype(jnp.bfloat16)    # NDHWC bf16
    w1 = params['w1'].reshape(27, Cin, C)
    w2 = params['w2'].reshape(27, C, C)
    pad = ((0, 0), (1, 1), (1, 1), (1, 1), (0, 0))

    # --- conv1 + BN1 statistics (pass A), then streamed BN1+ReLU (pass B) ---
    z1, ps1, ssq1 = _conv3x3x3_bn_stats(jnp.pad(xl, pad), w1, td)
    scale1, shift1 = _bn_folded(ps1, ssq1, params['g1'], params['b1'], float(M))
    h1 = _bn_relu_apply(z1, scale1, shift1, td)                    # bf16

    # --- conv2 + BN2/SE statistics (pass A) ---
    z2, ps2, ssq2 = _conv3x3x3_bn_stats(jnp.pad(h1, pad), w2, td)
    scale2, shift2 = _bn_folded(ps2, ssq2, params['g2'], params['b2'], float(M))

    # SE squeeze: BN2 is a per-channel affine, so spatial_mean(bn2(z2)) ==
    # bn2(spatial_mean(z2)); the pooled sums already live in ps2.
    pool = jnp.sum(ps2, axis=(1, 2)) / float(DHW)                  # (N, C)
    y = pool * scale2 + shift2
    y = jax.nn.relu(jnp.dot(y, params['fc1'].astype(jnp.float32)))
    gate = jax.nn.sigmoid(jnp.dot(y, params['fc2'].astype(jnp.float32)))
    gate = gate.reshape(N, 1, C)

    # --- streamed BN2 apply + SE excite + residual + ReLU (pass B) ---
    out = _bn_se_res_relu_apply(z2, xl, scale2, shift2, gate, td)
    return jnp.transpose(out, (0, 4, 1, 2, 3))                     # NCDHW


# ---------------------------- plain-JAX reference --------------------------- #

def reference_forward(x, params):
    xl = jnp.transpose(x, (0, 2, 3, 4, 1)).astype(jnp.bfloat16).astype(jnp.float32)
    w1 = params['w1'].astype(jnp.float32)
    w2 = params['w2'].astype(jnp.float32)

    def conv(h, w):
        dn = jax.lax.conv_dimension_numbers(h.shape, w.shape,
                                            ('NDHWC', 'DHWIO', 'NDHWC'))
        return jax.lax.conv_general_dilated(h, w, (1, 1, 1), 'SAME',
                                            dimension_numbers=dn,
                                            precision=jax.lax.Precision.HIGHEST)

    def bn(h, g, b):
        m = jnp.mean(h, axis=(0, 1, 2, 3), keepdims=True)
        v = jnp.mean(jnp.square(h - m), axis=(0, 1, 2, 3), keepdims=True)
        return ((h - m) / jnp.sqrt(v + BN_EPS) * g.reshape(1, 1, 1, 1, -1)
                + b.reshape(1, 1, 1, 1, -1))

    h = jax.nn.relu(bn(conv(xl, w1), params['g1'], params['b1']))
    h = bn(conv(h, w2), params['g2'], params['b2'])
    y = jnp.mean(h, axis=(1, 2, 3))
    y = jax.nn.relu(jnp.dot(y, params['fc1'].astype(jnp.float32)))
    y = jax.nn.sigmoid(jnp.dot(y, params['fc2'].astype(jnp.float32)))
    h = h * y[:, None, None, None, :]
    out = jax.nn.relu(h + xl)
    return jnp.transpose(out, (0, 4, 1, 2, 3))


# ----------------------------------- main ----------------------------------- #

if __name__ == "__main__":
    # SE basic block with inplanes == planes == 128 (the module's channels[1]),
    # stride=1, downsample=None, reduction=16 -> hidden=8.  C=128 keeps the
    # lane dimension dense (unmasked stores, full MXU columns).
    N, C, D, H, W = 2, 128, 8, 8, 8
    key = jax.random.PRNGKey(0)
    kx, kp = jax.random.split(key)
    x = jax.random.normal(kx, (N, C, D, H, W), jnp.float32)
    params = init_params(kp, C, C, reduction=16)

    out = jax.block_until_ready(se_basic_block_forward(x, params, td=4))
    ref = jax.block_until_ready(reference_forward(x, params))

    assert out.shape == (N, C, D, H, W)
    # Kernel keeps the inter-conv activation (h1) in bf16 for the MXU; the
    # reference is full f32, so allow bf16-storage-level tolerance.
    np.testing.assert_allclose(np.asarray(out), np.asarray(ref),
                               atol=2e-2, rtol=2e-2)
    print("KERNEL_OK")
</pallas_src>

<mosaic_0001>
module attributes {stable_mosaic.version = 11 : i64} {
  func.func @conv3d_stats_kernel(%arg0: i32, %arg1: i32, %arg2: memref<1x4x10x10x128xbf16, #tpu.memory_space<vmem>>, %arg3: memref<1x4x10x10x128xbf16, #tpu.memory_space<vmem>>, %arg4: memref<1x4x10x10x128xbf16, #tpu.memory_space<vmem>>, %arg5: memref<27x128x128xbf16, #tpu.memory_space<vmem>>, %arg6: memref<1x4x8x8x128xf32, #tpu.memory_space<vmem>>, %arg7: memref<1x1x1x128xf32, #tpu.memory_space<vmem>>, %arg8: memref<1x1x1x128xf32, #tpu.memory_space<vmem>>) attributes {dimension_semantics = [#tpu.dimension_semantics<parallel>, #tpu.dimension_semantics<parallel>], iteration_bounds = array<i64: 2, 2>, scalar_prefetch = 0 : i64, scratch_operands = 0 : i64, tpu.core_type = #tpu.core_type<tc>, window_params = [{transform_indices = @transform_0, window_bounds = array<i64: 1, 4, 10, 10, 128>}, {transform_indices = @transform_1, window_bounds = array<i64: 1, 4, 10, 10, 128>}, {transform_indices = @transform_2, window_bounds = array<i64: 1, 4, 10, 10, 128>}, {pipeline_mode = #tpu.pipeline_mode<synchronous>, transform_indices = @transform_3, window_bounds = array<i64: 27, 128, 128>}, {transform_indices = @transform_4, window_bounds = array<i64: 1, 4, 8, 8, 128>}, {transform_indices = @transform_5, window_bounds = array<i64: 1, 1, 1, 128>}, {transform_indices = @transform_6, window_bounds = array<i64: 1, 1, 1, 128>}]} {
    %c0 = arith.constant 0 : index
    %c0_0 = arith.constant 0 : index
    %c0_1 = arith.constant 0 : index
    %c0_2 = arith.constant 0 : index
    %c0_3 = arith.constant 0 : index
    %0 = vector.load %arg2[%c0, %c0_0, %c0_1, %c0_2, %c0_3] : memref<1x4x10x10x128xbf16, #tpu.memory_space<vmem>>, vector<1x4x10x10x128xbf16>
    %c0_4 = arith.constant 0 : index
    %c0_5 = arith.constant 0 : index
    %c0_6 = arith.constant 0 : index
    %c0_7 = arith.constant 0 : index
    %c0_8 = arith.constant 0 : index
    %1 = vector.load %arg3[%c0_4, %c0_5, %c0_6, %c0_7, %c0_8] : memref<1x4x10x10x128xbf16, #tpu.memory_space<vmem>>, vector<1x4x10x10x128xbf16>
    %c0_9 = arith.constant 0 : index
    %c0_10 = arith.constant 0 : index
    %c0_11 = arith.constant 0 : index
    %c0_12 = arith.constant 0 : index
    %c0_13 = arith.constant 0 : index
    %2 = vector.load %arg4[%c0_9, %c0_10, %c0_11, %c0_12, %c0_13] : memref<1x4x10x10x128xbf16, #tpu.memory_space<vmem>>, vector<1x4x10x10x128xbf16>
    %cst = arith.constant 0.000000e+00 : f32
    %3 = vector.broadcast %cst : f32 to vector<256x128xf32>
    %4 = vector.extract_strided_slice %0 {offsets = [0, 0, 0, 0, 0], sizes = [1, 4, 8, 8, 128], strides = [1, 1, 1, 1, 1]} : vector<1x4x10x10x128xbf16> to vector<1x4x8x8x128xbf16>
    %5 = vector.shape_cast %4 : vector<1x4x8x8x128xbf16> to vector<4x8x8x128xbf16>
    %6 = vector.shape_cast %5 : vector<4x8x8x128xbf16> to vector<256x128xbf16>
    %c0_14 = arith.constant 0 : index
    %c0_15 = arith.constant 0 : index
    %c0_16 = arith.constant 0 : index
    %7 = vector.load %arg5[%c0_14, %c0_15, %c0_16] : memref<27x128x128xbf16, #tpu.memory_space<vmem>>, vector<1x128x128xbf16>
    %8 = vector.shape_cast %7 : vector<1x128x128xbf16> to vector<128x128xbf16>
    %cst_17 = arith.constant dense<0.000000e+00> : vector<256x128xf32>
    %9 = tpu.matmul %6, %8, %cst_17 {dimension_numbers = #tpu.dot_dimension_numbers<[1], [0], [0], [1], [0, 0, 1, 1], [], []>} : vector<256x128xbf16>, vector<128x128xbf16>, vector<256x128xf32> -> vector<256x128xf32>
    %10 = arith.addf %3, %9 : vector<256x128xf32>
    %11 = vector.extract_strided_slice %0 {offsets = [0, 0, 0, 1, 0], sizes = [1, 4, 8, 8, 128], strides = [1, 1, 1, 1, 1]} : vector<1x4x10x10x128xbf16> to vector<1x4x8x8x128xbf16>
    %12 = vector.shape_cast %11 : vector<1x4x8x8x128xbf16> to vector<4x8x8x128xbf16>
    %13 = vector.shape_cast %12 : vector<4x8x8x128xbf16> to vector<256x128xbf16>
    %c1 = arith.constant 1 : index
    %c0_18 = arith.constant 0 : index
    %c0_19 = arith.constant 0 : index
    %14 = vector.load %arg5[%c1, %c0_18, %c0_19] : memref<27x128x128xbf16, #tpu.memory_space<vmem>>, vector<1x128x128xbf16>
    %15 = vector.shape_cast %14 : vector<1x128x128xbf16> to vector<128x128xbf16>
    %cst_20 = arith.constant dense<0.000000e+00> : vector<256x128xf32>
    %16 = tpu.matmul %13, %15, %cst_20 {dimension_numbers = #tpu.dot_dimension_numbers<[1], [0], [0], [1], [0, 0, 1, 1], [], []>} : vector<256x128xbf16>, vector<128x128xbf16>, vector<256x128xf32> -> vector<256x128xf32>
    %17 = arith.addf %10, %16 : vector<256x128xf32>
    %18 = vector.extract_strided_slice %0 {offsets = [0, 0, 0, 2, 0], sizes = [1, 4, 8, 8, 128], strides = [1, 1, 1, 1, 1]} : vector<1x4x10x10x128xbf16> to vector<1x4x8x8x128xbf16>
    %19 = vector.shape_cast %18 : vector<1x4x8x8x128xbf16> to vector<4x8x8x128xbf16>
    %20 = vector.shape_cast %19 : vector<4x8x8x128xbf16> to vector<256x128xbf16>
    %c2 = arith.constant 2 : index
    %c0_21 = arith.constant 0 : index
    %c0_22 = arith.constant 0 : index
    %21 = vector.load %arg5[%c2, %c0_21, %c0_22] : memref<27x128x128xbf16, #tpu.memory_space<vmem>>, vector<1x128x128xbf16>
    %22 = vector.shape_cast %21 : vector<1x128x128xbf16> to vector<128x128xbf16>
    %cst_23 = arith.constant dense<0.000000e+00> : vector<256x128xf32>
    %23 = tpu.matmul %20, %22, %cst_23 {dimension_numbers = #tpu.dot_dimension_numbers<[1], [0], [0], [1], [0, 0, 1, 1], [], []>} : vector<256x128xbf16>, vector<128x128xbf16>, vector<256x128xf32> -> vector<256x128xf32>
    %24 = arith.addf %17, %23 : vector<256x128xf32>
    %25 = vector.extract_strided_slice %0 {offsets = [0, 0, 1, 0, 0], sizes = [1, 4, 8, 8, 128], strides = [1, 1, 1, 1, 1]} : vector<1x4x10x10x128xbf16> to vector<1x4x8x8x128xbf16>
    %26 = vector.shape_cast %25 : vector<1x4x8x8x128xbf16> to vector<4x8x8x128xbf16>
    %27 = vector.shape_cast %26 : vector<4x8x8x128xbf16> to vector<256x128xbf16>
    %c3 = arith.constant 3 : index
    %c0_24 = arith.constant 0 : index
    %c0_25 = arith.constant 0 : index
    %28 = vector.load %arg5[%c3, %c0_24, %c0_25] : memref<27x128x128xbf16, #tpu.memory_space<vmem>>, vector<1x128x128xbf16>
    %29 = vector.shape_cast %28 : vector<1x128x128xbf16> to vector<128x128xbf16>
    %cst_26 = arith.constant dense<0.000000e+00> : vector<256x128xf32>
    %30 = tpu.matmul %27, %29, %cst_26 {dimension_numbers = #tpu.dot_dimension_numbers<[1], [0], [0], [1], [0, 0, 1, 1], [], []>} : vector<256x128xbf16>, vector<128x128xbf16>, vector<256x128xf32> -> vector<256x128xf32>
    %31 = arith.addf %24, %30 : vector<256x128xf32>
    %32 = vector.extract_strided_slice %0 {offsets = [0, 0, 1, 1, 0], sizes = [1, 4, 8, 8, 128], strides = [1, 1, 1, 1, 1]} : vector<1x4x10x10x128xbf16> to vector<1x4x8x8x128xbf16>
    %33 = vector.shape_cast %32 : vector<1x4x8x8x128xbf16> to vector<4x8x8x128xbf16>
    %34 = vector.shape_cast %33 : vector<4x8x8x128xbf16> to vector<256x128xbf16>
    %c4 = arith.constant 4 : index
    %c0_27 = arith.constant 0 : index
    %c0_28 = arith.constant 0 : index
    %35 = vector.load %arg5[%c4, %c0_27, %c0_28] : memref<27x128x128xbf16, #tpu.memory_space<vmem>>, vector<1x128x128xbf16>
    %36 = vector.shape_cast %35 : vector<1x128x128xbf16> to vector<128x128xbf16>
    %cst_29 = arith.constant dense<0.000000e+00> : vector<256x128xf32>
    %37 = tpu.matmul %34, %36, %cst_29 {dimension_numbers = #tpu.dot_dimension_numbers<[1], [0], [0], [1], [0, 0, 1, 1], [], []>} : vector<256x128xbf16>, vector<128x128xbf16>, vector<256x128xf32> -> vector<256x128xf32>
    %38 = arith.addf %31, %37 : vector<256x128xf32>
    %39 = vector.extract_strided_slice %0 {offsets = [0, 0, 1, 2, 0], sizes = [1, 4, 8, 8, 128], strides = [1, 1, 1, 1, 1]} : vector<1x4x10x10x128xbf16> to vector<1x4x8x8x128xbf16>
    %40 = vector.shape_cast %39 : vector<1x4x8x8x128xbf16> to vector<4x8x8x128xbf16>
    %41 = vector.shape_cast %40 : vector<4x8x8x128xbf16> to vector<256x128xbf16>
    %c5 = arith.constant 5 : index
    %c0_30 = arith.constant 0 : index
    %c0_31 = arith.constant 0 : index
    %42 = vector.load %arg5[%c5, %c0_30, %c0_31] : memref<27x128x128xbf16, #tpu.memory_space<vmem>>, vector<1x128x128xbf16>
    %43 = vector.shape_cast %42 : vector<1x128x128xbf16> to vector<128x128xbf16>
    %cst_32 = arith.constant dense<0.000000e+00> : vector<256x128xf32>
    %44 = tpu.matmul %41, %43, %cst_32 {dimension_numbers = #tpu.dot_dimension_numbers<[1], [0], [0], [1], [0, 0, 1, 1], [], []>} : vector<256x128xbf16>, vector<128x128xbf16>, vector<256x128xf32> -> vector<256x128xf32>
    %45 = arith.addf %38, %44 : vector<256x128xf32>
    %46 = vector.extract_strided_slice %0 {offsets = [0, 0, 2, 0, 0], sizes = [1, 4, 8, 8, 128], strides = [1, 1, 1, 1, 1]} : vector<1x4x10x10x128xbf16> to vector<1x4x8x8x128xbf16>
    %47 = vector.shape_cast %46 : vector<1x4x8x8x128xbf16> to vector<4x8x8x128xbf16>
    %48 = vector.shape_cast %47 : vector<4x8x8x128xbf16> to vector<256x128xbf16>
    %c6 = arith.constant 6 : index
    %c0_33 = arith.constant 0 : index
    %c0_34 = arith.constant 0 : index
    %49 = vector.load %arg5[%c6, %c0_33, %c0_34] : memref<27x128x128xbf16, #tpu.memory_space<vmem>>, vector<1x128x128xbf16>
    %50 = vector.shape_cast %49 : vector<1x128x128xbf16> to vector<128x128xbf16>
    %cst_35 = arith.constant dense<0.000000e+00> : vector<256x128xf32>
    %51 = tpu.matmul %48, %50, %cst_35 {dimension_numbers = #tpu.dot_dimension_numbers<[1], [0], [0], [1], [0, 0, 1, 1], [], []>} : vector<256x128xbf16>, vector<128x128xbf16>, vector<256x128xf32> -> vector<256x128xf32>
    %52 = arith.addf %45, %51 : vector<256x128xf32>
    %53 = vector.extract_strided_slice %0 {offsets = [0, 0, 2, 1, 0], sizes = [1, 4, 8, 8, 128], strides = [1, 1, 1, 1, 1]} : vector<1x4x10x10x128xbf16> to vector<1x4x8x8x128xbf16>
    %54 = vector.shape_cast %53 : vector<1x4x8x8x128xbf16> to vector<4x8x8x128xbf16>
    %55 = vector.shape_cast %54 : vector<4x8x8x128xbf16> to vector<256x128xbf16>
    %c7 = arith.constant 7 : index
    %c0_36 = arith.constant 0 : index
    %c0_37 = arith.constant 0 : index
    %56 = vector.load %arg5[%c7, %c0_36, %c0_37] : memref<27x128x128xbf16, #tpu.memory_space<vmem>>, vector<1x128x128xbf16>
    %57 = vector.shape_cast %56 : vector<1x128x128xbf16> to vector<128x128xbf16>
    %cst_38 = arith.constant dense<0.000000e+00> : vector<256x128xf32>
    %58 = tpu.matmul %55, %57, %cst_38 {dimension_numbers = #tpu.dot_dimension_numbers<[1], [0], [0], [1], [0, 0, 1, 1], [], []>} : vector<256x128xbf16>, vector<128x128xbf16>, vector<256x128xf32> -> vector<256x128xf32>
    %59 = arith.addf %52, %58 : vector<256x128xf32>
    %60 = vector.extract_strided_slice %0 {offsets = [0, 0, 2, 2, 0], sizes = [1, 4, 8, 8, 128], strides = [1, 1, 1, 1, 1]} : vector<1x4x10x10x128xbf16> to vector<1x4x8x8x128xbf16>
    %61 = vector.shape_cast %60 : vector<1x4x8x8x128xbf16> to vector<4x8x8x128xbf16>
    %62 = vector.shape_cast %61 : vector<4x8x8x128xbf16> to vector<256x128xbf16>
    %c8 = arith.constant 8 : index
    %c0_39 = arith.constant 0 : index
    %c0_40 = arith.constant 0 : index
    %63 = vector.load %arg5[%c8, %c0_39, %c0_40] : memref<27x128x128xbf16, #tpu.memory_space<vmem>>, vector<1x128x128xbf16>
    %64 = vector.shape_cast %63 : vector<1x128x128xbf16> to vector<128x128xbf16>
    %cst_41 = arith.constant dense<0.000000e+00> : vector<256x128xf32>
    %65 = tpu.matmul %62, %64, %cst_41 {dimension_numbers = #tpu.dot_dimension_numbers<[1], [0], [0], [1], [0, 0, 1, 1], [], []>} : vector<256x128xbf16>, vector<128x128xbf16>, vector<256x128xf32> -> vector<256x128xf32>
    %66 = arith.addf %59, %65 : vector<256x128xf32>
    %67 = vector.extract_strided_slice %1 {offsets = [0, 0, 0, 0, 0], sizes = [1, 4, 8, 8, 128], strides = [1, 1, 1, 1, 1]} : vector<1x4x10x10x128xbf16> to vector<1x4x8x8x128xbf16>
    %68 = vector.shape_cast %67 : vector<1x4x8x8x128xbf16> to vector<4x8x8x128xbf16>
    %69 = vector.shape_cast %68 : vector<4x8x8x128xbf16> to vector<256x128xbf16>
    %c9 = arith.constant 9 : index
    %c0_42 = arith.constant 0 : index
    %c0_43 = arith.constant 0 : index
    %70 = vector.load %arg5[%c9, %c0_42, %c0_43] : memref<27x128x128xbf16, #tpu.memory_space<vmem>>, vector<1x128x128xbf16>
    %71 = vector.shape_cast %70 : vector<1x128x128xbf16> to vector<128x128xbf16>
    %cst_44 = arith.constant dense<0.000000e+00> : vector<256x128xf32>
    %72 = tpu.matmul %69, %71, %cst_44 {dimension_numbers = #tpu.dot_dimension_numbers<[1], [0], [0], [1], [0, 0, 1, 1], [], []>} : vector<256x128xbf16>, vector<128x128xbf16>, vector<256x128xf32> -> vector<256x128xf32>
    %73 = arith.addf %66, %72 : vector<256x128xf32>
    %74 = vector.extract_strided_slice %1 {offsets = [0, 0, 0, 1, 0], sizes = [1, 4, 8, 8, 128], strides = [1, 1, 1, 1, 1]} : vector<1x4x10x10x128xbf16> to vector<1x4x8x8x128xbf16>
    %75 = vector.shape_cast %74 : vector<1x4x8x8x128xbf16> to vector<4x8x8x128xbf16>
    %76 = vector.shape_cast %75 : vector<4x8x8x128xbf16> to vector<256x128xbf16>
    %c10 = arith.constant 10 : index
    %c0_45 = arith.constant 0 : index
    %c0_46 = arith.constant 0 : index
    %77 = vector.load %arg5[%c10, %c0_45, %c0_46] : memref<27x128x128xbf16, #tpu.memory_space<vmem>>, vector<1x128x128xbf16>
    %78 = vector.shape_cast %77 : vector<1x128x128xbf16> to vector<128x128xbf16>
    %cst_47 = arith.constant dense<0.000000e+00> : vector<256x128xf32>
    %79 = tpu.matmul %76, %78, %cst_47 {dimension_numbers = #tpu.dot_dimension_numbers<[1], [0], [0], [1], [0, 0, 1, 1], [], []>} : vector<256x128xbf16>, vector<128x128xbf16>, vector<256x128xf32> -> vector<256x128xf32>
    %80 = arith.addf %73, %79 : vector<256x128xf32>
    %81 = vector.extract_strided_slice %1 {offsets = [0, 0, 0, 2, 0], sizes = [1, 4, 8, 8, 128], strides = [1, 1, 1, 1, 1]} : vector<1x4x10x10x128xbf16> to vector<1x4x8x8x128xbf16>
    %82 = vector.shape_cast %81 : vector<1x4x8x8x128xbf16> to vector<4x8x8x128xbf16>
    %83 = vector.shape_cast %82 : vector<4x8x8x128xbf16> to vector<256x128xbf16>
    %c11 = arith.constant 11 : index
    %c0_48 = arith.constant 0 : index
    %c0_49 = arith.constant 0 : index
    %84 = vector.load %arg5[%c11, %c0_48, %c0_49] : memref<27x128x128xbf16, #tpu.memory_space<vmem>>, vector<1x128x128xbf16>
    %85 = vector.shape_cast %84 : vector<1x128x128xbf16> to vector<128x128xbf16>
    %cst_50 = arith.constant dense<0.000000e+00> : vector<256x128xf32>
    %86 = tpu.matmul %83, %85, %cst_50 {dimension_numbers = #tpu.dot_dimension_numbers<[1], [0], [0], [1], [0, 0, 1, 1], [], []>} : vector<256x128xbf16>, vector<128x128xbf16>, vector<256x128xf32> -> vector<256x128xf32>
    %87 = arith.addf %80, %86 : vector<256x128xf32>
    %88 = vector.extract_strided_slice %1 {offsets = [0, 0, 1, 0, 0], sizes = [1, 4, 8, 8, 128], strides = [1, 1, 1, 1, 1]} : vector<1x4x10x10x128xbf16> to vector<1x4x8x8x128xbf16>
    %89 = vector.shape_cast %88 : vector<1x4x8x8x128xbf16> to vector<4x8x8x128xbf16>
    %90 = vector.shape_cast %89 : vector<4x8x8x128xbf16> to vector<256x128xbf16>
    %c12 = arith.constant 12 : index
    %c0_51 = arith.constant 0 : index
    %c0_52 = arith.constant 0 : index
    %91 = vector.load %arg5[%c12, %c0_51, %c0_52] : memref<27x128x128xbf16, #tpu.memory_space<vmem>>, vector<1x128x128xbf16>
    %92 = vector.shape_cast %91 : vector<1x128x128xbf16> to vector<128x128xbf16>
    %cst_53 = arith.constant dense<0.000000e+00> : vector<256x128xf32>
    %93 = tpu.matmul %90, %92, %cst_53 {dimension_numbers = #tpu.dot_dimension_numbers<[1], [0], [0], [1], [0, 0, 1, 1], [], []>} : vector<256x128xbf16>, vector<128x128xbf16>, vector<256x128xf32> -> vector<256x128xf32>
    %94 = arith.addf %87, %93 : vector<256x128xf32>
    %95 = vector.extract_strided_slice %1 {offsets = [0, 0, 1, 1, 0], sizes = [1, 4, 8, 8, 128], strides = [1, 1, 1, 1, 1]} : vector<1x4x10x10x128xbf16> to vector<1x4x8x8x128xbf16>
    %96 = vector.shape_cast %95 : vector<1x4x8x8x128xbf16> to vector<4x8x8x128xbf16>
    %97 = vector.shape_cast %96 : vector<4x8x8x128xbf16> to vector<256x128xbf16>
    %c13 = arith.constant 13 : index
    %c0_54 = arith.constant 0 : index
    %c0_55 = arith.constant 0 : index
    %98 = vector.load %arg5[%c13, %c0_54, %c0_55] : memref<27x128x128xbf16, #tpu.memory_space<vmem>>, vector<1x128x128xbf16>
    %99 = vector.shape_cast %98 : vector<1x128x128xbf16> to vector<128x128xbf16>
    %cst_56 = arith.constant dense<0.000000e+00> : vector<256x128xf32>
    %100 = tpu.matmul %97, %99, %cst_56 {dimension_numbers = #tpu.dot_dimension_numbers<[1], [0], [0], [1], [0, 0, 1, 1], [], []>} : vector<256x128xbf16>, vector<128x128xbf16>, vector<256x128xf32> -> vector<256x128xf32>
    %101 = arith.addf %94, %100 : vector<256x128xf32>
    %102 = vector.extract_strided_slice %1 {offsets = [0, 0, 1, 2, 0], sizes = [1, 4, 8, 8, 128], strides = [1, 1, 1, 1, 1]} : vector<1x4x10x10x128xbf16> to vector<1x4x8x8x128xbf16>
    %103 = vector.shape_cast %102 : vector<1x4x8x8x128xbf16> to vector<4x8x8x128xbf16>
    %104 = vector.shape_cast %103 : vector<4x8x8x128xbf16> to vector<256x128xbf16>
    %c14 = arith.constant 14 : index
    %c0_57 = arith.constant 0 : index
    %c0_58 = arith.constant 0 : index
    %105 = vector.load %arg5[%c14, %c0_57, %c0_58] : memref<27x128x128xbf16, #tpu.memory_space<vmem>>, vector<1x128x128xbf16>
    %106 = vector.shape_cast %105 : vector<1x128x128xbf16> to vector<128x128xbf16>
    %cst_59 = arith.constant dense<0.000000e+00> : vector<256x128xf32>
    %107 = tpu.matmul %104, %106, %cst_59 {dimension_numbers = #tpu.dot_dimension_numbers<[1], [0], [0], [1], [0, 0, 1, 1], [], []>} : vector<256x128xbf16>, vector<128x128xbf16>, vector<256x128xf32> -> vector<256x128xf32>
    %108 = arith.addf %101, %107 : vector<256x128xf32>
    %109 = vector.extract_strided_slice %1 {offsets = [0, 0, 2, 0, 0], sizes = [1, 4, 8, 8, 128], strides = [1, 1, 1, 1, 1]} : vector<1x4x10x10x128xbf16> to vector<1x4x8x8x128xbf16>
    %110 = vector.shape_cast %109 : vector<1x4x8x8x128xbf16> to vector<4x8x8x128xbf16>
    %111 = vector.shape_cast %110 : vector<4x8x8x128xbf16> to vector<256x128xbf16>
    %c15 = arith.constant 15 : index
    %c0_60 = arith.constant 0 : index
    %c0_61 = arith.constant 0 : index
    %112 = vector.load %arg5[%c15, %c0_60, %c0_61] : memref<27x128x128xbf16, #tpu.memory_space<vmem>>, vector<1x128x128xbf16>
    %113 = vector.shape_cast %112 : vector<1x128x128xbf16> to vector<128x128xbf16>
    %cst_62 = arith.constant dense<0.000000e+00> : vector<256x128xf32>
    %114 = tpu.matmul %111, %113, %cst_62 {dimension_numbers = #tpu.dot_dimension_numbers<[1], [0], [0], [1], [0, 0, 1, 1], [], []>} : vector<256x128xbf16>, vector<128x128xbf16>, vector<256x128xf32> -> vector<256x128xf32>
    %115 = arith.addf %108, %114 : vector<256x128xf32>
    %116 = vector.extract_strided_slice %1 {offsets = [0, 0, 2, 1, 0], sizes = [1, 4, 8, 8, 128], strides = [1, 1, 1, 1, 1]} : vector<1x4x10x10x128xbf16> to vector<1x4x8x8x128xbf16>
    %117 = vector.shape_cast %116 : vector<1x4x8x8x128xbf16> to vector<4x8x8x128xbf16>
    %118 = vector.shape_cast %117 : vector<4x8x8x128xbf16> to vector<256x128xbf16>
    %c16 = arith.constant 16 : index
    %c0_63 = arith.constant 0 : index
    %c0_64 = arith.constant 0 : index
    %119 = vector.load %arg5[%c16, %c0_63, %c0_64] : memref<27x128x128xbf16, #tpu.memory_space<vmem>>, vector<1x128x128xbf16>
    %120 = vector.shape_cast %119 : vector<1x128x128xbf16> to vector<128x128xbf16>
    %cst_65 = arith.constant dense<0.000000e+00> : vector<256x128xf32>
    %121 = tpu.matmul %118, %120, %cst_65 {dimension_numbers = #tpu.dot_dimension_numbers<[1], [0], [0], [1], [0, 0, 1, 1], [], []>} : vector<256x128xbf16>, vector<128x128xbf16>, vector<256x128xf32> -> vector<256x128xf32>
    %122 = arith.addf %115, %121 : vector<256x128xf32>
    %123 = vector.extract_strided_slice %1 {offsets = [0, 0, 2, 2, 0], sizes = [1, 4, 8, 8, 128], strides = [1, 1, 1, 1, 1]} : vector<1x4x10x10x128xbf16> to vector<1x4x8x8x128xbf16>
    %124 = vector.shape_cast %123 : vector<1x4x8x8x128xbf16> to vector<4x8x8x128xbf16>
    %125 = vector.shape_cast %124 : vector<4x8x8x128xbf16> to vector<256x128xbf16>
    %c17 = arith.constant 17 : index
    %c0_66 = arith.constant 0 : index
    %c0_67 = arith.constant 0 : index
    %126 = vector.load %arg5[%c17, %c0_66, %c0_67] : memref<27x128x128xbf16, #tpu.memory_space<vmem>>, vector<1x128x128xbf16>
    %127 = vector.shape_cast %126 : vector<1x128x128xbf16> to vector<128x128xbf16>
    %cst_68 = arith.constant dense<0.000000e+00> : vector<256x128xf32>
    %128 = tpu.matmul %125, %127, %cst_68 {dimension_numbers = #tpu.dot_dimension_numbers<[1], [0], [0], [1], [0, 0, 1, 1], [], []>} : vector<256x128xbf16>, vector<128x128xbf16>, vector<256x128xf32> -> vector<256x128xf32>
    %129 = arith.addf %122, %128 : vector<256x128xf32>
    %130 = vector.extract_strided_slice %2 {offsets = [0, 0, 0, 0, 0], sizes = [1, 4, 8, 8, 128], strides = [1, 1, 1, 1, 1]} : vector<1x4x10x10x128xbf16> to vector<1x4x8x8x128xbf16>
    %131 = vector.shape_cast %130 : vector<1x4x8x8x128xbf16> to vector<4x8x8x128xbf16>
    %132 = vector.shape_cast %131 : vector<4x8x8x128xbf16> to vector<256x128xbf16>
    %c18 = arith.constant 18 : index
    %c0_69 = arith.constant 0 : index
    %c0_70 = arith.constant 0 : index
    %133 = vector.load %arg5[%c18, %c0_69, %c0_70] : memref<27x128x128xbf16, #tpu.memory_space<vmem>>, vector<1x128x128xbf16>
    %134 = vector.shape_cast %133 : vector<1x128x128xbf16> to vector<128x128xbf16>
    %cst_71 = arith.constant dense<0.000000e+00> : vector<256x128xf32>
    %135 = tpu.matmul %132, %134, %cst_71 {dimension_numbers = #tpu.dot_dimension_numbers<[1], [0], [0], [1], [0, 0, 1, 1], [], []>} : vector<256x128xbf16>, vector<128x128xbf16>, vector<256x128xf32> -> vector<256x128xf32>
    %136 = arith.addf %129, %135 : vector<256x128xf32>
    %137 = vector.extract_strided_slice %2 {offsets = [0, 0, 0, 1, 0], sizes = [1, 4, 8, 8, 128], strides = [1, 1, 1, 1, 1]} : vector<1x4x10x10x128xbf16> to vector<1x4x8x8x128xbf16>
    %138 = vector.shape_cast %137 : vector<1x4x8x8x128xbf16> to vector<4x8x8x128xbf16>
    %139 = vector.shape_cast %138 : vector<4x8x8x128xbf16> to vector<256x128xbf16>
    %c19 = arith.constant 19 : index
    %c0_72 = arith.constant 0 : index
    %c0_73 = arith.constant 0 : index
    %140 = vector.load %arg5[%c19, %c0_72, %c0_73] : memref<27x128x128xbf16, #tpu.memory_space<vmem>>, vector<1x128x128xbf16>
    %141 = vector.shape_cast %140 : vector<1x128x128xbf16> to vector<128x128xbf16>
    %cst_74 = arith.constant dense<0.000000e+00> : vector<256x128xf32>
    %142 = tpu.matmul %139, %141, %cst_74 {dimension_numbers = #tpu.dot_dimension_numbers<[1], [0], [0], [1], [0, 0, 1, 1], [], []>} : vector<256x128xbf16>, vector<128x128xbf16>, vector<256x128xf32> -> vector<256x128xf32>
    %143 = arith.addf %136, %142 : vector<256x128xf32>
    %144 = vector.extract_strided_slice %2 {offsets = [0, 0, 0, 2, 0], sizes = [1, 4, 8, 8, 128], strides = [1, 1, 1, 1, 1]} : vector<1x4x10x10x128xbf16> to vector<1x4x8x8x128xbf16>
    %145 = vector.shape_cast %144 : vector<1x4x8x8x128xbf16> to vector<4x8x8x128xbf16>
    %146 = vector.shape_cast %145 : vector<4x8x8x128xbf16> to vector<256x128xbf16>
    %c20 = arith.constant 20 : index
    %c0_75 = arith.constant 0 : index
    %c0_76 = arith.constant 0 : index
    %147 = vector.load %arg5[%c20, %c0_75, %c0_76] : memref<27x128x128xbf16, #tpu.memory_space<vmem>>, vector<1x128x128xbf16>
    %148 = vector.shape_cast %147 : vector<1x128x128xbf16> to vector<128x128xbf16>
    %cst_77 = arith.constant dense<0.000000e+00> : vector<256x128xf32>
    %149 = tpu.matmul %146, %148, %cst_77 {dimension_numbers = #tpu.dot_dimension_numbers<[1], [0], [0], [1], [0, 0, 1, 1], [], []>} : vector<256x128xbf16>, vector<128x128xbf16>, vector<256x128xf32> -> vector<256x128xf32>
    %150 = arith.addf %143, %149 : vector<256x128xf32>
    %151 = vector.extract_strided_slice %2 {offsets = [0, 0, 1, 0, 0], sizes = [1, 4, 8, 8, 128], strides = [1, 1, 1, 1, 1]} : vector<1x4x10x10x128xbf16> to vector<1x4x8x8x128xbf16>
    %152 = vector.shape_cast %151 : vector<1x4x8x8x128xbf16> to vector<4x8x8x128xbf16>
    %153 = vector.shape_cast %152 : vector<4x8x8x128xbf16> to vector<256x128xbf16>
    %c21 = arith.constant 21 : index
    %c0_78 = arith.constant 0 : index
    %c0_79 = arith.constant 0 : index
    %154 = vector.load %arg5[%c21, %c0_78, %c0_79] : memref<27x128x128xbf16, #tpu.memory_space<vmem>>, vector<1x128x128xbf16>
    %155 = vector.shape_cast %154 : vector<1x128x128xbf16> to vector<128x128xbf16>
    %cst_80 = arith.constant dense<0.000000e+00> : vector<256x128xf32>
    %156 = tpu.matmul %153, %155, %cst_80 {dimension_numbers = #tpu.dot_dimension_numbers<[1], [0], [0], [1], [0, 0, 1, 1], [], []>} : vector<256x128xbf16>, vector<128x128xbf16>, vector<256x128xf32> -> vector<256x128xf32>
    %157 = arith.addf %150, %156 : vector<256x128xf32>
    %158 = vector.extract_strided_slice %2 {offsets = [0, 0, 1, 1, 0], sizes = [1, 4, 8, 8, 128], strides = [1, 1, 1, 1, 1]} : vector<1x4x10x10x128xbf16> to vector<1x4x8x8x128xbf16>
    %159 = vector.shape_cast %158 : vector<1x4x8x8x128xbf16> to vector<4x8x8x128xbf16>
    %160 = vector.shape_cast %159 : vector<4x8x8x128xbf16> to vector<256x128xbf16>
    %c22 = arith.constant 22 : index
    %c0_81 = arith.constant 0 : index
    %c0_82 = arith.constant 0 : index
    %161 = vector.load %arg5[%c22, %c0_81, %c0_82] : memref<27x128x128xbf16, #tpu.memory_space<vmem>>, vector<1x128x128xbf16>
    %162 = vector.shape_cast %161 : vector<1x128x128xbf16> to vector<128x128xbf16>
    %cst_83 = arith.constant dense<0.000000e+00> : vector<256x128xf32>
    %163 = tpu.matmul %160, %162, %cst_83 {dimension_numbers = #tpu.dot_dimension_numbers<[1], [0], [0], [1], [0, 0, 1, 1], [], []>} : vector<256x128xbf16>, vector<128x128xbf16>, vector<256x128xf32> -> vector<256x128xf32>
    %164 = arith.addf %157, %163 : vector<256x128xf32>
    %165 = vector.extract_strided_slice %2 {offsets = [0, 0, 1, 2, 0], sizes = [1, 4, 8, 8, 128], strides = [1, 1, 1, 1, 1]} : vector<1x4x10x10x128xbf16> to vector<1x4x8x8x128xbf16>
    %166 = vector.shape_cast %165 : vector<1x4x8x8x128xbf16> to vector<4x8x8x128xbf16>
    %167 = vector.shape_cast %166 : vector<4x8x8x128xbf16> to vector<256x128xbf16>
    %c23 = arith.constant 23 : index
    %c0_84 = arith.constant 0 : index
    %c0_85 = arith.constant 0 : index
    %168 = vector.load %arg5[%c23, %c0_84, %c0_85] : memref<27x128x128xbf16, #tpu.memory_space<vmem>>, vector<1x128x128xbf16>
    %169 = vector.shape_cast %168 : vector<1x128x128xbf16> to vector<128x128xbf16>
    %cst_86 = arith.constant dense<0.000000e+00> : vector<256x128xf32>
    %170 = tpu.matmul %167, %169, %cst_86 {dimension_numbers = #tpu.dot_dimension_numbers<[1], [0], [0], [1], [0, 0, 1, 1], [], []>} : vector<256x128xbf16>, vector<128x128xbf16>, vector<256x128xf32> -> vector<256x128xf32>
    %171 = arith.addf %164, %170 : vector<256x128xf32>
    %172 = vector.extract_strided_slice %2 {offsets = [0, 0, 2, 0, 0], sizes = [1, 4, 8, 8, 128], strides = [1, 1, 1, 1, 1]} : vector<1x4x10x10x128xbf16> to vector<1x4x8x8x128xbf16>
    %173 = vector.shape_cast %172 : vector<1x4x8x8x128xbf16> to vector<4x8x8x128xbf16>
    %174 = vector.shape_cast %173 : vector<4x8x8x128xbf16> to vector<256x128xbf16>
    %c24 = arith.constant 24 : index
    %c0_87 = arith.constant 0 : index
    %c0_88 = arith.constant 0 : index
    %175 = vector.load %arg5[%c24, %c0_87, %c0_88] : memref<27x128x128xbf16, #tpu.memory_space<vmem>>, vector<1x128x128xbf16>
    %176 = vector.shape_cast %175 : vector<1x128x128xbf16> to vector<128x128xbf16>
    %cst_89 = arith.constant dense<0.000000e+00> : vector<256x128xf32>
    %177 = tpu.matmul %174, %176, %cst_89 {dimension_numbers = #tpu.dot_dimension_numbers<[1], [0], [0], [1], [0, 0, 1, 1], [], []>} : vector<256x128xbf16>, vector<128x128xbf16>, vector<256x128xf32> -> vector<256x128xf32>
    %178 = arith.addf %171, %177 : vector<256x128xf32>
    %179 = vector.extract_strided_slice %2 {offsets = [0, 0, 2, 1, 0], sizes = [1, 4, 8, 8, 128], strides = [1, 1, 1, 1, 1]} : vector<1x4x10x10x128xbf16> to vector<1x4x8x8x128xbf16>
    %180 = vector.shape_cast %179 : vector<1x4x8x8x128xbf16> to vector<4x8x8x128xbf16>
    %181 = vector.shape_cast %180 : vector<4x8x8x128xbf16> to vector<256x128xbf16>
    %c25 = arith.constant 25 : index
    %c0_90 = arith.constant 0 : index
    %c0_91 = arith.constant 0 : index
    %182 = vector.load %arg5[%c25, %c0_90, %c0_91] : memref<27x128x128xbf16, #tpu.memory_space<vmem>>, vector<1x128x128xbf16>
    %183 = vector.shape_cast %182 : vector<1x128x128xbf16> to vector<128x128xbf16>
    %cst_92 = arith.constant dense<0.000000e+00> : vector<256x128xf32>
    %184 = tpu.matmul %181, %183, %cst_92 {dimension_numbers = #tpu.dot_dimension_numbers<[1], [0], [0], [1], [0, 0, 1, 1], [], []>} : vector<256x128xbf16>, vector<128x128xbf16>, vector<256x128xf32> -> vector<256x128xf32>
    %185 = arith.addf %178, %184 : vector<256x128xf32>
    %186 = vector.extract_strided_slice %2 {offsets = [0, 0, 2, 2, 0], sizes = [1, 4, 8, 8, 128], strides = [1, 1, 1, 1, 1]} : vector<1x4x10x10x128xbf16> to vector<1x4x8x8x128xbf16>
    %187 = vector.shape_cast %186 : vector<1x4x8x8x128xbf16> to vector<4x8x8x128xbf16>
    %188 = vector.shape_cast %187 : vector<4x8x8x128xbf16> to vector<256x128xbf16>
    %c26 = arith.constant 26 : index
    %c0_93 = arith.constant 0 : index
    %c0_94 = arith.constant 0 : index
    %189 = vector.load %arg5[%c26, %c0_93, %c0_94] : memref<27x128x128xbf16, #tpu.memory_space<vmem>>, vector<1x128x128xbf16>
    %190 = vector.shape_cast %189 : vector<1x128x128xbf16> to vector<128x128xbf16>
    %cst_95 = arith.constant dense<0.000000e+00> : vector<256x128xf32>
    %191 = tpu.matmul %188, %190, %cst_95 {dimension_numbers = #tpu.dot_dimension_numbers<[1], [0], [0], [1], [0, 0, 1, 1], [], []>} : vector<256x128xbf16>, vector<128x128xbf16>, vector<256x128xf32> -> vector<256x128xf32>
    %192 = arith.addf %185, %191 : vector<256x128xf32>
    %193 = vector.shape_cast %192 : vector<256x128xf32> to vector<1x4x8x8x128xf32>
    %c0_96 = arith.constant 0 : index
    %c0_97 = arith.constant 0 : index
    %c0_98 = arith.constant 0 : index
    %c0_99 = arith.constant 0 : index
    %c0_100 = arith.constant 0 : index
    %194 = vector.load %arg6[%c0_96, %c0_97, %c0_98, %c0_99, %c0_100] : memref<1x4x8x8x128xf32, #tpu.memory_space<vmem>>, vector<1x4x8x8x128xf32>
    tpu.vector_store %arg6[%c0_96, %c0_97, %c0_98, %c0_99, %c0_100], %193 {strides = array<i32>} : memref<1x4x8x8x128xf32, #tpu.memory_space<vmem>>, vector<1x4x8x8x128xf32>,
    %cst_101 = arith.constant dense<0.000000e+00> : vector<128xf32>
    %195 = vector.multi_reduction <add>, %192, %cst_101 [0] : vector<256x128xf32> to vector<128xf32>
    %196 = vector.shape_cast %195 : vector<128xf32> to vector<1x1x1x128xf32>
    %c0_102 = arith.constant 0 : index
    %c0_103 = arith.constant 0 : index
    %c0_104 = arith.constant 0 : index
    %c0_105 = arith.constant 0 : index
    %197 = vector.load %arg7[%c0_102, %c0_103, %c0_104, %c0_105] : memref<1x1x1x128xf32, #tpu.memory_space<vmem>>, vector<1x1x1x128xf32>
    tpu.vector_store %arg7[%c0_102, %c0_103, %c0_104, %c0_105], %196 {strides = array<i32>} : memref<1x1x1x128xf32, #tpu.memory_space<vmem>>, vector<1x1x1x128xf32>,
    %198 = arith.mulf %192, %192 : vector<256x128xf32>
    %cst_106 = arith.constant dense<0.000000e+00> : vector<128xf32>
    %199 = vector.multi_reduction <add>, %198, %cst_106 [0] : vector<256x128xf32> to vector<128xf32>
    %200 = vector.shape_cast %199 : vector<128xf32> to vector<1x1x1x128xf32>
    %c0_107 = arith.constant 0 : index
    %c0_108 = arith.constant 0 : index
    %c0_109 = arith.constant 0 : index
    %c0_110 = arith.constant 0 : index
    %201 = vector.load %arg8[%c0_107, %c0_108, %c0_109, %c0_110] : memref<1x1x1x128xf32, #tpu.memory_space<vmem>>, vector<1x1x1x128xf32>
    tpu.vector_store %arg8[%c0_107, %c0_108, %c0_109, %c0_110], %200 {strides = array<i32>} : memref<1x1x1x128xf32, #tpu.memory_space<vmem>>, vector<1x1x1x128xf32>,
    return
  }
  func.func @transform_0(%arg0: i32, %arg1: i32) -> (i32, i32, i32, i32, i32) {
    %c0_i32 = arith.constant 0 : i32
    %c0_i32_0 = arith.constant 0 : i32
    %c0_i32_1 = arith.constant 0 : i32
    %c0_i32_2 = arith.constant 0 : i32
    return %arg0, %arg1, %c0_i32, %c0_i32_0, %c0_i32_1 : i32, i32, i32, i32, i32
  }
  func.func @transform_1(%arg0: i32, %arg1: i32) -> (i32, i32, i32, i32, i32) {
    %c0_i32 = arith.constant 0 : i32
    %c0_i32_0 = arith.constant 0 : i32
    %c0_i32_1 = arith.constant 0 : i32
    %c0_i32_2 = arith.constant 0 : i32
    return %arg0, %arg1, %c0_i32, %c0_i32_0, %c0_i32_1 : i32, i32, i32, i32, i32
  }
  func.func @transform_2(%arg0: i32, %arg1: i32) -> (i32, i32, i32, i32, i32) {
    %c0_i32 = arith.constant 0 : i32
    %c0_i32_0 = arith.constant 0 : i32
    %c0_i32_1 = arith.constant 0 : i32
    %c0_i32_2 = arith.constant 0 : i32
    return %arg0, %arg1, %c0_i32, %c0_i32_0, %c0_i32_1 : i32, i32, i32, i32, i32
  }
  func.func @transform_3(%arg0: i32, %arg1: i32) -> (i32, i32, i32) {
    %c0_i32 = arith.constant 0 : i32
    %c0_i32_0 = arith.constant 0 : i32
    %c0_i32_1 = arith.constant 0 : i32
    %c0_i32_2 = arith.constant 0 : i32
    return %c0_i32, %c0_i32_0, %c0_i32_1 : i32, i32, i32
  }
  func.func @transform_4(%arg0: i32, %arg1: i32) -> (i32, i32, i32, i32, i32) {
    %c0_i32 = arith.constant 0 : i32
    %c0_i32_0 = arith.constant 0 : i32
    %c0_i32_1 = arith.constant 0 : i32
    %c0_i32_2 = arith.constant 0 : i32
    return %arg0, %arg1, %c0_i32, %c0_i32_0, %c0_i32_1 : i32, i32, i32, i32, i32
  }
  func.func @transform_5(%arg0: i32, %arg1: i32) -> (i32, i32, i32, i32) {
    %c0_i32 = arith.constant 0 : i32
    %c0_i32_0 = arith.constant 0 : i32
    %c0_i32_1 = arith.constant 0 : i32
    return %arg0, %arg1, %c0_i32, %c0_i32_0 : i32, i32, i32, i32
  }
  func.func @transform_6(%arg0: i32, %arg1: i32) -> (i32, i32, i32, i32) {
    %c0_i32 = arith.constant 0 : i32
    %c0_i32_0 = arith.constant 0 : i32
    %c0_i32_1 = arith.constant 0 : i32
    return %arg0, %arg1, %c0_i32, %c0_i32_0 : i32, i32, i32, i32
  }
}

module attributes {stable_mosaic.version = 11 : i64} {
  func.func @bn_relu_kernel(%arg0: i32, %arg1: i32, %arg2: memref<1x4x8x8x128xf32, #tpu.memory_space<vmem>>, %arg3: memref<1x128xf32, #tpu.memory_space<vmem>>, %arg4: memref<1x128xf32, #tpu.memory_space<vmem>>, %arg5: memref<1x4x8x8x128xbf16, #tpu.memory_space<vmem>>) attributes {dimension_semantics = [#tpu.dimension_semantics<parallel>, #tpu.dimension_semantics<parallel>], iteration_bounds = array<i64: 2, 2>, scalar_prefetch = 0 : i64, scratch_operands = 0 : i64, tpu.core_type = #tpu.core_type<tc>, window_params = [{transform_indices = @transform_0, window_bounds = array<i64: 1, 4, 8, 8, 128>}, {pipeline_mode = #tpu.pipeline_mode<synchronous>, transform_indices = @transform_1, window_bounds = array<i64: 1, 128>}, {pipeline_mode = #tpu.pipeline_mode<synchronous>, transform_indices = @transform_2, window_bounds = array<i64: 1, 128>}, {transform_indices = @transform_3, window_bounds = array<i64: 1, 4, 8, 8, 128>}]} {
    %c0 = arith.constant 0 : index
    %c0_0 = arith.constant 0 : index
    %0 = vector.load %arg3[%c0, %c0_0] : memref<1x128xf32, #tpu.memory_space<vmem>>, vector<1x128xf32>
    %1 = vector.shape_cast %0 : vector<1x128xf32> to vector<1x1x1x1x128xf32>
    %c0_1 = arith.constant 0 : index
    %c0_2 = arith.constant 0 : index
    %2 = vector.load %arg4[%c0_1, %c0_2] : memref<1x128xf32, #tpu.memory_space<vmem>>, vector<1x128xf32>
    %3 = vector.shape_cast %2 : vector<1x128xf32> to vector<1x1x1x1x128xf32>
    %c0_3 = arith.constant 0 : index
    %c0_4 = arith.constant 0 : index
    %c0_5 = arith.constant 0 : index
    %c0_6 = arith.constant 0 : index
    %c0_7 = arith.constant 0 : index
    %4 = vector.load %arg2[%c0_3, %c0_4, %c0_5, %c0_6, %c0_7] : memref<1x4x8x8x128xf32, #tpu.memory_space<vmem>>, vector<1x4x8x8x128xf32>
    %5 = vector.broadcast %1 : vector<1x1x1x1x128xf32> to vector<1x4x8x8x128xf32>
    %6 = arith.mulf %4, %5 : vector<1x4x8x8x128xf32>
    %7 = vector.broadcast %3 : vector<1x1x1x1x128xf32> to vector<1x4x8x8x128xf32>
    %8 = arith.addf %6, %7 : vector<1x4x8x8x128xf32>
    %cst = arith.constant 0.000000e+00 : f32
    %9 = vector.broadcast %cst : f32 to vector<1x4x8x8x128xf32>
    %10 = arith.maximumf %8, %9 : vector<1x4x8x8x128xf32>
    %11 = arith.truncf %10 : vector<1x4x8x8x128xf32> to vector<1x4x8x8x128xbf16>
    %c0_8 = arith.constant 0 : index
    %c0_9 = arith.constant 0 : index
    %c0_10 = arith.constant 0 : index
    %c0_11 = arith.constant 0 : index
    %c0_12 = arith.constant 0 : index
    %12 = vector.load %arg5[%c0_8, %c0_9, %c0_10, %c0_11, %c0_12] : memref<1x4x8x8x128xbf16, #tpu.memory_space<vmem>>, vector<1x4x8x8x128xbf16>
    tpu.vector_store %arg5[%c0_8, %c0_9, %c0_10, %c0_11, %c0_12], %11 {strides = array<i32>} : memref<1x4x8x8x128xbf16, #tpu.memory_space<vmem>>, vector<1x4x8x8x128xbf16>,
    return
  }
  func.func @transform_0(%arg0: i32, %arg1: i32) -> (i32, i32, i32, i32, i32) {
    %c0_i32 = arith.constant 0 : i32
    %c0_i32_0 = arith.constant 0 : i32
    %c0_i32_1 = arith.constant 0 : i32
    %c0_i32_2 = arith.constant 0 : i32
    return %arg0, %arg1, %c0_i32, %c0_i32_0, %c0_i32_1 : i32, i32, i32, i32, i32
  }
  func.func @transform_1(%arg0: i32, %arg1: i32) -> (i32, i32) {
    %c0_i32 = arith.constant 0 : i32
    %c0_i32_0 = arith.constant 0 : i32
    %c0_i32_1 = arith.constant 0 : i32
    return %c0_i32, %c0_i32_0 : i32, i32
  }
  func.func @transform_2(%arg0: i32, %arg1: i32) -> (i32, i32) {
    %c0_i32 = arith.constant 0 : i32
    %c0_i32_0 = arith.constant 0 : i32
    %c0_i32_1 = arith.constant 0 : i32
    return %c0_i32, %c0_i32_0 : i32, i32
  }
  func.func @transform_3(%arg0: i32, %arg1: i32) -> (i32, i32, i32, i32, i32) {
    %c0_i32 = arith.constant 0 : i32
    %c0_i32_0 = arith.constant 0 : i32
    %c0_i32_1 = arith.constant 0 : i32
    %c0_i32_2 = arith.constant 0 : i32
    return %arg0, %arg1, %c0_i32, %c0_i32_0, %c0_i32_1 : i32, i32, i32, i32, i32
  }
}

module attributes {stable_mosaic.version = 11 : i64} {
  func.func @bn_se_res_relu_kernel(%arg0: i32, %arg1: i32, %arg2: memref<1x4x8x8x128xf32, #tpu.memory_space<vmem>>, %arg3: memref<1x4x8x8x128xbf16, #tpu.memory_space<vmem>>, %arg4: memref<1x128xf32, #tpu.memory_space<vmem>>, %arg5: memref<1x128xf32, #tpu.memory_space<vmem>>, %arg6: memref<1x1x128xf32, #tpu.memory_space<vmem>>, %arg7: memref<1x4x8x8x128xf32, #tpu.memory_space<vmem>>) attributes {dimension_semantics = [#tpu.dimension_semantics<parallel>, #tpu.dimension_semantics<parallel>], iteration_bounds = array<i64: 2, 2>, scalar_prefetch = 0 : i64, scratch_operands = 0 : i64, tpu.core_type = #tpu.core_type<tc>, window_params = [{transform_indices = @transform_0, window_bounds = array<i64: 1, 4, 8, 8, 128>}, {transform_indices = @transform_1, window_bounds = array<i64: 1, 4, 8, 8, 128>}, {pipeline_mode = #tpu.pipeline_mode<synchronous>, transform_indices = @transform_2, window_bounds = array<i64: 1, 128>}, {pipeline_mode = #tpu.pipeline_mode<synchronous>, transform_indices = @transform_3, window_bounds = array<i64: 1, 128>}, {transform_indices = @transform_4, window_bounds = array<i64: 1, 1, 128>}, {transform_indices = @transform_5, window_bounds = array<i64: 1, 4, 8, 8, 128>}]} {
    %c0 = arith.constant 0 : index
    %c0_0 = arith.constant 0 : index
    %0 = vector.load %arg4[%c0, %c0_0] : memref<1x128xf32, #tpu.memory_space<vmem>>, vector<1x128xf32>
    %1 = vector.shape_cast %0 : vector<1x128xf32> to vector<1x1x1x1x128xf32>
    %c0_1 = arith.constant 0 : index
    %c0_2 = arith.constant 0 : index
    %2 = vector.load %arg5[%c0_1, %c0_2] : memref<1x128xf32, #tpu.memory_space<vmem>>, vector<1x128xf32>
    %3 = vector.shape_cast %2 : vector<1x128xf32> to vector<1x1x1x1x128xf32>
    %c0_3 = arith.constant 0 : index
    %c0_4 = arith.constant 0 : index
    %c0_5 = arith.constant 0 : index
    %4 = vector.load %arg6[%c0_3, %c0_4, %c0_5] : memref<1x1x128xf32, #tpu.memory_space<vmem>>, vector<1x1x128xf32>
    %5 = vector.shape_cast %4 : vector<1x1x128xf32> to vector<1x1x1x1x128xf32>
    %c0_6 = arith.constant 0 : index
    %c0_7 = arith.constant 0 : index
    %c0_8 = arith.constant 0 : index
    %c0_9 = arith.constant 0 : index
    %c0_10 = arith.constant 0 : index
    %6 = vector.load %arg2[%c0_6, %c0_7, %c0_8, %c0_9, %c0_10] : memref<1x4x8x8x128xf32, #tpu.memory_space<vmem>>, vector<1x4x8x8x128xf32>
    %7 = vector.broadcast %1 : vector<1x1x1x1x128xf32> to vector<1x4x8x8x128xf32>
    %8 = arith.mulf %6, %7 : vector<1x4x8x8x128xf32>
    %9 = vector.broadcast %3 : vector<1x1x1x1x128xf32> to vector<1x4x8x8x128xf32>
    %10 = arith.addf %8, %9 : vector<1x4x8x8x128xf32>
    %11 = vector.broadcast %5 : vector<1x1x1x1x128xf32> to vector<1x4x8x8x128xf32>
    %12 = arith.mulf %10, %11 : vector<1x4x8x8x128xf32>
    %c0_11 = arith.constant 0 : index
    %c0_12 = arith.constant 0 : index
    %c0_13 = arith.constant 0 : index
    %c0_14 = arith.constant 0 : index
    %c0_15 = arith.constant 0 : index
    %13 = vector.load %arg3[%c0_11, %c0_12, %c0_13, %c0_14, %c0_15] : memref<1x4x8x8x128xbf16, #tpu.memory_space<vmem>>, vector<1x4x8x8x128xbf16>
    %14 = arith.extf %13 : vector<1x4x8x8x128xbf16> to vector<1x4x8x8x128xf32>
    %15 = arith.addf %12, %14 : vector<1x4x8x8x128xf32>
    %cst = arith.constant 0.000000e+00 : f32
    %16 = vector.broadcast %cst : f32 to vector<1x4x8x8x128xf32>
    %17 = arith.maximumf %15, %16 : vector<1x4x8x8x128xf32>
    %c0_16 = arith.constant 0 : index
    %c0_17 = arith.constant 0 : index
    %c0_18 = arith.constant 0 : index
    %c0_19 = arith.constant 0 : index
    %c0_20 = arith.constant 0 : index
    %18 = vector.load %arg7[%c0_16, %c0_17, %c0_18, %c0_19, %c0_20] : memref<1x4x8x8x128xf32, #tpu.memory_space<vmem>>, vector<1x4x8x8x128xf32>
    tpu.vector_store %arg7[%c0_16, %c0_17, %c0_18, %c0_19, %c0_20], %17 {strides = array<i32>} : memref<1x4x8x8x128xf32, #tpu.memory_space<vmem>>, vector<1x4x8x8x128xf32>,
    return
  }
  func.func @transform_0(%arg0: i32, %arg1: i32) -> (i32, i32, i32, i32, i32) {
    %c0_i32 = arith.constant 0 : i32
    %c0_i32_0 = arith.constant 0 : i32
    %c0_i32_1 = arith.constant 0 : i32
    %c0_i32_2 = arith.constant 0 : i32
    return %arg0, %arg1, %c0_i32, %c0_i32_0, %c0_i32_1 : i32, i32, i32, i32, i32
  }
  func.func @transform_1(%arg0: i32, %arg1: i32) -> (i32, i32, i32, i32, i32) {
    %c0_i32 = arith.constant 0 : i32
    %c0_i32_0 = arith.constant 0 : i32
    %c0_i32_1 = arith.constant 0 : i32
    %c0_i32_2 = arith.constant 0 : i32
    return %arg0, %arg1, %c0_i32, %c0_i32_0, %c0_i32_1 : i32, i32, i32, i32, i32
  }
  func.func @transform_2(%arg0: i32, %arg1: i32) -> (i32, i32) {
    %c0_i32 = arith.constant 0 : i32
    %c0_i32_0 = arith.constant 0 : i32
    %c0_i32_1 = arith.constant 0 : i32
    return %c0_i32, %c0_i32_0 : i32, i32
  }
  func.func @transform_3(%arg0: i32, %arg1: i32) -> (i32, i32) {
    %c0_i32 = arith.constant 0 : i32
    %c0_i32_0 = arith.constant 0 : i32
    %c0_i32_1 = arith.constant 0 : i32
    return %c0_i32, %c0_i32_0 : i32, i32
  }
  func.func @transform_4(%arg0: i32, %arg1: i32) -> (i32, i32, i32) {
    %c0_i32 = arith.constant 0 : i32
    %c0_i32_0 = arith.constant 0 : i32
    %c0_i32_1 = arith.constant 0 : i32
    return %arg0, %c0_i32, %c0_i32_0 : i32, i32, i32
  }
  func.func @transform_5(%arg0: i32, %arg1: i32) -> (i32, i32, i32, i32, i32) {
    %c0_i32 = arith.constant 0 : i32
    %c0_i32_0 = arith.constant 0 : i32
    %c0_i32_1 = arith.constant 0 : i32
    %c0_i32_2 = arith.constant 0 : i32
    return %arg0, %arg1, %c0_i32, %c0_i32_0, %c0_i32_1 : i32, i32, i32, i32, i32
  }
}

</mosaic_0001>

<bundles_post_ra>
// kernel: se_basic_block_forward.5
= control target key start
LH: loop header
LB: loop body
LE: loop exit
PB: predicated region body
PF: predicated region fallthrough
CT: control target
= control target key end

     0   :  { %s726_s12 = smov 0   ;;  %s728_s13 = smov 0   ;;  %s907_s0 = inlined_call_operand.vmem [shape: f32[2,8,8,8,128], index: 0, kind: input, shape index: {}]   ;;  %s908_s1 = inlined_call_operand.vmem [shape: f32[1,128], index: 1, kind: input, shape index: {}]   ;;  %s909_s2 = inlined_call_operand.vmem [shape: f32[1,128], index: 2, kind: input, shape index: {}]   ;;  %s910_s3 = inlined_call_operand.vmem [shape: bf16[2,8,8,8,128], index: 3, kind: output, shape index: {}]  }
   0x1   :  { %s730_s14 = smov 0   ;;  %s732_s15 = smov 0  }
   0x2   :  { %s734_s16 = smov 0  }
   0x3 LB: > { %s22_s17 = sadd.s32 1, %s696_s14  ;;  %s25_s18 = sadd.s32 1, %s700_s15  ;;  %s704_s16 = sphi %s734_s16, %s13_s16   ;;  %s700_s15 = sphi %s732_s15, %s914_s15   ;;  %s696_s14 = sphi %s730_s14, %s913_s14   ;;  %s692_s13 = sphi %s728_s13, %s912_s13   ;;  %s688_s12 = sphi %s726_s12, %s911_s12  }
   0x4   : > { %p23_p0 = scmp.ge.s32.totalorder %s22_s17, 2  ;;  %p518_p1 = scmp.ge.s32.totalorder %s704_s16, 1 }
   0x5   : > { %p159_p2 = scmp.lt.s32.totalorder %s704_s16, 5 }
   0x6   : > { %s916_s17 = smov (%p23_p0, %s22_s17), 0  ;;  %s918_s18 = smov (!%p23_p0, %s25_s18), %s700_s15 }
   0x7   : > { %p160_p3 = pnand %p518_p1, %p159_p2  ;;  %p27_p4 = scmp.ge.s32.totalorder %s918_s18, 2 }
   0x8   : > { %s519_s19 = sshll.u32 (!%p160_p3), %s688_s12, 2  ;;  %p194_p5 = scmp.lt.s32.totalorder (!%p160_p3), %s692_s13, 1 }
   0x9   : > { %s920_s18 = smov (%p27_p4, %s918_s18), 0  ;;  %163 = sbr.rel (%p160_p3) target bundleno = 54 (0x36), region = 32 }
   0xa   : > { %p196_p6 = scmp.lt.s32.totalorder (!%p160_p3), %s519_s19, 7 }
   0xe   : > { %s922_s13 = smov (!%p194_p5, %s692_s13), 1  ;;  %s924_s19 = smov (!%p196_p6, %s519_s19), 7  ;;  %v761_v0 = vld [vmem:[%s908_s1] ss:$0 sm:$0xff] }
   0xf   : > { %s521_s20 = sshll.u32 %s922_s13, 6  ;;  %s520_s21 = sshll.u32 %s924_s19, 3  ;;  %v772_v1 = vld [vmem:[%s909_s2] ss:$0 sm:$0xff] }
  0x10   : > { %s756_s22 = sadd.s32 %s521_s20, %s520_s21 }
  0x11   : > { %s522_s25 = sshll.u32 %s756_s22, 3  ;;  %s526_s4 = sshll.u32 %s756_s22, 2 }
  0x12   : > { %s767_s28 = scalar_lea.vmem %s907_s0, %s522_s25  ;;  %s804_s7 = scalar_lea.vmem %s910_s3, %s526_s4 }
  0x13   : > { %v217_v2 = vld [vmem:[%s767_s28] sm:$0xff]  ;;  %v218_v3 = vld [vmem:[%s767_s28 + $0x8] sm:$0xff]  ;;  %v219_v4 = vld [vmem:[%s767_s28 + $0x10] sm:$0xff] }
  0x14   : > { %v252_v5 = vmul.f32 %v761_v0, %v217_v2  ;;  %v253_v6 = vmul.f32 %v761_v0, %v218_v3  ;;  %v220_v7 = vld [vmem:[%s767_s28 + $0x18] sm:$0xff]  ;;  %v254_v8 = vmul.f32 %v761_v0, %v219_v4  ;;  %v221_v9 = vld [vmem:[%s767_s28 + $0x20] sm:$0xff]  ;;  %v222_v10 = vld [vmem:[%s767_s28 + $0x28] sm:$0xff] }
  0x15   : > { %v255_v11 = vmul.f32 %v761_v0, %v220_v7  ;;  %v256_v12 = vmul.f32 %v761_v0, %v221_v9  ;;  %v257_v13 = vmul.f32 %v761_v0, %v222_v10  ;;  %v223_v14 = vld [vmem:[%s767_s28 + $0x30] sm:$0xff]  ;;  %v224_v15 = vld [vmem:[%s767_s28 + $0x38] sm:$0xff]  ;;  %v225_v24 = vld [vmem:[%s767_s28 + $0x40] sm:$0xff] }
  0x16   : > { %v287_v16 = vadd.f32 %v772_v1, %v252_v5  ;;  %v288_v17 = vadd.f32 %v772_v1, %v253_v6  ;;  %v289_v18 = vadd.f32 %v772_v1, %v254_v8  ;;  %v258_v19 = vmul.f32 %v761_v0, %v223_v14  ;;  %v226_v25 = vld [vmem:[%s767_s28 + $0x48] sm:$0xff]  ;;  %v227_v30 = vld [vmem:[%s767_s28 + $0x50] sm:$0xff]  ;;  %v228_v35 = vld [vmem:[%s767_s28 + $0x58] sm:$0xff] }
  0x17   : > { %v290_v20 = vadd.f32 %v772_v1, %v255_v11  ;;  %v291_v21 = vadd.f32 %v772_v1, %v256_v12  ;;  %v292_v22 = vadd.f32 %v772_v1, %v257_v13  ;;  %v259_v23 = vmul.f32 %v761_v0, %v224_v15  ;;  %v229_v36 = vld [vmem:[%s767_s28 + $0x60] sm:$0xff]  ;;  %v230_v41 = vld [vmem:[%s767_s28 + $0x68] sm:$0xff]  ;;  %v231_v42 = vld [vmem:[%s767_s28 + $0x70] sm:$0xff] }
  0x18   : > { %v319_v26 = vmax.f32 %v287_v16, 0.0  ;;  %v320_v27 = vmax.f32 %v288_v17, 0.0  ;;  %v321_v28 = vmax.f32 %v289_v18, 0.0  ;;  %v293_v29 = vadd.f32 %v772_v1, %v258_v19  ;;  %v232_v51 = vld [vmem:[%s767_s28 + $0x78] sm:$0xff]  ;;  %v233_v56 = vld [vmem:[%s767_s28 + $0x80] sm:$0xff]  ;;  %v234_v61 = vld [vmem:[%s767_s28 + $0x88] sm:$0xff] }
  0x19   : > { %v322_v31 = vmax.f32 %v290_v20, 0.0  ;;  %v323_v32 = vmax.f32 %v291_v21, 0.0  ;;  %v324_v33 = vmax.f32 %v292_v22, 0.0  ;;  %v294_v34 = vadd.f32 %v772_v1, %v259_v23  ;;  %v235_v4 = vld [vmem:[%s767_s28 + $0x90] sm:$0xff]  ;;  %v236_v5 = vld [vmem:[%s767_s28 + $0x98] sm:$0xff]  ;;  %v237_v10 = vld [vmem:[%s767_s28 + $0xa0] sm:$0xff] }
  0x1a   : > { %v532_v37 = vpack.c.bf16 %v320_v27, %v319_v26  ;;  %v325_v38 = vmax.f32 %v293_v29, 0.0  ;;  %v260_v39 = vmul.f32 %v761_v0, %v225_v24  ;;  %v261_v40 = vmul.f32 %v761_v0, %v226_v25  ;;  %v238_v15 = vld [vmem:[%s767_s28 + $0xa8] sm:$0xff]  ;;  %v239_v20 = vld [vmem:[%s767_s28 + $0xb0] sm:$0xff]  ;;  %v240_v25 = vld [vmem:[%s767_s28 + $0xb8] sm:$0xff] }
  0x1b   : > { %v537_v43 = vpack.c.bf16 %v322_v31, %v321_v28  ;;  %v542_v44 = vpack.c.bf16 %v324_v33, %v323_v32  ;;  %v326_v45 = vmax.f32 %v294_v34, 0.0  ;;  %v262_v46 = vmul.f32 %v761_v0, %v227_v30  ;;  %v241_v30 = vld [vmem:[%s767_s28 + $0xc0] sm:$0xff] }
  0x1c   : > { %533 = vst [vmem:[%s804_s7] sm:$0xff] %v532_v37   ;;  %v295_v47 = vadd.f32 %v772_v1, %v260_v39  ;;  %v296_v48 = vadd.f32 %v772_v1, %v261_v40  ;;  %v263_v49 = vmul.f32 %v761_v0, %v228_v35  ;;  %v264_v50 = vmul.f32 %v761_v0, %v229_v36  ;;  %v242_v35 = vld [vmem:[%s767_s28 + $0xc8] sm:$0xff]  ;;  %v243_v40 = vld [vmem:[%s767_s28 + $0xd0] sm:$0xff] }
  0x1d   : > { %609 = vst [vmem:[%s804_s7 + $0x8] sm:$0xff] %v537_v43   ;;  %v547_v52 = vpack.c.bf16 %v326_v45, %v325_v38  ;;  %v297_v53 = vadd.f32 %v772_v1, %v262_v46  ;;  %v265_v54 = vmul.f32 %v761_v0, %v230_v41  ;;  %v266_v55 = vmul.f32 %v761_v0, %v231_v42  ;;  %v244_v41 = vld [vmem:[%s767_s28 + $0xd8] sm:$0xff]  ;;  %v245_v46 = vld [vmem:[%s767_s28 + $0xe0] sm:$0xff] }
  0x1e   : > { %610 = vst [vmem:[%s804_s7 + $0x10] sm:$0xff] %v542_v44   ;;  %v327_v57 = vmax.f32 %v295_v47, 0.0  ;;  %v328_v58 = vmax.f32 %v296_v48, 0.0  ;;  %v298_v59 = vadd.f32 %v772_v1, %v263_v49  ;;  %v299_v60 = vadd.f32 %v772_v1, %v264_v50 }
  0x1f   : > { %611 = vst [vmem:[%s804_s7 + $0x18] sm:$0xff] %v547_v52   ;;  %v329_v62 = vmax.f32 %v297_v53, 0.0  ;;  %v300_v63 = vadd.f32 %v772_v1, %v265_v54  ;;  %v267_v2 = vmul.f32 %v761_v0, %v232_v51  ;;  %v301_v3 = vadd.f32 %v772_v1, %v266_v55  ;;  %v246_v51 = vld [vmem:[%s767_s28 + $0xe8] sm:$0xff] }
  0x20   : > { %v552_v6 = vpack.c.bf16 %v328_v58, %v327_v57  ;;  %v330_v7 = vmax.f32 %v298_v59, 0.0  ;;  %v331_v8 = vmax.f32 %v299_v60, 0.0  ;;  %v268_v9 = vmul.f32 %v761_v0, %v233_v56  ;;  %v247_v56 = vld [vmem:[%s767_s28 + $0xf0] sm:$0xff] }
  0x21   : > { %v332_v11 = vmax.f32 %v300_v63, 0.0  ;;  %v302_v12 = vadd.f32 %v772_v1, %v267_v2  ;;  %v333_v13 = vmax.f32 %v301_v3, 0.0  ;;  %v269_v14 = vmul.f32 %v761_v0, %v234_v61  ;;  %v248_v61 = vld [vmem:[%s767_s28 + $0xf8] sm:$0xff] }
  0x22   : > { %612 = vst [vmem:[%s804_s7 + $0x20] sm:$0xff] %v552_v6   ;;  %v557_v16 = vpack.c.bf16 %v330_v7, %v329_v62  ;;  %v303_v17 = vadd.f32 %v772_v1, %v268_v9  ;;  %v270_v18 = vmul.f32 %v761_v0, %v235_v4  ;;  %v271_v19 = vmul.f32 %v761_v0, %v236_v5 }
  0x23   : > { %v562_v21 = vpack.c.bf16 %v332_v11, %v331_v8  ;;  %v334_v22 = vmax.f32 %v302_v12, 0.0  ;;  %v304_v23 = vadd.f32 %v772_v1, %v269_v14  ;;  %v272_v24 = vmul.f32 %v761_v0, %v237_v10 }
  0x24   : > { %613 = vst [vmem:[%s804_s7 + $0x28] sm:$0xff] %v557_v16   ;;  %v335_v26 = vmax.f32 %v303_v17, 0.0  ;;  %v305_v27 = vadd.f32 %v772_v1, %v270_v18  ;;  %v306_v28 = vadd.f32 %v772_v1, %v271_v19  ;;  %v273_v29 = vmul.f32 %v761_v0, %v238_v15 }
  0x25   : > { %614 = vst [vmem:[%s804_s7 + $0x30] sm:$0xff] %v562_v21   ;;  %v567_v31 = vpack.c.bf16 %v334_v22, %v333_v13  ;;  %v336_v32 = vmax.f32 %v304_v23, 0.0  ;;  %v307_v33 = vadd.f32 %v772_v1, %v272_v24  ;;  %v274_v34 = vmul.f32 %v761_v0, %v239_v20 }
  0x26   : > { %v337_v36 = vmax.f32 %v305_v27, 0.0  ;;  %v338_v37 = vmax.f32 %v306_v28, 0.0  ;;  %v308_v38 = vadd.f32 %v772_v1, %v273_v29  ;;  %v275_v39 = vmul.f32 %v761_v0, %v240_v25 }
  0x27   : > { %615 = vst [vmem:[%s804_s7 + $0x38] sm:$0xff] %v567_v31   ;;  %v572_v42 = vpack.c.bf16 %v336_v32, %v335_v26  ;;  %v339_v43 = vmax.f32 %v307_v33, 0.0  ;;  %v309_v44 = vadd.f32 %v772_v1, %v274_v34  ;;  %v276_v45 = vmul.f32 %v761_v0, %v241_v30 }
  0x28   : > { %v577_v47 = vpack.c.bf16 %v338_v37, %v337_v36  ;;  %v340_v48 = vmax.f32 %v308_v38, 0.0  ;;  %v310_v49 = vadd.f32 %v772_v1, %v275_v39  ;;  %v277_v50 = vmul.f32 %v761_v0, %v242_v35 }
  0x29   : > { %616 = vst [vmem:[%s804_s7 + $0x40] sm:$0xff] %v572_v42   ;;  %v341_v52 = vmax.f32 %v309_v44, 0.0  ;;  %v311_v53 = vadd.f32 %v772_v1, %v276_v45  ;;  %v278_v54 = vmul.f32 %v761_v0, %v243_v40  ;;  %v279_v55 = vmul.f32 %v761_v0, %v244_v41 }
  0x2a   : > { %617 = vst [vmem:[%s804_s7 + $0x48] sm:$0xff] %v577_v47   ;;  %v582_v57 = vpack.c.bf16 %v340_v48, %v339_v43  ;;  %v342_v58 = vmax.f32 %v310_v49, 0.0  ;;  %v312_v59 = vadd.f32 %v772_v1, %v277_v50  ;;  %v280_v60 = vmul.f32 %v761_v0, %v245_v46 }
  0x2b   : > { %v343_v62 = vmax.f32 %v311_v53, 0.0  ;;  %v313_v63 = vadd.f32 %v772_v1, %v278_v54  ;;  %v314_v2 = vadd.f32 %v772_v1, %v279_v55  ;;  %v281_v3 = vmul.f32 %v761_v0, %v246_v51 }
  0x2c   : > { %618 = vst [vmem:[%s804_s7 + $0x50] sm:$0xff] %v582_v57   ;;  %v587_v4 = vpack.c.bf16 %v342_v58, %v341_v52  ;;  %v344_v5 = vmax.f32 %v312_v59, 0.0  ;;  %v315_v6 = vadd.f32 %v772_v1, %v280_v60  ;;  %v282_v7 = vmul.f32 %v761_v0, %v247_v56 }
  0x2d   : > { %v345_v8 = vmax.f32 %v313_v63, 0.0  ;;  %v346_v9 = vmax.f32 %v314_v2, 0.0  ;;  %v316_v10 = vadd.f32 %v772_v1, %v281_v3  ;;  %v283_v11 = vmul.f32 %v761_v0, %v248_v61 }
  0x2e   : > { %619 = vst [vmem:[%s804_s7 + $0x58] sm:$0xff] %v587_v4   ;;  %v592_v12 = vpack.c.bf16 %v344_v5, %v343_v62  ;;  %v347_v13 = vmax.f32 %v315_v6, 0.0  ;;  %v317_v14 = vadd.f32 %v772_v1, %v282_v7 }
  0x2f   : > { %v597_v15 = vpack.c.bf16 %v346_v9, %v345_v8  ;;  %v348_v16 = vmax.f32 %v316_v10, 0.0  ;;  %v318_v17 = vadd.f32 %v772_v1, %v283_v11 }
  0x30   : > { %620 = vst [vmem:[%s804_s7 + $0x60] sm:$0xff] %v592_v12   ;;  %v349_v18 = vmax.f32 %v317_v14, 0.0 }
  0x31   : > { %621 = vst [vmem:[%s804_s7 + $0x68] sm:$0xff] %v597_v15   ;;  %v602_v19 = vpack.c.bf16 %v348_v16, %v347_v13  ;;  %v350_v20 = vmax.f32 %v318_v17, 0.0 }
  0x33   : > { %622 = vst [vmem:[%s804_s7 + $0x70] sm:$0xff] %v602_v19   ;;  %v607_v21 = vpack.c.bf16 %v350_v20, %v349_v18 }
  0x35   : > { %623 = vst [vmem:[%s804_s7 + $0x78] sm:$0xff] %v607_v21  }
  0x36 PF: > { %s13_s16 = sadd.s32 1, %s704_s16   ;;  %s911_s12 = smov %s696_s14 }
  0x37   : > { %p10_p7 = scmp.ge.s32.totalorder %s13_s16, 6   ;;  %s912_s13 = smov %s700_s15 }
  0x38   : > { %s913_s14 = smov %s916_s17  ;;  %s914_s15 = smov %s920_s18 }
  0x39   :  { %12 = sbr.rel (!%p10_p7) target bundleno = 3 (0x3), region = 62 }

// kernel: se_basic_block_forward.7
= control target key start
LH: loop header
LB: loop body
LE: loop exit
PB: predicated region body
PF: predicated region fallthrough
CT: control target
= control target key end

     0   :  { %10 = vsyncpa [#allocation3], 0  ;;  %s1381_s0 = inlined_call_operand.vmem [shape: f32[2,8,8,8,128], index: 0, kind: input, shape index: {}]   ;;  %s1382_s1 = inlined_call_operand.vmem [shape: bf16[2,8,8,8,128], index: 1, kind: input, shape index: {}]   ;;  %s1383_s2 = inlined_call_operand.vmem [shape: f32[1,128], index: 2, kind: input, shape index: {}]   ;;  %s1384_s3 = inlined_call_operand.vmem [shape: f32[1,128], index: 3, kind: input, shape index: {}]   ;;  %s1385_s4 = inlined_call_operand.vmem [shape: f32[2,1,128], index: 4, kind: input, shape index: {}]   ;;  %s1386_s5 = inlined_call_operand.hbm [shape: f32[2,8,8,8,128], index: 5, kind: output, shape index: {}]  }
   0x1   :  { %12 = vsyncpa [#allocation3 + $0x1], 0  ;;  %s1049_s18 = smov 0   ;;  %s1051_s19 = smov 0  }
   0x2   :  { %s1053_s20 = smov 0   ;;  %s1055_s21 = smov 0  }
   0x3   :  { %s1057_s22 = smov 0   ;;  %s1059_s23 = smov 0  }
   0x4   :  { %s1061_s24 = smov 0   ;;  %s1063_s25 = smov 0  }
   0x5 LB: > { %1391 = sst [smem:[#allocation5_spill]] %s1007_s23  ;;  %s744_s26 = sadd.s32 4294967295, %s1015_s25   ;;  %s1015_s25 = sphi %s1063_s25, %s18_s25   ;;  %s1011_s24 = sphi %s1061_s24, %s1402_s24   ;;  %s1007_s23 = sphi %s1059_s23, %s1401_s23   ;;  %s1003_s22 = sphi %s1057_s22, %s1400_s22   ;;  %s999_s21 = sphi %s1055_s21, %s1406_s21   ;;  %s995_s20 = sphi %s1053_s20, %s1405_s20   ;;  %s991_s19 = sphi %s1051_s19, %s1404_s19   ;;  %s987_s18 = sphi %s1049_s18, %s1403_s18  }
   0x6   : > { %1392 = sst [smem:[#allocation6_spill]] %s1011_s24  ;;  %s745_s27 = sadd.s32 4294967294, %s1015_s25  }
   0x7   : > { %s27_s28 = sadd.s32 1, %s1007_s23  ;;  %s30_s29 = sadd.s32 1, %s1011_s24 }
   0x8   : > { %p28_p0 = scmp.ge.s32.totalorder %s27_s28, 2  ;;  %p173_p1 = scmp.ne.s32.totalorder %s995_s20, %s991_s19 }
   0x9   : > { %p174_p2 = scmp.eq.s32.totalorder %s744_s26, 3  ;;  %p179_p5 = scmp.ne.s32.totalorder %s991_s19, %s987_s18 }
   0xa   : > { %s1408_s28 = smov (%p28_p0, %s27_s28), 0  ;;  %s1410_s29 = smov (!%p28_p0, %s30_s29), %s1011_s24 }
   0xb   : > { %1393 = sst [smem:[#allocation7_spill]] %s1408_s28  ;;  %s159_s30 = ssub.s32 %s1007_s23, %s1408_s28 }
   0xc   : > { %p1100_p3 = por %p174_p2, %p173_p1  ;;  %p32_p4 = scmp.ge.s32.totalorder %s1410_s29, 2 }
   0xd   : > { %p180_p6 = scmp.eq.s32.totalorder %s745_s27, 3  ;;  %p748_p7 = scmp.ge.s32.totalorder %s1015_s25, 1 }
   0xe   : > { %s1412_s29 = smov (%p32_p4, %s1410_s29), 0  ;;  %p238_p9 = scmp.lt.s32.totalorder %s1015_s25, 5 }
   0xf   : > { %1395 = sst [smem:[#allocation8_spill]] %s1412_s29  ;;  %p1109_p8 = por %p180_p6, %p179_p5 }
  0x10   : > { %s158_s8 = ssub.s32 %s1011_s24, %s1412_s29  ;;  %s163_s9 = sadd.s32 1, %s995_s20 }
  0x11   : > { %s160_s10 = sor.u32 %s159_s30, %s158_s8  ;;  %p239_p10 = pnand %p748_p7, %p238_p9 }
  0x12   : > { %p161_p11 = scmp.eq.s32.totalorder %s160_s10, 0  ;;  %s750_s12 = sshll.u32 (!%p239_p10), %s999_s21, 2 }
  0x13   : > { %242 = sbr.rel (%p239_p10) target bundleno = 90 (0x5a), region = 40  ;;  %p285_p12 = scmp.lt.s32.totalorder (!%p239_p10), %s1003_s22, 1 }
  0x14   : > { %s1118_s11 = scalar_select %p161_p11, %s995_s20, %s163_s9  }
  0x15   : > { %p287_p13 = scmp.lt.s32.totalorder (!%p239_p10), %s750_s12, 7  ;;  %s281_s23 = sand.u32 (!%p239_p10), 1, %s991_s19  }
  0x16   : > { %1397 = sst [smem:[#allocation9_spill]] %s1118_s11  ;;  %s1172_s28 = sshll.u32 (!%p239_p10), %s281_s23, 8 }
  0x17   : > { %s1193_s29 = scalar_lea.vmem (!%p239_p10), [#allocation2], %s1172_s28  ;;  %s765_s11 = sshll.u32 (!%p239_p10), %s999_s21, 5 }
  0x18   : > { %s286_s13 = scalar_select %p285_p12, %s1003_s22, 1  ;;  %v1129_v0 = vld [vmem:[%s1383_s2] ss:$0 sm:$0xff] }
  0x19   : > { %s1414_s12 = smov (!%p287_p13, %s750_s12), 7  ;;  %v1144_v1 = vld [vmem:[%s1384_s3] ss:$0 sm:$0xff]  ;;  %s761_s15 = sshll.u32 %s1003_s22, 6 }
  0x1a   : > { %s752_s14 = sshll.u32 %s286_s13, 6  ;;  %s308_s17 = scalar_lea.vmem %s1385_s4, %s286_s13 }
  0x1b   : > { %s751_s26 = sshll.u32 %s1414_s12, 3  ;;  %v1146_v2 = vld [vmem:[%s308_s17] ss:$0 sm:$0xff]  ;;  %s1309_s21 = sadd.s32 %s765_s11, %s761_s15 }
  0x1c   : > { %s291_s27 = sadd.s32 %s752_s14, %s751_s26  ;;  %s762_s22 = sshll.u32 %s1309_s21, 3 }
  0x1d   : > { %s753_s9 = sshll.u32 %s291_s27, 3  ;;  %s757_s10 = sshll.u32 %s291_s27, 2 }
  0x1e   : > { %s1134_s24 = scalar_lea.vmem %s1381_s0, %s753_s9  ;;  %s1139_s12 = scalar_lea.vmem %s1382_s1, %s757_s10 }
  0x1f   : > { %v313_v3 = vld [vmem:[%s1134_s24] sm:$0xff]  ;;  %v314_v5 = vld [vmem:[%s1134_s24 + $0x8] sm:$0xff]  ;;  %v315_v10 = vld [vmem:[%s1134_s24 + $0x10] sm:$0xff]  ;;  %s625_s17 = scalar_lea.hbm %s1386_s5, %s762_s22  ;;  %s626_s26 = sshll.u32 %s1193_s29, 4  ;;  %s627_s26 = int_to_ptr.vmem [resolvable:$true] %s626_s26 }
  0x20   : > { %v767_v4 = vld [vmem:[%s1139_s12] sm:$0xff]   ;;  %v348_v6 = vmul.f32 %v1129_v0, %v313_v3  ;;  %v349_v8 = vmul.f32 %v1129_v0, %v314_v5  ;;  %v830_v11 = vld [vmem:[%s1139_s12 + $0x8] sm:$0xff]   ;;  %v316_v12 = vld [vmem:[%s1134_s24 + $0x18] sm:$0xff]  ;;  %v350_v13 = vmul.f32 %v1129_v0, %v315_v10  ;;  %s628_s27 = sshll.u32 %s625_s17, 4  ;;  %s611_s30 = scalar_lea.sflag [#allocation3], %s281_s23  ;;  %s629_s27 = int_to_ptr.hbm [resolvable:$true] %s628_s27 }
  0x21   : > { %v768_v7 = vunpack.c.l.bf16 %v767_v4  ;;  %v769_v9 = vunpack.c.h.bf16 %v767_v4  ;;  %v772_v14 = vunpack.c.l.bf16 %v830_v11  ;;  %v351_v15 = vmul.f32 %v1129_v0, %v316_v12  ;;  %v317_v17 = vld [vmem:[%s1134_s24 + $0x20] sm:$0xff]  ;;  %v831_v18 = vld [vmem:[%s1139_s12 + $0x10] sm:$0xff]   ;;  %v318_v19 = vld [vmem:[%s1134_s24 + $0x28] sm:$0xff]  ;;  %s935_s8 = sshra.s32 %s629_s27, 4  ;;  %s941_s13 = scalar_lea.hbm %s1386_s5, 1024  ;;  %s936_s8 = int_to_ptr.hbm [resolvable:$true] %s935_s8 }
  0x22   : > { %v773_v16 = vunpack.c.h.bf16 %v830_v11  ;;  %v383_v20 = vadd.f32 %v1144_v1, %v348_v6  ;;  %v384_v21 = vadd.f32 %v1144_v1, %v349_v8  ;;  %v352_v22 = vmul.f32 %v1129_v0, %v317_v17  ;;  %v319_v24 = vld [vmem:[%s1134_s24 + $0x30] sm:$0xff]  ;;  %v832_v25 = vld [vmem:[%s1139_s12 + $0x18] sm:$0xff]   ;;  %v321_v47 = vld [vmem:[%s1134_s24 + $0x40] sm:$0xff]  ;;  %s937_s9 = scalar_lea.hbm %s936_s8, 256  ;;  %p942_p4 = scmp.lt.s32.totalorder %s936_s8, %s1386_s5 }
  0x23   : > { %v776_v23 = vunpack.c.l.bf16 %v831_v18  ;;  %v385_v26 = vadd.f32 %v1144_v1, %v350_v13  ;;  %v386_v27 = vadd.f32 %v1144_v1, %v351_v15  ;;  %v353_v28 = vmul.f32 %v1129_v0, %v318_v19  ;;  %v320_v34 = vld [vmem:[%s1134_s24 + $0x38] sm:$0xff]  ;;  %v833_v52 = vld [vmem:[%s1139_s12 + $0x20] sm:$0xff]   ;;  %v322_v53 = vld [vmem:[%s1134_s24 + $0x48] sm:$0xff]  ;;  %p938_p0 = scmp.ne.s32.totalorder %s936_s8, %s937_s9  ;;  %p943_p5 = scmp.lt.s32.totalorder %s941_s13, %s937_s9 }
  0x24   : > { %v777_v29 = vunpack.c.h.bf16 %v831_v18  ;;  %v418_v30 = vmul.f32 %v1146_v2, %v383_v20  ;;  %v419_v31 = vmul.f32 %v1146_v2, %v384_v21  ;;  %v387_v32 = vadd.f32 %v1144_v1, %v352_v22  ;;  %v323_v58 = vld [vmem:[%s1134_s24 + $0x50] sm:$0xff]  ;;  %v834_v63 = vld [vmem:[%s1139_s12 + $0x28] sm:$0xff]   ;;  %v324_v3 = vld [vmem:[%s1134_s24 + $0x58] sm:$0xff] }
  0x25   : > { %v354_v33 = vmul.f32 %v1129_v0, %v319_v24  ;;  %v420_v35 = vmul.f32 %v1146_v2, %v385_v26  ;;  %v421_v36 = vmul.f32 %v1146_v2, %v386_v27  ;;  %v388_v37 = vadd.f32 %v1144_v1, %v353_v28  ;;  %v325_v8 = vld [vmem:[%s1134_s24 + $0x60] sm:$0xff]  ;;  %v835_v13 = vld [vmem:[%s1139_s12 + $0x30] sm:$0xff]   ;;  %v326_v18 = vld [vmem:[%s1134_s24 + $0x68] sm:$0xff]  ;;  %p939_p1 = pnand %p938_p0, %p1100_p3  ;;  %p944_p6 = por %p943_p5, %p942_p4 }
  0x26   : > { %v780_v38 = vunpack.c.l.bf16 %v832_v25  ;;  %v514_v39 = vadd.f32 %v768_v7, %v418_v30  ;;  %v515_v40 = vadd.f32 %v769_v9, %v419_v31  ;;  %v422_v41 = vmul.f32 %v1146_v2, %v387_v32  ;;  %v836_v32 = vld [vmem:[%s1139_s12 + $0x38] sm:$0xff]  }
  0x27   : > { %v389_v42 = vadd.f32 %v1144_v1, %v354_v33  ;;  %v516_v43 = vadd.f32 %v772_v14, %v420_v35  ;;  %v517_v44 = vadd.f32 %v773_v16, %v421_v36  ;;  %v423_v45 = vmul.f32 %v1146_v2, %v388_v37  ;;  %v328_v37 = vld [vmem:[%s1134_s24 + $0x78] sm:$0xff]  ;;  %p940_p2 = pneg %p939_p1 }
  0x28   : > { %v355_v46 = vmul.f32 %v1129_v0, %v320_v34  ;;  %v546_v48 = vmax.f32 %v514_v39, 0.0  ;;  %v547_v49 = vmax.f32 %v515_v40, 0.0  ;;  %v518_v50 = vadd.f32 %v776_v23, %v422_v41  ;;  %v327_v23 = vld [vmem:[%s1134_s24 + $0x70] sm:$0xff] }
  0x29   : > { %v424_v51 = vmul.f32 %v1146_v2, %v389_v42  ;;  %v548_v54 = vmax.f32 %v516_v43, 0.0  ;;  %v549_v55 = vmax.f32 %v517_v44, 0.0  ;;  %v519_v56 = vadd.f32 %v777_v29, %v423_v45  ;;  %v329_v42 = vld [vmem:[%s1134_s24 + $0x80] sm:$0xff]  ;;  %p945_p7 = pnand %p944_p6, %p940_p2 }
  0x2a   : > { %v390_v57 = vadd.f32 %v1144_v1, %v355_v46  ;;  %578 = vst [vmem:[%s1193_s29] sm:$0xff] %v546_v48  ;;  %v550_v59 = vmax.f32 %v518_v50, 0.0  ;;  %v781_v61 = vunpack.c.h.bf16 %v832_v25  ;;  %v356_v62 = vmul.f32 %v1129_v0, %v321_v47  ;;  %v837_v47 = vld [vmem:[%s1139_s12 + $0x40] sm:$0xff]  }
  0x2b   : > { %v520_v60 = vadd.f32 %v780_v38, %v424_v51  ;;  %579 = vst [vmem:[%s1193_s29 + $0x8] sm:$0xff] %v547_v49  ;;  %v551_v4 = vmax.f32 %v519_v56, 0.0  ;;  %v784_v6 = vunpack.c.l.bf16 %v833_v52  ;;  %v357_v7 = vmul.f32 %v1129_v0, %v322_v53 }
  0x2c   : > { %v425_v5 = vmul.f32 %v1146_v2, %v390_v57  ;;  %580 = vst [vmem:[%s1193_s29 + $0x10] sm:$0xff] %v548_v54  ;;  %v391_v10 = vadd.f32 %v1144_v1, %v356_v62  ;;  %v785_v11 = vunpack.c.h.bf16 %v833_v52  ;;  %v358_v12 = vmul.f32 %v1129_v0, %v323_v58  ;;  %v330_v52 = vld [vmem:[%s1134_s24 + $0x88] sm:$0xff]  ;;  %v331_v57 = vld [vmem:[%s1134_s24 + $0x90] sm:$0xff] }
  0x2d   : > { %v552_v9 = vmax.f32 %v520_v60, 0.0  ;;  %581 = vst [vmem:[%s1193_s29 + $0x18] sm:$0xff] %v549_v55  ;;  %v392_v15 = vadd.f32 %v1144_v1, %v357_v7  ;;  %v788_v16 = vunpack.c.l.bf16 %v834_v63  ;;  %v359_v17 = vmul.f32 %v1129_v0, %v324_v3  ;;  %v838_v58 = vld [vmem:[%s1139_s12 + $0x48] sm:$0xff]   ;;  %v333_v7 = vld [vmem:[%s1134_s24 + $0xa0] sm:$0xff] }
  0x2e   : > { %v521_v14 = vadd.f32 %v781_v61, %v425_v5  ;;  %582 = vst [vmem:[%s1193_s29 + $0x20] sm:$0xff] %v550_v59  ;;  %v426_v19 = vmul.f32 %v1146_v2, %v391_v10  ;;  %v393_v20 = vadd.f32 %v1144_v1, %v358_v12  ;;  %v789_v21 = vunpack.c.h.bf16 %v834_v63  ;;  %v332_v63 = vld [vmem:[%s1134_s24 + $0x98] sm:$0xff]  ;;  %v839_v12 = vld [vmem:[%s1139_s12 + $0x50] sm:$0xff]  }
  0x2f   : > { %v360_v22 = vmul.f32 %v1129_v0, %v325_v8  ;;  %583 = vst [vmem:[%s1193_s29 + $0x28] sm:$0xff] %v551_v4  ;;  %v427_v25 = vmul.f32 %v1146_v2, %v392_v15  ;;  %v394_v26 = vadd.f32 %v1144_v1, %v359_v17  ;;  %v792_v27 = vunpack.c.l.bf16 %v835_v13  ;;  %v334_v17 = vld [vmem:[%s1134_s24 + $0xa8] sm:$0xff] }
  0x30   : > { %v553_v24 = vmax.f32 %v521_v14, 0.0  ;;  %584 = vst [vmem:[%s1193_s29 + $0x30] sm:$0xff] %v552_v9  ;;  %v522_v28 = vadd.f32 %v784_v6, %v426_v19  ;;  %v428_v29 = vmul.f32 %v1146_v2, %v393_v20  ;;  %v361_v31 = vmul.f32 %v1129_v0, %v326_v18 }
  0x31   : > { %v395_v30 = vadd.f32 %v1144_v1, %v360_v22  ;;  %v523_v33 = vadd.f32 %v785_v11, %v427_v25  ;;  %v429_v34 = vmul.f32 %v1146_v2, %v394_v26  ;;  %v793_v35 = vunpack.c.h.bf16 %v835_v13  ;;  %v335_v26 = vld [vmem:[%s1134_s24 + $0xb0] sm:$0xff] }
  0x32   : > { %585 = vst [vmem:[%s1193_s29 + $0x38] sm:$0xff] %v553_v24  ;;  %v362_v36 = vmul.f32 %v1129_v0, %v327_v23  ;;  %v554_v38 = vmax.f32 %v522_v28, 0.0  ;;  %v524_v39 = vadd.f32 %v788_v16, %v428_v29  ;;  %v396_v41 = vadd.f32 %v1144_v1, %v361_v31  ;;  %v840_v31 = vld [vmem:[%s1139_s12 + $0x58] sm:$0xff]  }
  0x33   : > { %v430_v40 = vmul.f32 %v1146_v2, %v395_v30  ;;  %v555_v43 = vmax.f32 %v523_v33, 0.0  ;;  %v525_v44 = vadd.f32 %v789_v21, %v429_v34  ;;  %v796_v46 = vunpack.c.l.bf16 %v836_v32 }
  0x34   : > { %v397_v45 = vadd.f32 %v1144_v1, %v362_v36  ;;  %586 = vst [vmem:[%s1193_s29 + $0x40] sm:$0xff] %v554_v38  ;;  %v556_v48 = vmax.f32 %v524_v39, 0.0  ;;  %v431_v50 = vmul.f32 %v1146_v2, %v396_v41  ;;  %v363_v51 = vmul.f32 %v1129_v0, %v328_v37  ;;  %v337_v41 = vld [vmem:[%s1134_s24 + $0xc0] sm:$0xff] }
  0x35   : > { %v526_v49 = vadd.f32 %v792_v27, %v430_v40  ;;  %587 = vst [vmem:[%s1193_s29 + $0x48] sm:$0xff] %v555_v43  ;;  %v557_v53 = vmax.f32 %v525_v44, 0.0  ;;  %v797_v55 = vunpack.c.h.bf16 %v836_v32  ;;  %v364_v56 = vmul.f32 %v1129_v0, %v329_v42  ;;  %v336_v32 = vld [vmem:[%s1134_s24 + $0xb8] sm:$0xff] }
  0x36   : > { %v432_v54 = vmul.f32 %v1146_v2, %v397_v45  ;;  %588 = vst [vmem:[%s1193_s29 + $0x50] sm:$0xff] %v556_v48  ;;  %v527_v60 = vadd.f32 %v793_v35, %v431_v50  ;;  %v398_v61 = vadd.f32 %v1144_v1, %v363_v51  ;;  %v800_v62 = vunpack.c.l.bf16 %v837_v47  ;;  %v338_v51 = vld [vmem:[%s1134_s24 + $0xc8] sm:$0xff] }
  0x37   : > { %v558_v59 = vmax.f32 %v526_v49, 0.0  ;;  %589 = vst [vmem:[%s1193_s29 + $0x58] sm:$0xff] %v557_v53  ;;  %v399_v4 = vadd.f32 %v1144_v1, %v364_v56  ;;  %v365_v5 = vmul.f32 %v1129_v0, %v330_v52  ;;  %v801_v6 = vunpack.c.h.bf16 %v837_v47  ;;  %v339_v56 = vld [vmem:[%s1134_s24 + $0xd0] sm:$0xff] }
  0x38   : > { %v528_v3 = vadd.f32 %v796_v46, %v432_v54  ;;  %v559_v8 = vmax.f32 %v527_v60, 0.0  ;;  %v433_v9 = vmul.f32 %v1146_v2, %v398_v61  ;;  %v366_v10 = vmul.f32 %v1129_v0, %v331_v57  ;;  %v841_v46 = vld [vmem:[%s1139_s12 + $0x60] sm:$0xff]   ;;  %v842_v57 = vld [vmem:[%s1139_s12 + $0x68] sm:$0xff]  }
  0x39   : > { %590 = vst [vmem:[%s1193_s29 + $0x60] sm:$0xff] %v558_v59  ;;  %v804_v11 = vunpack.c.l.bf16 %v838_v58  ;;  %v434_v14 = vmul.f32 %v1146_v2, %v399_v4  ;;  %v400_v15 = vadd.f32 %v1144_v1, %v365_v5  ;;  %v367_v16 = vmul.f32 %v1129_v0, %v332_v63 }
  0x3a   : > { %v560_v13 = vmax.f32 %v528_v3, 0.0  ;;  %591 = vst [vmem:[%s1193_s29 + $0x68] sm:$0xff] %v559_v8  ;;  %v529_v18 = vadd.f32 %v797_v55, %v433_v9  ;;  %v401_v19 = vadd.f32 %v1144_v1, %v366_v10  ;;  %v805_v20 = vunpack.c.h.bf16 %v838_v58 }
  0x3b   : > { %v368_v21 = vmul.f32 %v1129_v0, %v333_v7  ;;  %v530_v22 = vadd.f32 %v800_v62, %v434_v14  ;;  %v435_v23 = vmul.f32 %v1146_v2, %v400_v15  ;;  %v402_v24 = vadd.f32 %v1144_v1, %v367_v16  ;;  %v340_v62 = vld [vmem:[%s1134_s24 + $0xd8] sm:$0xff]  ;;  %v843_v15 = vld [vmem:[%s1139_s12 + $0x70] sm:$0xff]   ;;  %v342_v16 = vld [vmem:[%s1134_s24 + $0xe8] sm:$0xff] }
  0x3c   : > { %592 = vst [vmem:[%s1193_s29 + $0x70] sm:$0xff] %v560_v13  ;;  %v808_v25 = vunpack.c.l.bf16 %v839_v12  ;;  %v561_v27 = vmax.f32 %v529_v18, 0.0  ;;  %v436_v28 = vmul.f32 %v1146_v2, %v401_v19  ;;  %v369_v30 = vmul.f32 %v1129_v0, %v334_v17 }
  0x3d   : > { %v403_v29 = vadd.f32 %v1144_v1, %v368_v21  ;;  %v562_v33 = vmax.f32 %v530_v22, 0.0  ;;  %v531_v34 = vadd.f32 %v801_v6, %v435_v23  ;;  %v437_v35 = vmul.f32 %v1146_v2, %v402_v24  ;;  %v341_v6 = vld [vmem:[%s1134_s24 + $0xe0] sm:$0xff] }
  0x3e   : > { %v809_v36 = vunpack.c.h.bf16 %v839_v12  ;;  %593 = vst [vmem:[%s1193_s29 + $0x78] sm:$0xff] %v561_v27  ;;  %v532_v37 = vadd.f32 %v804_v11, %v436_v28  ;;  %v404_v39 = vadd.f32 %v1144_v1, %v369_v30  ;;  %v370_v40 = vmul.f32 %v1129_v0, %v335_v26  ;;  %v844_v30 = vld [vmem:[%s1139_s12 + $0x78] sm:$0xff]  }
  0x3f   : > { %v438_v38 = vmul.f32 %v1146_v2, %v403_v29  ;;  %594 = vst [vmem:[%s1193_s29 + $0x80] sm:$0xff] %v562_v33  ;;  %v563_v42 = vmax.f32 %v531_v34, 0.0  ;;  %v533_v43 = vadd.f32 %v805_v20, %v437_v35  ;;  %v812_v44 = vunpack.c.l.bf16 %v840_v31 }
  0x40   : > { %v371_v45 = vmul.f32 %v1129_v0, %v336_v32  ;;  %v564_v47 = vmax.f32 %v532_v37, 0.0  ;;  %v439_v49 = vmul.f32 %v1146_v2, %v404_v39  ;;  %v405_v50 = vadd.f32 %v1144_v1, %v370_v40 }
  0x41   : > { %v534_v48 = vadd.f32 %v808_v25, %v438_v38  ;;  %595 = vst [vmem:[%s1193_s29 + $0x88] sm:$0xff] %v563_v42  ;;  %v565_v52 = vmax.f32 %v533_v43, 0.0  ;;  %v813_v54 = vunpack.c.h.bf16 %v840_v31  ;;  %v372_v55 = vmul.f32 %v1129_v0, %v337_v41  ;;  %v343_v25 = vld [vmem:[%s1134_s24 + $0xf0] sm:$0xff]  ;;  %v344_v31 = vld [vmem:[%s1134_s24 + $0xf8] sm:$0xff] }
  0x42   : > { %v406_v53 = vadd.f32 %v1144_v1, %v371_v45  ;;  %596 = vst [vmem:[%s1193_s29 + $0x90] sm:$0xff] %v564_v47  ;;  %v535_v59 = vadd.f32 %v809_v36, %v439_v49  ;;  %v440_v60 = vmul.f32 %v1146_v2, %v405_v50  ;;  %v816_v61 = vunpack.c.l.bf16 %v841_v46 }
  0x43   : > { %v566_v58 = vmax.f32 %v534_v48, 0.0  ;;  %597 = vst [vmem:[%s1193_s29 + $0x98] sm:$0xff] %v565_v52  ;;  %v407_v3 = vadd.f32 %v1144_v1, %v372_v55  ;;  %v373_v4 = vmul.f32 %v1129_v0, %v338_v51  ;;  %v817_v5 = vunpack.c.h.bf16 %v841_v46 }
  0x44   : > { %v441_v63 = vmul.f32 %v1146_v2, %v406_v53  ;;  %v567_v7 = vmax.f32 %v535_v59, 0.0  ;;  %v536_v8 = vadd.f32 %v812_v44, %v440_v60  ;;  %v374_v9 = vmul.f32 %v1129_v0, %v339_v56 }
  0x45   : > { %598 = vst [vmem:[%s1193_s29 + $0xa0] sm:$0xff] %v566_v58  ;;  %v820_v10 = vunpack.c.l.bf16 %v842_v57  ;;  %v442_v12 = vmul.f32 %v1146_v2, %v407_v3  ;;  %v408_v13 = vadd.f32 %v1144_v1, %v373_v4  ;;  %v375_v14 = vmul.f32 %v1129_v0, %v340_v62 }
  0x46   : > { %v537_v11 = vadd.f32 %v813_v54, %v441_v63  ;;  %599 = vst [vmem:[%s1193_s29 + $0xa8] sm:$0xff] %v567_v7  ;;  %v568_v17 = vmax.f32 %v536_v8, 0.0  ;;  %v409_v18 = vadd.f32 %v1144_v1, %v374_v9  ;;  %v821_v19 = vunpack.c.h.bf16 %v842_v57 }
  0x47   : > { %v376_v20 = vmul.f32 %v1129_v0, %v341_v6  ;;  %v538_v22 = vadd.f32 %v816_v61, %v442_v12  ;;  %v443_v23 = vmul.f32 %v1146_v2, %v408_v13  ;;  %v410_v24 = vadd.f32 %v1144_v1, %v375_v14 }
  0x48   : > { %v569_v21 = vmax.f32 %v537_v11, 0.0  ;;  %600 = vst [vmem:[%s1193_s29 + $0xb0] sm:$0xff] %v568_v17  ;;  %v444_v26 = vmul.f32 %v1146_v2, %v409_v18  ;;  %v824_v28 = vunpack.c.l.bf16 %v843_v15  ;;  %v377_v29 = vmul.f32 %v1129_v0, %v342_v16 }
  0x49   : > { %v411_v27 = vadd.f32 %v1144_v1, %v376_v20  ;;  %v570_v32 = vmax.f32 %v538_v22, 0.0  ;;  %v539_v33 = vadd.f32 %v817_v5, %v443_v23  ;;  %v445_v34 = vmul.f32 %v1146_v2, %v410_v24 }
  0x4a   : > { %601 = vst [vmem:[%s1193_s29 + $0xb8] sm:$0xff] %v569_v21  ;;  %v825_v35 = vunpack.c.h.bf16 %v843_v15  ;;  %v540_v36 = vadd.f32 %v820_v10, %v444_v26  ;;  %v412_v38 = vadd.f32 %v1144_v1, %v377_v29  ;;  %v378_v39 = vmul.f32 %v1129_v0, %v343_v25 }
  0x4b   : > { %v446_v37 = vmul.f32 %v1146_v2, %v411_v27  ;;  %602 = vst [vmem:[%s1193_s29 + $0xc0] sm:$0xff] %v570_v32  ;;  %v571_v40 = vmax.f32 %v539_v33, 0.0  ;;  %v541_v41 = vadd.f32 %v821_v19, %v445_v34  ;;  %v828_v42 = vunpack.c.l.bf16 %v844_v30 }
  0x4c   : > { %v379_v43 = vmul.f32 %v1129_v0, %v344_v31  ;;  %v572_v44 = vmax.f32 %v540_v36, 0.0  ;;  %v447_v46 = vmul.f32 %v1146_v2, %v412_v38  ;;  %v413_v47 = vadd.f32 %v1144_v1, %v378_v39 }
  0x4d   : > { %v542_v45 = vadd.f32 %v824_v28, %v446_v37  ;;  %603 = vst [vmem:[%s1193_s29 + $0xc8] sm:$0xff] %v571_v40  ;;  %v573_v48 = vmax.f32 %v541_v41, 0.0  ;;  %v829_v50 = vunpack.c.h.bf16 %v844_v30 }
  0x4e   : > { %v414_v49 = vadd.f32 %v1144_v1, %v379_v43  ;;  %604 = vst [vmem:[%s1193_s29 + $0xd0] sm:$0xff] %v572_v44  ;;  %v543_v51 = vadd.f32 %v825_v35, %v447_v46  ;;  %v448_v52 = vmul.f32 %v1146_v2, %v413_v47 }
  0x4f   : > { %v574_v0 = vmax.f32 %v542_v45, 0.0  ;;  %605 = vst [vmem:[%s1193_s29 + $0xd8] sm:$0xff] %v573_v48 }
  0x50   : > { %v449_v53 = vmul.f32 %v1146_v2, %v414_v49  ;;  %v575_v54 = vmax.f32 %v543_v51, 0.0  ;;  %v544_v1 = vadd.f32 %v828_v42, %v448_v52 }
  0x51   : > { %606 = vst [vmem:[%s1193_s29 + $0xe0] sm:$0xff] %v574_v0 }
  0x52   : > { %v545_v55 = vadd.f32 %v829_v50, %v449_v53  ;;  %607 = vst [vmem:[%s1193_s29 + $0xe8] sm:$0xff] %v575_v54  ;;  %v576_v56 = vmax.f32 %v544_v1, 0.0 }
  0x54   : > { %v577_v57 = vmax.f32 %v545_v55, 0.0  ;;  %608 = vst [vmem:[%s1193_s29 + $0xf0] sm:$0xff] %v576_v56 }
  0x56   : > { %609 = vst [vmem:[%s1193_s29 + $0xf8] sm:$0xff] %v577_v57 }
  0x57   : > { %948 = shalt.err (!%p945_p7)
}
  0x58   : > { %s1017_s23 = smov 128   ;;  %s1018_s29 = smov 8  }
  0x59   : > { %845 = dma.vmem_to_hbm [thread:$0]  (%p1100_p3), %s627_s26, 4096, %s629_s27, %s611_s30, %s1017_s23, %s1017_s23, %s1018_s29  }
  0x5a PF: > { %p851_p9 = scmp.ge.s32.totalorder %s1015_s25, 2  ;;  %s643_s11 = sand.u32 1, %s987_s18  }
  0x5b   : > { %s644_s15 = scalar_lea.sflag [#allocation3], %s643_s11 }
  0x5c   : > { %p848_p10 = pnand %p851_p9, %p1109_p8 }
  0x5e   : > { %p849_p11 = pneg %p848_p10 }
  0x60   : > { %982 = dma.done.wait (%p849_p11), %s644_s15, 4096  }
  0x61   : > { %984 = vsyncadd (%p849_p11), %s644_s15, 4294963200  ;;  %s18_s25 = sadd.s32 1, %s1015_s25   ;;  %s1398_s21 = sld [smem:[#allocation9_spill]] }
  0x62   : > { %p15_p12 = scmp.ge.s32.totalorder %s18_s25, 6   ;;  %s1399_s6 = sld [smem:[#allocation5_spill]] }
  0x63   : > { %s1400_s22 = sld [smem:[#allocation6_spill]]  ;;  %s1403_s18 = smov %s991_s19 }
  0x64   : > { %s1401_s23 = sld [smem:[#allocation7_spill]]  ;;  %s1404_s19 = smov %s995_s20 }
  0x65   : > { %s1402_s24 = sld [smem:[#allocation8_spill]]  ;;  %17 = sbr.rel (!%p15_p12) target bundleno = 5 (0x5), region = 81 }
  0x67   : > { %s1405_s20 = smov %s1398_s21 }
  0x68   : > { %s1406_s21 = smov %s1399_s6 }
  0x6a   :  { %650 = vsyncpa [#allocation3], 1 }
  0x6b   :  { %652 = vsyncpa [#allocation3 + $0x1], 1 }

// kernel: se_basic_block_forward.4
= control target key start
LH: loop header
LB: loop body
LE: loop exit
PB: predicated region body
PF: predicated region fallthrough
CT: control target
= control target key end

     0   :  { %s11277_s21 = smov 0   ;;  %s11279_s22 = smov 0   ;;  %s15932_s0 = inlined_call_operand.vmem [shape: bf16[2,8,10,10,128], index: 0, kind: input, shape index: {}]   ;;  %s15933_s1 = inlined_call_operand.vmem [shape: bf16[2,8,10,10,128], index: 1, kind: input, shape index: {}]   ;;  %s15934_s2 = inlined_call_operand.vmem [shape: bf16[2,8,10,10,128], index: 2, kind: input, shape index: {}]   ;;  %s15935_s3 = inlined_call_operand.vmem [shape: bf16[27,128,128], index: 3, kind: input, shape index: {}]   ;;  %s15936_s4 = inlined_call_operand.vmem [shape: f32[2,8,8,8,128], index: 4, kind: output, shape index: {0}]   ;;  %s15937_s5 = inlined_call_operand.vmem [shape: f32[2,2,1,128], index: 5, kind: output, shape index: {1}]   ;;  %s15938_s6 = inlined_call_operand.vmem [shape: f32[2,2,1,128], index: 6, kind: output, shape index: {2}]  }
   0x1   :  { %s11281_s23 = smov 0   ;;  %s11283_s24 = smov 0  }
   0x2   :  { %s11285_s25 = smov 0  }
   0x3 LB: > { %s26_s26 = sadd.s32 1, %s11232_s23  ;;  %s29_s27 = sadd.s32 1, %s11236_s24  ;;  %s11240_s25 = sphi %s11285_s25, %s17_s25   ;;  %s11236_s24 = sphi %s11283_s24, %s17026_s24   ;;  %s11232_s23 = sphi %s11281_s23, %s17025_s23   ;;  %s11228_s22 = sphi %s11279_s22, %s17024_s22   ;;  %s11224_s21 = sphi %s11277_s21, %s17023_s21  }
   0x4   : > { %p27_p0 = scmp.ge.s32.totalorder %s26_s26, 2  ;;  %p9389_p1 = scmp.ge.s32.totalorder %s11240_s25, 1 }
   0x5   : > { %p279_p2 = scmp.lt.s32.totalorder %s11240_s25, 5 }
   0x6   : > { %s17028_s26 = smov (%p27_p0, %s26_s26), 0  ;;  %s17030_s27 = smov (!%p27_p0, %s29_s27), %s11236_s24 }
   0x7   : > { %p280_p3 = pnand %p9389_p1, %p279_p2  ;;  %p31_p4 = scmp.ge.s32.totalorder %s17030_s27, 2 }
   0x9   : > { %s17032_s27 = smov (%p31_p4, %s17030_s27), 0  ;;  %283 = sbr.rel (%p280_p3) target bundleno = 1923 (0x783), region = 36 }
   0xe   : > { %v10819_v0 = vld [vmem:[%s15935_s3 + $0x78] sm:$0xff]  ;;  %s9390_s10 = sshll.u32 %s11224_s21, 2  ;;  %p354_p5 = scmp.lt.s32.totalorder %s11228_s22, 1  ;;  %v10818_v3 = vld [vmem:[%s15935_s3 + $0x70] sm:$0xff]  ;;  %v10817_v6 = vld [vmem:[%s15935_s3 + $0x68] sm:$0xff]  ;;  %vm1601_vm2 = vcmask 1042432  }
   0xf   : > { %v11315_v1 = vld [vmem:[%s15935_s3 + $0x38] sm:$0xff]  ;;  %p356_p6 = scmp.lt.s32.totalorder %s9390_s10, 7  ;;  %1247 = vmatpush.bf16.msra.mxu0 %v10819_v0  ;;  %11020 = vmatpush.bf16.msra.mxu3 %v10819_v0  ;;  %v11333_v4 = vld [vmem:[%s15935_s3 + $0x30] sm:$0xff]  ;;  %v11352_v7 = vld [vmem:[%s15935_s3 + $0x28] sm:$0xff]  ;;  %vm667_vm0 = vsmask.f32 3328 }
  0x10   : > { %v11320_v2 = vld [vmem:[%s15935_s3 + $0xb8] sm:$0xff]  ;;  %s17034_s22 = smov (!%p354_p5, %s11228_s22), 1  ;;  %1480 = vmatpush.bf16.msra.mxu1 %v11315_v1  ;;  %v11338_v5 = vld [vmem:[%s15935_s3 + $0xb0] sm:$0xff]  ;;  %v11357_v8 = vld [vmem:[%s15935_s3 + $0xa8] sm:$0xff]  ;;  %vm668_vm1 = vsmask.f32 7440 }
  0x11   : > { %1861 = vmatpush.bf16.msra.mxu2 %v11320_v2  ;;  %s17036_s10 = smov (!%p356_p6, %s9390_s10), 7  ;;  %s11045_s17 = smul.u32 160, %s17034_s22  ;;  %v10816_v9 = vld [vmem:[%s15935_s3 + $0x60] sm:$0xff]  ;;  %v10815_v20 = vld [vmem:[%s15935_s3 + $0x58] sm:$0xff]  ;;  %vm11429_vm3 = vmor %vm667_vm0, %vm668_vm1  ;;  %vm1602_vm4 = vcmask 1046532  }
  0x12   : > { %s11044_s18 = smul.u32 20, %s17036_s10  ;;  %v11367_v10 = vld [vmem:[%s15935_s3 + $0x20] sm:$0xff]  ;;  %v11418_v35 = vld [vmem:[%s15935_s3 + $0x18] sm:$0xff]  ;;  %v10814_v49 = vld [vmem:[%s15935_s3 + $0x50] sm:$0xff]  ;;  %s9397_s11 = sshll.u32 %s17036_s10, 3 }
  0x13   : > { %1248 = vmatpush.bf16.msra.mxu0 %v10818_v3  ;;  %11021 = vmatpush.bf16.msra.mxu3 %v10818_v3  ;;  %v11372_v11 = vld [vmem:[%s15935_s3 + $0xa0] sm:$0xff]  ;;  %v11423_v36 = vld [vmem:[%s15935_s3 + $0x98] sm:$0xff]  ;;  %v11442_v54 = vld [vmem:[%s15935_s3 + $0x10] sm:$0xff]  ;;  %s9398_s12 = sshll.u32 %s17034_s22, 6  ;;  %p399_p7 = scmp.lt.s32.totalorder %s11224_s21, 1 }
  0x14   : > { %1481 = vmatpush.bf16.msra.mxu1 %v11333_v4  ;;  %s360_s8 = sadd.s32 %s11045_s17, %s11044_s18  ;;  %v11447_v55 = vld [vmem:[%s15935_s3 + $0x90] sm:$0xff]  ;;  %vm11461_vm5 = vmor %vm1601_vm2, %vm1602_vm4  ;;  %s393_s13 = sadd.s32 %s9398_s12, %s9397_s11 }
  0x15   : > { %1862 = vmatpush.bf16.msra.mxu2 %v11338_v5  ;;  %s11359_s9 = sshll.u32 %s360_s8, 2  ;;  %s9399_s14 = sshll.u32 %s393_s13, 3 }
  0x16   : > { %s11378_s18 = scalar_lea.vmem %s15932_s0, %s11359_s9  ;;  %s12846_s20 = scalar_lea.vmem %s15933_s1, %s11359_s9 }
  0x17   : > { %1249 = vmatpush.bf16.msra.mxu0 %v10817_v6  ;;  %11022 = vmatpush.bf16.msra.mxu3 %v10817_v6  ;;  %v11381_v12 = vld [vmem:[%s11378_s18] sm:$0xf]  ;;  %v11384_v13 = vld [vmem:[%s11378_s18 + $0x4] sm:$0x1]  ;;  %v11387_v14 = vld [vmem:[%s11378_s18 + $0x8] sm:$0xf]  ;;  %s14184_s16 = scalar_lea.vmem %s15934_s2, %s11359_s9  ;;  %s15766_s10 = scalar_lea.vmem %s15936_s4, %s9399_s14 }
  0x18   : > { %1482 = vmatpush.bf16.msra.mxu1 %v11352_v7  ;;  %v11392_v15 = vld [vmem:[%s11378_s18 + $0xc] sm:$0x1]  ;;  %v671_v16 = vshrl.u32 %v11381_v12, 16  ;;  %v674_v17 = vshll.u32 %v11381_v12, 16  ;;  %v680_v18 = vshll.u32 %v11384_v13, 16  ;;  %v685_v19 = vshrl.u32 %v11387_v14, 16 }
  0x19   : > { %1863 = vmatpush.bf16.msra.mxu2 %v11357_v8  ;;  %v688_v21 = vshll.u32 %v11387_v14, 16  ;;  %v694_v22 = vshll.u32 %v11392_v15, 16  ;;  %v11404_v23 = vld [vmem:[%s11378_s18 + $0xf0] sm:$0xf]  ;;  %v472_v24 = vld [vmem:[%s11378_s18 + $0xf4] sm:$0x1]  ;;  %v1368_v53 = vunpack.c.l.b16 %v11381_v12  ;;  %v1369_v59 = vunpack.c.l.b16 %v11387_v14 }
  0x1a   : > { %v673_v25 = vrot.slane %v671_v16, 4  ;;  %v676_v26 = vrot.slane %v674_v17, 5  ;;  %v682_v27 = vrot.slane %v680_v18, 5  ;;  %v687_v28 = vrot.slane %v685_v19, 4  ;;  %v11408_v29 = vld [vmem:[%s11378_s18 + $0xf8] sm:$0xf] }
  0x1b   : > { %16256 = vst [vmem:[#allocation2_spill] sm:$0xff] %v11408_v29  ;;  %1250 = vmatpush.bf16.msra.mxu0 %v10816_v9  ;;  %11023 = vmatpush.bf16.msra.mxu3 %v10816_v9  ;;  %v690_v30 = vrot.slane %v688_v21, 5  ;;  %v696_v31 = vrot.slane %v694_v22, 5  ;;  %v474_v32 = vld [vmem:[%s11378_s18 + $0xfc] sm:$0x1]  ;;  %v1007_v33 = vshrl.u32 %v11404_v23, 16 }
  0x1c   : > { %v1010_v34 = vshll.u32 %v11404_v23, 16  ;;  %1483 = vmatpush.bf16.msra.mxu1 %v11367_v10  ;;  %v677_v37 = vor.u32 %v676_v26, %v673_v25  ;;  %v1016_v38 = vshll.u32 %v472_v24, 16  ;;  %v1021_v39 = vshrl.u32 %v11408_v29, 16  ;;  %v11453_v60 = vld [vmem:[%s11378_s18 + $0x10] sm:$0xf]  ;;  %v10813_v19 = vld [vmem:[%s15935_s3 + $0x48] sm:$0xff] }
  0x1d   : > { %1864 = vmatpush.bf16.msra.mxu2 %v11372_v11  ;;  %v1024_v40 = vshll.u32 %v11408_v29, 16  ;;  %v691_v42 = vor.u32 %v690_v30, %v687_v28  ;;  %v1009_v43 = vrot.slane %v1007_v33, 4  ;;  %v1030_v45 = vshll.u32 %v474_v32, 16  ;;  %v11471_v18 = vld [vmem:[%s11378_s18 + $0x14] sm:$0x1]  ;;  %v11489_v24 = vld [vmem:[%s15935_s3 + $0x8] sm:$0xff] }
  0x1e   : > { %v1012_v44 = vrot.slane %v1010_v34, 5  ;;  %v678_v46 = vrot.slane %v677_v37, 4  ;;  %v1023_v47 = vrot.slane %v1021_v39, 4  ;;  %v1018_v52 = vrot.slane %v1016_v38, 5  ;;  %v11480_v21 = vld [vmem:[%s11378_s18 + $0x18] sm:$0xf] }
  0x1f   : > { %v1026_v48 = vrot.slane %v1024_v40, 5  ;;  %1251 = vmatpush.bf16.msra.mxu0 %v10815_v20  ;;  %11024 = vmatpush.bf16.msra.mxu3 %v10815_v20  ;;  %v692_v50 = vrot.slane %v691_v42, 4  ;;  %v1032_v58 = vrot.slane %v1030_v45, 5  ;;  %v9482_v3 = vrot.slane %v11381_v12, 9  ;;  %v11501_v28 = vld [vmem:[%s11378_s18 + $0x100] sm:$0xf] }
  0x20   : > { %v1013_v51 = vor.u32 %v1012_v44, %v1009_v43  ;;  %1484 = vmatpush.bf16.msra.mxu1 %v11418_v35  ;;  %v683_v56 = vsel %vm11429_vm3, %v678_v46, %v682_v27  ;;  %v1606_v16 = vrot.slane %v11384_v13, 5  ;;  %v9483_v17 = vrot.slane %v11387_v14, 9  ;;  %16261 = vst [vmem:[#allocation3_spill] sm:$0xff] %v11501_v28  ;;  %v10812_v34 = vld [vmem:[%s15935_s3 + $0x40] sm:$0xff]  ;;  %v11517_v38 = vld [vmem:[%s11378_s18 + $0x1c] sm:$0x1] }
  0x21   : > { %1865 = vmatpush.bf16.msra.mxu2 %v11423_v36  ;;  %v1027_v57 = vor.u32 %v1026_v48, %v1023_v47  ;;  %v697_v61 = vsel %vm11429_vm3, %v692_v50, %v696_v31  ;;  %v11457_v62 = vunpack.c.l.b16 %v683_v56  ;;  %v1610_v12 = vrot.slane %v11392_v15, 5  ;;  %v11494_v15 = vld [vmem:[%s15935_s3 + $0x88] sm:$0xff]  ;;  %v476_v46 = vld [vmem:[%s11378_s18 + $0x104] sm:$0x1]  ;;  %s17038_s21 = smov (!%p399_p7, %s11224_s21), 1 }
  0x22   : > { %v1014_v63 = vrot.slane %v1013_v51, 4  ;;  %v11466_v6 = vunpack.c.l.b16 %v697_v61  ;;  %v699_v13 = vshrl.u32 %v11453_v60, 16  ;;  %v702_v22 = vshll.u32 %v11453_v60, 16  ;;  %v11525_v47 = vld [vmem:[%s11378_s18 + $0x108] sm:$0xf]  ;;  %v11538_v50 = vld [vmem:[%s15935_s3 + $0x80] sm:$0xff] }
  0x23   : > { %v1028_v9 = vrot.slane %v1027_v57, 4  ;;  %1252 = vmatpush.bf16.msra.mxu0 %v10814_v49  ;;  %11025 = vmatpush.bf16.msra.mxu3 %v10814_v49  ;;  %v1607_v27 = vsel %vm11461_vm5, %v9482_v3, %v1606_v16  ;;  %v1400_v31 = vpack.c.b16 %v1369_v59, %v1368_v53  ;;  %v11509_v32 = vsel %vm11461_vm5, %v9483_v17, %v1610_v12  ;;  %v11533_v49 = vld [vmem:[%s15935_s3] sm:$0xff]  ;;  %v478_v57 = vld [vmem:[%s11378_s18 + $0x10c] sm:$0x1] }
  0x24   : > { %v1019_v20 = vsel %vm11429_vm3, %v1014_v63, %v1018_v52  ;;  %1485 = vmatpush.bf16.msra.mxu1 %v11442_v54  ;;  %v701_v33 = vrot.slane %v699_v13, 4  ;;  %v1167_v37 = vpack.c.b16 %v11466_v6, %v11457_v62  ;;  %v704_v39 = vrot.slane %v702_v22, 5  ;;  %16263 = vst [vmem:[#allocation5_spill] sm:$0xff] %v11525_v47 }
  0x25   : > { %1866 = vmatpush.bf16.msra.mxu2 %v11447_v55  ;;  %v1033_v25 = vsel %vm11429_vm3, %v1028_v9, %v1032_v58  ;;  %v1159_v26 = vunpack.c.l.b16 %v1019_v20  ;;  %v708_v40 = vshll.u32 %v11471_v18, 16  ;;  %v713_v42 = vshrl.u32 %v11480_v21, 16  ;;  %v10859_v58 = vld [vmem:[%s15935_s3 + $0x1b8] sm:$0xff] }
  0x26   : > { %v11503_v30 = vunpack.c.l.b16 %v1033_v25  ;;  %v1749_v43 = vunpack.c.l.b16 %v1607_v27  ;;  %v1750_v44 = vunpack.c.l.b16 %v11509_v32  ;;  %v716_v45 = vshll.u32 %v11480_v21, 16  ;;  %v10843_v25 = vld [vmem:[%s15935_s3 + $0x138] sm:$0xff] }
  0x27   : > { %1253 = vmatpush.bf16.msra.mxu0 %v10813_v19  ;;  %11026 = vmatpush.bf16.msra.mxu3 %v10813_v19  ;;  %v1035_v48 = vshrl.u32 %v11501_v28, 16  ;;  %v705_v52 = vor.u32 %v704_v39, %v701_v33  ;;  %v710_v53 = vrot.slane %v708_v40, 5  ;;  %v715_v56 = vrot.slane %v713_v42, 4 }
  0x28   : > { %16262 = vst [vmem:[#allocation4_spill] sm:$0xff] %v11503_v30  ;;  %1486 = vmatpush.bf16.msra.mxu1 %v11489_v24  ;;  %v1179_v51 = vpack.c.b16 %v11503_v30, %v1159_v26  ;;  %v718_v61 = vrot.slane %v716_v45, 5  ;;  %v722_v62 = vshll.u32 %v11517_v38, 16  ;;  %v1038_v3 = vshll.u32 %v11501_v28, 16  ;;  %v10851_v26 = vld [vmem:[%s15935_s3 + $0x178] sm:$0xff] }
  0x29   : > { %1867 = vmatpush.bf16.msra.mxu2 %v11494_v15  ;;  %v1037_v63 = vrot.slane %v1035_v48, 4  ;;  %v706_v9 = vrot.slane %v705_v52, 4  ;;  %v1044_v16 = vshll.u32 %v476_v46, 16  ;;  %v1049_v17 = vshrl.u32 %v11525_v47, 16  ;;  %v10858_v46 = vld [vmem:[%s15935_s3 + $0x1b0] sm:$0xff] }
  0x2a   : > { %v1052_v19 = vshll.u32 %v11525_v47, 16  ;;  %v1781_v20 = vpack.c.b16 %v1750_v44, %v1749_v43  ;;  %v719_v12 = vor.u32 %v718_v61, %v715_v56  ;;  %v1040_v13 = vrot.slane %v1038_v3, 5  ;;  %v11574_v56 = vld [vmem:[%s11378_s18 + $0x20] sm:$0xf]  ;;  %v11594_v3 = vld [vmem:[%s11378_s18 + $0x28] sm:$0xf] }
  0x2b   : > { %1254 = vmatpush.bf16.msra.mxu0 %v10812_v34  ;;  %11027 = vmatpush.bf16.msra.mxu3 %v10812_v34  ;;  %v1058_v22 = vshll.u32 %v478_v57, 16  ;;  %v711_v27 = vsel %vm11429_vm3, %v706_v9, %v710_v53  ;;  %v1051_v33 = vrot.slane %v1049_v17, 4  ;;  %v1370_v39 = vunpack.c.l.b16 %v11453_v60  ;;  %v11731_v57 = vld [vmem:[%s11378_s18 + $0x124] sm:$0x1] }
  0x2c   : > { %1487 = vmatpush.bf16.msra.mxu1 %v11533_v49  ;;  %v1054_v34 = vrot.slane %v1052_v19, 5  ;;  %v720_v40 = vrot.slane %v719_v12, 4  ;;  %v724_v42 = vrot.slane %v722_v62, 5  ;;  %v11563_v43 = vunpack.c.l.b16 %v711_v27  ;;  %v11607_v12 = vld [vmem:[%s11378_s18 + $0x110] sm:$0xf] }
  0x2d   : > { %1868 = vmatpush.bf16.msra.mxu2 %v11538_v50  ;;  %v1041_v45 = vor.u32 %v1040_v13, %v1037_v63  ;;  %v1046_v48 = vrot.slane %v1044_v16, 5  ;;  %v11570_v53 = vpack.c.b16 %v1370_v39, %v1369_v59  ;;  %v1060_v61 = vrot.slane %v1058_v22, 5  ;;  %16264 = vst [vmem:[#allocation6_spill] sm:$0xff] %v11607_v12 }
  0x2e   : > { %1255 = vmatmul.bf16.vlgmr.msra.gmra.mxu0 %v1167_v37  ;;  %1315 = vmatmul.bf16.vlgmr.msra.gmra.mxu3 %v1179_v51  ;;  %v1055_v52 = vor.u32 %v1054_v34, %v1051_v33  ;;  %v1614_v37 = vrot.slane %v11471_v18, 5  ;;  %v15939_v14 = vunpack.c.l.b16 %v11480_v21  ;;  %v9485_v59 = vrot.slane %v11480_v21, 9  ;;  %v11627_v34 = vld [vmem:[%s11378_s18 + $0x2c] sm:$0x1] }
  0x2f   : > { %11028 = vmatpush.bf16.msrb.mxu3 %v11315_v1  ;;  %v9484_v1 = vrot.slane %v11453_v60, 9  ;;  %1488 = vmatmul.bf16.vlgmr.msra.gmra.mxu1 %v1400_v31  ;;  %v10842_v60 = vld [vmem:[%s15935_s3 + $0x130] sm:$0xff]  ;;  %v725_v18 = vsel %vm11429_vm3, %v720_v40, %v724_v42  ;;  %v1618_v63 = vrot.slane %v11517_v38, 5  ;;  %v727_v9 = vshrl.u32 %v11574_v56, 16  ;;  %v11631_v40 = vld [vmem:[%s11378_s18 + $0x118] sm:$0xf] }
  0x30   : > { %1869 = vmatmul.bf16.vlgmr.msra.gmra.mxu2 %v1781_v20  ;;  %2365 = vmatpush.bf16.msrb.mxu0 %v10843_v25  ;;  %v1056_v51 = vrot.slane %v1055_v52, 4  ;;  %v10850_v31 = vld [vmem:[%s15935_s3 + $0x170] sm:$0xff]  ;;  %v730_v38 = vshll.u32 %v11574_v56, 16  ;;  %v11609_v13 = vunpack.c.l.b16 %v725_v18  ;;  %v11616_v25 = vld [vmem:[%s11378_s18 + $0x24] sm:$0x1]  ;;  %v11624_v33 = vpack.c.b16 %v15939_v14, %v1370_v39  ;;  %16266 = vst [vmem:[#allocation8_spill] sm:$0xff] %v11631_v40 }
  0x31   : > { %2809 = vmatpush.bf16.msrb.mxu2 %v10859_v58  ;;  %v1042_v58 = vrot.slane %v1041_v45, 4  ;;  %2607 = vmatpush.bf16.msrb.mxu1 %v10851_v26  ;;  %v1615_v62 = vsel %vm11461_vm5, %v9484_v1, %v1614_v37  ;;  %v11603_v19 = vsel %vm11461_vm5, %v9485_v59, %v1618_v63  ;;  %v729_v20 = vrot.slane %v727_v9, 4  ;;  %v11640_v52 = vld [vmem:[%s11378_s18 + $0x11c] sm:$0x1] }
  0x32   : > { %v1751_v17 = vunpack.c.l.b16 %v1615_v62  ;;  %v741_v26 = vshrl.u32 %v11594_v3, 16  ;;  %v732_v32 = vrot.slane %v730_v38, 5  ;;  %v15940_v45 = vunpack.c.l.b16 %v11603_v19 }
  0x33   : > { %11029 = vmatpush.bf16.msrb.mxu3 %v11333_v4  ;;  %v1047_v16 = vsel %vm11429_vm3, %v1042_v58, %v1046_v48  ;;  %v1061_v4 = vsel %vm11429_vm3, %v1056_v51, %v1060_v61  ;;  %v11637_v48 = vld [vmem:[%s11378_s18 + $0x114] sm:$0x1]  ;;  %v736_v1 = vshll.u32 %v11616_v25, 16  ;;  %v1066_v61 = vshll.u32 %v11607_v12, 16 }
  0x34   : > { %v11613_v22 = vpack.c.b16 %v1751_v17, %v1750_v44  ;;  %2366 = vmatpush.bf16.msrb.mxu0 %v10842_v60  ;;  %v11619_v27 = vunpack.c.l.b16 %v1047_v16  ;;  %v744_v44 = vshll.u32 %v11594_v3, 16  ;;  %v11633_v42 = vunpack.c.l.b16 %v1061_v4 }
  0x35   : > { %2810 = vmatpush.bf16.msrb.mxu2 %v10858_v46  ;;  %2608 = vmatpush.bf16.msrb.mxu1 %v10850_v31  ;;  %v743_v46 = vrot.slane %v741_v26, 4  ;;  %v733_v39 = vor.u32 %v732_v32, %v729_v20  ;;  %v750_v37 = vshll.u32 %v11627_v34, 16  ;;  %v1077_v59 = vshrl.u32 %v11631_v40, 16 }
  0x36   : > { %16265 = vst [vmem:[#allocation7_spill] sm:$0xff] %v11619_v27  ;;  %v746_v58 = vrot.slane %v744_v44, 5  ;;  %v1080_v60 = vshll.u32 %v11631_v40, 16  ;;  %v1068_v18 = vrot.slane %v1066_v61, 5  ;;  %v1072_v62 = vshll.u32 %v11637_v48, 16 }
  0x37   : > { %11030 = vmatpush.bf16.msrb.mxu3 %v11352_v7  ;;  %16267 = vst [vmem:[#allocation9_spill] sm:$0xff] %v11633_v42  ;;  %v1063_v7 = vshrl.u32 %v11607_v12, 16  ;;  %v1086_v63 = vshll.u32 %v11640_v52, 16  ;;  %v11653_v9 = vpack.c.b16 %v11609_v13, %v11563_v43  ;;  %v11657_v16 = vpack.c.b16 %v11633_v42, %v11619_v27 }
  0x38   : > { %v747_v31 = vor.u32 %v746_v58, %v743_v46  ;;  %v1079_v4 = vrot.slane %v1077_v59, 4  ;;  %v1082_v20 = vrot.slane %v1080_v60, 5  ;;  %v734_v38 = vrot.slane %v733_v39, 4  ;;  %v11667_v60 = vld [vmem:[%s11378_s18 + $0x30] sm:$0xf] }
  0x39   : > { %v1065_v51 = vrot.slane %v1063_v7, 4  ;;  %16268 = vst [vmem:[#allocation10_spill] sm:$0xff] %v11653_v9  ;;  %v738_v26 = vrot.slane %v736_v1, 5  ;;  %v752_v46 = vrot.slane %v750_v37, 5  ;;  %v1074_v61 = vrot.slane %v1072_v62, 5  ;;  %v10841_v37 = vld [vmem:[%s15935_s3 + $0x128] sm:$0xff] }
  0x3a   : > { %16269 = vst [vmem:[#allocation11_spill] sm:$0xff] %v11657_v16  ;;  %v748_v44 = vrot.slane %v747_v31, 4  ;;  %v1083_v7 = vor.u32 %v1082_v20, %v1079_v4  ;;  %v1088_v14 = vrot.slane %v1086_v63, 5  ;;  %v9486_v1 = vrot.slane %v11574_v56, 9  ;;  %v11692_v4 = vld [vmem:[%s11378_s18 + $0x120] sm:$0xf]  ;;  %2367 = vmatpush.bf16.msrb.mxu0 %v10841_v37 }
  0x3b   : > { %11031 = vmatpush.bf16.msrb.mxu3 %v11367_v10  ;;  %v11661_v10 = vpack.c.b16 %v15940_v45, %v1751_v17  ;;  %v1069_v32 = vor.u32 %v1068_v18, %v1065_v51  ;;  %v11670_v17 = vld [vmem:[%s11378_s18 + $0x38] sm:$0xf]  ;;  %v739_v39 = vsel %vm11429_vm3, %v734_v38, %v738_v26  ;;  %v10849_v51 = vld [vmem:[%s15935_s3 + $0x168] sm:$0xff]  ;;  %v1622_v18 = vrot.slane %v11616_v25, 5  ;;  %16271 = vst [vmem:[#allocation13_spill] sm:$0xff] %v11692_v4 }
  0x3c   : > { %v1084_v59 = vrot.slane %v1083_v7, 4  ;;  %v753_v31 = vsel %vm11429_vm3, %v748_v44, %v752_v46  ;;  %v9487_v62 = vrot.slane %v11594_v3, 9  ;;  %v1626_v63 = vrot.slane %v11627_v34, 5  ;;  %2609 = vmatpush.bf16.msrb.mxu1 %v10849_v51  ;;  %v11726_v37 = vld [vmem:[%s11378_s18 + $0x3c] sm:$0x1] }
  0x3d   : > { %16270 = vst [vmem:[#allocation12_spill] sm:$0xff] %v11661_v10  ;;  %v1070_v58 = vrot.slane %v1069_v32, 4  ;;  %v755_v26 = vshrl.u32 %v11667_v60, 16  ;;  %v758_v25 = vshll.u32 %v11667_v60, 16  ;;  %v769_v32 = vshrl.u32 %v11670_v17, 16 }
  0x3e   : > { %1260 = vmatmul.bf16.gmra.mxu0 %v11653_v9  ;;  %1320 = vmatmul.bf16.gmra.mxu3 %v11657_v16  ;;  %v1089_v38 = vsel %vm11429_vm3, %v1084_v59, %v1088_v14  ;;  %v772_v34 = vshll.u32 %v11670_v17, 16  ;;  %v11703_v44 = vunpack.c.l.b16 %v739_v39  ;;  %v11705_v46 = vunpack.c.l.b16 %v753_v31  ;;  %v11709_v14 = vld [vmem:[%s11378_s18 + $0x128] sm:$0xf] }
  0x3f   : > { %11032 = vmatpush.bf16.msrb.mxu3 %v11418_v35  ;;  %1493 = vmatmul.bf16.gmra.mxu1 %v11624_v33  ;;  %v10857_v35 = vld [vmem:[%s15935_s3 + $0x1a8] sm:$0xff]  ;;  %v1075_v20 = vsel %vm11429_vm3, %v1070_v58, %v1074_v61  ;;  %16272 = vst [vmem:[#allocation14_spill] sm:$0xff] %v11709_v14  ;;  %v1091_v7 = vshrl.u32 %v11692_v4, 16  ;;  %v11714_v61 = vunpack.c.l.b16 %v1089_v38  ;;  %v11718_v59 = vsel %vm11461_vm5, %v9486_v1, %v1622_v18 }
  0x40   : > { %1874 = vmatmul.bf16.gmra.mxu2 %v11661_v10  ;;  %v11712_v58 = vunpack.c.l.b16 %v1075_v20  ;;  %v11722_v39 = vsel %vm11461_vm5, %v9487_v62, %v1626_v63  ;;  %v757_v51 = vrot.slane %v755_v26, 4  ;;  %v760_v31 = vrot.slane %v758_v25, 5 }
  0x41   : > { %2811 = vmatpush.bf16.msrb.mxu2 %v10857_v35  ;;  %16274 = vst [vmem:[#allocation16_spill] sm:$0xff] %v11714_v61  ;;  %v424_v35 = vld [vmem:[%s11378_s18 + $0x34] sm:$0x1]  ;;  %v771_v45 = vrot.slane %v769_v32, 4  ;;  %v1094_v20 = vshll.u32 %v11692_v4, 16  ;;  %v774_v38 = vrot.slane %v772_v34, 5  ;;  %v11746_v63 = vpack.c.b16 %v11705_v46, %v11703_v44 }
  0x42   : > { %16273 = vst [vmem:[#allocation15_spill] sm:$0xff] %v11712_v58  ;;  %v1093_v1 = vrot.slane %v1091_v7, 4  ;;  %v1105_v18 = vshrl.u32 %v11709_v14, 16  ;;  %v1108_v62 = vshll.u32 %v11709_v14, 16  ;;  %v11739_v32 = vld [vmem:[%s11378_s18 + $0x12c] sm:$0x1]  ;;  %v11750_v26 = vpack.c.b16 %v11714_v61, %v11712_v58 }
  0x43   : > { %11033 = vmatpush.bf16.msrb.mxu3 %v11442_v54  ;;  %v1096_v25 = vrot.slane %v1094_v20, 5  ;;  %v764_v34 = vshll.u32 %v424_v35, 16  ;;  %v778_v9 = vshll.u32 %v11726_v37, 16  ;;  %v1100_v7 = vshll.u32 %v11731_v57, 16  ;;  %16275 = vst [vmem:[#allocation17_spill] sm:$0xff] %v11746_v63 }
  0x44   : > { %v1107_v16 = vrot.slane %v1105_v18, 4  ;;  %v1110_v10 = vrot.slane %v1108_v62, 5  ;;  %16276 = vst [vmem:[#allocation18_spill] sm:$0xff] %v11750_v26  ;;  %v775_v20 = vor.u32 %v774_v38, %v771_v45  ;;  %v16280_v62 = vunpack.c.l.b16 %v11722_v39 }
  0x45   : > { %v1097_v54 = vor.u32 %v1096_v25, %v1093_v1  ;;  %v1114_v61 = vshll.u32 %v11739_v32, 16  ;;  %v766_v38 = vrot.slane %v764_v34, 5  ;;  %v780_v1 = vrot.slane %v778_v9, 5  ;;  %v10856_v9 = vld [vmem:[%s15935_s3 + $0x1a0] sm:$0xff] }
  0x46   : > { %v1111_v27 = vor.u32 %v1110_v10, %v1107_v16  ;;  %v776_v25 = vrot.slane %v775_v20, 4  ;;  %v1630_v58 = vrot.slane %v424_v35, 5  ;;  %v9489_v34 = vrot.slane %v11670_v17, 9  ;;  %2812 = vmatpush.bf16.msrb.mxu2 %v10856_v9 }
  0x47   : > { %11034 = vmatpush.bf16.msrb.mxu3 %v11489_v24  ;;  %v761_v24 = vor.u32 %v760_v31, %v757_v51  ;;  %v16277_v51 = vunpack.c.l.b16 %v11574_v56  ;;  %v16278_v31 = vunpack.c.l.b16 %v11594_v3  ;;  %v1116_v10 = vrot.slane %v1114_v61, 5 }
  0x48   : > { %v1112_v16 = vrot.slane %v1111_v27, 4  ;;  %v781_v27 = vsel %vm11429_vm3, %v776_v25, %v780_v1  ;;  %v15950_v25 = vunpack.c.l.b16 %v11670_v17 }
  0x49   : > { %v11757_v18 = vpack.c.b16 %v16278_v31, %v16277_v51  ;;  %v762_v45 = vrot.slane %v761_v24, 4  ;;  %v1098_v51 = vrot.slane %v1097_v54, 4  ;;  %v9488_v31 = vrot.slane %v11667_v60, 9  ;;  %v11772_v24 = vld [vmem:[%s11378_s18 + $0x50] sm:$0xf] }
  0x4a   : > { %v11780_v54 = vld [vmem:[%s11378_s18 + $0x58] sm:$0xf]  ;;  %v11806_v1 = vunpack.c.l.b16 %v781_v27  ;;  %v434_v27 = vld [vmem:[%s11378_s18 + $0x5c] sm:$0x1] }
  0x4b   : > { %11035 = vmatpush.bf16.msrb.mxu3 %v11533_v49  ;;  %v16279_v49 = vunpack.c.l.b16 %v11718_v59  ;;  %v767_v35 = vsel %vm11429_vm3, %v762_v45, %v766_v38  ;;  %v11791_v20 = vsel %vm11461_vm5, %v9488_v31, %v1630_v58  ;;  %v800_v45 = vshll.u32 %v11780_v54, 16 }
  0x4c   : > { %v11804_v58 = vunpack.c.l.b16 %v767_v35 }
  0x4d   : > { %v11763_v42 = vpack.c.b16 %v16280_v62, %v16279_v49  ;;  %v786_v49 = vshll.u32 %v11772_v24, 16  ;;  %v797_v62 = vshrl.u32 %v11780_v54, 16  ;;  %v802_v35 = vrot.slane %v800_v45, 5 }
  0x4e   : > { %1265 = vmatmul.bf16.gmra.mxu0 %v11746_v63  ;;  %1325 = vmatmul.bf16.gmra.mxu3 %v11750_v26  ;;  %v806_v26 = vshll.u32 %v434_v27, 16 }
  0x4f   : > { %11036 = vmatpush.bf16.msra.mxu3 %v11320_v2  ;;  %16281 = vst [vmem:[#allocation19_spill] sm:$0xff] %v11763_v42  ;;  %v1102_v2 = vrot.slane %v1100_v7, 5  ;;  %1498 = vmatmul.bf16.gmra.mxu1 %v11757_v18  ;;  %v1634_v7 = vrot.slane %v11726_v37, 5  ;;  %v783_v37 = vshrl.u32 %v11772_v24, 16 }
  0x50   : > { %1879 = vmatmul.bf16.gmra.mxu2 %v11763_v42  ;;  %v11843_v42 = vld [vmem:[%s11378_s18 + $0x60] sm:$0xf] }
  0x51   : > { %v1103_v61 = vsel %vm11429_vm3, %v1098_v51, %v1102_v2  ;;  %v11801_v38 = vsel %vm11461_vm5, %v9489_v34, %v1634_v7  ;;  %v15951_v2 = vunpack.c.l.b16 %v11667_v60  ;;  %v432_v34 = vld [vmem:[%s11378_s18 + $0x54] sm:$0x1]  ;;  %v788_v7 = vrot.slane %v786_v49, 5  ;;  %16287 = vst [vmem:[#allocation25_spill] sm:$0xff] %v11843_v42 }
  0x52   : > { %v11810_v51 = vunpack.c.l.b16 %v1103_v61  ;;  %v15952_v9 = vunpack.c.l.b16 %v11801_v38  ;;  %v11821_v61 = vpack.c.b16 %v11806_v1, %v11804_v58  ;;  %v792_v49 = vshll.u32 %v432_v34, 16 }
  0x53   : > { %11037 = vmatpush.bf16.msra.mxu3 %v11338_v5  ;;  %v1117_v5 = vsel %vm11429_vm3, %v1112_v16, %v1116_v10  ;;  %v15953_v16 = vunpack.c.l.b16 %v11791_v20  ;;  %v785_v10 = vrot.slane %v783_v37, 4  ;;  %v11831_v37 = vpack.c.b16 %v15950_v25, %v15951_v2  ;;  %v11846_v25 = vld [vmem:[%s11378_s18 + $0x68] sm:$0xf] }
  0x54   : > { %16282 = vst [vmem:[#allocation20_spill] sm:$0xff] %v11810_v51  ;;  %v11812_v31 = vunpack.c.l.b16 %v1117_v5 }
  0x55   : > { %16284 = vst [vmem:[#allocation22_spill] sm:$0xff] %v11821_v61 }
  0x56   : > { %16283 = vst [vmem:[#allocation21_spill] sm:$0xff] %v11812_v31  ;;  %v11825_v5 = vpack.c.b16 %v11812_v31, %v11810_v51 }
  0x57   : > { %11038 = vmatpush.bf16.msra.mxu3 %v11357_v8  ;;  %v799_v8 = vrot.slane %v797_v62, 4  ;;  %v789_v62 = vor.u32 %v788_v7, %v785_v10  ;;  %16288 = vst [vmem:[#allocation26_spill] sm:$0xff] %v11846_v25  ;;  %v808_v10 = vrot.slane %v806_v26, 5  ;;  %v10848_v7 = vld [vmem:[%s15935_s3 + $0x160] sm:$0xff]  ;;  %v814_v26 = vshll.u32 %v11843_v42, 16 }
  0x58   : > { %16285 = vst [vmem:[#allocation23_spill] sm:$0xff] %v11825_v5  ;;  %2610 = vmatpush.bf16.msrb.mxu1 %v10848_v7  ;;  %v15961_v7 = vunpack.c.l.b16 %v11408_v29 }
  0x59   : > { %v803_v45 = vor.u32 %v802_v35, %v799_v8  ;;  %v790_v2 = vrot.slane %v789_v62, 4  ;;  %v9490_v8 = vrot.slane %v11772_v24, 9  ;;  %v1638_v35 = vrot.slane %v432_v34, 5 }
  0x5a   : > { %v825_v62 = vshrl.u32 %v11846_v25, 16  ;;  %v816_v31 = vrot.slane %v814_v26, 5 }
  0x5b   : > { %11039 = vmatpush.bf16.msra.mxu3 %v11372_v11  ;;  %v11837_v11 = vpack.c.b16 %v15952_v9, %v15953_v16  ;;  %v794_v9 = vrot.slane %v792_v49, 5  ;;  %v804_v16 = vrot.slane %v803_v45, 4  ;;  %v811_v49 = vshrl.u32 %v11843_v42, 16 }
  0x5c   : > { %v828_v45 = vshll.u32 %v11846_v25, 16 }
  0x5d   : > { %16286 = vst [vmem:[#allocation24_spill] sm:$0xff] %v11837_v11  ;;  %v795_v34 = vsel %vm11429_vm3, %v790_v2, %v794_v9  ;;  %v813_v63 = vrot.slane %v811_v49, 4  ;;  %v436_v9 = vld [vmem:[%s11378_s18 + $0x64] sm:$0x1] }
  0x5e   : > { %1270 = vmatmul.bf16.gmra.mxu0 %v11821_v61  ;;  %1330 = vmatmul.bf16.gmra.mxu3 %v11825_v5  ;;  %v9491_v5 = vrot.slane %v11780_v54, 9  ;;  %v1642_v61 = vrot.slane %v434_v27, 5  ;;  %v809_v27 = vsel %vm11429_vm3, %v804_v16, %v808_v10  ;;  %v1143_v51 = vunpack.c.l.b16 %v795_v34  ;;  %v438_v16 = vld [vmem:[%s11378_s18 + $0x6c] sm:$0x1] }
  0x5f   : > { %11040 = vmatpush.bf16.msra.mxu3 %v11423_v36  ;;  %1503 = vmatmul.bf16.gmra.mxu1 %v11831_v37  ;;  %v10840_v36 = vld [vmem:[%s15935_s3 + $0x120] sm:$0xff]  ;;  %v11876_v2 = vunpack.c.l.b16 %v809_v27  ;;  %v827_v10 = vrot.slane %v825_v62, 4  ;;  %v830_v30 = vrot.slane %v828_v45, 5  ;;  %v834_v49 = vshll.u32 %v438_v16, 16 }
  0x60   : > { %1884 = vmatmul.bf16.gmra.mxu2 %v11837_v11  ;;  %2368 = vmatpush.bf16.msrb.mxu0 %v10840_v36  ;;  %v11871_v11 = vsel %vm11461_vm5, %v9491_v5, %v1642_v61  ;;  %v1392_v36 = vunpack.c.l.b16 %v11404_v23  ;;  %v15963_v61 = vunpack.c.l.b16 %v11780_v54  ;;  %v817_v23 = vor.u32 %v816_v31, %v813_v63 }
  0x61   : > { %16289 = vst [vmem:[#allocation27_spill] sm:$0xff] %v11871_v11  ;;  %v1171_v26 = vpack.c.b16 %v11876_v2, %v1143_v51  ;;  %v831_v27 = vor.u32 %v830_v30, %v827_v10  ;;  %v9492_v63 = vrot.slane %v11843_v42, 9  ;;  %v1646_v31 = vrot.slane %v436_v9, 5  ;;  %v10855_v10 = vld [vmem:[%s15935_s3 + $0x198] sm:$0xff] }
  0x62   : > { %16290 = vst [vmem:[#allocation28_spill] sm:$0xff] %v11876_v2  ;;  %v1412_v34 = vpack.c.b16 %v15961_v7, %v1392_v36  ;;  %v818_v45 = vrot.slane %v817_v23, 4  ;;  %v9493_v36 = vrot.slane %v11846_v25, 9  ;;  %v1650_v30 = vrot.slane %v438_v16, 5  ;;  %v11903_v23 = vld [vmem:[%s11378_s18 + $0x70] sm:$0xf]  ;;  %2813 = vmatpush.bf16.msrb.mxu2 %v10855_v10 }
  0x63   : > { %11041 = vmatpush.bf16.msra.mxu3 %v11447_v55  ;;  %v1639_v55 = vsel %vm11461_vm5, %v9490_v8, %v1638_v35  ;;  %v1376_v8 = vunpack.c.l.b16 %v11772_v24  ;;  %v820_v35 = vshll.u32 %v436_v9, 16  ;;  %v832_v51 = vrot.slane %v831_v27, 4  ;;  %16291 = vst [vmem:[#allocation29_spill] sm:$0xff] %v11903_v23  ;;  %v11906_v9 = vld [vmem:[%s11378_s18 + $0x78] sm:$0xf] }
  0x64   : > { %v1757_v5 = vunpack.c.l.b16 %v1639_v55  ;;  %16292 = vst [vmem:[#allocation30_spill] sm:$0xff] %v11906_v9  ;;  %v842_v27 = vshll.u32 %v11903_v23, 16  ;;  %v440_v10 = vld [vmem:[%s11378_s18 + $0x74] sm:$0x1] }
  0x65   : > { %v1404_v62 = vpack.c.b16 %v15963_v61, %v1376_v8  ;;  %v822_v55 = vrot.slane %v820_v35, 5  ;;  %v10839_v8 = vld [vmem:[%s15935_s3 + $0x118] sm:$0xff] }
  0x66   : > { %2369 = vmatpush.bf16.msrb.mxu0 %v10839_v8  ;;  %v442_v61 = vld [vmem:[%s11378_s18 + $0x7c] sm:$0x1] }
  0x67   : > { %11042 = vmatpush.bf16.msra.mxu3 %v11494_v15  ;;  %v15962_v15 = vunpack.c.l.b16 %v11871_v11  ;;  %v823_v16 = vsel %vm11429_vm3, %v818_v45, %v822_v55  ;;  %v15967_v45 = vunpack.c.l.b16 %v11843_v42  ;;  %v15966_v55 = vunpack.c.l.b16 %v11846_v25 }
  0x69   : > { %v1785_v24 = vpack.c.b16 %v15962_v15, %v1757_v5  ;;  %v10847_v5 = vld [vmem:[%s15935_s3 + $0x158] sm:$0xff] }
  0x6a   : > { %2611 = vmatpush.bf16.msrb.mxu1 %v10847_v5  ;;  %v844_v5 = vrot.slane %v842_v27, 5  ;;  %v848_v27 = vshll.u32 %v440_v10, 16 }
  0x6b   : > { %11043 = vmatpush.bf16.msra.mxu3 %v11538_v50  ;;  %v836_v50 = vrot.slane %v834_v49, 5  ;;  %v11914_v49 = vsel %vm11461_vm5, %v9492_v63, %v1646_v31  ;;  %v15968_v63 = vunpack.c.l.b16 %v11525_v47 }
  0x6c   : > { %16293 = vst [vmem:[#allocation31_spill] sm:$0xff] %v11914_v49 }
  0x6d   : > { %v837_v35 = vsel %vm11429_vm3, %v832_v51, %v836_v50  ;;  %v11928_v51 = vunpack.c.l.b16 %v823_v16  ;;  %v11944_v16 = vpack.c.b16 %v15966_v55, %v15967_v45  ;;  %v11961_v55 = vld [vmem:[%s11378_s18 + $0x80] sm:$0xf]  ;;  %v11964_v45 = vld [vmem:[%s11378_s18 + $0x88] sm:$0xf] }
  0x6e   : > { %1275 = vmatmul.bf16.gmra.mxu0 %v1171_v26  ;;  %1548 = vmatmul.bf16.vlgmr.msrb.gmra.mxu3 %v1412_v34  ;;  %v11918_v26 = vsel %vm11461_vm5, %v9493_v36, %v1650_v30  ;;  %v839_v34 = vshrl.u32 %v11903_v23, 16  ;;  %v11930_v31 = vunpack.c.l.b16 %v837_v35  ;;  %v15971_v36 = vunpack.c.l.b16 %v11914_v49  ;;  %16302 = vst [vmem:[#allocation39_spill] sm:$0xff] %v11961_v55 }
  0x6f   : > { %1508 = vmatmul.bf16.gmra.mxu1 %v1404_v62  ;;  %16294 = vst [vmem:[#allocation32_spill] sm:$0xff] %v11918_v26  ;;  %v853_v62 = vshrl.u32 %v11906_v9, 16  ;;  %v15970_v30 = vunpack.c.l.b16 %v11918_v26  ;;  %v16299_v35 = vunpack.c.l.b16 %v11501_v28 }
  0x70   : > { %1889 = vmatmul.bf16.gmra.mxu2 %v1785_v24  ;;  %v856_v24 = vshll.u32 %v11906_v9, 16  ;;  %16295 = vst [vmem:[#allocation33_spill] sm:$0xff] %v11928_v51  ;;  %v841_v8 = vrot.slane %v839_v34, 4  ;;  %v11938_v50 = vpack.c.b16 %v11930_v31, %v11928_v51 }
  0x71   : > { %16296 = vst [vmem:[#allocation34_spill] sm:$0xff] %v11930_v31  ;;  %v855_v7 = vrot.slane %v853_v62, 4  ;;  %v11950_v34 = vpack.c.b16 %v15968_v63, %v16299_v35  ;;  %v11956_v62 = vpack.c.b16 %v15970_v30, %v15971_v36  ;;  %v862_v31 = vshll.u32 %v442_v61, 16 }
  0x72   : > { %v858_v15 = vrot.slane %v856_v24, 5  ;;  %16297 = vst [vmem:[#allocation35_spill] sm:$0xff] %v11938_v50  ;;  %v845_v24 = vor.u32 %v844_v5, %v841_v8  ;;  %v850_v63 = vrot.slane %v848_v27, 5  ;;  %v9494_v8 = vrot.slane %v11903_v23, 9 }
  0x73   : > { %16298 = vst [vmem:[#allocation36_spill] sm:$0xff] %v11944_v16  ;;  %v864_v30 = vrot.slane %v862_v31, 5  ;;  %v1658_v5 = vrot.slane %v442_v61, 5  ;;  %v867_v36 = vshrl.u32 %v11961_v55, 16 }
  0x74   : > { %16300 = vst [vmem:[#allocation37_spill] sm:$0xff] %v11950_v34  ;;  %v859_v29 = vor.u32 %v858_v15, %v855_v7  ;;  %v846_v35 = vrot.slane %v845_v24, 4  ;;  %v1654_v7 = vrot.slane %v440_v10, 5  ;;  %v9495_v15 = vrot.slane %v11906_v9, 9 }
  0x75   : > { %16301 = vst [vmem:[#allocation38_spill] sm:$0xff] %v11956_v62  ;;  %v869_v27 = vrot.slane %v867_v36, 4 }
  0x76   : > { %16303 = vst [vmem:[#allocation40_spill] sm:$0xff] %v11964_v45  ;;  %v860_v47 = vrot.slane %v859_v29, 4  ;;  %v851_v29 = vsel %vm11429_vm3, %v846_v35, %v850_v63  ;;  %v11980_v10 = vsel %vm11461_vm5, %v9494_v8, %v1654_v7  ;;  %v11984_v61 = vsel %vm11461_vm5, %v9495_v15, %v1658_v5  ;;  %v446_v35 = vld [vmem:[%s11378_s18 + $0x8c] sm:$0x1] }
  0x77   : > { %16304 = vst [vmem:[#allocation41_spill] sm:$0xff] %v11980_v10  ;;  %v11986_v25 = vunpack.c.l.b16 %v851_v29  ;;  %v15982_v63 = vunpack.c.l.b16 %v11607_v12  ;;  %v15985_v8 = vunpack.c.l.b16 %v11903_v23  ;;  %v15983_v7 = vunpack.c.l.b16 %v11906_v9  ;;  %v11086_v23 = vld [vmem:[%s11378_s18 + $0xf4] sm:$0x1] }
  0x78   : > { %v865_v31 = vsel %vm11429_vm3, %v860_v47, %v864_v30  ;;  %16305 = vst [vmem:[#allocation42_spill] sm:$0xff] %v11984_v61  ;;  %v15981_v47 = vunpack.c.l.b16 %v11631_v40  ;;  %v444_v30 = vld [vmem:[%s11378_s18 + $0x84] sm:$0x1]  ;;  %v15984_v15 = vunpack.c.l.b16 %v11980_v10  ;;  %v890_v5 = vshll.u32 %v446_v35, 16 }
  0x79   : > { %16306 = vst [vmem:[#allocation43_spill] sm:$0xff] %v11986_v25  ;;  %v16323_v10 = vunpack.c.l.b16 %v11964_v45 }
  0x7e   : > { %1280 = vmatmul.bf16.gmra.mxu0 %v11938_v50  ;;  %1553 = vmatmul.bf16.gmra.mxu3 %v11950_v34  ;;  %v870_v50 = vshll.u32 %v11961_v55, 16  ;;  %v881_v34 = vshrl.u32 %v11964_v45, 16 }
  0x7f   : > { %1513 = vmatmul.bf16.gmra.mxu1 %v11944_v16  ;;  %v11988_v16 = vunpack.c.l.b16 %v865_v31  ;;  %v12006_v31 = vpack.c.b16 %v15981_v47, %v15982_v63  ;;  %v10854_v47 = vld [vmem:[%s15935_s3 + $0x190] sm:$0xff]  ;;  %v12026_v63 = vld [vmem:[%s11378_s18 + $0xa0] sm:$0xf] }
  0x80   : > { %1894 = vmatmul.bf16.gmra.mxu2 %v11956_v62  ;;  %v884_v62 = vshll.u32 %v11964_v45, 16  ;;  %v872_v24 = vrot.slane %v870_v50, 5  ;;  %v883_v28 = vrot.slane %v881_v34, 4  ;;  %v876_v34 = vshll.u32 %v444_v30, 16 }
  0x81   : > { %16307 = vst [vmem:[#allocation44_spill] sm:$0xff] %v11988_v16  ;;  %v12000_v29 = vpack.c.b16 %v11988_v16, %v11986_v25  ;;  %v12012_v50 = vpack.c.b16 %v15983_v7, %v15985_v8  ;;  %v892_v25 = vrot.slane %v890_v5, 5  ;;  %v12029_v7 = vld [vmem:[%s11378_s18 + $0xa8] sm:$0xf]  ;;  %v9496_v5 = vrot.slane %v11961_v55, 9  ;;  %2814 = vmatpush.bf16.msrb.mxu2 %v10854_v47 }
  0x82   : > { %v886_v26 = vrot.slane %v884_v62, 5  ;;  %v873_v36 = vor.u32 %v872_v24, %v869_v27  ;;  %16309 = vst [vmem:[#allocation46_spill] sm:$0xff] %v12006_v31  ;;  %v878_v24 = vrot.slane %v876_v34, 5  ;;  %v10838_v34 = vld [vmem:[%s15935_s3 + $0x110] sm:$0xff]  ;;  %v1666_v8 = vrot.slane %v446_v35, 5 }
  0x83   : > { %16308 = vst [vmem:[#allocation45_spill] sm:$0xff] %v12000_v29  ;;  %2370 = vmatpush.bf16.msrb.mxu0 %v10838_v34  ;;  %v909_v9 = vshrl.u32 %v12029_v7, 16 }
  0x84   : > { %v887_v62 = vor.u32 %v886_v26, %v883_v28  ;;  %16310 = vst [vmem:[#allocation47_spill] sm:$0xff] %v12012_v50  ;;  %v16311_v28 = vunpack.c.l.b16 %v11984_v61  ;;  %v874_v27 = vrot.slane %v873_v36, 4  ;;  %v10835_v36 = vld [vmem:[%s15935_s3 + $0xf8] sm:$0xff]  ;;  %v898_v61 = vshll.u32 %v12026_v63, 16 }
  0x85   : > { %16313 = vst [vmem:[#allocation49_spill] sm:$0xff] %v12029_v7  ;;  %2087 = vmatpush.bf16.msrb.mxu3 %v10835_v36  ;;  %v10834_v36 = vld [vmem:[%s15935_s3 + $0xf0] sm:$0xff] }
  0x86   : > { %v12018_v26 = vpack.c.b16 %v16311_v28, %v15984_v15  ;;  %v888_v16 = vrot.slane %v887_v62, 4  ;;  %v10846_v62 = vld [vmem:[%s15935_s3 + $0x150] sm:$0xff]  ;;  %v1662_v28 = vrot.slane %v444_v30, 5  ;;  %v9497_v15 = vrot.slane %v11964_v45, 9  ;;  %v12105_v45 = vld [vmem:[%s11378_s18 + $0xb8] sm:$0xf] }
  0x87   : > { %v912_v30 = vshll.u32 %v12029_v7, 16  ;;  %2612 = vmatpush.bf16.msrb.mxu1 %v10846_v62  ;;  %v900_v62 = vrot.slane %v898_v61, 5  ;;  %v16320_v61 = vunpack.c.l.b16 %v11709_v14  ;;  %16328 = vst [vmem:[#allocation58_spill] sm:$0xff] %v12105_v45 }
  0x88   : > { %16312 = vst [vmem:[#allocation48_spill] sm:$0xff] %v12018_v26  ;;  %v12054_v47 = vsel %vm11461_vm5, %v9496_v5, %v1662_v28  ;;  %v911_v5 = vrot.slane %v909_v9, 4  ;;  %v16319_v9 = vunpack.c.l.b16 %v11692_v4 }
  0x89   : > { %16314 = vst [vmem:[#allocation50_spill] sm:$0xff] %v12054_v47  ;;  %v914_v28 = vrot.slane %v912_v30, 5  ;;  %2088 = vmatpush.bf16.msrb.mxu3 %v10834_v36 }
  0x8a   : > { %v12083_v30 = vpack.c.b16 %v16320_v61, %v16319_v9  ;;  %v1702_v9 = vrot.slane %v11086_v23, 5  ;;  %v9498_v23 = vrot.slane %v12026_v63, 9 }
  0x8c   : > { %16321 = vst [vmem:[#allocation55_spill] sm:$0xff] %v12083_v30 }
  0x8e   : > { %1285 = vmatmul.bf16.gmra.mxu0 %v12000_v29  ;;  %1558 = vmatmul.bf16.gmra.mxu3 %v12006_v31  ;;  %v893_v29 = vsel %vm11429_vm3, %v888_v16, %v892_v25  ;;  %v895_v31 = vshrl.u32 %v12026_v63, 16  ;;  %v12058_v25 = vsel %vm11461_vm5, %v9497_v15, %v1666_v8 }
  0x8f   : > { %1518 = vmatmul.bf16.gmra.mxu1 %v12012_v50  ;;  %16315 = vst [vmem:[#allocation51_spill] sm:$0xff] %v12058_v25  ;;  %v12062_v35 = vunpack.c.l.b16 %v893_v29  ;;  %v915_v29 = vor.u32 %v914_v28, %v911_v5  ;;  %v12100_v5 = vld [vmem:[%s11378_s18 + $0xb0] sm:$0xf] }
  0x90   : > { %1899 = vmatmul.bf16.gmra.mxu2 %v12018_v26  ;;  %v879_v26 = vsel %vm11429_vm3, %v874_v27, %v878_v24  ;;  %v897_v34 = vrot.slane %v895_v31, 4  ;;  %v452_v24 = vld [vmem:[%s11378_s18 + $0xa4] sm:$0x1]  ;;  %v454_v27 = vld [vmem:[%s11378_s18 + $0xac] sm:$0x1] }
  0x91   : > { %v12060_v16 = vunpack.c.l.b16 %v879_v26  ;;  %16317 = vst [vmem:[#allocation53_spill] sm:$0xff] %v12062_v35  ;;  %v904_v8 = vshll.u32 %v452_v24, 16  ;;  %v918_v50 = vshll.u32 %v454_v27, 16  ;;  %v16322_v26 = vunpack.c.l.b16 %v11961_v55 }
  0x92   : > { %v901_v15 = vor.u32 %v900_v62, %v897_v34  ;;  %v11087_v34 = vld [vmem:[%s11378_s18 + $0xfc] sm:$0x1] }
  0x93   : > { %16316 = vst [vmem:[#allocation52_spill] sm:$0xff] %v12060_v16  ;;  %v12077_v31 = vpack.c.b16 %v12062_v35, %v12060_v16  ;;  %v12089_v36 = vpack.c.b16 %v16323_v10, %v16322_v26  ;;  %v16325_v35 = vunpack.c.l.b16 %v12054_v47  ;;  %v16326_v16 = vunpack.c.l.b16 %v12058_v25  ;;  %v11089_v25 = vld [vmem:[%s11378_s18 + $0xf8] sm:$0xf] }
  0x94   : > { %v1706_v62 = vrot.slane %v11087_v34, 5  ;;  %v902_v10 = vrot.slane %v901_v15, 4  ;;  %v906_v28 = vrot.slane %v904_v8, 5  ;;  %v916_v26 = vrot.slane %v915_v29, 4  ;;  %v10833_v15 = vld [vmem:[%s15935_s3 + $0xe8] sm:$0xff] }
  0x95   : > { %16318 = vst [vmem:[#allocation54_spill] sm:$0xff] %v12077_v31  ;;  %v12095_v4 = vpack.c.b16 %v16326_v16, %v16325_v35  ;;  %v920_v61 = vrot.slane %v918_v50, 5  ;;  %v1670_v16 = vrot.slane %v452_v24, 5  ;;  %v11088_v35 = vld [vmem:[%s11378_s18 + $0xf0] sm:$0xf]  ;;  %v9507_v47 = vrot.slane %v11089_v25, 9  ;;  %2089 = vmatpush.bf16.msrb.mxu3 %v10833_v15 }
  0x96   : > { %16324 = vst [vmem:[#allocation56_spill] sm:$0xff] %v12089_v36  ;;  %v9506_v34 = vrot.slane %v11088_v35, 9  ;;  %v9499_v8 = vrot.slane %v12029_v7, 9  ;;  %v1674_v50 = vrot.slane %v454_v27, 5  ;;  %v923_v29 = vshrl.u32 %v12100_v5, 16 }
  0x97   : > { %16327 = vst [vmem:[#allocation57_spill] sm:$0xff] %v12095_v4  ;;  %v907_v24 = vsel %vm11429_vm3, %v902_v10, %v906_v28  ;;  %v921_v25 = vsel %vm11429_vm3, %v916_v26, %v920_v61  ;;  %v12128_v27 = vsel %vm11461_vm5, %v9507_v47, %v1706_v62  ;;  %v10832_v47 = vld [vmem:[%s15935_s3 + $0xe0] sm:$0xff]  ;;  %v10837_v62 = vld [vmem:[%s15935_s3 + $0x108] sm:$0xff] }
  0x98   : > { %v1703_v35 = vsel %vm11461_vm5, %v9506_v34, %v1702_v9  ;;  %16329 = vst [vmem:[#allocation59_spill] sm:$0xff] %v12128_v27  ;;  %v12134_v15 = vsel %vm11461_vm5, %v9499_v8, %v1674_v50  ;;  %v925_v10 = vrot.slane %v923_v29, 4  ;;  %v10853_v9 = vld [vmem:[%s15935_s3 + $0x188] sm:$0xff]  ;;  %v1151_v61 = vunpack.c.l.b16 %v907_v24  ;;  %2371 = vmatpush.bf16.msrb.mxu0 %v10837_v62 }
  0x99   : > { %16330 = vst [vmem:[#allocation60_spill] sm:$0xff] %v12134_v15  ;;  %v10845_v34 = vld [vmem:[%s15935_s3 + $0x148] sm:$0xff]  ;;  %v1384_v8 = vunpack.c.l.b16 %v12026_v63  ;;  %2815 = vmatpush.bf16.msrb.mxu2 %v10853_v9  ;;  %2090 = vmatpush.bf16.msrb.mxu3 %v10832_v47  ;;  %v16332_v63 = vunpack.c.l.b16 %v12128_v27  ;;  %v16333_v24 = vunpack.c.l.b16 %v12029_v7 }
  0x9a   : > { %2613 = vmatpush.bf16.msrb.mxu1 %v10845_v34  ;;  %v12170_v34 = vld [vmem:[%s11378_s18 + $0xc0] sm:$0xf] }
  0x9b   : > { %v1408_v9 = vpack.c.b16 %v16333_v24, %v1384_v8  ;;  %v9500_v8 = vrot.slane %v12100_v5, 9 }
  0x9e   : > { %1290 = vmatmul.bf16.gmra.mxu0 %v12077_v31  ;;  %1563 = vmatmul.bf16.gmra.mxu3 %v12083_v30  ;;  %v926_v31 = vshll.u32 %v12100_v5, 16  ;;  %v940_v30 = vshll.u32 %v12105_v45, 16 }
  0x9f   : > { %1523 = vmatmul.bf16.gmra.mxu1 %v12089_v36  ;;  %v1671_v36 = vsel %vm11461_vm5, %v9498_v23, %v1670_v16  ;;  %v12145_v23 = vunpack.c.l.b16 %v921_v25  ;;  %v1773_v16 = vunpack.c.l.b16 %v1703_v35 }
  0xa0   : > { %1904 = vmatmul.bf16.gmra.mxu2 %v12095_v4  ;;  %v937_v4 = vshrl.u32 %v12105_v45, 16  ;;  %v928_v28 = vrot.slane %v926_v31, 5  ;;  %v942_v26 = vrot.slane %v940_v30, 5  ;;  %v12152_v30 = vld [vmem:[%s11378_s18 + $0xbc] sm:$0x1]  ;;  %v1765_v29 = vunpack.c.l.b16 %v1671_v36 }
  0xa1   : > { %16331 = vst [vmem:[#allocation61_spill] sm:$0xff] %v12145_v23  ;;  %v946_v49 = vshll.u32 %v12152_v30, 16  ;;  %v1175_v11 = vpack.c.b16 %v12145_v23, %v1151_v61  ;;  %v1793_v50 = vpack.c.b16 %v16332_v63, %v1773_v16  ;;  %v12173_v16 = vld [vmem:[%s11378_s18 + $0xc8] sm:$0xf]  ;;  %v11090_v63 = vld [vmem:[%s11378_s18 + $0x100] sm:$0xf] }
  0xa2   : > { %v939_v55 = vrot.slane %v937_v4, 4  ;;  %v12149_v4 = vld [vmem:[%s11378_s18 + $0xb4] sm:$0x1]  ;;  %v929_v25 = vor.u32 %v928_v28, %v925_v10  ;;  %v16334_v10 = vunpack.c.l.b16 %v12134_v15  ;;  %v11092_v15 = vld [vmem:[%s11378_s18 + $0x108] sm:$0xf] }
  0xa3   : > { %v932_v35 = vshll.u32 %v12149_v4, 16  ;;  %v948_v27 = vrot.slane %v946_v49, 5  ;;  %v1678_v24 = vrot.slane %v12149_v4, 5  ;;  %v951_v49 = vshrl.u32 %v12170_v34, 16 }
  0xa4   : > { %v943_v31 = vor.u32 %v942_v26, %v939_v55  ;;  %v1789_v28 = vpack.c.b16 %v16334_v10, %v1765_v29  ;;  %v930_v62 = vrot.slane %v929_v25, 4  ;;  %v9508_v29 = vrot.slane %v11090_v63, 9  ;;  %v11091_v10 = vld [vmem:[%s11378_s18 + $0x104] sm:$0x1] }
  0xa5   : > { %v934_v26 = vrot.slane %v932_v35, 5  ;;  %v1710_v25 = vrot.slane %v11091_v10, 5  ;;  %v11093_v35 = vld [vmem:[%s11378_s18 + $0x10c] sm:$0x1]  ;;  %v9501_v4 = vrot.slane %v12105_v45, 9  ;;  %v965_v63 = vshrl.u32 %v12173_v16, 16 }
  0xa6   : > { %v944_v61 = vrot.slane %v943_v31, 4  ;;  %v954_v31 = vshll.u32 %v12170_v34, 16 }
  0xa7   : > { %v935_v10 = vsel %vm11429_vm3, %v930_v62, %v934_v26  ;;  %v12198_v23 = vsel %vm11461_vm5, %v9508_v29, %v1710_v25  ;;  %v12208_v62 = vsel %vm11461_vm5, %v9500_v8, %v1678_v24  ;;  %v967_v26 = vrot.slane %v965_v63, 4  ;;  %v12217_v25 = vld [vmem:[%s11378_s18 + $0xc4] sm:$0x1] }
  0xa8   : > { %16335 = vst [vmem:[#allocation62_spill] sm:$0xff] %v12198_v23  ;;  %v956_v2 = vrot.slane %v954_v31, 5  ;;  %v12214_v29 = vunpack.c.l.b16 %v935_v10  ;;  %v16017_v24 = vunpack.c.l.b16 %v12198_v23  ;;  %v960_v63 = vshll.u32 %v12217_v25, 16 }
  0xab   : > { %v1256_v36 = vpop.f32.mrf.mxu0 }
  0xac   : > { %v1489_v47 = vpop.f32.mrf.mxu1 }
  0xad   : > { %v1490_v55 = vadd.f32 %v1489_v47, %v1256_v36  ;;  %v9509_v36 = vrot.slane %v11092_v15, 9  ;;  %v1714_v47 = vrot.slane %v11093_v35, 5  ;;  %v949_v35 = vsel %vm11429_vm3, %v944_v61, %v948_v27 }
  0xae   : > { %1295 = vmatmul.bf16.gmra.mxu0 %v1175_v11  ;;  %1929 = vmatmul.bf16.vlgmr.msra.gmra.mxu3 %v1793_v50  ;;  %v10831_v11 = vld [vmem:[%s15935_s3 + $0xd8] sm:$0xff]  ;;  %v1682_v50 = vrot.slane %v12152_v30, 5 }
  0xaf   : > { %1528 = vmatmul.bf16.gmra.mxu1 %v1408_v9  ;;  %v968_v9 = vshll.u32 %v12173_v16, 16  ;;  %2091 = vmatpush.bf16.msrb.mxu3 %v10831_v11  ;;  %v12204_v51 = vsel %vm11461_vm5, %v9509_v36, %v1714_v47  ;;  %v953_v11 = vrot.slane %v951_v49, 4  ;;  %v12220_v36 = vld [vmem:[%s11378_s18 + $0xcc] sm:$0x1]  ;;  %v10830_v47 = vld [vmem:[%s15935_s3 + $0xd0] sm:$0xff]  ;;  %v12225_v49 = vunpack.c.l.b16 %v949_v35 }
  0xb0   : > { %1909 = vmatmul.bf16.gmra.mxu2 %v1789_v28  ;;  %16337 = vst [vmem:[#allocation64_spill] sm:$0xff] %v12204_v51  ;;  %v12212_v27 = vsel %vm11461_vm5, %v9501_v4, %v1682_v50  ;;  %v16016_v31 = vunpack.c.l.b16 %v12204_v51 }
  0xb1   : > { %v12190_v28 = vpop.f32.mrf.mxu3  ;;  %16338 = vst [vmem:[#allocation65_spill] sm:$0xff] %v12212_v27  ;;  %v970_v61 = vrot.slane %v968_v9, 5  ;;  %v16022_v4 = vunpack.c.l.b16 %v12212_v27  ;;  %v957_v50 = vor.u32 %v956_v2, %v953_v11  ;;  %v12239_v8 = vpack.c.b16 %v12225_v49, %v12214_v29  ;;  %v10852_v27 = vld [vmem:[%s15935_s3 + $0x180] sm:$0xff] }
  0xb2   : > { %16339 = vst [vmem:[#allocation66_spill] sm:$0xff] %v12225_v49  ;;  %v9510_v49 = vrot.slane %v11607_v12, 9  ;;  %2816 = vmatpush.bf16.msrb.mxu2 %v10852_v27 }
  0xb3   : > { %v1870_v15 = vpop.f32.mrf.mxu2  ;;  %v1258_v7 = vpop.f32.mrf.mxu0  ;;  %2092 = vmatpush.bf16.msrb.mxu3 %v10830_v47  ;;  %v971_v9 = vor.u32 %v970_v61, %v967_v26  ;;  %16340 = vst [vmem:[#allocation67_spill] sm:$0xff] %v12239_v8  ;;  %v16343_v26 = vunpack.c.l.b16 %v12100_v5  ;;  %v16345_v47 = vunpack.c.l.b16 %v12208_v62  ;;  %v958_v51 = vrot.slane %v957_v50, 4  ;;  %v12271_v50 = vld [vmem:[%s11378_s18 + $0xd0] sm:$0xf] }
  0xb4   : > { %v12200_v30 = vadd.f32 %v1870_v15, %v1490_v55  ;;  %v1491_v42 = vpop.f32.mrf.mxu1  ;;  %v974_v15 = vshll.u32 %v12220_v36, 16  ;;  %v982_v27 = vshll.u32 %v12271_v50, 16 }
  0xb5   : > { %v1492_v55 = vadd.f32 %v1491_v42, %v1258_v7  ;;  %v16020_v42 = vunpack.c.l.b16 %v12105_v45  ;;  %v12245_v7 = vpack.c.b16 %v16016_v31, %v16017_v24  ;;  %v12259_v23 = vpack.c.b16 %v16022_v4, %v16345_v47 }
  0xb6   : > { %16336 = vst [vmem:[#allocation63_spill] sm:$0xff] %v12200_v30  ;;  %v962_v24 = vrot.slane %v960_v63, 5  ;;  %v1718_v45 = vrot.slane %v11637_v48, 5  ;;  %v12274_v63 = vld [vmem:[%s11378_s18 + $0xd8] sm:$0xf]  ;;  %v9502_v48 = vrot.slane %v12170_v34, 9 }
  0xb7   : > { %16341 = vst [vmem:[#allocation68_spill] sm:$0xff] %v12245_v7  ;;  %v12253_v61 = vpack.c.b16 %v16020_v42, %v16343_v26  ;;  %v9511_v26 = vrot.slane %v11631_v40, 9  ;;  %v1722_v42 = vrot.slane %v11640_v52, 5  ;;  %v10829_v52 = vld [vmem:[%s15935_s3 + $0xc8] sm:$0xff]  ;;  %v9503_v47 = vrot.slane %v12173_v16, 9 }
  0xb8   : > { %16346 = vst [vmem:[#allocation71_spill] sm:$0xff] %v12259_v23  ;;  %v1690_v4 = vrot.slane %v12220_v36, 5  ;;  %2093 = vmatpush.bf16.msrb.mxu3 %v10829_v52  ;;  %v993_v36 = vshrl.u32 %v12274_v63, 16  ;;  %v984_v12 = vrot.slane %v982_v27, 5 }
  0xb9   : > { %v12235_v10 = vpop.f32.mrf.mxu3  ;;  %16344 = vst [vmem:[#allocation70_spill] sm:$0xff] %v12253_v61  ;;  %v12303_v40 = vsel %vm11461_vm5, %v9511_v26, %v1722_v42 }
  0xba   : > { %16348 = vst [vmem:[#allocation73_spill] sm:$0xff] %v12303_v40  ;;  %v12319_v26 = vsel %vm11461_vm5, %v9503_v47, %v1690_v4  ;;  %v16354_v27 = vunpack.c.l.b16 %v12303_v40  ;;  %v1726_v40 = vrot.slane %v11731_v57, 5 }
  0xbb   : > { %v1872_v35 = vpop.f32.mrf.mxu2  ;;  %v1261_v11 = vpop.f32.mrf.mxu0 }
  0xbc   : > { %v12247_v2 = vadd.f32 %v1872_v35, %v1492_v55  ;;  %v1494_v31 = vpop.f32.mrf.mxu1  ;;  %v972_v55 = vrot.slane %v971_v9, 4  ;;  %v976_v35 = vrot.slane %v974_v15, 5  ;;  %v10844_v9 = vld [vmem:[%s15935_s3 + $0x140] sm:$0xff]  ;;  %v963_v15 = vsel %vm11429_vm3, %v958_v51, %v962_v24 }
  0xbd   : > { %v996_v24 = vshll.u32 %v12274_v63, 16  ;;  %2614 = vmatpush.bf16.msrb.mxu1 %v10844_v9 }
  0xbe   : > { %16342 = vst [vmem:[#allocation69_spill] sm:$0xff] %v12247_v2  ;;  %v1495_v2 = vadd.f32 %v1494_v31, %v1261_v11  ;;  %1300 = vmatmul.bf16.gmra.mxu0 %v12239_v8  ;;  %1934 = vmatmul.bf16.gmra.mxu3 %v12245_v7  ;;  %v10836_v31 = vld [vmem:[%s15935_s3 + $0x100] sm:$0xff]  ;;  %v1686_v11 = vrot.slane %v12217_v25, 5  ;;  %v12299_v8 = vsel %vm11461_vm5, %v9510_v49, %v1718_v45  ;;  %v979_v25 = vshrl.u32 %v12271_v50, 16 }
  0xbf   : > { %1533 = vmatmul.bf16.gmra.mxu1 %v12253_v61  ;;  %16347 = vst [vmem:[#allocation72_spill] sm:$0xff] %v12299_v8  ;;  %2372 = vmatpush.bf16.msrb.mxu0 %v10836_v31  ;;  %v16356_v61 = vunpack.c.l.b16 %v12170_v34 }
  0xc0   : > { %1914 = vmatmul.bf16.gmra.mxu2 %v12259_v23  ;;  %v977_v23 = vsel %vm11429_vm3, %v972_v55, %v976_v35  ;;  %v12311_v35 = vunpack.c.l.b16 %v963_v15  ;;  %v12315_v42 = vsel %vm11461_vm5, %v9502_v48, %v1686_v11  ;;  %v10828_v15 = vld [vmem:[%s15935_s3 + $0xc0] sm:$0xff]  ;;  %v995_v48 = vrot.slane %v993_v36, 4 }
  0xc1   : > { %v12293_v7 = vpop.f32.mrf.mxu3  ;;  %v12321_v31 = vunpack.c.l.b16 %v977_v23  ;;  %v998_v11 = vrot.slane %v996_v24, 5  ;;  %2094 = vmatpush.bf16.msrb.mxu3 %v10828_v15 }
  0xc2   : > { %16350 = vst [vmem:[#allocation75_spill] sm:$0xff] %v12311_v35 }
  0xc3   : > { %v1875_v51 = vpop.f32.mrf.mxu2  ;;  %v1263_v45 = vpop.f32.mrf.mxu0  ;;  %16351 = vst [vmem:[#allocation76_spill] sm:$0xff] %v12321_v31 }
  0xc4   : > { %v12309_v55 = vadd.f32 %v1875_v51, %v1495_v2  ;;  %v1496_v49 = vpop.f32.mrf.mxu1  ;;  %v981_v51 = vrot.slane %v979_v25, 4  ;;  %v12338_v2 = vpack.c.b16 %v12321_v31, %v12311_v35  ;;  %v16353_v25 = vunpack.c.l.b16 %v12299_v8 }
  0xc5   : > { %v1497_v52 = vadd.f32 %v1496_v49, %v1263_v45  ;;  %v464_v45 = vld [vmem:[%s11378_s18 + $0xd4] sm:$0x1]  ;;  %v466_v49 = vld [vmem:[%s11378_s18 + $0xdc] sm:$0x1]  ;;  %v16357_v31 = vunpack.c.l.b16 %v12173_v16  ;;  %v16358_v8 = vunpack.c.l.b16 %v12315_v42 }
  0xc6   : > { %16349 = vst [vmem:[#allocation74_spill] sm:$0xff] %v12309_v55  ;;  %v12344_v36 = vpack.c.b16 %v16354_v27, %v16353_v25  ;;  %v985_v4 = vor.u32 %v984_v12, %v981_v51  ;;  %v988_v47 = vshll.u32 %v464_v45, 16  ;;  %v999_v55 = vor.u32 %v998_v11, %v995_v48 }
  0xc7   : > { %16352 = vst [vmem:[#allocation77_spill] sm:$0xff] %v12338_v2  ;;  %v1002_v23 = vshll.u32 %v466_v49, 16  ;;  %v12352_v35 = vpack.c.b16 %v16357_v31, %v16356_v61  ;;  %v16359_v25 = vunpack.c.l.b16 %v12319_v26  ;;  %v11094_v61 = vld [vmem:[%s11378_s18 + $0x120] sm:$0xf] }
  0xc8   : > { %16355 = vst [vmem:[#allocation78_spill] sm:$0xff] %v12344_v36  ;;  %v990_v48 = vrot.slane %v988_v47, 5  ;;  %v1000_v11 = vrot.slane %v999_v55, 4  ;;  %v9512_v31 = vrot.slane %v11094_v61, 9  ;;  %v1694_v55 = vrot.slane %v464_v45, 5 }
  0xc9   : > { %v12334_v9 = vpop.f32.mrf.mxu3  ;;  %v12358_v27 = vpack.c.b16 %v16359_v25, %v16358_v8  ;;  %v9513_v8 = vrot.slane %v11709_v14, 9  ;;  %v10867_v25 = vld [vmem:[%s15935_s3 + $0x1f8] sm:$0xff]  ;;  %v9505_v47 = vrot.slane %v12274_v63, 9 }
  0xca   : > { %3063 = vmatpush.bf16.msra.mxu3 %v10867_v25 }
  0xcb   : > { %v1877_v24 = vpop.f32.mrf.mxu2  ;;  %v1266_v15 = vpop.f32.mrf.mxu0  ;;  %16360 = vst [vmem:[#allocation79_spill] sm:$0xff] %v12358_v27 }
  0xcc   : > { %v12346_v30 = vadd.f32 %v1877_v24, %v1497_v52  ;;  %v1499_v12 = vpop.f32.mrf.mxu1  ;;  %v986_v52 = vrot.slane %v985_v4, 4  ;;  %v1004_v24 = vrot.slane %v1002_v23, 5  ;;  %v9504_v4 = vrot.slane %v12271_v50, 9 }
  0xcd   : > { %v1500_v51 = vadd.f32 %v1499_v12, %v1266_v15  ;;  %v1730_v15 = vrot.slane %v11739_v32, 5  ;;  %v1698_v23 = vrot.slane %v466_v49, 5 }
  0xce   : > { %1305 = vmatmul.bf16.gmra.mxu0 %v12338_v2  ;;  %1939 = vmatmul.bf16.gmra.mxu3 %v12344_v36  ;;  %v991_v57 = vsel %vm11429_vm3, %v986_v52, %v990_v48  ;;  %v12383_v2 = vsel %vm11461_vm5, %v9512_v31, %v1726_v40  ;;  %v12391_v25 = vsel %vm11461_vm5, %v9504_v4, %v1694_v55  ;;  %v10891_v48 = vld [vmem:[%s15935_s3 + $0x2b8] sm:$0xff]  ;;  %v16041_v4 = vunpack.c.l.b16 %v12271_v50 }
  0xcf   : > { %1538 = vmatmul.bf16.gmra.mxu1 %v12352_v35  ;;  %16361 = vst [vmem:[#allocation80_spill] sm:$0xff] %v12383_v2  ;;  %v12387_v45 = vsel %vm11461_vm5, %v9513_v8, %v1730_v15  ;;  %v10875_v40 = vld [vmem:[%s15935_s3 + $0x238] sm:$0xff]  ;;  %v16039_v8 = vunpack.c.l.b16 %v12383_v2  ;;  %v16040_v55 = vunpack.c.l.b16 %v12274_v63  ;;  %4261 = vmatpush.bf16.msra.mxu2 %v10891_v48 }
  0xd0   : > { %1919 = vmatmul.bf16.gmra.mxu2 %v12358_v27  ;;  %v1005_v27 = vsel %vm11429_vm3, %v1000_v11, %v1004_v24  ;;  %v10883_v11 = vld [vmem:[%s15935_s3 + $0x278] sm:$0xff]  ;;  %v12406_v24 = vunpack.c.l.b16 %v991_v57  ;;  %v16038_v15 = vunpack.c.l.b16 %v12387_v45  ;;  %3281 = vmatpush.bf16.msra.mxu0 %v10875_v40  ;;  %v16364_v40 = vunpack.c.l.b16 %v12391_v25 }
  0xd1   : > { %v12373_v12 = vpop.f32.mrf.mxu3  ;;  %v12408_v31 = vunpack.c.l.b16 %v1005_v27  ;;  %3563 = vmatpush.bf16.msra.mxu1 %v10883_v11  ;;  %v12434_v48 = vpack.c.b16 %v16040_v55, %v16041_v4 }
  0xd3   : > { %v1880_v61 = vpop.f32.mrf.mxu2  ;;  %v1268_v32 = vpop.f32.mrf.mxu0  ;;  %v12420_v27 = vpack.c.b16 %v12408_v31, %v12406_v24 }
  0xd4   : > { %v12377_v36 = vadd.f32 %v1880_v61, %v1500_v51  ;;  %v1501_v49 = vpop.f32.mrf.mxu1  ;;  %v12395_v51 = vsel %vm11461_vm5, %v9505_v47, %v1698_v23 }
  0xd5   : > { %v1502_v52 = vadd.f32 %v1501_v49, %v1268_v32  ;;  %v16042_v23 = vunpack.c.l.b16 %v12395_v51  ;;  %16362 = vst [vmem:[#allocation81_spill] sm:$0xff] %v12420_v27  ;;  %v12426_v32 = vpack.c.b16 %v16038_v15, %v16039_v8 }
  0xd7   : > { %16363 = vst [vmem:[#allocation82_spill] sm:$0xff] %v12426_v32  ;;  %v12440_v11 = vpack.c.b16 %v16042_v23, %v16364_v40 }
  0xd9   : > { %v12416_v61 = vpop.f32.mrf.mxu3  ;;  %16365 = vst [vmem:[#allocation83_spill] sm:$0xff] %v12440_v11 }
  0xdb   : > { %v1882_v57 = vpop.f32.mrf.mxu2  ;;  %v1271_v47 = vpop.f32.mrf.mxu0 }
  0xdc   : > { %v12428_v49 = vadd.f32 %v1882_v57, %v1502_v52  ;;  %v1504_v14 = vpop.f32.mrf.mxu1 }
  0xdd   : > { %v1505_v2 = vadd.f32 %v1504_v14, %v1271_v47 }
  0xde   : > { %1310 = vmatmul.bf16.gmra.mxu0 %v12420_v27  ;;  %1944 = vmatmul.bf16.gmra.mxu3 %v12426_v32 }
  0xdf   : > { %1543 = vmatmul.bf16.gmra.mxu1 %v12434_v48 }
  0xe0   : > { %1924 = vmatmul.bf16.gmra.mxu2 %v12440_v11  ;;  %v16366_v11 = vpack.c.b16 %v11563_v43, %v11466_v6  ;;  %v10890_v43 = vld [vmem:[%s15935_s3 + $0x2b0] sm:$0xff] }
  0xe1   : > { %v12446_v52 = vpop.f32.mrf.mxu3  ;;  %4262 = vmatpush.bf16.msra.mxu2 %v10890_v43  ;;  %v16370_v43 = vunpack.c.l.b16 %v11718_v59 }
  0xe3   : > { %v1885_v57 = vpop.f32.mrf.mxu2  ;;  %v1273_v8 = vpop.f32.mrf.mxu0 }
  0xe4   : > { %v12448_v15 = vadd.f32 %v1885_v57, %v1505_v2  ;;  %v1506_v55 = vpop.f32.mrf.mxu1  ;;  %v10866_v2 = vld [vmem:[%s15935_s3 + $0x1f0] sm:$0xff]  ;;  %v16367_v57 = vunpack.c.l.b16 %v11480_v21  ;;  %v12494_v21 = vld [vmem:[%s11378_s18 + $0x40] sm:$0xf] }
  0xe5   : > { %v1507_v4 = vadd.f32 %v1506_v55, %v1273_v8  ;;  %3064 = vmatpush.bf16.msra.mxu3 %v10866_v2  ;;  %v2209_v59 = vshrl.u32 %v12494_v21, 16 }
  0xe9   : > { %v12450_v40 = vpop.f32.mrf.mxu3 }
  0xeb   : > { %v1887_v23 = vpop.f32.mrf.mxu2  ;;  %v1276_v47 = vpop.f32.mrf.mxu0 }
  0xec   : > { %v12452_v14 = vadd.f32 %v1887_v23, %v1507_v4  ;;  %v1509_v27 = vpop.f32.mrf.mxu1 }
  0xed   : > { %v1510_v32 = vadd.f32 %v1509_v27, %v1276_v47  ;;  %v16368_v47 = vunpack.c.l.b16 %v11574_v56 }
  0xee   : > { %2095 = vmatmul.bf16.vlgmr.msrb.gmra.mxu3 %v11570_v53  ;;  %2373 = vmatmul.bf16.vlgmr.msrb.gmra.mxu0 %v16366_v11 }
  0xef   : > { %2615 = vmatmul.bf16.vlgmr.msrb.gmra.mxu1 %v11613_v22  ;;  %v10874_v22 = vld [vmem:[%s15935_s3 + $0x230] sm:$0xff]  ;;  %v2008_v2 = vpack.c.b16 %v16368_v47, %v16367_v57  ;;  %v2211_v47 = vrot.slane %v2209_v59, 4 }
  0xf0   : > { %2817 = vmatmul.bf16.vlgmr.msrb.gmra.mxu2 %v11624_v33  ;;  %v10882_v33 = vld [vmem:[%s15935_s3 + $0x270] sm:$0xff]  ;;  %3282 = vmatpush.bf16.msra.mxu0 %v10874_v22 }
  0xf1   : > { %v1549_v8 = vpop.f32.mrf.mxu3  ;;  %3564 = vmatpush.bf16.msra.mxu1 %v10882_v33 }
  0xf2   : > { %v12464_v4 = vadd.f32 %v1549_v8, %v12190_v28  ;;  %v2286_v8 = vpack.c.b16 %v11703_v44, %v11609_v13 }
  0xf3   : > { %v1890_v55 = vpop.f32.mrf.mxu2  ;;  %v1278_v53 = vpop.f32.mrf.mxu0 }
  0xf4   : > { %v12466_v23 = vadd.f32 %v1890_v55, %v1510_v32  ;;  %v1511_v27 = vpop.f32.mrf.mxu1 }
  0xf5   : > { %v1512_v6 = vadd.f32 %v1511_v27, %v1278_v53  ;;  %v16369_v27 = vunpack.c.l.b16 %v11603_v19 }
  0xf7   : > { %v2528_v22 = vpack.c.b16 %v16370_v43, %v16369_v27  ;;  %v16372_v43 = vunpack.c.l.b16 %v11667_v60 }
  0xf9   : > { %v1551_v28 = vpop.f32.mrf.mxu3 }
  0xfa   : > { %v12478_v32 = vadd.f32 %v1551_v28, %v12235_v10  ;;  %v2212_v28 = vshll.u32 %v12494_v21, 16 }
  0xfb   : > { %v1892_v11 = vpop.f32.mrf.mxu2  ;;  %v1281_v53 = vpop.f32.mrf.mxu0 }
  0xfc   : > { %v12486_v55 = vadd.f32 %v1892_v11, %v1512_v6  ;;  %v1514_v33 = vpop.f32.mrf.mxu1 }
  0xfd   : > { %v1515_v10 = vadd.f32 %v1514_v33, %v1281_v53  ;;  %v2287_v33 = vpack.c.b16 %v11804_v58, %v11705_v46  ;;  %v10865_v46 = vld [vmem:[%s15935_s3 + $0x1e8] sm:$0xff] }
  0xfe   : > { %2100 = vmatmul.bf16.gmra.mxu3 %v2008_v2  ;;  %2378 = vmatmul.bf16.gmra.mxu0 %v2286_v8  ;;  %v2214_v2 = vrot.slane %v2212_v28, 5 }
  0xff   : > { %2620 = vmatmul.bf16.gmra.mxu1 %v2528_v22  ;;  %3065 = vmatpush.bf16.msra.mxu3 %v10865_v46 }
 0x100   : > { %2822 = vmatmul.bf16.gmra.mxu2 %v11757_v18  ;;  %v428_v18 = vld [vmem:[%s11378_s18 + $0x44] sm:$0x1]  ;;  %v2215_v28 = vor.u32 %v2214_v2, %v2211_v47 }
 0x101   : > { %v1554_v56 = vpop.f32.mrf.mxu3 }
 0x102   : > { %v12497_v13 = vadd.f32 %v1554_v56, %v12293_v7  ;;  %v16371_v7 = vunpack.c.l.b16 %v11594_v3  ;;  %v2216_v3 = vrot.slane %v2215_v28, 4 }
 0x103   : > { %v1895_v44 = vpop.f32.mrf.mxu2  ;;  %v1283_v19 = vpop.f32.mrf.mxu0 }
 0x104   : > { %v12499_v6 = vadd.f32 %v1895_v44, %v1515_v10  ;;  %v1516_v11 = vpop.f32.mrf.mxu1  ;;  %v2009_v22 = vpack.c.b16 %v16372_v43, %v16371_v7  ;;  %v16373_v44 = vunpack.c.l.b16 %v11722_v39  ;;  %v9658_v39 = vrot.slane %v12494_v21, 9  ;;  %v429_v43 = vld [vmem:[%s11378_s18 + $0x48] sm:$0xf] }
 0x105   : > { %v1517_v57 = vadd.f32 %v1516_v11, %v1283_v19  ;;  %v16374_v19 = vunpack.c.l.b16 %v11791_v20  ;;  %v2492_v20 = vrot.slane %v428_v18, 5 }
 0x107   : > { %v2529_v59 = vpack.c.b16 %v16374_v19, %v16373_v44  ;;  %v2003_v44 = vunpack.c.l.b16 %v12494_v21 }
 0x109   : > { %v1556_v8 = vpop.f32.mrf.mxu3 }
 0x10a   : > { %v12505_v53 = vadd.f32 %v1556_v8, %v12334_v9  ;;  %v2218_v9 = vshll.u32 %v428_v18, 16  ;;  %v10889_v18 = vld [vmem:[%s15935_s3 + $0x2a8] sm:$0xff] }
 0x10b   : > { %v1897_v27 = vpop.f32.mrf.mxu2  ;;  %v1286_v56 = vpop.f32.mrf.mxu0  ;;  %4263 = vmatpush.bf16.msra.mxu2 %v10889_v18 }
 0x10c   : > { %v12513_v10 = vadd.f32 %v1897_v27, %v1517_v57  ;;  %v1519_v11 = vpop.f32.mrf.mxu1  ;;  %v2220_v60 = vrot.slane %v2218_v9, 5 }
 0x10d   : > { %v1520_v8 = vadd.f32 %v1519_v11, %v1286_v56  ;;  %v10881_v56 = vld [vmem:[%s15935_s3 + $0x268] sm:$0xff] }
 0x10e   : > { %2105 = vmatmul.bf16.gmra.mxu3 %v2009_v22  ;;  %2383 = vmatmul.bf16.gmra.mxu0 %v2287_v33  ;;  %v12534_v22 = vsel %vm11461_vm5, %v9658_v39, %v2492_v20 }
 0x10f   : > { %2625 = vmatmul.bf16.gmra.mxu1 %v2529_v59  ;;  %16375 = vst [vmem:[#allocation84_spill] sm:$0xff] %v12534_v22  ;;  %v2749_v59 = vunpack.c.l.b16 %v429_v43  ;;  %v16046_v28 = vunpack.c.l.b16 %v12534_v22 }
 0x110   : > { %2827 = vmatmul.bf16.gmra.mxu2 %v11831_v37  ;;  %v2221_v37 = vsel %vm11429_vm3, %v2216_v3, %v2220_v60  ;;  %3565 = vmatpush.bf16.msra.mxu1 %v10881_v56  ;;  %v16377_v3 = vunpack.c.l.b16 %v11670_v17 }
 0x111   : > { %v1559_v58 = vpop.f32.mrf.mxu3  ;;  %v12546_v19 = vunpack.c.l.b16 %v2221_v37  ;;  %v2753_v20 = vpack.c.b16 %v2749_v59, %v2003_v44  ;;  %v16380_v59 = vld [vmem:[#allocation25_spill] sm:$0xff] }
 0x112   : > { %v12525_v57 = vadd.f32 %v1559_v58, %v12373_v12  ;;  %v10873_v12 = vld [vmem:[%s15935_s3 + $0x228] sm:$0xff]  ;;  %v2010_v60 = vpack.c.b16 %v2003_v44, %v16377_v3  ;;  %v16378_v58 = vunpack.c.l.b16 %v11801_v38  ;;  %v16379_v44 = vunpack.c.l.b16 %v11780_v54  ;;  %v16382_v3 = vld [vmem:[#allocation28_spill] sm:$0xff]  ;;  %v10864_v54 = vld [vmem:[%s15935_s3 + $0x1e0] sm:$0xff] }
 0x113   : > { %v1900_v47 = vpop.f32.mrf.mxu2  ;;  %v1288_v27 = vpop.f32.mrf.mxu0  ;;  %16376 = vst [vmem:[#allocation85_spill] sm:$0xff] %v12546_v19  ;;  %3283 = vmatpush.bf16.msra.mxu0 %v10873_v12  ;;  %v2288_v46 = vpack.c.b16 %v12546_v19, %v11806_v1  ;;  %3066 = vmatpush.bf16.msra.mxu3 %v10864_v54 }
 0x114   : > { %v12527_v2 = vadd.f32 %v1900_v47, %v1520_v8  ;;  %v1521_v7 = vpop.f32.mrf.mxu1  ;;  %v2530_v47 = vpack.c.b16 %v16046_v28, %v16378_v58 }
 0x115   : > { %v1522_v33 = vadd.f32 %v1521_v7, %v1288_v27 }
 0x119   : > { %v1561_v9 = vpop.f32.mrf.mxu3 }
 0x11a   : > { %v12550_v11 = vadd.f32 %v1561_v9, %v12416_v61  ;;  %v16381_v9 = vunpack.c.l.b16 %v16380_v59 }
 0x11b   : > { %v1902_v8 = vpop.f32.mrf.mxu2  ;;  %v1291_v39 = vpop.f32.mrf.mxu0 }
 0x11c   : > { %v12556_v21 = vadd.f32 %v1902_v8, %v1522_v33  ;;  %v1524_v27 = vpop.f32.mrf.mxu1  ;;  %v2011_v8 = vpack.c.b16 %v16381_v9, %v16379_v44  ;;  %v10888_v9 = vld [vmem:[%s15935_s3 + $0x2a0] sm:$0xff] }
 0x11d   : > { %v1525_v37 = vadd.f32 %v1524_v27, %v1291_v39  ;;  %4264 = vmatpush.bf16.msra.mxu2 %v10888_v9 }
 0x11e   : > { %2110 = vmatmul.bf16.gmra.mxu3 %v2010_v60  ;;  %2388 = vmatmul.bf16.gmra.mxu0 %v2288_v46  ;;  %v16383_v60 = vld [vmem:[#allocation33_spill] sm:$0xff] }
 0x11f   : > { %2630 = vmatmul.bf16.gmra.mxu1 %v2530_v47  ;;  %v16386_v47 = vld [vmem:[#allocation31_spill] sm:$0xff] }
 0x120   : > { %2832 = vmatmul.bf16.gmra.mxu2 %v2753_v20  ;;  %v16384_v20 = vld [vmem:[#allocation27_spill] sm:$0xff]  ;;  %v16387_v27 = vunpack.c.l.b16 %v16386_v47 }
 0x121   : > { %v1564_v17 = vpop.f32.mrf.mxu3  ;;  %v16385_v58 = vunpack.c.l.b16 %v16384_v20 }
 0x122   : > { %v12563_v61 = vadd.f32 %v1564_v17, %v12446_v52  ;;  %v2289_v52 = vpack.c.b16 %v16383_v60, %v16382_v3  ;;  %v10880_v3 = vld [vmem:[%s15935_s3 + $0x260] sm:$0xff] }
 0x123   : > { %v1905_v1 = vpop.f32.mrf.mxu2  ;;  %v1293_v43 = vpop.f32.mrf.mxu0  ;;  %3566 = vmatpush.bf16.msra.mxu1 %v10880_v3 }
 0x124   : > { %v12565_v7 = vadd.f32 %v1905_v1, %v1525_v37  ;;  %v1526_v33 = vpop.f32.mrf.mxu1  ;;  %v2531_v37 = vpack.c.b16 %v16387_v27, %v16385_v58  ;;  %v16388_v1 = vld [vmem:[#allocation36_spill] sm:$0xff]  ;;  %v16393_v58 = vld [vmem:[#allocation29_spill] sm:$0xff] }
 0x125   : > { %v1527_v18 = vadd.f32 %v1526_v33, %v1293_v43  ;;  %v16394_v47 = vunpack.c.l.b16 %v16393_v58 }
 0x129   : > { %v1566_v38 = vpop.f32.mrf.mxu3 }
 0x12a   : > { %v12568_v12 = vadd.f32 %v1566_v38, %v12450_v40 }
 0x12b   : > { %v1907_v56 = vpop.f32.mrf.mxu2  ;;  %v1296_v39 = vpop.f32.mrf.mxu0 }
 0x12c   : > { %v12576_v46 = vadd.f32 %v1907_v56, %v1527_v18  ;;  %v1529_v17 = vpop.f32.mrf.mxu1 }
 0x12d   : > { %v1530_v40 = vadd.f32 %v1529_v17, %v1296_v39  ;;  %v16391_v39 = vld [vmem:[#allocation26_spill] sm:$0xff]  ;;  %v16396_v17 = vld [vmem:[#allocation43_spill] sm:$0xff] }
 0x12e   : > { %2115 = vmatmul.bf16.gmra.mxu3 %v2011_v8  ;;  %2393 = vmatmul.bf16.gmra.mxu0 %v2289_v52  ;;  %v10872_v8 = vld [vmem:[%s15935_s3 + $0x220] sm:$0xff]  ;;  %v16392_v20 = vunpack.c.l.b16 %v16391_v39 }
 0x12f   : > { %2635 = vmatmul.bf16.gmra.mxu1 %v2531_v37  ;;  %3284 = vmatpush.bf16.msra.mxu0 %v10872_v8  ;;  %v16395_v37 = vld [vmem:[#allocation34_spill] sm:$0xff] }
 0x130   : > { %2837 = vmatmul.bf16.gmra.mxu2 %v16388_v1  ;;  %v2012_v27 = vpack.c.b16 %v16394_v47, %v16392_v20 }
 0x131   : > { %v1930_v43 = vpop.f32.mrf.mxu3 }
 0x132   : > { %v12587_v18 = vadd.f32 %v1930_v43, %v12464_v4  ;;  %v16397_v43 = vld [vmem:[#allocation32_spill] sm:$0xff] }
 0x133   : > { %v1910_v33 = vpop.f32.mrf.mxu2  ;;  %v1298_v56 = vpop.f32.mrf.mxu0 }
 0x134   : > { %16389 = vst [vmem:[#allocation25_spill] sm:$0xff] %v12587_v18  ;;  %v12589_v38 = vadd.f32 %v1910_v33, %v1530_v40  ;;  %v1531_v44 = vpop.f32.mrf.mxu1  ;;  %v2290_v40 = vpack.c.b16 %v16396_v17, %v16395_v37  ;;  %v16398_v33 = vunpack.c.l.b16 %v16397_v43 }
 0x135   : > { %v1532_v59 = vadd.f32 %v1531_v44, %v1298_v56  ;;  %v16399_v56 = vld [vmem:[#allocation41_spill] sm:$0xff] }
 0x136   : > { %v16400_v44 = vunpack.c.l.b16 %v16399_v56 }
 0x138   : > { %v2532_v9 = vpack.c.b16 %v16400_v44, %v16398_v33  ;;  %v448_v33 = vld [vmem:[%s11378_s18 + $0x94] sm:$0x1] }
 0x139   : > { %v1932_v4 = vpop.f32.mrf.mxu3  ;;  %v2232_v19 = vshll.u32 %v448_v33, 16 }
 0x13a   : > { %v12601_v52 = vadd.f32 %v1932_v4, %v12478_v32  ;;  %v16401_v32 = vld [vmem:[#allocation47_spill] sm:$0xff]  ;;  %v447_v4 = vld [vmem:[%s11378_s18 + $0x90] sm:$0xf] }
 0x13b   : > { %v1912_v60 = vpop.f32.mrf.mxu2  ;;  %v1301_v54 = vpop.f32.mrf.mxu0  ;;  %v2223_v47 = vshrl.u32 %v447_v4, 16  ;;  %v2226_v37 = vshll.u32 %v447_v4, 16 }
 0x13c   : > { %16390 = vst [vmem:[#allocation28_spill] sm:$0xff] %v12601_v52  ;;  %v12609_v1 = vadd.f32 %v1912_v60, %v1532_v59  ;;  %v1534_v8 = vpop.f32.mrf.mxu1 }
 0x13d   : > { %v1535_v3 = vadd.f32 %v1534_v8, %v1301_v54  ;;  %v2225_v54 = vrot.slane %v2223_v47, 4 }
 0x13e   : > { %2120 = vmatmul.bf16.gmra.mxu3 %v2012_v27  ;;  %2398 = vmatmul.bf16.gmra.mxu0 %v2290_v40  ;;  %v2228_v27 = vrot.slane %v2226_v37, 5  ;;  %v16411_v37 = vld [vmem:[#allocation50_spill] sm:$0xff] }
 0x13f   : > { %2640 = vmatmul.bf16.gmra.mxu1 %v2532_v9  ;;  %v16403_v9 = vld [vmem:[#allocation30_spill] sm:$0xff] }
 0x140   : > { %2842 = vmatmul.bf16.gmra.mxu2 %v16401_v32  ;;  %v16404_v8 = vunpack.c.l.b16 %v16403_v9  ;;  %v16405_v32 = vld [vmem:[#allocation39_spill] sm:$0xff]  ;;  %v2229_v22 = vor.u32 %v2228_v27, %v2225_v54  ;;  %v16413_v9 = vld [vmem:[#allocation56_spill] sm:$0xff] }
 0x141   : > { %v1935_v39 = vpop.f32.mrf.mxu3 }
 0x142   : > { %v12618_v59 = vadd.f32 %v1935_v39, %v12497_v13  ;;  %v16406_v13 = vunpack.c.l.b16 %v16405_v32  ;;  %v2234_v32 = vrot.slane %v2232_v19, 5  ;;  %v449_v19 = vld [vmem:[%s11378_s18 + $0x98] sm:$0xf] }
 0x143   : > { %v1915_v20 = vpop.f32.mrf.mxu2  ;;  %v1303_v58 = vpop.f32.mrf.mxu0 }
 0x144   : > { %16402 = vst [vmem:[#allocation33_spill] sm:$0xff] %v12618_v59  ;;  %v12620_v60 = vadd.f32 %v1915_v20, %v1535_v3  ;;  %v1536_v17 = vpop.f32.mrf.mxu1  ;;  %v2013_v39 = vpack.c.b16 %v16406_v13, %v16404_v8  ;;  %v16407_v3 = vld [vmem:[#allocation44_spill] sm:$0xff]  ;;  %v2230_v8 = vrot.slane %v2229_v22, 4  ;;  %v2496_v13 = vrot.slane %v448_v33, 5 }
 0x145   : > { %v1537_v43 = vadd.f32 %v1536_v17, %v1303_v58  ;;  %v16408_v20 = vld [vmem:[#allocation52_spill] sm:$0xff]  ;;  %v16409_v58 = vld [vmem:[#allocation42_spill] sm:$0xff]  ;;  %v16412_v17 = vunpack.c.l.b16 %v16411_v37  ;;  %v2004_v33 = vunpack.c.l.b16 %v447_v4  ;;  %v10887_v37 = vld [vmem:[%s15935_s3 + $0x298] sm:$0xff] }
 0x146   : > { %v2291_v28 = vpack.c.b16 %v16408_v20, %v16407_v3  ;;  %v16410_v47 = vunpack.c.l.b16 %v16409_v58  ;;  %4265 = vmatpush.bf16.msra.mxu2 %v10887_v37 }
 0x148   : > { %v2533_v18 = vpack.c.b16 %v16412_v17, %v16410_v47  ;;  %v2750_v47 = vunpack.c.l.b16 %v449_v19  ;;  %v10871_v17 = vld [vmem:[%s15935_s3 + $0x218] sm:$0xff] }
 0x149   : > { %v1937_v40 = vpop.f32.mrf.mxu3  ;;  %3285 = vmatpush.bf16.msra.mxu0 %v10871_v17 }
 0x14a   : > { %v12624_v44 = vadd.f32 %v1937_v40, %v12505_v53 }
 0x14b   : > { %v1917_v56 = vpop.f32.mrf.mxu2  ;;  %v1306_v52 = vpop.f32.mrf.mxu0 }
 0x14c   : > { %v12632_v59 = vadd.f32 %v1917_v56, %v1537_v43  ;;  %v1539_v53 = vpop.f32.mrf.mxu1  ;;  %v10863_v43 = vld [vmem:[%s15935_s3 + $0x1d8] sm:$0xff]  ;;  %v9659_v56 = vrot.slane %v447_v4, 9 }
 0x14d   : > { %v1540_v40 = vadd.f32 %v1539_v53, %v1306_v52  ;;  %3067 = vmatpush.bf16.msra.mxu3 %v10863_v43  ;;  %v10879_v53 = vld [vmem:[%s15935_s3 + $0x258] sm:$0xff] }
 0x14e   : > { %2125 = vmatmul.bf16.gmra.mxu3 %v2013_v39  ;;  %2403 = vmatmul.bf16.gmra.mxu0 %v2291_v28  ;;  %v12652_v39 = vsel %vm11461_vm5, %v9659_v56, %v2496_v13  ;;  %v16416_v56 = vld [vmem:[#allocation53_spill] sm:$0xff] }
 0x14f   : > { %2645 = vmatmul.bf16.gmra.mxu1 %v2533_v18  ;;  %v2235_v18 = vsel %vm11429_vm3, %v2230_v8, %v2234_v32  ;;  %v16414_v8 = vld [vmem:[#allocation40_spill] sm:$0xff] }
 0x150   : > { %2847 = vmatmul.bf16.gmra.mxu2 %v16413_v9  ;;  %v12654_v58 = vunpack.c.l.b16 %v2235_v18  ;;  %v16415_v32 = vunpack.c.l.b16 %v16414_v8  ;;  %v16417_v18 = vld [vmem:[#allocation51_spill] sm:$0xff]  ;;  %3567 = vmatpush.bf16.msra.mxu1 %v10879_v53 }
 0x151   : > { %v1940_v3 = vpop.f32.mrf.mxu3 }
 0x152   : > { %v12643_v27 = vadd.f32 %v1940_v3, %v12525_v57  ;;  %v16049_v57 = vunpack.c.l.b16 %v12652_v39  ;;  %v2014_v43 = vpack.c.b16 %v2004_v33, %v16415_v32  ;;  %v2292_v13 = vpack.c.b16 %v12654_v58, %v16416_v56 }
 0x153   : > { %v1920_v54 = vpop.f32.mrf.mxu2  ;;  %v1308_v28 = vpop.f32.mrf.mxu0 }
 0x154   : > { %v12645_v52 = vadd.f32 %v1920_v54, %v1540_v40  ;;  %v1541_v22 = vpop.f32.mrf.mxu1 }
 0x155   : > { %v1542_v20 = vadd.f32 %v1541_v22, %v1308_v28  ;;  %v2754_v28 = vpack.c.b16 %v2750_v47, %v2004_v33  ;;  %v16418_v22 = vunpack.c.l.b16 %v16417_v18  ;;  %v16423_v18 = vld [vmem:[#allocation61_spill] sm:$0xff] }
 0x157   : > { %v2534_v19 = vpack.c.b16 %v16049_v57, %v16418_v22  ;;  %v2293_v22 = vpack.c.b16 %v12214_v29, %v16423_v18  ;;  %v16428_v29 = vld [vmem:[#allocation63_spill] sm:$0xff]  ;;  %v10870_v18 = vld [vmem:[%s15935_s3 + $0x210] sm:$0xff]  ;;  %v16438_v57 = vunpack.c.l.b16 %v12315_v42 }
 0x158   : > { %3286 = vmatpush.bf16.msra.mxu0 %v10870_v18 }
 0x159   : > { %v1942_v40 = vpop.f32.mrf.mxu3 }
 0x15a   : > { %v12667_v4 = vadd.f32 %v1942_v40, %v12550_v11 }
 0x15b   : > { %v1922_v9 = vpop.f32.mrf.mxu2  ;;  %v1311_v54 = vpop.f32.mrf.mxu0 }
 0x15c   : > { %v12673_v3 = vadd.f32 %v1922_v9, %v1542_v20  ;;  %v1544_v11 = vpop.f32.mrf.mxu1 }
 0x15d   : > { %v1545_v40 = vadd.f32 %v1544_v11, %v1311_v54  ;;  %v16420_v54 = vld [vmem:[#allocation49_spill] sm:$0xff]  ;;  %v16424_v11 = vld [vmem:[#allocation60_spill] sm:$0xff] }
 0x15e   : > { %2130 = vmatmul.bf16.gmra.mxu3 %v2014_v43  ;;  %2408 = vmatmul.bf16.gmra.mxu0 %v2292_v13  ;;  %v16421_v43 = vunpack.c.l.b16 %v16420_v54  ;;  %v16422_v13 = vunpack.c.l.b16 %v12100_v5  ;;  %v10862_v5 = vld [vmem:[%s15935_s3 + $0x1d0] sm:$0xff] }
 0x15f   : > { %2650 = vmatmul.bf16.gmra.mxu1 %v2534_v19  ;;  %3068 = vmatpush.bf16.msra.mxu3 %v10862_v5 }
 0x160   : > { %2852 = vmatmul.bf16.gmra.mxu2 %v2754_v28  ;;  %v2015_v28 = vpack.c.b16 %v16422_v13, %v16421_v43 }
 0x161   : > { %v1945_v8 = vpop.f32.mrf.mxu3 }
 0x162   : > { %v12680_v37 = vadd.f32 %v1945_v8, %v12563_v61  ;;  %v16426_v8 = vunpack.c.l.b16 %v12208_v62 }
 0x163   : > { %v1925_v32 = vpop.f32.mrf.mxu2  ;;  %v1313_v33 = vpop.f32.mrf.mxu0 }
 0x164   : > { %v12682_v20 = vadd.f32 %v1925_v32, %v1545_v40  ;;  %v1546_v47 = vpop.f32.mrf.mxu1  ;;  %v16425_v40 = vunpack.c.l.b16 %v16424_v11 }
 0x165   : > { %v1547_v17 = vadd.f32 %v1546_v47, %v1313_v33 }
 0x166   : > { %v2535_v32 = vpack.c.b16 %v16426_v8, %v16425_v40  ;;  %v16430_v40 = vld [vmem:[#allocation69_spill] sm:$0xff] }
 0x169   : > { %v1947_v9 = vpop.f32.mrf.mxu3 }
 0x16a   : > { %v12685_v53 = vadd.f32 %v1947_v9, %v12568_v12  ;;  %v16427_v12 = vld [vmem:[#allocation70_spill] sm:$0xff] }
 0x16b   : > { %v1927_v56 = vpop.f32.mrf.mxu2  ;;  %v2374_v19 = vpop.f32.mrf.mxu0 }
 0x16c   : > { %16419 = vst [vmem:[#allocation27_spill] sm:$0xff] %v12685_v53  ;;  %v12693_v61 = vadd.f32 %v1927_v56, %v1547_v17  ;;  %v2616_v33 = vpop.f32.mrf.mxu1 }
 0x16e   : > { %2135 = vmatmul.bf16.gmra.mxu3 %v2015_v28  ;;  %2413 = vmatmul.bf16.gmra.mxu0 %v2293_v22  ;;  %v10886_v28 = vld [vmem:[%s15935_s3 + $0x290] sm:$0xff] }
 0x16f   : > { %2655 = vmatmul.bf16.gmra.mxu1 %v2535_v32  ;;  %v10878_v22 = vld [vmem:[%s15935_s3 + $0x250] sm:$0xff]  ;;  %v16431_v32 = vld [vmem:[#allocation58_spill] sm:$0xff]  ;;  %4266 = vmatpush.bf16.msra.mxu2 %v10886_v28 }
 0x170   : > { %2857 = vmatmul.bf16.gmra.mxu2 %v16427_v12  ;;  %v16433_v12 = vunpack.c.l.b16 %v12170_v34  ;;  %3568 = vmatpush.bf16.msra.mxu1 %v10878_v22  ;;  %v12730_v28 = vld [vmem:[%s11378_s18 + $0xe0] sm:$0xf] }
 0x171   : > { %v2096_v47 = vpop.f32.mrf.mxu3 }
 0x172   : > { %v2176_v17 = vadd.f32 %v2096_v47, %v16428_v29  ;;  %v16434_v47 = vld [vmem:[#allocation66_spill] sm:$0xff]  ;;  %v16435_v29 = vld [vmem:[#allocation75_spill] sm:$0xff] }
 0x173   : > { %v2818_v9 = vpop.f32.mrf.mxu2  ;;  %v2376_v56 = vpop.f32.mrf.mxu0 }
 0x174   : > { %v2454_v54 = vadd.f32 %v2374_v19, %v2176_v17  ;;  %v2618_v43 = vpop.f32.mrf.mxu1  ;;  %v2294_v17 = vpack.c.b16 %v16435_v29, %v16434_v47 }
 0x176   : > { %v2696_v62 = vadd.f32 %v2616_v33, %v2454_v54  ;;  %v16432_v33 = vunpack.c.l.b16 %v16431_v32  ;;  %v16436_v54 = vld [vmem:[#allocation65_spill] sm:$0xff]  ;;  %v16439_v32 = vld [vmem:[#allocation74_spill] sm:$0xff] }
 0x178   : > { %v12704_v13 = vadd.f32 %v2818_v9, %v2696_v62  ;;  %v2016_v5 = vpack.c.b16 %v16433_v12, %v16432_v33  ;;  %v16437_v62 = vunpack.c.l.b16 %v16436_v54  ;;  %v16441_v54 = vunpack.c.l.b16 %v12271_v50 }
 0x179   : > { %v2098_v11 = vpop.f32.mrf.mxu3 }
 0x17a   : > { %16429 = vst [vmem:[#allocation31_spill] sm:$0xff] %v12704_v13  ;;  %v2177_v8 = vadd.f32 %v2098_v11, %v16430_v40  ;;  %v2536_v13 = vpack.c.b16 %v16438_v57, %v16437_v62  ;;  %v2237_v57 = vshrl.u32 %v12730_v28, 16 }
 0x17b   : > { %v2820_v19 = vpop.f32.mrf.mxu2  ;;  %v2379_v9 = vpop.f32.mrf.mxu0 }
 0x17c   : > { %v2455_v11 = vadd.f32 %v2376_v56, %v2177_v8  ;;  %v2621_v40 = vpop.f32.mrf.mxu1  ;;  %v2240_v56 = vshll.u32 %v12730_v28, 16 }
 0x17e   : > { %v2697_v53 = vadd.f32 %v2618_v43, %v2455_v11  ;;  %2140 = vmatmul.bf16.gmra.mxu3 %v2016_v5  ;;  %2418 = vmatmul.bf16.gmra.mxu0 %v2294_v17  ;;  %v2239_v5 = vrot.slane %v2237_v57, 4  ;;  %v16440_v17 = vunpack.c.l.b16 %v12173_v16  ;;  %v16442_v11 = vld [vmem:[#allocation76_spill] sm:$0xff] }
 0x17f   : > { %2660 = vmatmul.bf16.gmra.mxu1 %v2536_v13 }
 0x180   : > { %2862 = vmatmul.bf16.gmra.mxu2 %v12352_v35  ;;  %v12727_v34 = vadd.f32 %v2820_v19, %v2697_v53  ;;  %v2242_v35 = vrot.slane %v2240_v56, 5  ;;  %v468_v53 = vld [vmem:[%s11378_s18 + $0xe4] sm:$0x1]  ;;  %v2017_v62 = vpack.c.b16 %v16441_v54, %v16440_v17  ;;  %v2005_v54 = vunpack.c.l.b16 %v12730_v28 }
 0x181   : > { %v2101_v18 = vpop.f32.mrf.mxu3  ;;  %v2246_v57 = vshll.u32 %v468_v53, 16 }
 0x182   : > { %v2178_v33 = vadd.f32 %v2101_v18, %v16439_v32  ;;  %v2295_v18 = vpack.c.b16 %v12406_v24, %v16442_v11  ;;  %v16444_v32 = vunpack.c.l.b16 %v12391_v25  ;;  %v10861_v25 = vld [vmem:[%s15935_s3 + $0x1c8] sm:$0xff] }
 0x183   : > { %v2823_v12 = vpop.f32.mrf.mxu2  ;;  %v2381_v42 = vpop.f32.mrf.mxu0  ;;  %v2248_v50 = vrot.slane %v2246_v57, 5  ;;  %3069 = vmatpush.bf16.msra.mxu3 %v10861_v25  ;;  %v16445_v57 = vunpack.c.l.b16 %v12274_v63 }
 0x184   : > { %v2456_v43 = vadd.f32 %v2379_v9, %v2178_v33  ;;  %v2623_v22 = vpop.f32.mrf.mxu1 }
 0x186   : > { %v2698_v8 = vadd.f32 %v2621_v40, %v2456_v43  ;;  %v16443_v40 = vunpack.c.l.b16 %v12319_v26  ;;  %v9660_v26 = vrot.slane %v12730_v28, 9 }
 0x188   : > { %v12735_v47 = vadd.f32 %v2823_v12, %v2698_v8  ;;  %v2537_v33 = vpack.c.b16 %v16444_v32, %v16443_v40  ;;  %v2243_v12 = vor.u32 %v2242_v35, %v2239_v5  ;;  %v2500_v8 = vrot.slane %v468_v53, 5  ;;  %v10869_v40 = vld [vmem:[%s15935_s3 + $0x208] sm:$0xff] }
 0x189   : > { %v2103_v13 = vpop.f32.mrf.mxu3  ;;  %v10877_v32 = vld [vmem:[%s15935_s3 + $0x248] sm:$0xff]  ;;  %3287 = vmatpush.bf16.msra.mxu0 %v10869_v40 }
 0x18a   : > { %v2179_v19 = vadd.f32 %v2103_v13, %v12346_v30  ;;  %v2244_v16 = vrot.slane %v2243_v12, 4  ;;  %v12762_v17 = vsel %vm11461_vm5, %v9660_v26, %v2500_v8  ;;  %3569 = vmatpush.bf16.msra.mxu1 %v10877_v32 }
 0x18b   : > { %v2825_v29 = vpop.f32.mrf.mxu2  ;;  %v2384_v9 = vpop.f32.mrf.mxu0 }
 0x18c   : > { %v2457_v56 = vadd.f32 %v2381_v42, %v2179_v19  ;;  %v2626_v43 = vpop.f32.mrf.mxu1 }
 0x18e   : > { %v2699_v30 = vadd.f32 %v2623_v22, %v2457_v56  ;;  %2145 = vmatmul.bf16.gmra.mxu3 %v2017_v62  ;;  %2423 = vmatmul.bf16.gmra.mxu0 %v2295_v18  ;;  %v2018_v56 = vpack.c.b16 %v2005_v54, %v16445_v57  ;;  %v16453_v57 = vld [vmem:[#allocation59_spill] sm:$0xff] }
 0x18f   : > { %2665 = vmatmul.bf16.gmra.mxu1 %v2537_v33 }
 0x190   : > { %2867 = vmatmul.bf16.gmra.mxu2 %v12434_v48  ;;  %v12750_v24 = vadd.f32 %v2825_v29, %v2699_v30  ;;  %v2249_v48 = vsel %vm11429_vm3, %v2244_v16, %v2248_v50  ;;  %v469_v29 = vld [vmem:[%s11378_s18 + $0xe8] sm:$0xf]  ;;  %v16446_v50 = vunpack.c.l.b16 %v12395_v51 }
 0x191   : > { %v2106_v42 = vpop.f32.mrf.mxu3  ;;  %v12765_v62 = vunpack.c.l.b16 %v2249_v48  ;;  %v2751_v11 = vunpack.c.l.b16 %v469_v29 }
 0x192   : > { %v2180_v22 = vadd.f32 %v2106_v42, %v12377_v36  ;;  %v16050_v36 = vunpack.c.l.b16 %v12762_v17 }
 0x193   : > { %v2828_v5 = vpop.f32.mrf.mxu2  ;;  %v2386_v35 = vpop.f32.mrf.mxu0  ;;  %v2755_v16 = vpack.c.b16 %v2751_v11, %v2005_v54  ;;  %v16447_v54 = vld [vmem:[#allocation2_spill] sm:$0xff] }
 0x194   : > { %v2458_v13 = vadd.f32 %v2384_v9, %v2180_v22  ;;  %v2628_v19 = vpop.f32.mrf.mxu1  ;;  %v10885_v9 = vld [vmem:[%s15935_s3 + $0x288] sm:$0xff]  ;;  %v2538_v26 = vpack.c.b16 %v16050_v36, %v16446_v50  ;;  %v16448_v11 = vunpack.c.l.b16 %v16447_v54 }
 0x195   : > { %4267 = vmatpush.bf16.msra.mxu2 %v10885_v9  ;;  %v16449_v9 = vld [vmem:[#allocation3_spill] sm:$0xff] }
 0x196   : > { %v2700_v53 = vadd.f32 %v2626_v43, %v2458_v13  ;;  %v2296_v43 = vpack.c.b16 %v12765_v62, %v12408_v31  ;;  %v16450_v40 = vunpack.c.l.b16 %v16449_v9 }
 0x198   : > { %v12768_v18 = vadd.f32 %v2828_v5, %v2700_v53  ;;  %v2019_v32 = vpack.c.b16 %v16450_v40, %v16448_v11  ;;  %v16458_v40 = vld [vmem:[#allocation5_spill] sm:$0xff] }
 0x199   : > { %v2108_v28 = vpop.f32.mrf.mxu3 }
 0x19a   : > { %v2181_v33 = vadd.f32 %v2108_v28, %v12428_v49  ;;  %v16451_v28 = vld [vmem:[#allocation4_spill] sm:$0xff] }
 0x19b   : > { %v2830_v12 = vpop.f32.mrf.mxu2  ;;  %v2389_v30 = vpop.f32.mrf.mxu0 }
 0x19c   : > { %v2459_v8 = vadd.f32 %v2386_v35, %v2181_v33  ;;  %v2631_v25 = vpop.f32.mrf.mxu1  ;;  %v16452_v33 = vld [vmem:[#allocation7_spill] sm:$0xff] }
 0x19e   : > { %v2701_v49 = vadd.f32 %v2628_v19, %v2459_v8  ;;  %2150 = vmatmul.bf16.gmra.mxu3 %v2018_v56  ;;  %2428 = vmatmul.bf16.gmra.mxu0 %v2296_v43  ;;  %v16454_v56 = vunpack.c.l.b16 %v16453_v57  ;;  %v16455_v43 = vld [vmem:[#allocation62_spill] sm:$0xff]  ;;  %v16463_v57 = vld [vmem:[#allocation15_spill] sm:$0xff] }
 0x19f   : > { %2670 = vmatmul.bf16.gmra.mxu1 %v2538_v26 }
 0x1a0   : > { %2872 = vmatmul.bf16.gmra.mxu2 %v2755_v16  ;;  %v12788_v63 = vadd.f32 %v2830_v12, %v2701_v49  ;;  %v2297_v12 = vpack.c.b16 %v16452_v33, %v16451_v28  ;;  %v10860_v49 = vld [vmem:[%s15935_s3 + $0x1c0] sm:$0xff] }
 0x1a1   : > { %v2111_v31 = vpop.f32.mrf.mxu3  ;;  %3070 = vmatpush.bf16.msra.mxu3 %v10860_v49  ;;  %v16460_v28 = vld [vmem:[#allocation6_spill] sm:$0xff] }
 0x1a2   : > { %v2182_v42 = vadd.f32 %v2111_v31, %v12448_v15  ;;  %v16461_v33 = vunpack.c.l.b16 %v16460_v28  ;;  %v12850_v28 = vld [vmem:[%s12846_s20 + $0x8] sm:$0xf] }
 0x1a3   : > { %v2833_v22 = vpop.f32.mrf.mxu2  ;;  %v2391_v5 = vpop.f32.mrf.mxu0 }
 0x1a4   : > { %v2460_v48 = vadd.f32 %v2389_v30, %v2182_v42  ;;  %v2633_v51 = vpop.f32.mrf.mxu1  ;;  %v16456_v30 = vunpack.c.l.b16 %v16455_v43 }
 0x1a6   : > { %v2702_v13 = vadd.f32 %v2631_v25, %v2460_v48  ;;  %v2539_v16 = vpack.c.b16 %v16456_v30, %v16454_v56  ;;  %v16464_v30 = vld [vmem:[#allocation64_spill] sm:$0xff] }
 0x1a8   : > { %v12791_v29 = vadd.f32 %v2833_v22, %v2702_v13 }
 0x1a9   : > { %v2113_v53 = vpop.f32.mrf.mxu3 }
 0x1aa   : > { %v2183_v35 = vadd.f32 %v2113_v53, %v12452_v14  ;;  %v16457_v14 = vld [vmem:[#allocation37_spill] sm:$0xff] }
 0x1ab   : > { %v2835_v19 = vpop.f32.mrf.mxu2  ;;  %v2394_v15 = vpop.f32.mrf.mxu0 }
 0x1ac   : > { %v2461_v50 = vadd.f32 %v2391_v5, %v2183_v35  ;;  %v2636_v26 = vpop.f32.mrf.mxu1  ;;  %v10884_v35 = vld [vmem:[%s15935_s3 + $0x280] sm:$0xff] }
 0x1ad   : > { %4268 = vmatpush.bf16.msra.mxu2 %v10884_v35 }
 0x1ae   : > { %v2703_v8 = vadd.f32 %v2633_v51, %v2461_v50  ;;  %2155 = vmatmul.bf16.gmra.mxu3 %v2019_v32  ;;  %2433 = vmatmul.bf16.gmra.mxu0 %v2297_v12  ;;  %v16459_v32 = vunpack.c.l.b16 %v16458_v40  ;;  %v16466_v50 = vld [vmem:[#allocation72_spill] sm:$0xff] }
 0x1af   : > { %2675 = vmatmul.bf16.gmra.mxu1 %v2539_v16  ;;  %v16465_v16 = vunpack.c.l.b16 %v16464_v30 }
 0x1b0   : > { %2877 = vmatmul.bf16.gmra.mxu2 %v16457_v14  ;;  %v12805_v25 = vadd.f32 %v2835_v19, %v2703_v8  ;;  %v10868_v19 = vld [vmem:[%s15935_s3 + $0x200] sm:$0xff]  ;;  %v2020_v12 = vpack.c.b16 %v16461_v33, %v16459_v32  ;;  %v488_v32 = vld [vmem:[%s11378_s18 + $0x134] sm:$0x1] }
 0x1b1   : > { %v2116_v31 = vpop.f32.mrf.mxu3  ;;  %3288 = vmatpush.bf16.msra.mxu0 %v10868_v19 }
 0x1b2   : > { %v2184_v42 = vadd.f32 %v2116_v31, %v12466_v23  ;;  %v10876_v23 = vld [vmem:[%s15935_s3 + $0x240] sm:$0xff]  ;;  %v12834_v31 = vld [vmem:[%s11378_s18 + $0x130] sm:$0xf] }
 0x1b3   : > { %v2838_v22 = vpop.f32.mrf.mxu2  ;;  %v2396_v48 = vpop.f32.mrf.mxu0  ;;  %3570 = vmatpush.bf16.msra.mxu1 %v10876_v23  ;;  %v2254_v35 = vshll.u32 %v12834_v31, 16 }
 0x1b4   : > { %v2462_v5 = vadd.f32 %v2394_v15, %v2184_v42  ;;  %v2638_v13 = vpop.f32.mrf.mxu1  ;;  %v16462_v15 = vld [vmem:[#allocation9_spill] sm:$0xff]  ;;  %v16468_v42 = vld [vmem:[#allocation46_spill] sm:$0xff] }
 0x1b5   : > { %v2298_v56 = vpack.c.b16 %v16463_v57, %v16462_v15  ;;  %v16473_v57 = vld [vmem:[#allocation13_spill] sm:$0xff] }
 0x1b6   : > { %v2704_v51 = vadd.f32 %v2636_v26, %v2462_v5  ;;  %v16467_v26 = vunpack.c.l.b16 %v16466_v50  ;;  %v2260_v50 = vshll.u32 %v488_v32, 16 }
 0x1b8   : > { %v12811_v53 = vadd.f32 %v2838_v22, %v2704_v51  ;;  %v2540_v8 = vpack.c.b16 %v16467_v26, %v16465_v16  ;;  %v2251_v51 = vshrl.u32 %v12834_v31, 16 }
 0x1b9   : > { %v2118_v54 = vpop.f32.mrf.mxu3 }
 0x1ba   : > { %v2185_v11 = vadd.f32 %v2118_v54, %v12486_v55 }
 0x1bb   : > { %v2840_v9 = vpop.f32.mrf.mxu2  ;;  %v2399_v43 = vpop.f32.mrf.mxu0 }
 0x1bc   : > { %v2463_v55 = vadd.f32 %v2396_v48, %v2185_v11  ;;  %v2641_v14 = vpop.f32.mrf.mxu1  ;;  %v2253_v11 = vrot.slane %v2251_v51, 4  ;;  %v16477_v51 = vld [vmem:[#allocation73_spill] sm:$0xff] }
 0x1be   : > { %v2705_v49 = vadd.f32 %v2638_v13, %v2463_v55  ;;  %2160 = vmatmul.bf16.gmra.mxu3 %v2020_v12  ;;  %2438 = vmatmul.bf16.gmra.mxu0 %v2298_v56  ;;  %v16474_v56 = vunpack.c.l.b16 %v16473_v57  ;;  %v16476_v55 = vld [vmem:[#allocation20_spill] sm:$0xff] }
 0x1bf   : > { %2680 = vmatmul.bf16.gmra.mxu1 %v2540_v8  ;;  %v16475_v8 = vld [vmem:[#allocation16_spill] sm:$0xff] }
 0x1c0   : > { %2882 = vmatmul.bf16.gmra.mxu2 %v16468_v42  ;;  %v12837_v22 = vadd.f32 %v2840_v9, %v2705_v49  ;;  %v2256_v9 = vrot.slane %v2254_v35, 5  ;;  %v3699_v49 = vshrl.u32 %v12850_v28, 16  ;;  %v3702_v42 = vshll.u32 %v12850_v28, 16 }
 0x1c1   : > { %v2121_v5 = vpop.f32.mrf.mxu3  ;;  %v16478_v35 = vunpack.c.l.b16 %v16477_v51  ;;  %v2504_v51 = vrot.slane %v488_v32, 5 }
 0x1c2   : > { %16469 = vst [vmem:[#allocation36_spill] sm:$0xff] %v12837_v22  ;;  %v2186_v19 = vadd.f32 %v2121_v5, %v12499_v6  ;;  %v16471_v6 = vld [vmem:[#allocation8_spill] sm:$0xff]  ;;  %v2257_v16 = vor.u32 %v2256_v9, %v2253_v11  ;;  %v3704_v57 = vrot.slane %v3702_v42, 5 }
 0x1c3   : > { %v2843_v48 = vpop.f32.mrf.mxu2  ;;  %v2401_v23 = vpop.f32.mrf.mxu0  ;;  %v16472_v15 = vunpack.c.l.b16 %v16471_v6  ;;  %v2262_v6 = vrot.slane %v2260_v50, 5  ;;  %v12881_v50 = vld [vmem:[%s12846_s20 + $0x10] sm:$0xf] }
 0x1c4   : > { %v2464_v13 = vadd.f32 %v2399_v43, %v2186_v19  ;;  %v2643_v54 = vpop.f32.mrf.mxu1  ;;  %v16479_v19 = vld [vmem:[#allocation80_spill] sm:$0xff]  ;;  %v3713_v32 = vshrl.u32 %v12881_v50, 16 }
 0x1c5   : > { %v2021_v30 = vpack.c.b16 %v16474_v56, %v16472_v15  ;;  %v3701_v15 = vrot.slane %v3699_v49, 4  ;;  %v16481_v56 = vld [vmem:[#allocation55_spill] sm:$0xff]  ;;  %v3716_v49 = vshll.u32 %v12881_v50, 16 }
 0x1c6   : > { %v2706_v40 = vadd.f32 %v2641_v14, %v2464_v13  ;;  %v2299_v14 = vpack.c.b16 %v16476_v55, %v16475_v8  ;;  %v9661_v55 = vrot.slane %v12834_v31, 9 }
 0x1c8   : > { %v12852_v33 = vadd.f32 %v2843_v48, %v2706_v40  ;;  %v16480_v48 = vunpack.c.l.b16 %v16479_v19  ;;  %v2258_v40 = vrot.slane %v2257_v16, 4 }
 0x1c9   : > { %v2123_v12 = vpop.f32.mrf.mxu3 }
 0x1ca   : > { %16470 = vst [vmem:[#allocation26_spill] sm:$0xff] %v12852_v33  ;;  %v2187_v43 = vadd.f32 %v2123_v12, %v12513_v10  ;;  %v2541_v13 = vpack.c.b16 %v16480_v48, %v16478_v35  ;;  %v494_v12 = vld [vmem:[%s12846_s20 + $0xc] sm:$0x1]  ;;  %v12873_v35 = vld [vmem:[%s12846_s20] sm:$0xf] }
 0x1cb   : > { %v2845_v26 = vpop.f32.mrf.mxu2  ;;  %v2404_v5 = vpop.f32.mrf.mxu0  ;;  %v3708_v16 = vshll.u32 %v494_v12, 16  ;;  %v3685_v19 = vshrl.u32 %v12873_v35, 16  ;;  %v3688_v48 = vshll.u32 %v12873_v35, 16  ;;  %v2006_v12 = vunpack.c.l.b16 %v12834_v31  ;;  %v10923_v31 = vld [vmem:[%s15935_s3 + $0x3b8] sm:$0xff] }
 0x1cc   : > { %v2465_v11 = vadd.f32 %v2401_v23, %v2187_v43  ;;  %v2646_v9 = vpop.f32.mrf.mxu1  ;;  %v10899_v23 = vld [vmem:[%s15935_s3 + $0x2f8] sm:$0xff]  ;;  %5417 = vmatpush.bf16.msrb.mxu2 %v10923_v31 }
 0x1cd   : > { %4671 = vmatpush.bf16.msrb.mxu3 %v10899_v23  ;;  %v3687_v33 = vrot.slane %v3685_v19, 4  ;;  %v3690_v22 = vrot.slane %v3688_v48, 5 }
 0x1ce   : > { %v2707_v10 = vadd.f32 %v2643_v54, %v2465_v11  ;;  %2165 = vmatmul.bf16.gmra.mxu3 %v2021_v30  ;;  %2443 = vmatmul.bf16.gmra.mxu0 %v2299_v14  ;;  %v2263_v30 = vsel %vm11429_vm3, %v2258_v40, %v2262_v6  ;;  %v3705_v14 = vor.u32 %v3704_v57, %v3701_v15  ;;  %v489_v40 = vld [vmem:[%s11378_s18 + $0x138] sm:$0xf]  ;;  %v3710_v57 = vrot.slane %v3708_v16, 5 }
 0x1cf   : > { %2685 = vmatmul.bf16.gmra.mxu1 %v2541_v13  ;;  %v12891_v6 = vsel %vm11461_vm5, %v9661_v55, %v2504_v51  ;;  %v12894_v15 = vunpack.c.l.b16 %v2263_v30  ;;  %v10907_v51 = vld [vmem:[%s15935_s3 + $0x338] sm:$0xff] }
 0x1d0   : > { %2887 = vmatmul.bf16.gmra.mxu2 %v16481_v56  ;;  %v12869_v8 = vadd.f32 %v2845_v26, %v2707_v10  ;;  %v3718_v10 = vrot.slane %v3716_v49, 5  ;;  %v496_v56 = vld [vmem:[%s12846_s20 + $0x14] sm:$0x1]  ;;  %4897 = vmatpush.bf16.msrb.mxu0 %v10907_v51  ;;  %v12938_v51 = vld [vmem:[%s12846_s20 + $0x18] sm:$0xf] }
 0x1d1   : > { %v2126_v54 = vpop.f32.mrf.mxu3  ;;  %16483 = vst [vmem:[#allocation34_spill] sm:$0xff] %v12894_v15 }
 0x1d2   : > { %16482 = vst [vmem:[#allocation29_spill] sm:$0xff] %v12869_v8  ;;  %v2188_v43 = vadd.f32 %v2126_v54, %v12527_v2  ;;  %v3715_v2 = vrot.slane %v3713_v32, 4  ;;  %v3706_v54 = vrot.slane %v3705_v14, 4  ;;  %v3722_v8 = vshll.u32 %v496_v56, 16  ;;  %v16484_v32 = vld [vmem:[#allocation14_spill] sm:$0xff] }
 0x1d3   : > { %v2848_v26 = vpop.f32.mrf.mxu2  ;;  %v2406_v42 = vpop.f32.mrf.mxu0  ;;  %v16485_v49 = vunpack.c.l.b16 %v16484_v32  ;;  %v3691_v32 = vor.u32 %v3690_v22, %v3687_v33  ;;  %16488 = vst [vmem:[#allocation43_spill] sm:$0xff] %v12938_v51 }
 0x1d4   : > { %v2466_v13 = vadd.f32 %v2404_v5, %v2188_v43  ;;  %v2648_v11 = vpop.f32.mrf.mxu1  ;;  %v3719_v36 = vor.u32 %v3718_v10, %v3715_v2  ;;  %v2752_v5 = vunpack.c.l.b16 %v489_v40  ;;  %v16053_v43 = vunpack.c.l.b16 %v12891_v6  ;;  %v16486_v40 = vld [vmem:[#allocation21_spill] sm:$0xff] }
 0x1d5   : > { %v3724_v16 = vrot.slane %v3722_v8, 5  ;;  %v2022_v19 = vpack.c.b16 %v2006_v12, %v16485_v49  ;;  %v2300_v2 = vpack.c.b16 %v12894_v15, %v16486_v40  ;;  %v3711_v10 = vsel %vm11429_vm3, %v3706_v54, %v3710_v57 }
 0x1d6   : > { %v2708_v23 = vadd.f32 %v2646_v9, %v2466_v13  ;;  %v10915_v9 = vld [vmem:[%s15935_s3 + $0x378] sm:$0xff]  ;;  %v3720_v30 = vrot.slane %v3719_v36, 4  ;;  %v16487_v36 = vunpack.c.l.b16 %v12387_v45  ;;  %v12923_v15 = vunpack.c.l.b16 %v3711_v10 }
 0x1d7   : > { %5175 = vmatpush.bf16.msrb.mxu1 %v10915_v9  ;;  %v3453_v54 = vunpack.c.l.b16 %v12881_v50  ;;  %v3692_v22 = vrot.slane %v3691_v32, 4 }
 0x1d8   : > { %v12898_v55 = vadd.f32 %v2848_v26, %v2708_v23  ;;  %v492_v26 = vld [vmem:[%s12846_s20 + $0x4] sm:$0x1]  ;;  %v2756_v23 = vpack.c.b16 %v2752_v5, %v2006_v12  ;;  %v2542_v8 = vpack.c.b16 %v16053_v43, %v16487_v36  ;;  %v3452_v12 = vunpack.c.l.b16 %v12850_v28 }
 0x1d9   : > { %v2128_v14 = vpop.f32.mrf.mxu3  ;;  %v3694_v40 = vshll.u32 %v492_v26, 16 }
 0x1da   : > { %v2189_v48 = vadd.f32 %v2128_v14, %v12556_v21  ;;  %v3725_v21 = vsel %vm11429_vm3, %v3720_v30, %v3724_v16 }
 0x1db   : > { %v2850_v13 = vpop.f32.mrf.mxu2  ;;  %v2409_v56 = vpop.f32.mrf.mxu0  ;;  %v12926_v45 = vunpack.c.l.b16 %v3725_v21  ;;  %v498_v21 = vld [vmem:[%s12846_s20 + $0x1c] sm:$0x1] }
 0x1dc   : > { %v2467_v14 = vadd.f32 %v2406_v42, %v2189_v48  ;;  %v2651_v49 = vpop.f32.mrf.mxu1  ;;  %v3696_v42 = vrot.slane %v3694_v40, 5  ;;  %v3727_v48 = vshrl.u32 %v12938_v51, 16 }
 0x1de   : > { %v2709_v57 = vadd.f32 %v2648_v11, %v2467_v14  ;;  %2170 = vmatmul.bf16.gmra.mxu3 %v2022_v19  ;;  %2448 = vmatmul.bf16.gmra.mxu0 %v2300_v2  ;;  %v12935_v11 = vpack.c.b16 %v3453_v54, %v3452_v12  ;;  %v3697_v26 = vsel %vm11429_vm3, %v3692_v22, %v3696_v42 }
 0x1df   : > { %2690 = vmatmul.bf16.gmra.mxu1 %v2542_v8  ;;  %v4149_v10 = vunpack.c.l.b16 %v3697_v26  ;;  %v3729_v8 = vrot.slane %v3727_v48, 4  ;;  %v12954_v26 = vld [vmem:[%s12846_s20 + $0x20] sm:$0xf] }
 0x1e0   : > { %2892 = vmatmul.bf16.gmra.mxu2 %v2756_v23  ;;  %v12929_v33 = vadd.f32 %v2850_v13, %v2709_v57  ;;  %v3730_v13 = vshll.u32 %v12938_v51, 16  ;;  %v3451_v23 = vunpack.c.l.b16 %v12873_v35 }
 0x1e1   : > { %v2131_v31 = vpop.f32.mrf.mxu3  ;;  %v4181_v57 = vpack.c.b16 %v12923_v15, %v4149_v10 }
 0x1e2   : > { %v2190_v28 = vadd.f32 %v2131_v31, %v12565_v7  ;;  %v3732_v32 = vrot.slane %v3730_v13, 5  ;;  %v3483_v22 = vpack.c.b16 %v3452_v12, %v3451_v23  ;;  %v10898_v12 = vld [vmem:[%s15935_s3 + $0x2f0] sm:$0xff]  ;;  %v3741_v23 = vshrl.u32 %v12954_v26, 16 }
 0x1e3   : > { %v2853_v9 = vpop.f32.mrf.mxu2  ;;  %v2411_v30 = vpop.f32.mrf.mxu0  ;;  %4672 = vmatpush.bf16.msrb.mxu3 %v10898_v12 }
 0x1e4   : > { %v2468_v16 = vadd.f32 %v2409_v56, %v2190_v28  ;;  %v2653_v19 = vpop.f32.mrf.mxu1  ;;  %v3733_v31 = vor.u32 %v3732_v32, %v3729_v8  ;;  %v3736_v28 = vshll.u32 %v498_v21, 16  ;;  %v3744_v8 = vshll.u32 %v12954_v26, 16 }
 0x1e6   : > { %v2710_v2 = vadd.f32 %v2651_v49, %v2468_v16  ;;  %v16490_v16 = vld [vmem:[#allocation12_spill] sm:$0xff]  ;;  %v3734_v48 = vrot.slane %v3733_v31, 4  ;;  %v3738_v13 = vrot.slane %v3736_v28, 5  ;;  %v16052_v28 = vunpack.c.l.b16 %v12938_v51 }
 0x1e8   : > { %v12946_v36 = vadd.f32 %v2853_v9, %v2710_v2  ;;  %v16489_v9 = vld [vmem:[#allocation10_spill] sm:$0xff]  ;;  %v12959_v2 = vld [vmem:[%s12846_s20 + $0x28] sm:$0xf] }
 0x1e9   : > { %v2133_v7 = vpop.f32.mrf.mxu3  ;;  %v3758_v21 = vshll.u32 %v12959_v2, 16 }
 0x1ea   : > { %v2191_v56 = vadd.f32 %v2133_v7, %v12576_v46  ;;  %v3755_v7 = vshrl.u32 %v12959_v2, 16 }
 0x1eb   : > { %v2855_v14 = vpop.f32.mrf.mxu2  ;;  %v2414_v40 = vpop.f32.mrf.mxu0  ;;  %v3760_v12 = vrot.slane %v3758_v21, 5 }
 0x1ec   : > { %v2469_v42 = vadd.f32 %v2411_v30, %v2191_v56  ;;  %v2656_v49 = vpop.f32.mrf.mxu1 }
 0x1ee   : > { %v2711_v35 = vadd.f32 %v2653_v19, %v2469_v42  ;;  %3071 = vmatmul.bf16.vlgmr.msra.gmra.mxu3 %v16489_v9  ;;  %3289 = vmatmul.bf16.vlgmr.msra.gmra.mxu0 %v16490_v16  ;;  %v3746_v42 = vrot.slane %v3744_v8, 5  ;;  %v502_v9 = vld [vmem:[%s12846_s20 + $0x2c] sm:$0x1]  ;;  %v3757_v16 = vrot.slane %v3755_v7, 4 }
 0x1ef   : > { %3571 = vmatmul.bf16.vlgmr.msra.gmra.mxu1 %v3483_v22 }
 0x1f0   : > { %4269 = vmatmul.bf16.vlgmr.msra.gmra.mxu2 %v4181_v57  ;;  %v12956_v46 = vadd.f32 %v2855_v14, %v2711_v35  ;;  %v3739_v57 = vsel %vm11429_vm3, %v3734_v48, %v3738_v13  ;;  %v500_v35 = vld [vmem:[%s12846_s20 + $0x24] sm:$0x1]  ;;  %v10914_v48 = vld [vmem:[%s15935_s3 + $0x370] sm:$0xff] }
 0x1f1   : > { %v2136_v30 = vpop.f32.mrf.mxu3  ;;  %v12971_v31 = vunpack.c.l.b16 %v3739_v57  ;;  %v3750_v7 = vshll.u32 %v500_v35, 16  ;;  %v3761_v57 = vor.u32 %v3760_v12, %v3757_v16  ;;  %5176 = vmatpush.bf16.msrb.mxu1 %v10914_v48  ;;  %v16495_v35 = vld [vmem:[#allocation17_spill] sm:$0xff] }
 0x1f2   : > { %v2192_v19 = vadd.f32 %v2136_v30, %v12589_v38  ;;  %v3743_v38 = vrot.slane %v3741_v23, 4  ;;  %v13008_v12 = vld [vmem:[%s12846_s20 + $0x38] sm:$0xf] }
 0x1f3   : > { %v2858_v10 = vpop.f32.mrf.mxu2  ;;  %v2416_v32 = vpop.f32.mrf.mxu0  ;;  %16491 = vst [vmem:[#allocation32_spill] sm:$0xff] %v12971_v31  ;;  %v12990_v21 = vpack.c.b16 %v12971_v31, %v12926_v45  ;;  %v3762_v50 = vrot.slane %v3761_v57, 4  ;;  %v504_v31 = vld [vmem:[%s12846_s20 + $0x34] sm:$0x1] }
 0x1f4   : > { %v2470_v56 = vadd.f32 %v2414_v40, %v2192_v19  ;;  %v2658_v14 = vpop.f32.mrf.mxu1  ;;  %v10922_v40 = vld [vmem:[%s15935_s3 + $0x3b0] sm:$0xff]  ;;  %v3747_v8 = vor.u32 %v3746_v42, %v3743_v38  ;;  %16498 = vst [vmem:[#allocation44_spill] sm:$0xff] %v13008_v12 }
 0x1f5   : > { %5418 = vmatpush.bf16.msrb.mxu2 %v10922_v40  ;;  %16493 = vst [vmem:[#allocation47_spill] sm:$0xff] %v12990_v21  ;;  %v16496_v40 = vld [vmem:[#allocation19_spill] sm:$0xff] }
 0x1f6   : > { %v2712_v22 = vadd.f32 %v2656_v49, %v2470_v56  ;;  %v10906_v49 = vld [vmem:[%s15935_s3 + $0x330] sm:$0xff]  ;;  %v12996_v56 = vpack.c.b16 %v16052_v28, %v3453_v54 }
 0x1f7   : > { %4898 = vmatpush.bf16.msrb.mxu0 %v10906_v49  ;;  %v3748_v49 = vrot.slane %v3747_v8, 4  ;;  %v13014_v8 = vld [vmem:[%s11378_s18 + $0x48] sm:$0xf] }
 0x1f8   : > { %v12976_v30 = vadd.f32 %v2858_v10, %v2712_v22  ;;  %16494 = vst [vmem:[#allocation30_spill] sm:$0xff] %v12996_v56  ;;  %v3764_v22 = vshll.u32 %v502_v9, 16  ;;  %v13005_v9 = vld [vmem:[%s12846_s20 + $0x30] sm:$0xf]  ;;  %v2934_v57 = vshll.u32 %v13014_v8, 16 }
 0x1f9   : > { %v2138_v13 = vpop.f32.mrf.mxu3 }
 0x1fa   : > { %16492 = vst [vmem:[#allocation41_spill] sm:$0xff] %v12976_v30  ;;  %v2193_v19 = vadd.f32 %v2138_v13, %v12609_v1  ;;  %v3752_v13 = vrot.slane %v3750_v7, 5  ;;  %v3766_v54 = vrot.slane %v3764_v22, 5  ;;  %v2931_v7 = vshrl.u32 %v13014_v8, 16 }
 0x1fb   : > { %v2860_v23 = vpop.f32.mrf.mxu2  ;;  %v2419_v10 = vpop.f32.mrf.mxu0  ;;  %v2936_v43 = vrot.slane %v2934_v57, 5 }
 0x1fc   : > { %v2471_v1 = vadd.f32 %v2416_v32, %v2193_v19  ;;  %v2661_v38 = vpop.f32.mrf.mxu1  ;;  %v3753_v19 = vsel %vm11429_vm3, %v3748_v49, %v3752_v13  ;;  %v3767_v22 = vsel %vm11429_vm3, %v3762_v50, %v3766_v54  ;;  %v3786_v49 = vshll.u32 %v13008_v12, 16 }
 0x1fd   : > { %v13024_v13 = vunpack.c.l.b16 %v3753_v19  ;;  %v13026_v28 = vunpack.c.l.b16 %v3767_v22  ;;  %v2933_v5 = vrot.slane %v2931_v7, 4  ;;  %v16060_v54 = vunpack.c.l.b16 %v12959_v2  ;;  %v506_v19 = vld [vmem:[%s12846_s20 + $0x3c] sm:$0x1] }
 0x1fe   : > { %v2713_v42 = vadd.f32 %v2658_v14, %v2471_v1  ;;  %3076 = vmatmul.bf16.gmra.mxu3 %v16495_v35  ;;  %3294 = vmatmul.bf16.gmra.mxu0 %v16496_v40  ;;  %v3769_v1 = vshrl.u32 %v13005_v9, 16  ;;  %v3783_v40 = vshrl.u32 %v13008_v12, 16 }
 0x1ff   : > { %3576 = vmatmul.bf16.gmra.mxu1 %v12996_v56  ;;  %16499 = vst [vmem:[#allocation52_spill] sm:$0xff] %v13024_v13  ;;  %v13038_v50 = vpack.c.b16 %v13026_v28, %v13024_v13 }
 0x200   : > { %4274 = vmatmul.bf16.gmra.mxu2 %v12990_v21  ;;  %v13002_v16 = vadd.f32 %v2860_v23, %v2713_v42  ;;  %v3772_v42 = vshll.u32 %v13005_v9, 16  ;;  %16500 = vst [vmem:[#allocation42_spill] sm:$0xff] %v13026_v28  ;;  %v430_v21 = vld [vmem:[%s11378_s18 + $0x4c] sm:$0x1]  ;;  %v3771_v56 = vrot.slane %v3769_v1, 4  ;;  %v3785_v51 = vrot.slane %v3783_v40, 4 }
 0x201   : > { %v2141_v32 = vpop.f32.mrf.mxu3  ;;  %v2940_v7 = vshll.u32 %v430_v21, 16  ;;  %16502 = vst [vmem:[#allocation56_spill] sm:$0xff] %v13038_v50  ;;  %v16503_v1 = vunpack.c.l.b16 %v12954_v26  ;;  %v3778_v40 = vshll.u32 %v504_v31, 16  ;;  %v3190_v31 = vrot.slane %v430_v21, 5 }
 0x202   : > { %16497 = vst [vmem:[#allocation39_spill] sm:$0xff] %v13002_v16  ;;  %v2194_v14 = vadd.f32 %v2141_v32, %v12620_v60  ;;  %v3788_v16 = vrot.slane %v3786_v49, 5 }
 0x203   : > { %v2863_v48 = vpop.f32.mrf.mxu2  ;;  %v2421_v23 = vpop.f32.mrf.mxu0  ;;  %v2942_v13 = vrot.slane %v2940_v7, 5  ;;  %v13060_v7 = vld [vmem:[%s12846_s20 + $0x58] sm:$0xf] }
 0x204   : > { %v2472_v60 = vadd.f32 %v2419_v10, %v2194_v14  ;;  %v2663_v35 = vpop.f32.mrf.mxu1  ;;  %v3774_v10 = vrot.slane %v3772_v42, 5  ;;  %16507 = vst [vmem:[#allocation53_spill] sm:$0xff] %v13060_v7 }
 0x206   : > { %v2714_v32 = vadd.f32 %v2661_v38, %v2472_v60  ;;  %v2937_v60 = vor.u32 %v2936_v43, %v2933_v5  ;;  %v3775_v42 = vor.u32 %v3774_v10, %v3771_v56  ;;  %v16505_v5 = vld [vmem:[#allocation22_spill] sm:$0xff]  ;;  %v9806_v56 = vrot.slane %v13014_v8, 9 }
 0x207   : > { %v3780_v10 = vrot.slane %v3778_v40, 5 }
 0x208   : > { %v13031_v14 = vadd.f32 %v2863_v48, %v2714_v32  ;;  %v13044_v48 = vpack.c.b16 %v16060_v54, %v16503_v1  ;;  %v2938_v28 = vrot.slane %v2937_v60, 4 }
 0x209   : > { %v2143_v30 = vpop.f32.mrf.mxu3 }
 0x20a   : > { %16501 = vst [vmem:[#allocation50_spill] sm:$0xff] %v13031_v14  ;;  %v2195_v38 = vadd.f32 %v2143_v30, %v12632_v59  ;;  %v3789_v14 = vor.u32 %v3788_v16, %v3785_v51  ;;  %v3792_v59 = vshll.u32 %v506_v19, 16  ;;  %v16506_v30 = vld [vmem:[#allocation24_spill] sm:$0xff]  ;;  %v2943_v21 = vsel %vm11429_vm3, %v2938_v28, %v2942_v13 }
 0x20b   : > { %v2865_v22 = vpop.f32.mrf.mxu2  ;;  %v2424_v57 = vpop.f32.mrf.mxu0  ;;  %16504 = vst [vmem:[#allocation40_spill] sm:$0xff] %v13044_v48  ;;  %v13054_v19 = vld [vmem:[%s12846_s20 + $0x50] sm:$0xf]  ;;  %v3814_v28 = vshll.u32 %v13060_v7, 16  ;;  %v3003_v13 = vunpack.c.l.b16 %v2943_v21  ;;  %v10905_v21 = vld [vmem:[%s15935_s3 + $0x328] sm:$0xff] }
 0x20c   : > { %v2473_v49 = vadd.f32 %v2421_v23, %v2195_v38  ;;  %v2666_v32 = vpop.f32.mrf.mxu1  ;;  %v3776_v23 = vrot.slane %v3775_v42, 4  ;;  %v3790_v16 = vrot.slane %v3789_v14, 4  ;;  %v10897_v38 = vld [vmem:[%s15935_s3 + $0x2e8] sm:$0xff]  ;;  %v3191_v14 = vsel %vm11461_vm5, %v9806_v56, %v3190_v31  ;;  %4899 = vmatpush.bf16.msrb.mxu0 %v10905_v21 }
 0x20d   : > { %4673 = vmatpush.bf16.msrb.mxu3 %v10897_v38  ;;  %v3797_v42 = vshrl.u32 %v13054_v19, 16  ;;  %v3800_v40 = vshll.u32 %v13054_v19, 16  ;;  %v3221_v56 = vunpack.c.l.b16 %v3191_v14  ;;  %v10913_v14 = vld [vmem:[%s15935_s3 + $0x368] sm:$0xff] }
 0x20e   : > { %v2715_v43 = vadd.f32 %v2663_v35, %v2473_v49  ;;  %3081 = vmatmul.bf16.gmra.mxu3 %v16505_v5  ;;  %3299 = vmatmul.bf16.gmra.mxu0 %v16506_v30  ;;  %v3794_v35 = vrot.slane %v3792_v59, 5  ;;  %v3811_v5 = vshrl.u32 %v13060_v7, 16 }
 0x20f   : > { %3581 = vmatmul.bf16.gmra.mxu1 %v13044_v48  ;;  %v3799_v38 = vrot.slane %v3797_v42, 4  ;;  %v514_v42 = vld [vmem:[%s12846_s20 + $0x5c] sm:$0x1]  ;;  %v16516_v48 = vunpack.c.l.b16 %v13008_v12  ;;  %v13114_v12 = vld [vmem:[%s12846_s20 + $0x68] sm:$0xf] }
 0x210   : > { %4279 = vmatmul.bf16.gmra.mxu2 %v13038_v50  ;;  %v13051_v51 = vadd.f32 %v2865_v22, %v2715_v43  ;;  %v3781_v22 = vsel %vm11429_vm3, %v3776_v23, %v3780_v10  ;;  %v16515_v50 = vunpack.c.l.b16 %v13005_v9  ;;  %5177 = vmatpush.bf16.msrb.mxu1 %v10913_v14  ;;  %16519 = vst [vmem:[#allocation69_spill] sm:$0xff] %v13114_v12  ;;  %v3839_v14 = vshrl.u32 %v13114_v12, 16 }
 0x211   : > { %v2146_v60 = vpop.f32.mrf.mxu3  ;;  %v13075_v31 = vunpack.c.l.b16 %v3781_v22 }
 0x212   : > { %v2196_v1 = vadd.f32 %v2146_v60, %v12645_v52  ;;  %v3795_v52 = vsel %vm11429_vm3, %v3790_v16, %v3794_v35  ;;  %v3802_v60 = vrot.slane %v3800_v40, 5  ;;  %v3813_v35 = vrot.slane %v3811_v5, 4 }
 0x213   : > { %v2868_v49 = vpop.f32.mrf.mxu2  ;;  %v2426_v8 = vpop.f32.mrf.mxu0  ;;  %16508 = vst [vmem:[#allocation51_spill] sm:$0xff] %v13075_v31  ;;  %v13078_v10 = vunpack.c.l.b16 %v3795_v52  ;;  %v16511_v52 = vld [vmem:[#allocation85_spill] sm:$0xff] }
 0x214   : > { %v2474_v59 = vadd.f32 %v2424_v57, %v2196_v1  ;;  %v2668_v43 = vpop.f32.mrf.mxu1  ;;  %v3816_v1 = vrot.slane %v3814_v28, 5  ;;  %v3007_v5 = vpack.c.b16 %v3003_v13, %v16511_v52  ;;  %v16512_v28 = vld [vmem:[#allocation84_spill] sm:$0xff] }
 0x215   : > { %16509 = vst [vmem:[#allocation49_spill] sm:$0xff] %v13078_v10  ;;  %v13100_v23 = vpack.c.b16 %v13078_v10, %v13075_v31  ;;  %v16544_v31 = vld [vmem:[#allocation54_spill] sm:$0xff] }
 0x216   : > { %v2716_v30 = vadd.f32 %v2666_v32, %v2474_v59  ;;  %v10921_v32 = vld [vmem:[%s15935_s3 + $0x3a8] sm:$0xff]  ;;  %v512_v59 = vld [vmem:[%s12846_s20 + $0x54] sm:$0x1] }
 0x217   : > { %5419 = vmatpush.bf16.msrb.mxu2 %v10921_v32  ;;  %16514 = vst [vmem:[#allocation60_spill] sm:$0xff] %v13100_v23  ;;  %v3820_v32 = vshll.u32 %v514_v42, 16 }
 0x218   : > { %v13081_v16 = vadd.f32 %v2868_v49, %v2716_v30  ;;  %v16513_v30 = vunpack.c.l.b16 %v16512_v28  ;;  %v3817_v28 = vor.u32 %v3816_v1, %v3813_v35 }
 0x219   : > { %v2148_v22 = vpop.f32.mrf.mxu3 }
 0x21a   : > { %16510 = vst [vmem:[#allocation61_spill] sm:$0xff] %v13081_v16  ;;  %v2197_v49 = vadd.f32 %v2148_v22, %v12673_v3  ;;  %v3225_v54 = vpack.c.b16 %v3221_v56, %v16513_v30  ;;  %v13106_v3 = vpack.c.b16 %v16516_v48, %v16515_v50  ;;  %v3803_v22 = vor.u32 %v3802_v60, %v3799_v38  ;;  %v13109_v30 = vld [vmem:[%s12846_s20 + $0x60] sm:$0xf] }
 0x21b   : > { %v2870_v40 = vpop.f32.mrf.mxu2  ;;  %v2429_v57 = vpop.f32.mrf.mxu0  ;;  %v3806_v56 = vshll.u32 %v512_v59, 16  ;;  %16518 = vst [vmem:[#allocation63_spill] sm:$0xff] %v13109_v30  ;;  %v3822_v38 = vrot.slane %v3820_v32, 5  ;;  %v3842_v59 = vshll.u32 %v13114_v12, 16  ;;  %v516_v32 = vld [vmem:[%s12846_s20 + $0x64] sm:$0x1] }
 0x21c   : > { %16517 = vst [vmem:[#allocation70_spill] sm:$0xff] %v13106_v3  ;;  %v2475_v13 = vadd.f32 %v2426_v8, %v2197_v49  ;;  %v2671_v52 = vpop.f32.mrf.mxu1  ;;  %v3804_v10 = vrot.slane %v3803_v22, 4  ;;  %v3818_v8 = vrot.slane %v3817_v28, 4  ;;  %v3834_v16 = vshll.u32 %v516_v32, 16  ;;  %v13142_v32 = vld [vmem:[%s12846_s20 + $0x70] sm:$0xf] }
 0x21d   : > { %v3808_v48 = vrot.slane %v3806_v56, 5 }
 0x21e   : > { %v2717_v21 = vadd.f32 %v2668_v43, %v2475_v13  ;;  %3086 = vmatmul.bf16.gmra.mxu3 %v3007_v5  ;;  %3304 = vmatmul.bf16.gmra.mxu0 %v3225_v54  ;;  %v3825_v43 = vshrl.u32 %v13109_v30, 16  ;;  %v3828_v54 = vshll.u32 %v13109_v30, 16  ;;  %v3823_v22 = vsel %vm11429_vm3, %v3818_v8, %v3822_v38 }
 0x21f   : > { %3586 = vmatmul.bf16.gmra.mxu1 %v13106_v3  ;;  %v3809_v5 = vsel %vm11429_vm3, %v3804_v10, %v3808_v48  ;;  %v3459_v3 = vunpack.c.l.b16 %v13054_v19 }
 0x220   : > { %4284 = vmatmul.bf16.gmra.mxu2 %v13100_v23  ;;  %v13116_v50 = vadd.f32 %v2870_v40, %v2717_v21  ;;  %v3827_v13 = vrot.slane %v3825_v43, 4  ;;  %v3830_v56 = vrot.slane %v3828_v54, 5  ;;  %v3844_v21 = vrot.slane %v3842_v59, 5 }
 0x221   : > { %v2151_v60 = vpop.f32.mrf.mxu3  ;;  %v13128_v23 = vunpack.c.l.b16 %v3823_v22 }
 0x222   : > { %16520 = vst [vmem:[#allocation58_spill] sm:$0xff] %v13116_v50  ;;  %v2198_v35 = vadd.f32 %v2151_v60, %v12682_v20  ;;  %v3841_v20 = vrot.slane %v3839_v14, 4  ;;  %v4157_v60 = vunpack.c.l.b16 %v3809_v5  ;;  %v3831_v48 = vor.u32 %v3830_v56, %v3827_v13  ;;  %v16523_v13 = vld [vmem:[#allocation35_spill] sm:$0xff]  ;;  %v16524_v56 = vld [vmem:[#allocation38_spill] sm:$0xff] }
 0x223   : > { %v2873_v1 = vpop.f32.mrf.mxu2  ;;  %v2431_v42 = vpop.f32.mrf.mxu0  ;;  %16521 = vst [vmem:[#allocation66_spill] sm:$0xff] %v13128_v23  ;;  %v3836_v5 = vrot.slane %v3834_v16, 5 }
 0x224   : > { %v2476_v49 = vadd.f32 %v2429_v57, %v2198_v35  ;;  %v2673_v40 = vpop.f32.mrf.mxu1  ;;  %v16067_v57 = vunpack.c.l.b16 %v13060_v7  ;;  %v518_v35 = vld [vmem:[%s12846_s20 + $0x6c] sm:$0x1]  ;;  %v4185_v14 = vpack.c.b16 %v13128_v23, %v4157_v60 }
 0x225   : > { %v3848_v43 = vshll.u32 %v518_v35, 16 }
 0x226   : > { %v2718_v28 = vadd.f32 %v2671_v52, %v2476_v49  ;;  %v3845_v52 = vor.u32 %v3844_v21, %v3841_v20  ;;  %v3487_v19 = vpack.c.b16 %v16067_v57, %v3459_v3  ;;  %v13147_v21 = vld [vmem:[%s12846_s20 + $0x78] sm:$0xf]  ;;  %v10896_v3 = vld [vmem:[%s15935_s3 + $0x2e0] sm:$0xff] }
 0x227   : > { %16526 = vst [vmem:[#allocation74_spill] sm:$0xff] %v13147_v21  ;;  %4674 = vmatpush.bf16.msrb.mxu3 %v10896_v3  ;;  %v522_v3 = vld [vmem:[%s12846_s20 + $0x7c] sm:$0x1] }
 0x228   : > { %v13133_v50 = vadd.f32 %v2873_v1, %v2718_v28  ;;  %v3832_v1 = vrot.slane %v3831_v48, 4  ;;  %v3850_v28 = vrot.slane %v3848_v43, 5  ;;  %v3853_v48 = vshrl.u32 %v13142_v32, 16 }
 0x229   : > { %v2153_v10 = vpop.f32.mrf.mxu3  ;;  %v3870_v43 = vshll.u32 %v13147_v21, 16  ;;  %v3876_v23 = vshll.u32 %v522_v3, 16  ;;  %v13198_v3 = vld [vmem:[%s12846_s20 + $0x80] sm:$0xf] }
 0x22a   : > { %16522 = vst [vmem:[#allocation75_spill] sm:$0xff] %v13133_v50  ;;  %v2199_v8 = vadd.f32 %v2153_v10, %v12693_v61  ;;  %v3846_v61 = vrot.slane %v3845_v52, 4  ;;  %v3867_v52 = vshrl.u32 %v13147_v21, 16 }
 0x22b   : > { %v2875_v38 = vpop.f32.mrf.mxu2  ;;  %v2434_v54 = vpop.f32.mrf.mxu0 }
 0x22c   : > { %v2477_v59 = vadd.f32 %v2431_v42, %v2199_v8  ;;  %v2676_v49 = vpop.f32.mrf.mxu1  ;;  %v3837_v42 = vsel %vm11429_vm3, %v3832_v1, %v3836_v5  ;;  %v3851_v10 = vsel %vm11429_vm3, %v3846_v61, %v3850_v28  ;;  %v3856_v8 = vshll.u32 %v13142_v32, 16  ;;  %v520_v28 = vld [vmem:[%s12846_s20 + $0x74] sm:$0x1] }
 0x22d   : > { %v13163_v1 = vunpack.c.l.b16 %v3851_v10  ;;  %v16073_v5 = vunpack.c.l.b16 %v13109_v30  ;;  %v16531_v10 = vld [vmem:[#allocation28_spill] sm:$0xff] }
 0x22e   : > { %v2719_v22 = vadd.f32 %v2673_v40, %v2477_v59  ;;  %3091 = vmatmul.bf16.gmra.mxu3 %v16523_v13  ;;  %3309 = vmatmul.bf16.gmra.mxu0 %v16524_v56  ;;  %v16527_v40 = vld [vmem:[#allocation25_spill] sm:$0xff]  ;;  %v13161_v59 = vunpack.c.l.b16 %v3837_v42  ;;  %v16072_v13 = vunpack.c.l.b16 %v13114_v12  ;;  %v3855_v56 = vrot.slane %v3853_v48, 4  ;;  %v10904_v42 = vld [vmem:[%s15935_s3 + $0x320] sm:$0xff]  ;;  %v16535_v30 = vld [vmem:[#allocation48_spill] sm:$0xff] }
 0x22f   : > { %3591 = vmatmul.bf16.gmra.mxu1 %v3487_v19  ;;  %16529 = vst [vmem:[#allocation2_spill] sm:$0xff] %v13163_v1  ;;  %v3858_v61 = vrot.slane %v3856_v8, 5  ;;  %4900 = vmatpush.bf16.msrb.mxu0 %v10904_v42  ;;  %v16537_v42 = vld [vmem:[#allocation33_spill] sm:$0xff] }
 0x230   : > { %4289 = vmatmul.bf16.gmra.mxu2 %v4185_v14  ;;  %v13144_v20 = vadd.f32 %v2875_v38, %v2719_v22  ;;  %16528 = vst [vmem:[#allocation76_spill] sm:$0xff] %v13161_v59 }
 0x231   : > { %v2156_v16 = vpop.f32.mrf.mxu3 }
 0x232   : > { %16525 = vst [vmem:[#allocation65_spill] sm:$0xff] %v13144_v20  ;;  %v2200_v60 = vadd.f32 %v2156_v16, %v16527_v40  ;;  %v3869_v16 = vrot.slane %v3867_v52, 4  ;;  %v3872_v40 = vrot.slane %v3870_v43, 5  ;;  %v13189_v52 = vpack.c.b16 %v16072_v13, %v16073_v5 }
 0x233   : > { %v2878_v35 = vpop.f32.mrf.mxu2  ;;  %v2436_v38 = vpop.f32.mrf.mxu0 }
 0x234   : > { %v2478_v14 = vadd.f32 %v2434_v54, %v2200_v60  ;;  %v2678_v19 = vpop.f32.mrf.mxu1  ;;  %v10920_v54 = vld [vmem:[%s15935_s3 + $0x3a0] sm:$0xff]  ;;  %16533 = vst [vmem:[#allocation7_spill] sm:$0xff] %v13189_v52 }
 0x235   : > { %5420 = vmatpush.bf16.msrb.mxu2 %v10920_v54 }
 0x236   : > { %v2720_v22 = vadd.f32 %v2676_v49, %v2478_v14  ;;  %v10912_v49 = vld [vmem:[%s15935_s3 + $0x360] sm:$0xff]  ;;  %v3859_v14 = vor.u32 %v3858_v61, %v3855_v56 }
 0x237   : > { %5178 = vmatpush.bf16.msrb.mxu1 %v10912_v49 }
 0x238   : > { %v13169_v57 = vadd.f32 %v2878_v35, %v2720_v22  ;;  %v13183_v35 = vpack.c.b16 %v13163_v1, %v13161_v59  ;;  %v3862_v22 = vshll.u32 %v520_v28, 16  ;;  %v16534_v59 = vld [vmem:[#allocation45_spill] sm:$0xff]  ;;  %v3860_v54 = vrot.slane %v3859_v14, 4 }
 0x239   : > { %v2158_v60 = vpop.f32.mrf.mxu3  ;;  %v3878_v28 = vrot.slane %v3876_v23, 5 }
 0x23a   : > { %16530 = vst [vmem:[#allocation3_spill] sm:$0xff] %v13169_v57  ;;  %v2201_v48 = vadd.f32 %v2158_v60, %v16531_v10  ;;  %v3873_v57 = vor.u32 %v3872_v40, %v3869_v16  ;;  %v3864_v56 = vrot.slane %v3862_v22, 5  ;;  %v13201_v40 = vld [vmem:[%s11378_s18 + $0x98] sm:$0xf] }
 0x23b   : > { %v2880_v8 = vpop.f32.mrf.mxu2  ;;  %16532 = vst [vmem:[#allocation4_spill] sm:$0xff] %v13183_v35  ;;  %v2439_v43 = vpop.f32.mrf.mxu0 }
 0x23c   : > { %v2479_v60 = vadd.f32 %v2436_v38, %v2201_v48  ;;  %v2681_v10 = vpop.f32.mrf.mxu1  ;;  %v3874_v61 = vrot.slane %v3873_v57, 4  ;;  %v3865_v23 = vsel %vm11429_vm3, %v3860_v54, %v3864_v56  ;;  %v450_v56 = vld [vmem:[%s11378_s18 + $0x9c] sm:$0x1] }
 0x23d   : > { %v2954_v50 = vshll.u32 %v450_v56, 16 }
 0x23e   : > { %v2721_v1 = vadd.f32 %v2678_v19, %v2479_v60  ;;  %3096 = vmatmul.bf16.gmra.mxu3 %v16534_v59  ;;  %3314 = vmatmul.bf16.gmra.mxu0 %v16535_v30  ;;  %v2945_v19 = vshrl.u32 %v13201_v40, 16  ;;  %v2948_v59 = vshll.u32 %v13201_v40, 16  ;;  %v13206_v30 = vld [vmem:[%s12846_s20 + $0x88] sm:$0xf]  ;;  %v3879_v57 = vsel %vm11429_vm3, %v3874_v61, %v3878_v28 }
 0x23f   : > { %3596 = vmatmul.bf16.gmra.mxu1 %v13189_v52  ;;  %v3895_v13 = vshrl.u32 %v13206_v30, 16  ;;  %v13217_v52 = vunpack.c.l.b16 %v3865_v23  ;;  %v13219_v54 = vunpack.c.l.b16 %v3879_v57  ;;  %v16082_v28 = vunpack.c.l.b16 %v13147_v21 }
 0x240   : > { %4294 = vmatmul.bf16.gmra.mxu2 %v13183_v35  ;;  %v13195_v16 = vadd.f32 %v2880_v8, %v2721_v1  ;;  %v3881_v1 = vshrl.u32 %v13198_v3, 16  ;;  %v3884_v8 = vshll.u32 %v13198_v3, 16  ;;  %v2950_v5 = vrot.slane %v2948_v59, 5 }
 0x241   : > { %v2161_v38 = vpop.f32.mrf.mxu3  ;;  %16538 = vst [vmem:[#allocation62_spill] sm:$0xff] %v13217_v52  ;;  %v3897_v7 = vrot.slane %v3895_v13, 4  ;;  %v13231_v61 = vpack.c.b16 %v13219_v54, %v13217_v52  ;;  %v9807_v52 = vrot.slane %v13201_v40, 9  ;;  %v3194_v21 = vrot.slane %v450_v56, 5 }
 0x242   : > { %16536 = vst [vmem:[#allocation59_spill] sm:$0xff] %v13195_v16  ;;  %v2202_v49 = vadd.f32 %v2161_v38, %v16537_v42  ;;  %v3898_v38 = vshll.u32 %v13206_v30, 16  ;;  %v2947_v42 = vrot.slane %v2945_v19, 4  ;;  %v3883_v12 = vrot.slane %v3881_v1, 4  ;;  %v524_v16 = vld [vmem:[%s12846_s20 + $0x84] sm:$0x1] }
 0x243   : > { %v2883_v48 = vpop.f32.mrf.mxu2  ;;  %v2441_v14 = vpop.f32.mrf.mxu0  ;;  %16539 = vst [vmem:[#allocation37_spill] sm:$0xff] %v13219_v54  ;;  %v16542_v1 = vunpack.c.l.b16 %v13142_v32  ;;  %v16545_v54 = vld [vmem:[#allocation57_spill] sm:$0xff] }
 0x244   : > { %v2480_v22 = vadd.f32 %v2439_v43, %v2202_v49  ;;  %v2683_v60 = vpop.f32.mrf.mxu1  ;;  %v3886_v43 = vrot.slane %v3884_v8, 5  ;;  %v3900_v20 = vrot.slane %v3898_v38, 5  ;;  %v2951_v59 = vor.u32 %v2950_v5, %v2947_v42  ;;  %16541 = vst [vmem:[#allocation6_spill] sm:$0xff] %v13231_v61 }
 0x246   : > { %v2722_v35 = vadd.f32 %v2681_v10, %v2480_v22  ;;  %v526_v10 = vld [vmem:[%s12846_s20 + $0x8c] sm:$0x1]  ;;  %v3887_v13 = vor.u32 %v3886_v43, %v3883_v12  ;;  %v3901_v38 = vor.u32 %v3900_v20, %v3897_v7 }
 0x247   : > { %v3904_v42 = vshll.u32 %v526_v10, 16 }
 0x248   : > { %v13224_v49 = vadd.f32 %v2883_v48, %v2722_v35  ;;  %v13237_v35 = vpack.c.b16 %v16082_v28, %v16542_v1  ;;  %v3890_v48 = vshll.u32 %v524_v16, 16  ;;  %v3888_v12 = vrot.slane %v3887_v13, 4  ;;  %v534_v28 = vld [vmem:[%s12846_s20 + $0xac] sm:$0x1] }
 0x249   : > { %v2163_v19 = vpop.f32.mrf.mxu3  ;;  %v3902_v20 = vrot.slane %v3901_v38, 4  ;;  %v16085_v38 = vunpack.c.l.b16 %v13198_v3 }
 0x24a   : > { %16540 = vst [vmem:[#allocation5_spill] sm:$0xff] %v13224_v49  ;;  %v2203_v23 = vadd.f32 %v2163_v19, %v12624_v44  ;;  %v2952_v44 = vrot.slane %v2951_v59, 4  ;;  %v2956_v19 = vrot.slane %v2954_v50, 5  ;;  %v3892_v16 = vrot.slane %v3890_v48, 5 }
 0x24b   : > { %v2885_v57 = vpop.f32.mrf.mxu2  ;;  %v2444_v22 = vpop.f32.mrf.mxu0  ;;  %16543 = vst [vmem:[#allocation9_spill] sm:$0xff] %v13237_v35  ;;  %v3906_v50 = vrot.slane %v3904_v42, 5  ;;  %v3195_v59 = vsel %vm11461_vm5, %v9807_v52, %v3194_v21 }
 0x24c   : > { %v2481_v5 = vadd.f32 %v2441_v14, %v2203_v23  ;;  %v2686_v8 = vpop.f32.mrf.mxu1  ;;  %v13245_v14 = vld [vmem:[%s12846_s20 + $0xa0] sm:$0xf] }
 0x24d   : > { %v3912_v10 = vshll.u32 %v13245_v14, 16  ;;  %v3907_v21 = vsel %vm11429_vm3, %v3902_v20, %v3906_v50  ;;  %v10919_v20 = vld [vmem:[%s15935_s3 + $0x398] sm:$0xff] }
 0x24e   : > { %v2723_v49 = vadd.f32 %v2683_v60, %v2481_v5  ;;  %3101 = vmatmul.bf16.gmra.mxu3 %v16544_v31  ;;  %3319 = vmatmul.bf16.gmra.mxu0 %v16545_v54  ;;  %v13250_v60 = vld [vmem:[%s12846_s20 + $0xa8] sm:$0xf]  ;;  %v10895_v31 = vld [vmem:[%s15935_s3 + $0x2d8] sm:$0xff]  ;;  %v2957_v54 = vsel %vm11429_vm3, %v2952_v44, %v2956_v19  ;;  %v3222_v5 = vunpack.c.l.b16 %v3195_v59 }
 0x24f   : > { %3601 = vmatmul.bf16.gmra.mxu1 %v13237_v35  ;;  %16546 = vst [vmem:[#allocation15_spill] sm:$0xff] %v13250_v60  ;;  %4675 = vmatpush.bf16.msrb.mxu3 %v10895_v31  ;;  %v3923_v1 = vshrl.u32 %v13250_v60, 16  ;;  %v3926_v13 = vshll.u32 %v13250_v60, 16  ;;  %v3004_v52 = vunpack.c.l.b16 %v2957_v54  ;;  %v3914_v31 = vrot.slane %v3912_v10, 5  ;;  %v10911_v50 = vld [vmem:[%s15935_s3 + $0x358] sm:$0xff]  ;;  %v16555_v35 = vld [vmem:[#allocation71_spill] sm:$0xff] }
 0x250   : > { %4299 = vmatmul.bf16.gmra.mxu2 %v13231_v61  ;;  %v13247_v7 = vadd.f32 %v2885_v57, %v2723_v49  ;;  %v3909_v49 = vshrl.u32 %v13245_v14, 16  ;;  %v3893_v57 = vsel %vm11429_vm3, %v3888_v12, %v3892_v16  ;;  %v13271_v12 = vunpack.c.l.b16 %v3907_v21  ;;  %5179 = vmatpush.bf16.msrb.mxu1 %v10911_v50 }
 0x251   : > { %v2166_v40 = vpop.f32.mrf.mxu3  ;;  %v13269_v44 = vunpack.c.l.b16 %v3893_v57  ;;  %v16084_v16 = vunpack.c.l.b16 %v13206_v30  ;;  %v3008_v59 = vpack.c.b16 %v3004_v52, %v12654_v58  ;;  %5421 = vmatpush.bf16.msrb.mxu2 %v10919_v20 }
 0x252   : > { %v2204_v56 = vadd.f32 %v2166_v40, %v12643_v27  ;;  %v3911_v19 = vrot.slane %v3909_v49, 4  ;;  %v532_v40 = vld [vmem:[%s12846_s20 + $0xa4] sm:$0x1] }
 0x253   : > { %v2888_v43 = vpop.f32.mrf.mxu2  ;;  %v2446_v23 = vpop.f32.mrf.mxu0  ;;  %v13293_v21 = vpack.c.b16 %v13271_v12, %v13269_v44  ;;  %v13299_v58 = vpack.c.b16 %v16084_v16, %v16085_v38  ;;  %v538_v38 = vld [vmem:[%s12846_s20 + $0xbc] sm:$0x1] }
 0x254   : > { %v2482_v27 = vadd.f32 %v2444_v22, %v2204_v56  ;;  %v2688_v48 = vpop.f32.mrf.mxu1  ;;  %v3925_v22 = vrot.slane %v3923_v1, 4  ;;  %v3928_v56 = vrot.slane %v3926_v13, 5  ;;  %v3915_v1 = vor.u32 %v3914_v31, %v3911_v19 }
 0x255   : > { %v3918_v13 = vshll.u32 %v532_v40, 16  ;;  %16548 = vst [vmem:[#allocation64_spill] sm:$0xff] %v13293_v21 }
 0x256   : > { %v2724_v42 = vadd.f32 %v2686_v8, %v2482_v27  ;;  %v10903_v8 = vld [vmem:[%s15935_s3 + $0x318] sm:$0xff]  ;;  %16549 = vst [vmem:[#allocation72_spill] sm:$0xff] %v13299_v58  ;;  %v3916_v19 = vrot.slane %v3915_v1, 4 }
 0x257   : > { %4901 = vmatpush.bf16.msrb.mxu0 %v10903_v8  ;;  %v3920_v31 = vrot.slane %v3918_v13, 5  ;;  %v13304_v8 = vld [vmem:[%s12846_s20 + $0xb0] sm:$0xf] }
 0x258   : > { %v13276_v61 = vadd.f32 %v2888_v43, %v2724_v42  ;;  %v16547_v43 = vunpack.c.l.b16 %v12652_v39  ;;  %v3932_v39 = vshll.u32 %v534_v28, 16  ;;  %16550 = vst [vmem:[#allocation46_spill] sm:$0xff] %v13304_v8  ;;  %v3937_v50 = vshrl.u32 %v13304_v8, 16 }
 0x259   : > { %v2168_v54 = vpop.f32.mrf.mxu3 }
 0x25a   : > { %v2205_v49 = vadd.f32 %v2168_v54, %v12667_v4  ;;  %v3226_v57 = vpack.c.b16 %v3222_v5, %v16547_v43  ;;  %v3929_v4 = vor.u32 %v3928_v56, %v3925_v22  ;;  %v3934_v20 = vrot.slane %v3932_v39, 5  ;;  %v13309_v22 = vld [vmem:[%s12846_s20 + $0xb8] sm:$0xf] }
 0x25b   : > { %v2890_v10 = vpop.f32.mrf.mxu2  ;;  %v2449_v27 = vpop.f32.mrf.mxu0  ;;  %16551 = vst [vmem:[#allocation8_spill] sm:$0xff] %v13309_v22  ;;  %v3921_v56 = vsel %vm11429_vm3, %v3916_v19, %v3920_v31  ;;  %v3467_v19 = vunpack.c.l.b16 %v13245_v14  ;;  %v16089_v31 = vunpack.c.l.b16 %v13250_v60 }
 0x25c   : > { %v2483_v52 = vadd.f32 %v2446_v23, %v2205_v49  ;;  %v2691_v5 = vpop.f32.mrf.mxu1  ;;  %v3930_v40 = vrot.slane %v3929_v4, 4  ;;  %v4165_v13 = vunpack.c.l.b16 %v3921_v56 }
 0x25d   : > { %v3491_v14 = vpack.c.b16 %v16089_v31, %v3467_v19  ;;  %v13340_v19 = vld [vmem:[%s12846_s20 + $0xc8] sm:$0xf]  ;;  %v542_v31 = vld [vmem:[%s12846_s20 + $0xcc] sm:$0x1] }
 0x25e   : > { %v2725_v42 = vadd.f32 %v2688_v48, %v2483_v52  ;;  %3106 = vmatmul.bf16.gmra.mxu3 %v3008_v59  ;;  %3324 = vmatmul.bf16.gmra.mxu0 %v3226_v57  ;;  %v3940_v59 = vshll.u32 %v13304_v8, 16  ;;  %v3935_v43 = vsel %vm11429_vm3, %v3930_v40, %v3934_v20  ;;  %v3954_v57 = vshll.u32 %v13309_v22, 16 }
 0x25f   : > { %3606 = vmatmul.bf16.gmra.mxu1 %v13299_v58  ;;  %v13320_v39 = vunpack.c.l.b16 %v3935_v43  ;;  %v3939_v52 = vrot.slane %v3937_v50, 4  ;;  %v16553_v58 = vld [vmem:[#allocation27_spill] sm:$0xff] }
 0x260   : > { %4304 = vmatmul.bf16.gmra.mxu2 %v13293_v21  ;;  %v13306_v54 = vadd.f32 %v2890_v10, %v2725_v42  ;;  %v3951_v10 = vshrl.u32 %v13309_v22, 16  ;;  %v3942_v42 = vrot.slane %v3940_v59, 5  ;;  %v3956_v40 = vrot.slane %v3954_v57, 5 }
 0x261   : > { %v2171_v28 = vpop.f32.mrf.mxu3  ;;  %16552 = vst [vmem:[#allocation13_spill] sm:$0xff] %v13320_v39  ;;  %v4189_v50 = vpack.c.b16 %v13320_v39, %v4165_v13  ;;  %v13335_v13 = vld [vmem:[%s12846_s20 + $0xc0] sm:$0xf] }
 0x262   : > { %v2206_v23 = vadd.f32 %v2171_v28, %v12680_v37  ;;  %v536_v28 = vld [vmem:[%s12846_s20 + $0xb4] sm:$0x1]  ;;  %v3953_v16 = vrot.slane %v3951_v10, 4  ;;  %v3943_v56 = vor.u32 %v3942_v42, %v3939_v52  ;;  %v3960_v10 = vshll.u32 %v538_v38, 16 }
 0x263   : > { %v2893_v48 = vpop.f32.mrf.mxu2  ;;  %v2451_v49 = vpop.f32.mrf.mxu0  ;;  %v10894_v38 = vld [vmem:[%s15935_s3 + $0x2d0] sm:$0xff] }
 0x264   : > { %v2484_v1 = vadd.f32 %v2449_v27, %v2206_v23  ;;  %v2693_v37 = vpop.f32.mrf.mxu1  ;;  %v3957_v59 = vor.u32 %v3956_v40, %v3953_v16  ;;  %v3962_v42 = vrot.slane %v3960_v10, 5  ;;  %4676 = vmatpush.bf16.msrb.mxu3 %v10894_v38  ;;  %v16091_v38 = vunpack.c.l.b16 %v13309_v22  ;;  %v470_v22 = vld [vmem:[%s11378_s18 + $0xec] sm:$0x1] }
 0x266   : > { %v2726_v4 = vadd.f32 %v2691_v5, %v2484_v1  ;;  %v3946_v5 = vshll.u32 %v536_v28, 16  ;;  %v3958_v52 = vrot.slane %v3957_v59, 4 }
 0x268   : > { %v13325_v20 = vadd.f32 %v2893_v48, %v2726_v4  ;;  %v16554_v4 = vld [vmem:[#allocation67_spill] sm:$0xff] }
 0x269   : > { %v2173_v21 = vpop.f32.mrf.mxu3 }
 0x26a   : > { %v2207_v27 = vadd.f32 %v2173_v21, %v16553_v58  ;;  %v3944_v21 = vrot.slane %v3943_v56, 4  ;;  %v3948_v58 = vrot.slane %v3946_v5, 5  ;;  %v3968_v56 = vshll.u32 %v13335_v13, 16 }
 0x26b   : > { %v2895_v23 = vpop.f32.mrf.mxu2  ;;  %v3290_v43 = vpop.f32.mrf.mxu0  ;;  %v3963_v5 = vsel %vm11429_vm3, %v3958_v52, %v3962_v42 }
 0x26c   : > { %v2485_v57 = vadd.f32 %v2451_v49, %v2207_v27  ;;  %v3572_v48 = vpop.f32.mrf.mxu1  ;;  %v16557_v49 = vld [vmem:[#allocation31_spill] sm:$0xff]  ;;  %v3949_v40 = vsel %vm11429_vm3, %v3944_v21, %v3948_v58  ;;  %v3965_v27 = vshrl.u32 %v13335_v13, 16  ;;  %v3970_v58 = vrot.slane %v3968_v56, 5 }
 0x26e   : > { %v2727_v1 = vadd.f32 %v2693_v37, %v2485_v57  ;;  %3111 = vmatmul.bf16.gmra.mxu3 %v16554_v4  ;;  %3329 = vmatmul.bf16.gmra.mxu0 %v16555_v35  ;;  %v13354_v57 = vunpack.c.l.b16 %v3949_v40  ;;  %v13356_v4 = vunpack.c.l.b16 %v3963_v5  ;;  %v3967_v21 = vrot.slane %v3965_v27, 4 }
 0x26f   : > { %3611 = vmatmul.bf16.gmra.mxu1 %v3491_v14  ;;  %v3982_v14 = vshll.u32 %v13340_v19, 16 }
 0x270   : > { %4309 = vmatmul.bf16.gmra.mxu2 %v4189_v50  ;;  %v13337_v28 = vadd.f32 %v2895_v23, %v2727_v1  ;;  %v3979_v50 = vshrl.u32 %v13340_v19, 16  ;;  %16558 = vst [vmem:[#allocation20_spill] sm:$0xff] %v13354_v57  ;;  %v3971_v5 = vor.u32 %v3970_v58, %v3967_v21 }
 0x271   : > { %v3072_v16 = vpop.f32.mrf.mxu3  ;;  %16559 = vst [vmem:[#allocation73_spill] sm:$0xff] %v13356_v4  ;;  %v3984_v42 = vrot.slane %v3982_v14, 5  ;;  %v13376_v14 = vpack.c.b16 %v13356_v4, %v13354_v57  ;;  %v544_v57 = vld [vmem:[%s12846_s20 + $0xd4] sm:$0x1] }
 0x272   : > { %16556 = vst [vmem:[#allocation16_spill] sm:$0xff] %v13337_v28  ;;  %v3152_v37 = vadd.f32 %v3072_v16, %v16557_v49  ;;  %v16092_v16 = vunpack.c.l.b16 %v13304_v8  ;;  %v540_v49 = vld [vmem:[%s12846_s20 + $0xc4] sm:$0x1]  ;;  %v3981_v52 = vrot.slane %v3979_v50, 4 }
 0x273   : > { %v4270_v35 = vpop.f32.mrf.mxu2  ;;  %v3292_v23 = vpop.f32.mrf.mxu0  ;;  %v3974_v50 = vshll.u32 %v540_v49, 16  ;;  %16561 = vst [vmem:[#allocation55_spill] sm:$0xff] %v13376_v14  ;;  %v16563_v49 = vld [vmem:[#allocation77_spill] sm:$0xff] }
 0x274   : > { %v3370_v59 = vadd.f32 %v3290_v43, %v3152_v37  ;;  %v3574_v10 = vpop.f32.mrf.mxu1  ;;  %v10918_v43 = vld [vmem:[%s15935_s3 + $0x390] sm:$0xff] }
 0x275   : > { %v10910_v37 = vld [vmem:[%s15935_s3 + $0x350] sm:$0xff]  ;;  %5422 = vmatpush.bf16.msrb.mxu2 %v10918_v43  ;;  %v16564_v43 = vld [vmem:[#allocation79_spill] sm:$0xff] }
 0x276   : > { %v3652_v1 = vadd.f32 %v3572_v48, %v3370_v59  ;;  %v10902_v48 = vld [vmem:[%s15935_s3 + $0x310] sm:$0xff]  ;;  %v13382_v59 = vpack.c.b16 %v16091_v38, %v16092_v16  ;;  %5180 = vmatpush.bf16.msrb.mxu1 %v10910_v37 }
 0x277   : > { %4902 = vmatpush.bf16.msrb.mxu0 %v10902_v48  ;;  %v3972_v48 = vrot.slane %v3971_v5, 4  ;;  %v13400_v5 = vld [vmem:[%s11378_s18 + $0xe8] sm:$0xf] }
 0x278   : > { %v13362_v39 = vadd.f32 %v4270_v35, %v3652_v1  ;;  %16562 = vst [vmem:[#allocation14_spill] sm:$0xff] %v13382_v59  ;;  %v3985_v1 = vor.u32 %v3984_v42, %v3981_v52  ;;  %v13394_v42 = vld [vmem:[%s12846_s20 + $0xd8] sm:$0xf] }
 0x279   : > { %v3074_v40 = vpop.f32.mrf.mxu3  ;;  %16566 = vst [vmem:[#allocation10_spill] sm:$0xff] %v13394_v42 }
 0x27a   : > { %16560 = vst [vmem:[#allocation80_spill] sm:$0xff] %v13362_v39  ;;  %v3153_v27 = vadd.f32 %v3074_v40, %v12727_v34  ;;  %v3988_v39 = vshll.u32 %v542_v31, 16  ;;  %v3976_v40 = vrot.slane %v3974_v50, 5  ;;  %v3986_v38 = vrot.slane %v3985_v1, 4  ;;  %v13391_v31 = vld [vmem:[%s12846_s20 + $0xd0] sm:$0xf] }
 0x27b   : > { %v4272_v56 = vpop.f32.mrf.mxu2  ;;  %v3295_v35 = vpop.f32.mrf.mxu0  ;;  %v2959_v50 = vshrl.u32 %v13400_v5, 16  ;;  %v2962_v1 = vshll.u32 %v13400_v5, 16 }
 0x27c   : > { %v3371_v34 = vadd.f32 %v3292_v23, %v3153_v27  ;;  %v3577_v21 = vpop.f32.mrf.mxu1  ;;  %v3990_v16 = vrot.slane %v3988_v39, 5  ;;  %v3977_v27 = vsel %vm11429_vm3, %v3972_v48, %v3976_v40  ;;  %v4010_v48 = vshll.u32 %v13394_v42, 16 }
 0x27d   : > { %v13410_v40 = vunpack.c.l.b16 %v3977_v27  ;;  %v2964_v4 = vrot.slane %v2962_v1, 5  ;;  %v546_v27 = vld [vmem:[%s12846_s20 + $0xdc] sm:$0x1] }
 0x27e   : > { %v3653_v58 = vadd.f32 %v3574_v10, %v3371_v34  ;;  %3116 = vmatmul.bf16.gmra.mxu3 %v16563_v49  ;;  %3334 = vmatmul.bf16.gmra.mxu0 %v16564_v43  ;;  %v3993_v34 = vshrl.u32 %v13391_v31, 16  ;;  %v4007_v43 = vshrl.u32 %v13394_v42, 16  ;;  %v4012_v60 = vrot.slane %v4010_v48, 5 }
 0x27f   : > { %3616 = vmatmul.bf16.gmra.mxu1 %v13382_v59  ;;  %16567 = vst [vmem:[#allocation12_spill] sm:$0xff] %v13410_v40  ;;  %v2961_v59 = vrot.slane %v2959_v50, 4  ;;  %v2968_v50 = vshll.u32 %v470_v22, 16 }
 0x280   : > { %4314 = vmatmul.bf16.gmra.mxu2 %v13376_v14  ;;  %v13388_v52 = vadd.f32 %v4272_v56, %v3653_v58  ;;  %v3991_v56 = vsel %vm11429_vm3, %v3986_v38, %v3990_v16  ;;  %v3996_v58 = vshll.u32 %v13391_v31, 16  ;;  %v16102_v38 = vunpack.c.l.b16 %v13340_v19 }
 0x281   : > { %v3077_v23 = vpop.f32.mrf.mxu3  ;;  %v13412_v14 = vunpack.c.l.b16 %v3991_v56  ;;  %v4009_v8 = vrot.slane %v4007_v43, 4  ;;  %v4002_v43 = vshll.u32 %v544_v57, 16  ;;  %v3198_v57 = vrot.slane %v470_v22, 5 }
 0x282   : > { %16565 = vst [vmem:[#allocation21_spill] sm:$0xff] %v13388_v52  ;;  %v3154_v10 = vadd.f32 %v3077_v23, %v12735_v47  ;;  %v3995_v52 = vrot.slane %v3993_v34, 4  ;;  %v16571_v34 = vunpack.c.l.b16 %v13335_v13 }
 0x283   : > { %v4275_v37 = vpop.f32.mrf.mxu2  ;;  %v3297_v39 = vpop.f32.mrf.mxu0  ;;  %16568 = vst [vmem:[#allocation17_spill] sm:$0xff] %v13412_v14  ;;  %v13424_v16 = vpack.c.b16 %v13412_v14, %v13410_v40  ;;  %v2970_v40 = vrot.slane %v2968_v50, 5  ;;  %v13446_v50 = vld [vmem:[%s12846_s20 + $0xf8] sm:$0xf] }
 0x284   : > { %v3372_v47 = vadd.f32 %v3295_v35, %v3154_v10  ;;  %v3579_v49 = vpop.f32.mrf.mxu1  ;;  %v3998_v35 = vrot.slane %v3996_v58, 5  ;;  %16575 = vst [vmem:[#allocation85_spill] sm:$0xff] %v13446_v50 }
 0x285   : > { %16570 = vst [vmem:[#allocation22_spill] sm:$0xff] %v13424_v16 }
 0x286   : > { %v3654_v23 = vadd.f32 %v3577_v21, %v3372_v47  ;;  %v2965_v47 = vor.u32 %v2964_v4, %v2961_v59  ;;  %v3999_v58 = vor.u32 %v3998_v35, %v3995_v52  ;;  %v16573_v4 = vld [vmem:[#allocation81_spill] sm:$0xff]  ;;  %v16574_v59 = vld [vmem:[#allocation83_spill] sm:$0xff]  ;;  %v9808_v52 = vrot.slane %v13400_v5, 9 }
 0x287   : > { %v4004_v35 = vrot.slane %v4002_v43, 5 }
 0x288   : > { %v13417_v10 = vadd.f32 %v4275_v37, %v3654_v23  ;;  %v13430_v37 = vpack.c.b16 %v16102_v38, %v16571_v34  ;;  %v2966_v14 = vrot.slane %v2965_v47, 4 }
 0x289   : > { %v3079_v28 = vpop.f32.mrf.mxu3 }
 0x28a   : > { %16569 = vst [vmem:[#allocation19_spill] sm:$0xff] %v13417_v10  ;;  %v3155_v21 = vadd.f32 %v3079_v28, %v12750_v24  ;;  %v4013_v10 = vor.u32 %v4012_v60, %v4009_v8  ;;  %v4016_v24 = vshll.u32 %v546_v27, 16  ;;  %v13440_v27 = vld [vmem:[%s12846_s20 + $0xf0] sm:$0xf]  ;;  %v2971_v22 = vsel %vm11429_vm3, %v2966_v14, %v2970_v40 }
 0x28b   : > { %v4277_v56 = vpop.f32.mrf.mxu2  ;;  %v3300_v1 = vpop.f32.mrf.mxu0  ;;  %16572 = vst [vmem:[#allocation24_spill] sm:$0xff] %v13430_v37  ;;  %v4024_v43 = vshll.u32 %v13440_v27, 16  ;;  %v4038_v14 = vshll.u32 %v13446_v50, 16  ;;  %v3005_v40 = vunpack.c.l.b16 %v2971_v22  ;;  %v10901_v22 = vld [vmem:[%s15935_s3 + $0x308] sm:$0xff] }
 0x28c   : > { %v3373_v48 = vadd.f32 %v3297_v39, %v3155_v21  ;;  %v3582_v23 = vpop.f32.mrf.mxu1  ;;  %v4000_v39 = vrot.slane %v3999_v58, 4  ;;  %v4014_v8 = vrot.slane %v4013_v10, 4  ;;  %v10893_v21 = vld [vmem:[%s15935_s3 + $0x2c8] sm:$0xff]  ;;  %v3199_v10 = vsel %vm11461_vm5, %v9808_v52, %v3198_v57  ;;  %4903 = vmatpush.bf16.msrb.mxu0 %v10901_v22 }
 0x28d   : > { %4677 = vmatpush.bf16.msrb.mxu3 %v10893_v21  ;;  %v4021_v58 = vshrl.u32 %v13440_v27, 16  ;;  %v3223_v52 = vunpack.c.l.b16 %v3199_v10  ;;  %v10909_v10 = vld [vmem:[%s15935_s3 + $0x348] sm:$0xff] }
 0x28e   : > { %v3655_v28 = vadd.f32 %v3579_v49, %v3373_v48  ;;  %3121 = vmatmul.bf16.gmra.mxu3 %v16573_v4  ;;  %3339 = vmatmul.bf16.gmra.mxu0 %v16574_v59  ;;  %v4018_v49 = vrot.slane %v4016_v24, 5  ;;  %v4035_v4 = vshrl.u32 %v13446_v50, 16 }
 0x28f   : > { %3621 = vmatmul.bf16.gmra.mxu1 %v13430_v37  ;;  %v4023_v21 = vrot.slane %v4021_v58, 4  ;;  %v554_v58 = vld [vmem:[%s12846_s20 + $0xfc] sm:$0x1]  ;;  %v13500_v37 = vld [vmem:[%s12846_s20 + $0x108] sm:$0xf] }
 0x290   : > { %4319 = vmatmul.bf16.gmra.mxu2 %v13424_v16  ;;  %v13437_v60 = vadd.f32 %v4277_v56, %v3655_v28  ;;  %v4005_v56 = vsel %vm11429_vm3, %v4000_v39, %v4004_v35  ;;  %v16106_v39 = vunpack.c.l.b16 %v13391_v31  ;;  %5181 = vmatpush.bf16.msrb.mxu1 %v10909_v10  ;;  %16581 = vst [vmem:[#allocation28_spill] sm:$0xff] %v13500_v37 }
 0x291   : > { %v3082_v47 = vpop.f32.mrf.mxu3  ;;  %v13461_v57 = vunpack.c.l.b16 %v4005_v56 }
 0x292   : > { %v3156_v34 = vadd.f32 %v3082_v47, %v12768_v18  ;;  %v4019_v18 = vsel %vm11429_vm3, %v4014_v8, %v4018_v49  ;;  %v4026_v47 = vrot.slane %v4024_v43, 5  ;;  %v4037_v49 = vrot.slane %v4035_v4, 4 }
 0x293   : > { %v4280_v48 = vpop.f32.mrf.mxu2  ;;  %v3302_v5 = vpop.f32.mrf.mxu0  ;;  %v13464_v35 = vunpack.c.l.b16 %v4019_v18  ;;  %v3009_v18 = vpack.c.b16 %v3005_v40, %v12765_v62  ;;  %v16577_v4 = vunpack.c.l.b16 %v12762_v17 }
 0x294   : > { %v3374_v24 = vadd.f32 %v3300_v1, %v3156_v34  ;;  %v3584_v28 = vpop.f32.mrf.mxu1  ;;  %v16105_v1 = vunpack.c.l.b16 %v13394_v42  ;;  %v4040_v34 = vrot.slane %v4038_v14, 5 }
 0x295   : > { %16576 = vst [vmem:[#allocation84_spill] sm:$0xff] %v13464_v35  ;;  %v3227_v14 = vpack.c.b16 %v3223_v52, %v16577_v4  ;;  %v13486_v38 = vpack.c.b16 %v13464_v35, %v13461_v57  ;;  %v13495_v4 = vld [vmem:[%s12846_s20 + $0x100] sm:$0xf] }
 0x296   : > { %v3656_v59 = vadd.f32 %v3582_v23, %v3374_v24  ;;  %v10917_v23 = vld [vmem:[%s15935_s3 + $0x388] sm:$0xff]  ;;  %v552_v24 = vld [vmem:[%s12846_s20 + $0xf4] sm:$0x1]  ;;  %v4041_v52 = vor.u32 %v4040_v34, %v4037_v49  ;;  %16580 = vst [vmem:[#allocation25_spill] sm:$0xff] %v13495_v4  ;;  %v4052_v34 = vshll.u32 %v13495_v4, 16 }
 0x297   : > { %5423 = vmatpush.bf16.msrb.mxu2 %v10917_v23  ;;  %16578 = vst [vmem:[#allocation35_spill] sm:$0xff] %v13486_v38  ;;  %v4030_v40 = vshll.u32 %v552_v24, 16  ;;  %v4044_v23 = vshll.u32 %v554_v58, 16  ;;  %v4063_v58 = vshrl.u32 %v13500_v37, 16 }
 0x298   : > { %v13467_v8 = vadd.f32 %v4280_v48, %v3656_v59 }
 0x299   : > { %v3084_v56 = vpop.f32.mrf.mxu3 }
 0x29a   : > { %v3157_v48 = vadd.f32 %v3084_v56, %v12788_v63  ;;  %v13492_v63 = vpack.c.b16 %v16105_v1, %v16106_v39  ;;  %v4027_v56 = vor.u32 %v4026_v47, %v4023_v21  ;;  %v4032_v21 = vrot.slane %v4030_v40, 5 }
 0x29b   : > { %v4282_v43 = vpop.f32.mrf.mxu2  ;;  %v3305_v59 = vpop.f32.mrf.mxu0  ;;  %v4046_v47 = vrot.slane %v4044_v23, 5 }
 0x29c   : > { %16579 = vst [vmem:[#allocation38_spill] sm:$0xff] %v13492_v63  ;;  %v3375_v62 = vadd.f32 %v3302_v5, %v3157_v48  ;;  %v3587_v17 = vpop.f32.mrf.mxu1  ;;  %v4028_v16 = vrot.slane %v4027_v56, 4  ;;  %v4042_v5 = vrot.slane %v4041_v52, 4  ;;  %v4066_v48 = vshll.u32 %v13500_v37, 16 }
 0x29d   : > { %v4054_v52 = vrot.slane %v4052_v34, 5 }
 0x29e   : > { %v3657_v22 = vadd.f32 %v3584_v28, %v3375_v62  ;;  %3126 = vmatmul.bf16.gmra.mxu3 %v3009_v18  ;;  %3344 = vmatmul.bf16.gmra.mxu0 %v3227_v14  ;;  %v4049_v28 = vshrl.u32 %v13495_v4, 16  ;;  %v4033_v56 = vsel %vm11429_vm3, %v4028_v16, %v4032_v21  ;;  %v4047_v62 = vsel %vm11429_vm3, %v4042_v5, %v4046_v47 }
 0x29f   : > { %3626 = vmatmul.bf16.gmra.mxu1 %v13492_v63  ;;  %v4173_v39 = vunpack.c.l.b16 %v4033_v56  ;;  %v3475_v63 = vunpack.c.l.b16 %v13440_v27 }
 0x2a0   : > { %4324 = vmatmul.bf16.gmra.mxu2 %v13486_v38  ;;  %v13502_v1 = vadd.f32 %v4282_v43, %v3657_v22  ;;  %v4051_v40 = vrot.slane %v4049_v28, 4  ;;  %v556_v22 = vld [vmem:[%s12846_s20 + $0x104] sm:$0x1]  ;;  %v13514_v38 = vunpack.c.l.b16 %v4047_v62 }
 0x2a1   : > { %v3087_v49 = vpop.f32.mrf.mxu3  ;;  %v4058_v42 = vshll.u32 %v556_v22, 16  ;;  %v13528_v22 = vld [vmem:[%s12846_s20 + $0x110] sm:$0xf] }
 0x2a2   : > { %v3158_v10 = vadd.f32 %v3087_v49, %v12791_v29  ;;  %v4065_v29 = vrot.slane %v4063_v58, 4  ;;  %v4068_v49 = vrot.slane %v4066_v48, 5  ;;  %16582 = vst [vmem:[#allocation45_spill] sm:$0xff] %v13514_v38  ;;  %v4055_v21 = vor.u32 %v4054_v52, %v4051_v40  ;;  %v16584_v40 = vld [vmem:[#allocation11_spill] sm:$0xff]  ;;  %v16585_v52 = vld [vmem:[#allocation68_spill] sm:$0xff] }
 0x2a3   : > { %v4285_v24 = vpop.f32.mrf.mxu2  ;;  %v3307_v18 = vpop.f32.mrf.mxu0  ;;  %v4193_v58 = vpack.c.b16 %v13514_v38, %v4173_v39  ;;  %v4060_v56 = vrot.slane %v4058_v42, 5  ;;  %v13533_v39 = vld [vmem:[%s12846_s20 + $0x118] sm:$0xf]  ;;  %v16595_v38 = vld [vmem:[#allocation78_spill] sm:$0xff] }
 0x2a4   : > { %v3376_v43 = vadd.f32 %v3305_v59, %v3158_v10  ;;  %v3589_v14 = vpop.f32.mrf.mxu1  ;;  %v16111_v59 = vunpack.c.l.b16 %v13446_v50  ;;  %v558_v10 = vld [vmem:[%s12846_s20 + $0x10c] sm:$0x1]  ;;  %16587 = vst [vmem:[#allocation54_spill] sm:$0xff] %v13533_v39 }
 0x2a5   : > { %v4072_v28 = vshll.u32 %v558_v10, 16 }
 0x2a6   : > { %v3658_v23 = vadd.f32 %v3587_v17, %v3376_v43  ;;  %v4069_v17 = vor.u32 %v4068_v49, %v4065_v29  ;;  %v3495_v27 = vpack.c.b16 %v16111_v59, %v3475_v63  ;;  %v10892_v63 = vld [vmem:[%s15935_s3 + $0x2c0] sm:$0xff] }
 0x2a7   : > { %4678 = vmatpush.bf16.msrb.mxu3 %v10892_v63 }
 0x2a8   : > { %v13519_v35 = vadd.f32 %v4285_v24, %v3658_v23  ;;  %v4056_v24 = vrot.slane %v4055_v21, 4  ;;  %v4074_v23 = vrot.slane %v4072_v28, 5  ;;  %v4080_v21 = vshll.u32 %v13528_v22, 16 }
 0x2a9   : > { %v3089_v16 = vpop.f32.mrf.mxu3 }
 0x2aa   : > { %16583 = vst [vmem:[#allocation48_spill] sm:$0xff] %v13519_v35  ;;  %v3159_v5 = vadd.f32 %v3089_v16, %v12805_v25  ;;  %v4070_v25 = vrot.slane %v4069_v17, 4  ;;  %v4077_v16 = vshrl.u32 %v13528_v22, 16  ;;  %v4094_v17 = vshll.u32 %v13533_v39, 16 }
 0x2ab   : > { %v4287_v47 = vpop.f32.mrf.mxu2  ;;  %v3310_v34 = vpop.f32.mrf.mxu0 }
 0x2ac   : > { %v3377_v48 = vadd.f32 %v3307_v18, %v3159_v5  ;;  %v3592_v43 = vpop.f32.mrf.mxu1  ;;  %v4061_v18 = vsel %vm11429_vm3, %v4056_v24, %v4060_v56  ;;  %v4075_v10 = vsel %vm11429_vm3, %v4070_v25, %v4074_v23  ;;  %v16115_v56 = vunpack.c.l.b16 %v13500_v37  ;;  %v562_v25 = vld [vmem:[%s12846_s20 + $0x11c] sm:$0x1]  ;;  %v564_v37 = vld [vmem:[%s12846_s20 + $0x124] sm:$0x1] }
 0x2ad   : > { %v4096_v63 = vrot.slane %v4094_v17, 5 }
 0x2ae   : > { %v3659_v62 = vadd.f32 %v3589_v14, %v3377_v48  ;;  %3131 = vmatmul.bf16.gmra.mxu3 %v16584_v40  ;;  %3349 = vmatmul.bf16.gmra.mxu0 %v16585_v52  ;;  %v16116_v48 = vunpack.c.l.b16 %v13495_v4  ;;  %v4082_v40 = vrot.slane %v4080_v21, 5  ;;  %v560_v52 = vld [vmem:[%s12846_s20 + $0x114] sm:$0x1] }
 0x2af   : > { %3631 = vmatmul.bf16.gmra.mxu1 %v3495_v27  ;;  %v13547_v27 = vunpack.c.l.b16 %v4061_v18  ;;  %v10900_v18 = vld [vmem:[%s15935_s3 + $0x300] sm:$0xff] }
 0x2b0   : > { %4329 = vmatmul.bf16.gmra.mxu2 %v4193_v58  ;;  %v13530_v29 = vadd.f32 %v4287_v47, %v3659_v62  ;;  %v4091_v47 = vshrl.u32 %v13533_v39, 16  ;;  %v4079_v62 = vrot.slane %v4077_v16, 4  ;;  %4904 = vmatpush.bf16.msrb.mxu0 %v10900_v18 }
 0x2b1   : > { %v3092_v42 = vpop.f32.mrf.mxu3  ;;  %16588 = vst [vmem:[#allocation57_spill] sm:$0xff] %v13547_v27 }
 0x2b2   : > { %16586 = vst [vmem:[#allocation33_spill] sm:$0xff] %v13530_v29  ;;  %v3160_v14 = vadd.f32 %v3092_v42, %v12811_v53  ;;  %v13549_v53 = vunpack.c.l.b16 %v4075_v10  ;;  %v4093_v23 = vrot.slane %v4091_v47, 4  ;;  %v16591_v10 = vld [vmem:[#allocation36_spill] sm:$0xff]  ;;  %v13575_v47 = vpack.c.b16 %v16115_v56, %v16116_v48 }
 0x2b3   : > { %v4290_v49 = vpop.f32.mrf.mxu2  ;;  %v3312_v5 = vpop.f32.mrf.mxu0 }
 0x2b4   : > { %v3378_v28 = vadd.f32 %v3310_v34, %v3160_v14  ;;  %v3594_v58 = vpop.f32.mrf.mxu1  ;;  %16589 = vst [vmem:[#allocation27_spill] sm:$0xff] %v13549_v53  ;;  %v10916_v34 = vld [vmem:[%s15935_s3 + $0x380] sm:$0xff]  ;;  %v4097_v59 = vor.u32 %v4096_v63, %v4093_v23  ;;  %v13587_v63 = vld [vmem:[%s12846_s20 + $0x128] sm:$0xf] }
 0x2b5   : > { %16593 = vst [vmem:[#allocation31_spill] sm:$0xff] %v13575_v47  ;;  %5424 = vmatpush.bf16.msrb.mxu2 %v10916_v34 }
 0x2b6   : > { %v3660_v24 = vadd.f32 %v3592_v43, %v3378_v28  ;;  %v10908_v43 = vld [vmem:[%s15935_s3 + $0x340] sm:$0xff]  ;;  %v4083_v28 = vor.u32 %v4082_v40, %v4079_v62  ;;  %v4098_v40 = vrot.slane %v4097_v59, 4 }
 0x2b7   : > { %5182 = vmatpush.bf16.msrb.mxu1 %v10908_v43  ;;  %v13591_v43 = vld [vmem:[%s11378_s18 + $0x138] sm:$0xf] }
 0x2b8   : > { %v13555_v42 = vadd.f32 %v4290_v49, %v3660_v24  ;;  %v13569_v49 = vpack.c.b16 %v13549_v53, %v13547_v27  ;;  %v4086_v24 = vshll.u32 %v560_v52, 16  ;;  %v16594_v27 = vld [vmem:[#allocation18_spill] sm:$0xff]  ;;  %v4084_v34 = vrot.slane %v4083_v28, 4 }
 0x2b9   : > { %v3094_v14 = vpop.f32.mrf.mxu3 }
 0x2ba   : > { %16590 = vst [vmem:[#allocation67_spill] sm:$0xff] %v13555_v42  ;;  %v3161_v16 = vadd.f32 %v3094_v14, %v16591_v10  ;;  %v4100_v42 = vshll.u32 %v562_v25, 16  ;;  %v4088_v62 = vrot.slane %v4086_v24, 5  ;;  %v13584_v25 = vld [vmem:[%s12846_s20 + $0x120] sm:$0xf] }
 0x2bb   : > { %v4292_v21 = vpop.f32.mrf.mxu2  ;;  %16592 = vst [vmem:[#allocation71_spill] sm:$0xff] %v13569_v49  ;;  %v3315_v17 = vpop.f32.mrf.mxu0 }
 0x2bc   : > { %v3379_v14 = vadd.f32 %v3312_v5, %v3161_v16  ;;  %v3597_v10 = vpop.f32.mrf.mxu1  ;;  %v4102_v52 = vrot.slane %v4100_v42, 5  ;;  %v2976_v16 = vshll.u32 %v13591_v43, 16  ;;  %v4089_v59 = vsel %vm11429_vm3, %v4084_v34, %v4088_v62 }
 0x2bd   : > { %v4105_v42 = vshrl.u32 %v13584_v25, 16  ;;  %v13603_v48 = vunpack.c.l.b16 %v4089_v59  ;;  %v16600_v59 = vld [vmem:[#allocation29_spill] sm:$0xff] }
 0x2be   : > { %v3661_v53 = vadd.f32 %v3594_v58, %v3379_v14  ;;  %3136 = vmatmul.bf16.gmra.mxu3 %v16594_v27  ;;  %3354 = vmatmul.bf16.gmra.mxu0 %v16595_v38  ;;  %v16597_v58 = vld [vmem:[#allocation26_spill] sm:$0xff]  ;;  %v2973_v38 = vshrl.u32 %v13591_v43, 16  ;;  %v4108_v14 = vshll.u32 %v13584_v25, 16  ;;  %v2978_v34 = vrot.slane %v2976_v16, 5 }
 0x2bf   : > { %3636 = vmatmul.bf16.gmra.mxu1 %v13575_v47 }
 0x2c0   : > { %4334 = vmatmul.bf16.gmra.mxu2 %v13569_v49  ;;  %v13581_v23 = vadd.f32 %v4292_v21, %v3661_v53  ;;  %v4103_v53 = vsel %vm11429_vm3, %v4098_v40, %v4102_v52  ;;  %v2975_v49 = vrot.slane %v2973_v38, 4  ;;  %v16602_v52 = vunpack.c.l.b16 %v13528_v22 }
 0x2c1   : > { %v3097_v5 = vpop.f32.mrf.mxu3  ;;  %v13605_v62 = vunpack.c.l.b16 %v4103_v53 }
 0x2c2   : > { %16596 = vst [vmem:[#allocation77_spill] sm:$0xff] %v13581_v23  ;;  %v3162_v18 = vadd.f32 %v3097_v5, %v16597_v58  ;;  %v4119_v5 = vshrl.u32 %v13587_v63, 16  ;;  %v4122_v58 = vshll.u32 %v13587_v63, 16  ;;  %v4110_v23 = vrot.slane %v4108_v14, 5 }
 0x2c3   : > { %v4295_v27 = vpop.f32.mrf.mxu2  ;;  %v3317_v28 = vpop.f32.mrf.mxu0  ;;  %16598 = vst [vmem:[#allocation79_spill] sm:$0xff] %v13605_v62  ;;  %v2979_v16 = vor.u32 %v2978_v34, %v2975_v49  ;;  %v13617_v40 = vpack.c.b16 %v13605_v62, %v13603_v48  ;;  %v4114_v14 = vshll.u32 %v564_v37, 16  ;;  %v16605_v49 = vld [vmem:[#allocation23_spill] sm:$0xff]  ;;  %v16606_v34 = vld [vmem:[#allocation82_spill] sm:$0xff] }
 0x2c4   : > { %v3380_v21 = vadd.f32 %v3315_v17, %v3162_v18  ;;  %v3599_v24 = vpop.f32.mrf.mxu1  ;;  %v490_v17 = vld [vmem:[%s11378_s18 + $0x13c] sm:$0x1]  ;;  %v4107_v18 = vrot.slane %v4105_v42, 4  ;;  %v4121_v4 = vrot.slane %v4119_v5, 4  ;;  %v4124_v50 = vrot.slane %v4122_v58, 5 }
 0x2c5   : > { %16601 = vst [vmem:[#allocation83_spill] sm:$0xff] %v13617_v40  ;;  %v2982_v42 = vshll.u32 %v490_v17, 16  ;;  %v2980_v62 = vrot.slane %v2979_v16, 4  ;;  %v4116_v37 = vrot.slane %v4114_v14, 5 }
 0x2c6   : > { %v3662_v56 = vadd.f32 %v3597_v10, %v3380_v21  ;;  %v566_v10 = vld [vmem:[%s12846_s20 + $0x12c] sm:$0x1]  ;;  %v4125_v35 = vor.u32 %v4124_v50, %v4121_v4 }
 0x2c8   : > { %v13610_v47 = vadd.f32 %v4295_v27, %v3662_v56  ;;  %v16603_v56 = vunpack.c.l.b16 %v13533_v39  ;;  %v2984_v39 = vrot.slane %v2982_v42, 5  ;;  %v4126_v50 = vrot.slane %v4125_v35, 4 }
 0x2c9   : > { %v3099_v29 = vpop.f32.mrf.mxu3 }
 0x2ca   : > { %16599 = vst [vmem:[#allocation81_spill] sm:$0xff] %v13610_v47  ;;  %v3163_v21 = vadd.f32 %v3099_v29, %v16600_v59  ;;  %v13623_v27 = vpack.c.b16 %v16603_v56, %v16602_v52  ;;  %v4111_v47 = vor.u32 %v4110_v23, %v4107_v18  ;;  %v4128_v29 = vshll.u32 %v566_v10, 16 }
 0x2cb   : > { %v4297_v38 = vpop.f32.mrf.mxu2  ;;  %v3320_v53 = vpop.f32.mrf.mxu0  ;;  %v9809_v52 = vrot.slane %v13591_v43, 9  ;;  %v3202_v56 = vrot.slane %v490_v17, 5  ;;  %v2985_v43 = vsel %vm11429_vm3, %v2980_v62, %v2984_v39  ;;  %v16125_v39 = vunpack.c.l.b16 %v13584_v25 }
 0x2cc   : > { %16604 = vst [vmem:[#allocation11_spill] sm:$0xff] %v13623_v27  ;;  %v3381_v5 = vadd.f32 %v3317_v28, %v3163_v21  ;;  %v3602_v58 = vpop.f32.mrf.mxu1  ;;  %v4112_v23 = vrot.slane %v4111_v47, 4  ;;  %v4130_v4 = vrot.slane %v4128_v29, 5  ;;  %v16124_v62 = vunpack.c.l.b16 %v13587_v63 }
 0x2cd   : > { %v3203_v17 = vsel %vm11461_vm5, %v9809_v52, %v3202_v56 }
 0x2ce   : > { %v3663_v59 = vadd.f32 %v3599_v24, %v3381_v5  ;;  %3141 = vmatmul.bf16.gmra.mxu3 %v16605_v49  ;;  %3359 = vmatmul.bf16.gmra.mxu0 %v16606_v34  ;;  %v10931_v24 = vld [vmem:[%s15935_s3 + $0x3f8] sm:$0xff]  ;;  %v4117_v35 = vsel %vm11429_vm3, %v4112_v23, %v4116_v37  ;;  %v4131_v42 = vsel %vm11429_vm3, %v4126_v50, %v4130_v4  ;;  %v3006_v5 = vunpack.c.l.b16 %v2985_v43  ;;  %v16607_v23 = vld [vmem:[#allocation34_spill] sm:$0xff] }
 0x2cf   : > { %3641 = vmatmul.bf16.gmra.mxu1 %v13623_v27  ;;  %5619 = vmatpush.bf16.msra.mxu3 %v10931_v24  ;;  %v13644_v29 = vunpack.c.l.b16 %v4117_v35  ;;  %v10947_v34 = vld [vmem:[%s15935_s3 + $0x478] sm:$0xff]  ;;  %v16608_v4 = vunpack.c.l.b16 %v12891_v6  ;;  %v11100_v35 = vld [vmem:[%s12846_s20 + $0x4] sm:$0x1] }
 0x2d0   : > { %4339 = vmatmul.bf16.gmra.mxu2 %v13617_v40  ;;  %v13630_v28 = vadd.f32 %v4297_v38, %v3663_v59  ;;  %v13646_v59 = vunpack.c.l.b16 %v4131_v42  ;;  %v3010_v50 = vpack.c.b16 %v3006_v5, %v16607_v23  ;;  %6091 = vmatpush.bf16.msra.mxu1 %v10947_v34  ;;  %v4416_v42 = vrot.slane %v11100_v35, 5 }
 0x2d1   : > { %v3102_v18 = vpop.f32.mrf.mxu3 }
 0x2d2   : > { %v3164_v10 = vadd.f32 %v3102_v18, %v12898_v55  ;;  %v3224_v55 = vunpack.c.l.b16 %v3203_v17  ;;  %v11099_v17 = vld [vmem:[%s12846_s20] sm:$0xf] }
 0x2d3   : > { %v4300_v21 = vpop.f32.mrf.mxu2  ;;  %v3322_v16 = vpop.f32.mrf.mxu0 }
 0x2d4   : > { %v3382_v38 = vadd.f32 %v3320_v53, %v3164_v10  ;;  %v3604_v47 = vpop.f32.mrf.mxu1  ;;  %v10955_v53 = vld [vmem:[%s15935_s3 + $0x4b8] sm:$0xff]  ;;  %v3228_v24 = vpack.c.b16 %v3224_v55, %v16608_v4  ;;  %v13667_v10 = vpack.c.b16 %v13646_v59, %v13644_v29  ;;  %v11102_v55 = vld [vmem:[%s12846_s20 + $0xc] sm:$0x1] }
 0x2d5   : > { %6373 = vmatpush.bf16.msra.mxu2 %v10955_v53  ;;  %v4420_v53 = vrot.slane %v11102_v55, 5 }
 0x2d6   : > { %v3664_v14 = vadd.f32 %v3602_v58, %v3382_v38  ;;  %v10939_v58 = vld [vmem:[%s15935_s3 + $0x438] sm:$0xff]  ;;  %16609 = vst [vmem:[#allocation68_spill] sm:$0xff] %v13667_v10  ;;  %v9954_v38 = vrot.slane %v11099_v17, 9 }
 0x2d7   : > { %5873 = vmatpush.bf16.msra.mxu0 %v10939_v58  ;;  %v11103_v58 = vld [vmem:[%s12846_s20 + $0x14] sm:$0x1] }
 0x2d8   : > { %v13650_v49 = vadd.f32 %v4300_v21, %v3664_v14  ;;  %v11101_v14 = vld [vmem:[%s12846_s20 + $0x8] sm:$0xf]  ;;  %v4424_v34 = vrot.slane %v11103_v58, 5 }
 0x2d9   : > { %v3104_v52 = vpop.f32.mrf.mxu3  ;;  %v9955_v5 = vrot.slane %v11101_v14, 9 }
 0x2da   : > { %v3165_v56 = vadd.f32 %v3104_v52, %v12929_v33  ;;  %v13673_v33 = vpack.c.b16 %v16124_v62, %v16125_v39  ;;  %v508_v39 = vld [vmem:[%s12846_s20 + $0x44] sm:$0x1] }
 0x2db   : > { %v4302_v37 = vpop.f32.mrf.mxu2  ;;  %v3325_v18 = vpop.f32.mrf.mxu0 }
 0x2dc   : > { %16610 = vst [vmem:[#allocation36_spill] sm:$0xff] %v13673_v33  ;;  %v3383_v6 = vadd.f32 %v3322_v16, %v3165_v56  ;;  %v3607_v21 = vpop.f32.mrf.mxu1 }
 0x2de   : > { %v3665_v43 = vadd.f32 %v3604_v47, %v3383_v6  ;;  %3146 = vmatmul.bf16.gmra.mxu3 %v3010_v50  ;;  %3364 = vmatmul.bf16.gmra.mxu0 %v3228_v24  ;;  %v11104_v47 = vld [vmem:[%s12846_s20 + $0x10] sm:$0xf]  ;;  %v4417_v24 = vsel %vm11461_vm5, %v9954_v38, %v4416_v42  ;;  %v4421_v6 = vsel %vm11461_vm5, %v9955_v5, %v4420_v53 }
 0x2df   : > { %3646 = vmatmul.bf16.gmra.mxu1 %v13673_v33  ;;  %v9956_v52 = vrot.slane %v11104_v47, 9  ;;  %v4560_v55 = vunpack.c.l.b16 %v4421_v6  ;;  %v16631_v33 = vld [vmem:[#allocation75_spill] sm:$0xff] }
 0x2e0   : > { %4344 = vmatmul.bf16.gmra.mxu2 %v13667_v10  ;;  %v13682_v16 = vadd.f32 %v4302_v37, %v3665_v43  ;;  %v4559_v43 = vunpack.c.l.b16 %v4417_v24  ;;  %v5028_v10 = vshll.u32 %v508_v39, 16 }
 0x2e1   : > { %v3107_v56 = vpop.f32.mrf.mxu3  ;;  %v4425_v14 = vsel %vm11461_vm5, %v9956_v52, %v4424_v34  ;;  %v11105_v52 = vld [vmem:[%s12846_s20 + $0x18] sm:$0xf] }
 0x2e2   : > { %v3166_v23 = vadd.f32 %v3107_v56, %v12946_v36  ;;  %v4561_v58 = vunpack.c.l.b16 %v4425_v14  ;;  %v4591_v42 = vpack.c.b16 %v4560_v55, %v4559_v43  ;;  %v16612_v43 = vld [vmem:[#allocation41_spill] sm:$0xff] }
 0x2e3   : > { %v4305_v50 = vpop.f32.mrf.mxu2  ;;  %v3327_v4 = vpop.f32.mrf.mxu0 }
 0x2e4   : > { %v3384_v17 = vadd.f32 %v3325_v18, %v3166_v23  ;;  %v3609_v35 = vpop.f32.mrf.mxu1  ;;  %v5337_v18 = vpack.c.b16 %v4561_v58, %v4560_v55 }
 0x2e6   : > { %v3666_v37 = vadd.f32 %v3607_v21, %v3384_v17  ;;  %v16611_v21 = vpack.c.b16 %v12926_v45, %v12923_v15  ;;  %v11107_v17 = vld [vmem:[%s12846_s20 + $0x20] sm:$0xf] }
 0x2e7   : > { %v9958_v14 = vrot.slane %v11107_v17, 9 }
 0x2e8   : > { %v13692_v47 = vadd.f32 %v4305_v50, %v3666_v37  ;;  %v9957_v50 = vrot.slane %v11105_v52, 9  ;;  %v11108_v37 = vld [vmem:[%s12846_s20 + $0x24] sm:$0x1]  ;;  %v10954_v52 = vld [vmem:[%s15935_s3 + $0x4b0] sm:$0xff] }
 0x2e9   : > { %v3109_v36 = vpop.f32.mrf.mxu3  ;;  %6374 = vmatpush.bf16.msra.mxu2 %v10954_v52 }
 0x2ea   : > { %v3167_v56 = vadd.f32 %v3109_v36, %v12956_v46  ;;  %v11106_v46 = vld [vmem:[%s12846_s20 + $0x1c] sm:$0x1] }
 0x2eb   : > { %v4307_v38 = vpop.f32.mrf.mxu2  ;;  %v3330_v5 = vpop.f32.mrf.mxu0  ;;  %v4428_v24 = vrot.slane %v11106_v46, 5  ;;  %v10938_v46 = vld [vmem:[%s15935_s3 + $0x430] sm:$0xff] }
 0x2ec   : > { %v3385_v53 = vadd.f32 %v3327_v4, %v3167_v56  ;;  %v3612_v23 = vpop.f32.mrf.mxu1  ;;  %v4432_v4 = vrot.slane %v11108_v37, 5  ;;  %v16614_v37 = vld [vmem:[#allocation43_spill] sm:$0xff]  ;;  %5874 = vmatpush.bf16.msra.mxu0 %v10938_v46 }
 0x2ed   : > { %v4429_v45 = vsel %vm11461_vm5, %v9957_v50, %v4428_v24  ;;  %v16613_v24 = vld [vmem:[#allocation39_spill] sm:$0xff] }
 0x2ee   : > { %v3667_v34 = vadd.f32 %v3609_v35, %v3385_v53  ;;  %4679 = vmatmul.bf16.vlgmr.msrb.gmra.mxu3 %v4591_v42  ;;  %4905 = vmatmul.bf16.vlgmr.msrb.gmra.mxu0 %v12935_v11  ;;  %v10930_v35 = vld [vmem:[%s15935_s3 + $0x3f0] sm:$0xff]  ;;  %v4433_v42 = vsel %vm11461_vm5, %v9958_v14, %v4432_v4  ;;  %v4562_v53 = vunpack.c.l.b16 %v4429_v45  ;;  %v16615_v4 = vunpack.c.l.b16 %v16614_v37  ;;  %v11110_v46 = vld [vmem:[%s12846_s20 + $0x2c] sm:$0x1] }
 0x2ef   : > { %5183 = vmatmul.bf16.vlgmr.msrb.gmra.mxu1 %v16611_v21  ;;  %5620 = vmatpush.bf16.msra.mxu3 %v10930_v35  ;;  %v16616_v35 = vunpack.c.l.b16 %v12954_v26  ;;  %v16618_v45 = vld [vmem:[#allocation52_spill] sm:$0xff]  ;;  %v11109_v26 = vld [vmem:[%s12846_s20 + $0x28] sm:$0xf] }
 0x2f0   : > { %5425 = vmatmul.bf16.vlgmr.msrb.gmra.mxu2 %v5337_v18  ;;  %v13701_v6 = vadd.f32 %v4307_v38, %v3667_v34  ;;  %v4563_v34 = vunpack.c.l.b16 %v4433_v42  ;;  %v13725_v14 = vpack.c.b16 %v4562_v53, %v4561_v58  ;;  %v9959_v52 = vrot.slane %v11109_v26, 9 }
 0x2f1   : > { %v3112_v11 = vpop.f32.mrf.mxu3 }
 0x2f2   : > { %v3168_v55 = vadd.f32 %v3112_v11, %v16612_v43  ;;  %v4818_v11 = vpack.c.b16 %v16616_v35, %v16615_v4  ;;  %v11112_v4 = vld [vmem:[%s12846_s20 + $0x34] sm:$0x1] }
 0x2f3   : > { %v4310_v36 = vpop.f32.mrf.mxu2  ;;  %v3332_v15 = vpop.f32.mrf.mxu0  ;;  %v4440_v35 = vrot.slane %v11112_v4, 5 }
 0x2f4   : > { %v3386_v56 = vadd.f32 %v3330_v5, %v3168_v55  ;;  %v3614_v38 = vpop.f32.mrf.mxu1  ;;  %v10946_v5 = vld [vmem:[%s15935_s3 + $0x470] sm:$0xff]  ;;  %v5338_v55 = vpack.c.b16 %v4563_v34, %v4562_v53 }
 0x2f5   : > { %6092 = vmatpush.bf16.msra.mxu1 %v10946_v5  ;;  %v11111_v53 = vld [vmem:[%s12846_s20 + $0x30] sm:$0xf] }
 0x2f6   : > { %v3668_v18 = vadd.f32 %v3612_v23, %v3386_v56  ;;  %v9960_v37 = vrot.slane %v11111_v53, 9 }
 0x2f8   : > { %v13713_v21 = vadd.f32 %v4310_v36, %v3668_v18  ;;  %v16617_v36 = vld [vmem:[#allocation32_spill] sm:$0xff] }
 0x2f9   : > { %v3114_v50 = vpop.f32.mrf.mxu3  ;;  %v5096_v56 = vpack.c.b16 %v16618_v45, %v16617_v36 }
 0x2fa   : > { %v3169_v17 = vadd.f32 %v3114_v50, %v16613_v24  ;;  %v4436_v50 = vrot.slane %v11110_v46, 5 }
 0x2fb   : > { %v4312_v23 = vpop.f32.mrf.mxu2  ;;  %v3335_v43 = vpop.f32.mrf.mxu0 }
 0x2fc   : > { %v3387_v42 = vadd.f32 %v3332_v15, %v3169_v17  ;;  %v3617_v18 = vpop.f32.mrf.mxu1  ;;  %v13741_v15 = vld [vmem:[%s12846_s20 + $0x40] sm:$0xf] }
 0x2fd   : > { %v16619_v17 = vld [vmem:[#allocation50_spill] sm:$0xff] }
 0x2fe   : > { %v3669_v58 = vadd.f32 %v3614_v38, %v3387_v42  ;;  %4684 = vmatmul.bf16.gmra.mxu3 %v13725_v14  ;;  %4910 = vmatmul.bf16.gmra.mxu0 %v4818_v11  ;;  %v5019_v42 = vshrl.u32 %v13741_v15, 16 }
 0x2ff   : > { %5188 = vmatmul.bf16.gmra.mxu1 %v5096_v56 }
 0x300   : > { %5430 = vmatmul.bf16.gmra.mxu2 %v5338_v55  ;;  %v13736_v24 = vadd.f32 %v4312_v23, %v3669_v58  ;;  %v4437_v55 = vsel %vm11461_vm5, %v9959_v52, %v4436_v50  ;;  %v4441_v23 = vsel %vm11461_vm5, %v9960_v37, %v4440_v35  ;;  %v5022_v58 = vshll.u32 %v13741_v15, 16 }
 0x301   : > { %v3117_v5 = vpop.f32.mrf.mxu3  ;;  %v4564_v46 = vunpack.c.l.b16 %v4437_v55  ;;  %v4565_v53 = vunpack.c.l.b16 %v4441_v23  ;;  %v16620_v37 = vunpack.c.l.b16 %v12959_v2  ;;  %v16621_v35 = vunpack.c.l.b16 %v13005_v9  ;;  %v11113_v2 = vld [vmem:[%s12846_s20 + $0x38] sm:$0xf]  ;;  %v11114_v9 = vld [vmem:[%s12846_s20 + $0x3c] sm:$0x1] }
 0x302   : > { %v3170_v38 = vadd.f32 %v3117_v5, %v16619_v17  ;;  %v5021_v5 = vrot.slane %v5019_v42, 4  ;;  %v5024_v17 = vrot.slane %v5022_v58, 5 }
 0x303   : > { %v4315_v36 = vpop.f32.mrf.mxu2  ;;  %v3337_v11 = vpop.f32.mrf.mxu0  ;;  %v13754_v50 = vpack.c.b16 %v4564_v46, %v4563_v34  ;;  %v5339_v55 = vpack.c.b16 %v4565_v53, %v4564_v46  ;;  %v4444_v34 = vrot.slane %v11114_v9, 5 }
 0x304   : > { %v3388_v45 = vadd.f32 %v3335_v43, %v3170_v38  ;;  %v3619_v56 = vpop.f32.mrf.mxu1 }
 0x306   : > { %v3670_v26 = vadd.f32 %v3617_v18, %v3388_v45  ;;  %v4819_v18 = vpack.c.b16 %v16621_v35, %v16620_v37  ;;  %v16623_v45 = vld [vmem:[#allocation51_spill] sm:$0xff]  ;;  %v10130_v37 = vrot.slane %v13741_v15, 9  ;;  %v5302_v35 = vrot.slane %v508_v39, 5 }
 0x308   : > { %v13750_v4 = vadd.f32 %v4315_v36, %v3670_v26  ;;  %v16622_v36 = vld [vmem:[#allocation42_spill] sm:$0xff]  ;;  %v5025_v26 = vor.u32 %v5024_v17, %v5021_v5  ;;  %v16624_v17 = vld [vmem:[#allocation61_spill] sm:$0xff]  ;;  %v13776_v39 = vsel %vm11461_vm5, %v10130_v37, %v5302_v35 }
 0x309   : > { %v3119_v62 = vpop.f32.mrf.mxu3  ;;  %v5097_v23 = vpack.c.b16 %v16623_v45, %v16622_v36  ;;  %16625 = vst [vmem:[#allocation18_spill] sm:$0xff] %v13776_v39  ;;  %v16627_v37 = vld [vmem:[#allocation58_spill] sm:$0xff] }
 0x30a   : > { %v3171_v52 = vadd.f32 %v3119_v62, %v13051_v51  ;;  %v9961_v62 = vrot.slane %v11113_v2, 9  ;;  %v5026_v36 = vrot.slane %v5025_v26, 4  ;;  %v16127_v2 = vunpack.c.l.b16 %v13776_v39 }
 0x30b   : > { %v4317_v43 = vpop.f32.mrf.mxu2  ;;  %v3340_v38 = vpop.f32.mrf.mxu0 }
 0x30c   : > { %v3389_v42 = vadd.f32 %v3337_v11, %v3171_v52  ;;  %v3622_v58 = vpop.f32.mrf.mxu1  ;;  %v5030_v11 = vrot.slane %v5028_v10, 5  ;;  %v4445_v45 = vsel %vm11461_vm5, %v9961_v62, %v4444_v34  ;;  %v10937_v62 = vld [vmem:[%s15935_s3 + $0x428] sm:$0xff] }
 0x30d   : > { %v4566_v26 = vunpack.c.l.b16 %v4445_v45  ;;  %5875 = vmatpush.bf16.msra.mxu0 %v10937_v62 }
 0x30e   : > { %v3671_v51 = vadd.f32 %v3619_v56, %v3389_v42  ;;  %4689 = vmatmul.bf16.gmra.mxu3 %v13754_v50  ;;  %4915 = vmatmul.bf16.gmra.mxu0 %v4819_v18  ;;  %v10929_v56 = vld [vmem:[%s15935_s3 + $0x3e8] sm:$0xff]  ;;  %v5031_v10 = vsel %vm11429_vm3, %v5026_v36, %v5030_v11 }
 0x30f   : > { %5193 = vmatmul.bf16.gmra.mxu1 %v5097_v23  ;;  %5621 = vmatpush.bf16.msra.mxu3 %v10929_v56  ;;  %v13782_v9 = vunpack.c.l.b16 %v5031_v10  ;;  %v13796_v11 = vpack.c.b16 %v4566_v26, %v4565_v53  ;;  %v5340_v45 = vpack.c.b16 %v16127_v2, %v4566_v26  ;;  %v11117_v26 = vld [vmem:[%s12846_s20 + $0x58] sm:$0xf]  ;;  %v11118_v2 = vld [vmem:[%s12846_s20 + $0x5c] sm:$0x1] }
 0x310   : > { %5435 = vmatmul.bf16.gmra.mxu2 %v5339_v55  ;;  %v13766_v46 = vadd.f32 %v4317_v43, %v3671_v51  ;;  %v16128_v51 = vunpack.c.l.b16 %v13741_v15 }
 0x311   : > { %v3122_v5 = vpop.f32.mrf.mxu3  ;;  %16626 = vst [vmem:[#allocation78_spill] sm:$0xff] %v13782_v9 }
 0x312   : > { %v3172_v52 = vadd.f32 %v3122_v5, %v16624_v17  ;;  %v16628_v5 = vld [vmem:[#allocation44_spill] sm:$0xff] }
 0x313   : > { %v4320_v18 = vpop.f32.mrf.mxu2  ;;  %v3342_v55 = vpop.f32.mrf.mxu0  ;;  %v16629_v17 = vunpack.c.l.b16 %v16628_v5 }
 0x314   : > { %v3390_v23 = vadd.f32 %v3340_v38, %v3172_v52  ;;  %v3624_v42 = vpop.f32.mrf.mxu1  ;;  %v10953_v38 = vld [vmem:[%s15935_s3 + $0x4a8] sm:$0xff] }
 0x315   : > { %v4820_v52 = vpack.c.b16 %v16128_v51, %v16629_v17  ;;  %6375 = vmatpush.bf16.msra.mxu2 %v10953_v38  ;;  %v11115_v38 = vld [vmem:[%s12846_s20 + $0x50] sm:$0xf]  ;;  %v9963_v17 = vrot.slane %v11117_v26, 9  ;;  %v4452_v51 = vrot.slane %v11118_v2, 5 }
 0x316   : > { %v3672_v43 = vadd.f32 %v3622_v58, %v3390_v23  ;;  %v10945_v58 = vld [vmem:[%s15935_s3 + $0x468] sm:$0xff]  ;;  %v16630_v23 = vld [vmem:[#allocation49_spill] sm:$0xff]  ;;  %v9962_v62 = vrot.slane %v11115_v38, 9 }
 0x317   : > { %v5098_v10 = vpack.c.b16 %v13782_v9, %v16630_v23  ;;  %6093 = vmatpush.bf16.msra.mxu1 %v10945_v58  ;;  %v4453_v38 = vsel %vm11461_vm5, %v9963_v17, %v4452_v51  ;;  %v16633_v9 = vld [vmem:[#allocation53_spill] sm:$0xff] }
 0x318   : > { %v13784_v56 = vadd.f32 %v4320_v18, %v3672_v43  ;;  %v16634_v51 = vunpack.c.l.b16 %v16633_v9  ;;  %v11122_v9 = vld [vmem:[%s12846_s20 + $0x6c] sm:$0x1] }
 0x319   : > { %v3124_v34 = vpop.f32.mrf.mxu3 }
 0x31a   : > { %v3173_v35 = vadd.f32 %v3124_v34, %v16627_v37  ;;  %v11116_v37 = vld [vmem:[%s12846_s20 + $0x54] sm:$0x1] }
 0x31b   : > { %v4322_v36 = vpop.f32.mrf.mxu2  ;;  %v3345_v18 = vpop.f32.mrf.mxu0  ;;  %v4448_v5 = vrot.slane %v11116_v37, 5 }
 0x31c   : > { %v3391_v53 = vadd.f32 %v3342_v55, %v3173_v35  ;;  %v3627_v43 = vpop.f32.mrf.mxu1  ;;  %v11119_v55 = vld [vmem:[%s12846_s20 + $0x60] sm:$0xf]  ;;  %v11120_v35 = vld [vmem:[%s12846_s20 + $0x64] sm:$0x1] }
 0x31d   : > { %v9964_v58 = vrot.slane %v11119_v55, 9  ;;  %v4568_v55 = vunpack.c.l.b16 %v4453_v38 }
 0x31e   : > { %v3673_v34 = vadd.f32 %v3624_v42, %v3391_v53  ;;  %4694 = vmatmul.bf16.gmra.mxu3 %v13796_v11  ;;  %4920 = vmatmul.bf16.gmra.mxu0 %v4820_v52  ;;  %v4456_v42 = vrot.slane %v11120_v35, 5 }
 0x31f   : > { %5198 = vmatmul.bf16.gmra.mxu1 %v5098_v10  ;;  %v4449_v10 = vsel %vm11461_vm5, %v9962_v62, %v4448_v5 }
 0x320   : > { %5440 = vmatmul.bf16.gmra.mxu2 %v5340_v45  ;;  %v13811_v23 = vadd.f32 %v4322_v36, %v3673_v34  ;;  %v4457_v2 = vsel %vm11461_vm5, %v9964_v58, %v4456_v42  ;;  %v4567_v34 = vunpack.c.l.b16 %v4449_v10  ;;  %v16637_v42 = vld [vmem:[#allocation66_spill] sm:$0xff]  ;;  %v16638_v10 = vld [vmem:[#allocation76_spill] sm:$0xff] }
 0x321   : > { %v3127_v53 = vpop.f32.mrf.mxu3  ;;  %v4569_v35 = vunpack.c.l.b16 %v4457_v2 }
 0x322   : > { %v3174_v40 = vadd.f32 %v3127_v53, %v16631_v33  ;;  %v16632_v53 = vld [vmem:[#allocation65_spill] sm:$0xff]  ;;  %v4595_v5 = vpack.c.b16 %v4568_v55, %v4567_v34 }
 0x323   : > { %v4325_v52 = vpop.f32.mrf.mxu2  ;;  %v3347_v45 = vpop.f32.mrf.mxu0 }
 0x324   : > { %v3392_v37 = vadd.f32 %v3345_v18, %v3174_v40  ;;  %v3629_v26 = vpop.f32.mrf.mxu1  ;;  %v16635_v40 = vld [vmem:[#allocation63_spill] sm:$0xff] }
 0x325   : > { %v16636_v18 = vunpack.c.l.b16 %v16635_v40 }
 0x326   : > { %v3674_v36 = vadd.f32 %v3627_v43, %v3392_v37  ;;  %v5341_v43 = vpack.c.b16 %v4569_v35, %v4568_v55  ;;  %v11124_v55 = vld [vmem:[%s12846_s20 + $0x74] sm:$0x1] }
 0x327   : > { %v4821_v17 = vpack.c.b16 %v16636_v18, %v16634_v51  ;;  %v11123_v51 = vld [vmem:[%s12846_s20 + $0x70] sm:$0xf]  ;;  %v4464_v18 = vrot.slane %v11124_v55, 5  ;;  %v10936_v55 = vld [vmem:[%s15935_s3 + $0x420] sm:$0xff] }
 0x328   : > { %v13822_v27 = vadd.f32 %v4325_v52, %v3674_v36  ;;  %v5099_v52 = vpack.c.b16 %v16638_v10, %v16637_v42  ;;  %v11121_v36 = vld [vmem:[%s12846_s20 + $0x68] sm:$0xf]  ;;  %v9966_v40 = vrot.slane %v11123_v51, 9  ;;  %v10952_v51 = vld [vmem:[%s15935_s3 + $0x4a0] sm:$0xff]  ;;  %5876 = vmatpush.bf16.msra.mxu0 %v10936_v55  ;;  %v11126_v55 = vld [vmem:[%s12846_s20 + $0x7c] sm:$0x1] }
 0x329   : > { %v3129_v33 = vpop.f32.mrf.mxu3  ;;  %v9965_v34 = vrot.slane %v11121_v36, 9  ;;  %6376 = vmatpush.bf16.msra.mxu2 %v10952_v51 }
 0x32a   : > { %v3175_v39 = vadd.f32 %v3129_v33, %v16632_v53  ;;  %v4460_v33 = vrot.slane %v11122_v9, 5 }
 0x32b   : > { %v4327_v62 = vpop.f32.mrf.mxu2  ;;  %v3350_v58 = vpop.f32.mrf.mxu0 }
 0x32c   : > { %v3393_v38 = vadd.f32 %v3347_v45, %v3175_v39  ;;  %v3632_v37 = vpop.f32.mrf.mxu1  ;;  %v10928_v39 = vld [vmem:[%s15935_s3 + $0x3e0] sm:$0xff]  ;;  %v4461_v42 = vsel %vm11461_vm5, %v9965_v34, %v4460_v33  ;;  %v16642_v33 = vld [vmem:[#allocation59_spill] sm:$0xff] }
 0x32d   : > { %5622 = vmatpush.bf16.msra.mxu3 %v10928_v39  ;;  %v16644_v39 = vld [vmem:[#allocation69_spill] sm:$0xff] }
 0x32e   : > { %v3675_v2 = vadd.f32 %v3629_v26, %v3393_v38  ;;  %4699 = vmatmul.bf16.gmra.mxu3 %v4595_v5  ;;  %4925 = vmatmul.bf16.gmra.mxu0 %v4821_v17  ;;  %v16640_v26 = vld [vmem:[#allocation3_spill] sm:$0xff] }
 0x32f   : > { %5203 = vmatmul.bf16.gmra.mxu1 %v5099_v52  ;;  %v4465_v52 = vsel %vm11461_vm5, %v9966_v40, %v4464_v18 }
 0x330   : > { %5445 = vmatmul.bf16.gmra.mxu2 %v5341_v43  ;;  %v13833_v53 = vadd.f32 %v4327_v62, %v3675_v2  ;;  %v4570_v2 = vunpack.c.l.b16 %v4461_v42  ;;  %v4571_v36 = vunpack.c.l.b16 %v4465_v52  ;;  %v16648_v52 = vld [vmem:[#allocation62_spill] sm:$0xff] }
 0x331   : > { %v3132_v45 = vpop.f32.mrf.mxu3 }
 0x332   : > { %16639 = vst [vmem:[#allocation26_spill] sm:$0xff] %v13833_v53  ;;  %v3176_v5 = vadd.f32 %v3132_v45, %v16640_v26  ;;  %v13857_v18 = vpack.c.b16 %v4570_v2, %v4569_v35  ;;  %v16645_v45 = vunpack.c.l.b16 %v16644_v39  ;;  %v16646_v26 = vunpack.c.l.b16 %v13142_v32  ;;  %v11125_v32 = vld [vmem:[%s12846_s20 + $0x78] sm:$0xf]  ;;  %v528_v53 = vld [vmem:[%s12846_s20 + $0x94] sm:$0x1] }
 0x333   : > { %v4330_v17 = vpop.f32.mrf.mxu2  ;;  %v3352_v43 = vpop.f32.mrf.mxu0  ;;  %v5342_v42 = vpack.c.b16 %v4571_v36, %v4570_v2  ;;  %v9967_v51 = vrot.slane %v11125_v32, 9  ;;  %v4468_v39 = vrot.slane %v11126_v55, 5  ;;  %v11127_v2 = vld [vmem:[%s12846_s20 + $0x80] sm:$0xf] }
 0x334   : > { %v3394_v10 = vadd.f32 %v3350_v58, %v3176_v5  ;;  %v3634_v62 = vpop.f32.mrf.mxu1  ;;  %v10944_v58 = vld [vmem:[%s15935_s3 + $0x460] sm:$0xff]  ;;  %16643 = vst [vmem:[#allocation23_spill] sm:$0xff] %v13857_v18  ;;  %v4822_v5 = vpack.c.b16 %v16646_v26, %v16645_v45  ;;  %v9968_v26 = vrot.slane %v11127_v2, 9 }
 0x335   : > { %6094 = vmatpush.bf16.msra.mxu1 %v10944_v58 }
 0x336   : > { %v3676_v38 = vadd.f32 %v3632_v37, %v3394_v10  ;;  %v16647_v10 = vld [vmem:[#allocation2_spill] sm:$0xff] }
 0x338   : > { %v13845_v9 = vadd.f32 %v4330_v17, %v3676_v38  ;;  %v5100_v38 = vpack.c.b16 %v16648_v52, %v16647_v10  ;;  %v11128_v10 = vld [vmem:[%s12846_s20 + $0x84] sm:$0x1] }
 0x339   : > { %v3134_v34 = vpop.f32.mrf.mxu3  ;;  %v4472_v52 = vrot.slane %v11128_v10, 5 }
 0x33a   : > { %16641 = vst [vmem:[#allocation29_spill] sm:$0xff] %v13845_v9  ;;  %v3177_v40 = vadd.f32 %v3134_v34, %v16642_v33 }
 0x33b   : > { %v4332_v37 = vpop.f32.mrf.mxu2  ;;  %v3355_v17 = vpop.f32.mrf.mxu0 }
 0x33c   : > { %v3395_v34 = vadd.f32 %v3352_v43, %v3177_v40  ;;  %v3637_v33 = vpop.f32.mrf.mxu1  ;;  %v13873_v43 = vld [vmem:[%s12846_s20 + $0x90] sm:$0xf]  ;;  %v16650_v40 = vld [vmem:[#allocation5_spill] sm:$0xff] }
 0x33d   : > { %v5036_v55 = vshll.u32 %v13873_v43, 16 }
 0x33e   : > { %v3677_v35 = vadd.f32 %v3634_v62, %v3395_v34  ;;  %4704 = vmatmul.bf16.gmra.mxu3 %v13857_v18  ;;  %4930 = vmatmul.bf16.gmra.mxu0 %v4822_v5 }
 0x33f   : > { %5208 = vmatmul.bf16.gmra.mxu1 %v5100_v38 }
 0x340   : > { %5450 = vmatmul.bf16.gmra.mxu2 %v5342_v42  ;;  %v13868_v45 = vadd.f32 %v4332_v37, %v3677_v35  ;;  %v4469_v42 = vsel %vm11461_vm5, %v9967_v51, %v4468_v39  ;;  %v4473_v37 = vsel %vm11461_vm5, %v9968_v26, %v4472_v52  ;;  %v5033_v35 = vshrl.u32 %v13873_v43, 16  ;;  %v16652_v26 = vld [vmem:[#allocation74_spill] sm:$0xff] }
 0x341   : > { %v3137_v58 = vpop.f32.mrf.mxu3  ;;  %v4572_v10 = vunpack.c.l.b16 %v4469_v42  ;;  %v16653_v52 = vunpack.c.l.b16 %v16652_v26 }
 0x342   : > { %16649 = vst [vmem:[#allocation82_spill] sm:$0xff] %v13868_v45  ;;  %v3178_v62 = vadd.f32 %v3137_v58, %v16650_v40  ;;  %v4573_v45 = vunpack.c.l.b16 %v4473_v37  ;;  %v5035_v58 = vrot.slane %v5033_v35, 4  ;;  %v5038_v40 = vrot.slane %v5036_v55, 5 }
 0x343   : > { %v4335_v34 = vpop.f32.mrf.mxu2  ;;  %v3357_v5 = vpop.f32.mrf.mxu0  ;;  %v13886_v39 = vpack.c.b16 %v4572_v10, %v4571_v36  ;;  %v11129_v36 = vld [vmem:[%s12846_s20 + $0x88] sm:$0xf] }
 0x344   : > { %v3396_v38 = vadd.f32 %v3355_v17, %v3178_v62  ;;  %v3639_v32 = vpop.f32.mrf.mxu1  ;;  %v16654_v62 = vunpack.c.l.b16 %v13198_v3  ;;  %v11130_v3 = vld [vmem:[%s12846_s20 + $0x8c] sm:$0x1] }
 0x345   : > { %v4476_v26 = vrot.slane %v11130_v3, 5 }
 0x346   : > { %v3678_v2 = vadd.f32 %v3637_v33, %v3396_v38  ;;  %v4823_v33 = vpack.c.b16 %v16654_v62, %v16653_v52  ;;  %v5343_v38 = vpack.c.b16 %v4573_v45, %v4572_v10  ;;  %v10131_v52 = vrot.slane %v13873_v43, 9 }
 0x347   : > { %v5306_v62 = vrot.slane %v528_v53, 5 }
 0x348   : > { %v13882_v9 = vadd.f32 %v4335_v34, %v3678_v2  ;;  %v16655_v34 = vld [vmem:[#allocation37_spill] sm:$0xff]  ;;  %v5039_v2 = vor.u32 %v5038_v40, %v5035_v58 }
 0x349   : > { %v3139_v18 = vpop.f32.mrf.mxu3  ;;  %v5101_v37 = vpack.c.b16 %v13269_v44, %v16655_v34 }
 0x34a   : > { %16651 = vst [vmem:[#allocation34_spill] sm:$0xff] %v13882_v9  ;;  %v3179_v51 = vadd.f32 %v3139_v18, %v13247_v7  ;;  %v5042_v9 = vshll.u32 %v528_v53, 16  ;;  %v9969_v18 = vrot.slane %v11129_v36, 9  ;;  %v5040_v44 = vrot.slane %v5039_v2, 4 }
 0x34b   : > { %v4337_v17 = vpop.f32.mrf.mxu2  ;;  %v3360_v42 = vpop.f32.mrf.mxu0  ;;  %v13908_v53 = vsel %vm11461_vm5, %v10131_v52, %v5306_v62  ;;  %v16136_v2 = vunpack.c.l.b16 %v13873_v43 }
 0x34c   : > { %v3397_v35 = vadd.f32 %v3357_v5, %v3179_v51  ;;  %v3642_v55 = vpop.f32.mrf.mxu1  ;;  %v5044_v5 = vrot.slane %v5042_v9, 5 }
 0x34e   : > { %v3679_v7 = vadd.f32 %v3639_v32, %v3397_v35  ;;  %4709 = vmatmul.bf16.gmra.mxu3 %v13886_v39  ;;  %4935 = vmatmul.bf16.gmra.mxu0 %v4823_v33  ;;  %v10927_v32 = vld [vmem:[%s15935_s3 + $0x3d8] sm:$0xff]  ;;  %v5045_v9 = vsel %vm11429_vm3, %v5040_v44, %v5044_v5  ;;  %v16656_v44 = vunpack.c.l.b16 %v13206_v30 }
 0x34f   : > { %5213 = vmatmul.bf16.gmra.mxu1 %v5101_v37  ;;  %5623 = vmatpush.bf16.msra.mxu3 %v10927_v32 }
 0x350   : > { %5455 = vmatmul.bf16.gmra.mxu2 %v5343_v38  ;;  %v13898_v10 = vadd.f32 %v4337_v17, %v3679_v7  ;;  %v4477_v38 = vsel %vm11461_vm5, %v9969_v18, %v4476_v26  ;;  %v13914_v7 = vunpack.c.l.b16 %v5045_v9  ;;  %v10935_v18 = vld [vmem:[%s15935_s3 + $0x418] sm:$0xff]  ;;  %v4824_v5 = vpack.c.b16 %v16136_v2, %v16656_v44  ;;  %v16658_v2 = vld [vmem:[#allocation15_spill] sm:$0xff] }
 0x351   : > { %v3142_v58 = vpop.f32.mrf.mxu3  ;;  %v4574_v35 = vunpack.c.l.b16 %v4477_v38  ;;  %5877 = vmatpush.bf16.msra.mxu0 %v10935_v18 }
 0x352   : > { %v3180_v40 = vadd.f32 %v3142_v58, %v13276_v61  ;;  %v16135_v61 = vunpack.c.l.b16 %v13908_v53 }
 0x353   : > { %v4340_v51 = vpop.f32.mrf.mxu2  ;;  %v3362_v33 = vpop.f32.mrf.mxu0  ;;  %v13928_v62 = vpack.c.b16 %v4574_v35, %v4573_v45 }
 0x354   : > { %v3398_v34 = vadd.f32 %v3360_v42, %v3180_v40  ;;  %v3644_v37 = vpop.f32.mrf.mxu1  ;;  %v10951_v42 = vld [vmem:[%s15935_s3 + $0x498] sm:$0xff]  ;;  %v5344_v58 = vpack.c.b16 %v16135_v61, %v4574_v35 }
 0x355   : > { %6377 = vmatpush.bf16.msra.mxu2 %v10951_v42  ;;  %v11134_v42 = vld [vmem:[%s12846_s20 + $0xac] sm:$0x1] }
 0x356   : > { %v3680_v17 = vadd.f32 %v3642_v55, %v3398_v34  ;;  %v10943_v55 = vld [vmem:[%s15935_s3 + $0x458] sm:$0xff]  ;;  %v11132_v34 = vld [vmem:[%s12846_s20 + $0xa4] sm:$0x1]  ;;  %v4484_v18 = vrot.slane %v11134_v42, 5 }
 0x357   : > { %6095 = vmatpush.bf16.msra.mxu1 %v10943_v55  ;;  %v4480_v9 = vrot.slane %v11132_v34, 5 }
 0x358   : > { %v13916_v36 = vadd.f32 %v4340_v51, %v3680_v17  ;;  %v11131_v51 = vld [vmem:[%s12846_s20 + $0xa0] sm:$0xf]  ;;  %v11133_v17 = vld [vmem:[%s12846_s20 + $0xa8] sm:$0xf] }
 0x359   : > { %v3144_v3 = vpop.f32.mrf.mxu3  ;;  %v9970_v38 = vrot.slane %v11131_v51, 9  ;;  %v9971_v35 = vrot.slane %v11133_v17, 9 }
 0x35a   : > { %v3181_v26 = vadd.f32 %v3144_v3, %v13306_v54  ;;  %v5102_v54 = vpack.c.b16 %v13914_v7, %v13271_v12  ;;  %v11136_v3 = vld [vmem:[%s12846_s20 + $0xb4] sm:$0x1] }
 0x35b   : > { %v4342_v52 = vpop.f32.mrf.mxu2  ;;  %v3365_v32 = vpop.f32.mrf.mxu0 }
 0x35c   : > { %v3399_v45 = vadd.f32 %v3362_v33, %v3181_v26  ;;  %v3647_v40 = vpop.f32.mrf.mxu1  ;;  %v11135_v33 = vld [vmem:[%s12846_s20 + $0xb0] sm:$0xf] }
 0x35d   : > { %v9972_v55 = vrot.slane %v11135_v33, 9 }
 0x35e   : > { %v3681_v30 = vadd.f32 %v3644_v37, %v3399_v45  ;;  %4714 = vmatmul.bf16.gmra.mxu3 %v13928_v62  ;;  %4940 = vmatmul.bf16.gmra.mxu0 %v4824_v5  ;;  %v4488_v37 = vrot.slane %v11136_v3, 5  ;;  %v4485_v45 = vsel %vm11461_vm5, %v9971_v35, %v4484_v18  ;;  %v16659_v35 = vunpack.c.l.b16 %v16658_v2  ;;  %v11138_v2 = vld [vmem:[%s12846_s20 + $0xbc] sm:$0x1] }
 0x35f   : > { %5218 = vmatmul.bf16.gmra.mxu1 %v5102_v54  ;;  %v4481_v54 = vsel %vm11461_vm5, %v9970_v38, %v4480_v9  ;;  %v4576_v42 = vunpack.c.l.b16 %v4485_v45 }
 0x360   : > { %5460 = vmatmul.bf16.gmra.mxu2 %v5344_v58  ;;  %v13943_v12 = vadd.f32 %v4342_v52, %v3681_v30  ;;  %v4489_v52 = vsel %vm11461_vm5, %v9972_v55, %v4488_v37  ;;  %v4575_v17 = vunpack.c.l.b16 %v4481_v54  ;;  %v16662_v37 = vld [vmem:[#allocation13_spill] sm:$0xff]  ;;  %v16663_v54 = vld [vmem:[#allocation20_spill] sm:$0xff] }
 0x361   : > { %v3147_v26 = vpop.f32.mrf.mxu3  ;;  %v4577_v33 = vunpack.c.l.b16 %v4489_v52 }
 0x362   : > { %v3182_v44 = vadd.f32 %v3147_v26, %v13325_v20  ;;  %v16657_v26 = vld [vmem:[#allocation16_spill] sm:$0xff]  ;;  %v4599_v9 = vpack.c.b16 %v4576_v42, %v4575_v17 }
 0x363   : > { %v4345_v5 = vpop.f32.mrf.mxu2  ;;  %v3367_v58 = vpop.f32.mrf.mxu0 }
 0x364   : > { %v3400_v51 = vadd.f32 %v3365_v32, %v3182_v44  ;;  %v3649_v34 = vpop.f32.mrf.mxu1  ;;  %v16660_v32 = vld [vmem:[#allocation46_spill] sm:$0xff] }
 0x365   : > { %v16661_v18 = vunpack.c.l.b16 %v16660_v32 }
 0x366   : > { %v3682_v30 = vadd.f32 %v3647_v40, %v3400_v51  ;;  %v5345_v40 = vpack.c.b16 %v4577_v33, %v4576_v42  ;;  %v11140_v42 = vld [vmem:[%s12846_s20 + $0xc4] sm:$0x1] }
 0x367   : > { %v4825_v44 = vpack.c.b16 %v16661_v18, %v16659_v35  ;;  %v11139_v35 = vld [vmem:[%s12846_s20 + $0xc0] sm:$0xf]  ;;  %v4496_v18 = vrot.slane %v11140_v42, 5  ;;  %v10934_v42 = vld [vmem:[%s15935_s3 + $0x410] sm:$0xff] }
 0x368   : > { %v13954_v3 = vadd.f32 %v4345_v5, %v3682_v30  ;;  %v5103_v5 = vpack.c.b16 %v16663_v54, %v16662_v37  ;;  %v11137_v30 = vld [vmem:[%s12846_s20 + $0xb8] sm:$0xf]  ;;  %v9974_v32 = vrot.slane %v11139_v35, 9  ;;  %v10950_v35 = vld [vmem:[%s15935_s3 + $0x490] sm:$0xff]  ;;  %5878 = vmatpush.bf16.msra.mxu0 %v10934_v42  ;;  %v11142_v42 = vld [vmem:[%s12846_s20 + $0xcc] sm:$0x1] }
 0x369   : > { %v3149_v20 = vpop.f32.mrf.mxu3  ;;  %v9973_v17 = vrot.slane %v11137_v30, 9  ;;  %6378 = vmatpush.bf16.msra.mxu2 %v10950_v35 }
 0x36a   : > { %v3183_v61 = vadd.f32 %v3149_v20, %v16657_v26  ;;  %v4492_v20 = vrot.slane %v11138_v2, 5 }
 0x36b   : > { %v4347_v38 = vpop.f32.mrf.mxu2  ;;  %v4906_v55 = vpop.f32.mrf.mxu0 }
 0x36c   : > { %v3401_v45 = vadd.f32 %v3367_v58, %v3183_v61  ;;  %v5184_v51 = vpop.f32.mrf.mxu1  ;;  %v10926_v61 = vld [vmem:[%s15935_s3 + $0x3d0] sm:$0xff]  ;;  %v4493_v37 = vsel %vm11461_vm5, %v9973_v17, %v4492_v20  ;;  %v16667_v20 = vld [vmem:[#allocation21_spill] sm:$0xff] }
 0x36d   : > { %5624 = vmatpush.bf16.msra.mxu3 %v10926_v61  ;;  %v16669_v61 = vld [vmem:[#allocation8_spill] sm:$0xff] }
 0x36e   : > { %v3683_v52 = vadd.f32 %v3649_v34, %v3401_v45  ;;  %4719 = vmatmul.bf16.gmra.mxu3 %v4599_v9  ;;  %4945 = vmatmul.bf16.gmra.mxu0 %v4825_v44  ;;  %v16665_v34 = vld [vmem:[#allocation80_spill] sm:$0xff] }
 0x36f   : > { %5223 = vmatmul.bf16.gmra.mxu1 %v5103_v5  ;;  %v4497_v5 = vsel %vm11461_vm5, %v9974_v32, %v4496_v18 }
 0x370   : > { %5465 = vmatmul.bf16.gmra.mxu2 %v5345_v40  ;;  %v13965_v26 = vadd.f32 %v4347_v38, %v3683_v52  ;;  %v4578_v52 = vunpack.c.l.b16 %v4493_v37  ;;  %v4579_v30 = vunpack.c.l.b16 %v4497_v5  ;;  %v16673_v5 = vld [vmem:[#allocation12_spill] sm:$0xff] }
 0x371   : > { %v4680_v58 = vpop.f32.mrf.mxu3 }
 0x372   : > { %16664 = vst [vmem:[#allocation41_spill] sm:$0xff] %v13965_v26  ;;  %v4760_v9 = vadd.f32 %v4680_v58, %v16665_v34  ;;  %v13989_v18 = vpack.c.b16 %v4578_v52, %v4577_v33  ;;  %v16670_v58 = vunpack.c.l.b16 %v16669_v61  ;;  %v16671_v34 = vunpack.c.l.b16 %v13335_v13  ;;  %v11141_v13 = vld [vmem:[%s12846_s20 + $0xc8] sm:$0xf]  ;;  %v548_v26 = vld [vmem:[%s12846_s20 + $0xe4] sm:$0x1] }
 0x373   : > { %v5426_v44 = vpop.f32.mrf.mxu2  ;;  %v4908_v40 = vpop.f32.mrf.mxu0  ;;  %v5346_v37 = vpack.c.b16 %v4579_v30, %v4578_v52  ;;  %v9975_v35 = vrot.slane %v11141_v13, 9  ;;  %v4500_v61 = vrot.slane %v11142_v42, 5  ;;  %v11143_v52 = vld [vmem:[%s12846_s20 + $0xd0] sm:$0xf] }
 0x374   : > { %v4986_v54 = vadd.f32 %v4906_v55, %v4760_v9  ;;  %v5186_v38 = vpop.f32.mrf.mxu1  ;;  %v10942_v55 = vld [vmem:[%s15935_s3 + $0x450] sm:$0xff]  ;;  %16668 = vst [vmem:[#allocation43_spill] sm:$0xff] %v13989_v18  ;;  %v4826_v9 = vpack.c.b16 %v16671_v34, %v16670_v58  ;;  %v9976_v34 = vrot.slane %v11143_v52, 9 }
 0x375   : > { %6096 = vmatpush.bf16.msra.mxu1 %v10942_v55 }
 0x376   : > { %v5264_v45 = vadd.f32 %v5184_v51, %v4986_v54  ;;  %v16672_v54 = vld [vmem:[#allocation73_spill] sm:$0xff] }
 0x378   : > { %v13977_v2 = vadd.f32 %v5426_v44, %v5264_v45  ;;  %v5104_v45 = vpack.c.b16 %v16673_v5, %v16672_v54  ;;  %v11144_v54 = vld [vmem:[%s12846_s20 + $0xd4] sm:$0x1] }
 0x379   : > { %v4682_v17 = vpop.f32.mrf.mxu3  ;;  %v4504_v5 = vrot.slane %v11144_v54, 5 }
 0x37a   : > { %16666 = vst [vmem:[#allocation39_spill] sm:$0xff] %v13977_v2  ;;  %v4761_v32 = vadd.f32 %v4682_v17, %v16667_v20 }
 0x37b   : > { %v5428_v51 = vpop.f32.mrf.mxu2  ;;  %v4911_v44 = vpop.f32.mrf.mxu0 }
 0x37c   : > { %v4987_v17 = vadd.f32 %v4908_v40, %v4761_v32  ;;  %v5189_v20 = vpop.f32.mrf.mxu1  ;;  %v14005_v40 = vld [vmem:[%s12846_s20 + $0xe0] sm:$0xf]  ;;  %v16676_v32 = vld [vmem:[#allocation19_spill] sm:$0xff] }
 0x37d   : > { %16675 = vst [vmem:[#allocation52_spill] sm:$0xff] %v14005_v40  ;;  %v5050_v42 = vshll.u32 %v14005_v40, 16 }
 0x37e   : > { %v5265_v33 = vadd.f32 %v5186_v38, %v4987_v17  ;;  %4724 = vmatmul.bf16.gmra.mxu3 %v13989_v18  ;;  %4950 = vmatmul.bf16.gmra.mxu0 %v4826_v9 }
 0x37f   : > { %5228 = vmatmul.bf16.gmra.mxu1 %v5104_v45 }
 0x380   : > { %5470 = vmatmul.bf16.gmra.mxu2 %v5346_v37  ;;  %v14000_v58 = vadd.f32 %v5428_v51, %v5265_v33  ;;  %v4501_v37 = vsel %vm11461_vm5, %v9975_v35, %v4500_v61  ;;  %v4505_v51 = vsel %vm11461_vm5, %v9976_v34, %v4504_v5  ;;  %v5047_v33 = vshrl.u32 %v14005_v40, 16 }
 0x381   : > { %v4685_v55 = vpop.f32.mrf.mxu3  ;;  %v4580_v54 = vunpack.c.l.b16 %v4501_v37  ;;  %v16677_v34 = vunpack.c.l.b16 %v13340_v19  ;;  %v16678_v5 = vunpack.c.l.b16 %v13391_v31  ;;  %v11145_v19 = vld [vmem:[%s12846_s20 + $0xd8] sm:$0xf]  ;;  %v11146_v31 = vld [vmem:[%s12846_s20 + $0xdc] sm:$0x1] }
 0x382   : > { %16674 = vst [vmem:[#allocation32_spill] sm:$0xff] %v14000_v58  ;;  %v4762_v38 = vadd.f32 %v4685_v55, %v16676_v32  ;;  %v4581_v58 = vunpack.c.l.b16 %v4505_v51  ;;  %v5049_v55 = vrot.slane %v5047_v33, 4  ;;  %v5052_v32 = vrot.slane %v5050_v42, 5 }
 0x383   : > { %v5431_v17 = vpop.f32.mrf.mxu2  ;;  %v4913_v9 = vpop.f32.mrf.mxu0  ;;  %v14018_v61 = vpack.c.b16 %v4580_v54, %v4579_v30  ;;  %v9977_v30 = vrot.slane %v11145_v19, 9 }
 0x384   : > { %v4988_v45 = vadd.f32 %v4911_v44, %v4762_v38  ;;  %v5191_v13 = vpop.f32.mrf.mxu1  ;;  %v5347_v37 = vpack.c.b16 %v4581_v58, %v4580_v54  ;;  %v5053_v42 = vor.u32 %v5052_v32, %v5049_v55 }
 0x386   : > { %v5266_v52 = vadd.f32 %v5189_v20, %v4988_v45  ;;  %v4827_v20 = vpack.c.b16 %v16678_v5, %v16677_v34  ;;  %v10132_v34 = vrot.slane %v14005_v40, 9  ;;  %v5310_v5 = vrot.slane %v548_v26, 5 }
 0x388   : > { %v14014_v2 = vadd.f32 %v5431_v17, %v5266_v52  ;;  %v16679_v17 = vld [vmem:[#allocation17_spill] sm:$0xff]  ;;  %v5056_v52 = vshll.u32 %v548_v26, 16  ;;  %v14040_v26 = vsel %vm11461_vm5, %v10132_v34, %v5310_v5 }
 0x389   : > { %v4687_v18 = vpop.f32.mrf.mxu3  ;;  %v5105_v45 = vpack.c.b16 %v13461_v57, %v16679_v17  ;;  %v5054_v57 = vrot.slane %v5053_v42, 4  ;;  %16680 = vst [vmem:[#allocation50_spill] sm:$0xff] %v14040_v26 }
 0x38a   : > { %v4763_v35 = vadd.f32 %v4687_v18, %v13437_v60  ;;  %v4508_v18 = vrot.slane %v11146_v31, 5 }
 0x38b   : > { %v5433_v44 = vpop.f32.mrf.mxu2  ;;  %v4916_v38 = vpop.f32.mrf.mxu0 }
 0x38c   : > { %v4989_v51 = vadd.f32 %v4913_v9, %v4763_v35  ;;  %v5194_v33 = vpop.f32.mrf.mxu1  ;;  %v5058_v9 = vrot.slane %v5056_v52, 5  ;;  %v16139_v52 = vunpack.c.l.b16 %v14005_v40  ;;  %v16687_v40 = vld [vmem:[#allocation85_spill] sm:$0xff] }
 0x38e   : > { %v5267_v60 = vadd.f32 %v5191_v13, %v4989_v51  ;;  %4729 = vmatmul.bf16.gmra.mxu3 %v14018_v61  ;;  %4955 = vmatmul.bf16.gmra.mxu0 %v4827_v20  ;;  %v10925_v13 = vld [vmem:[%s15935_s3 + $0x3c8] sm:$0xff] }
 0x38f   : > { %5233 = vmatmul.bf16.gmra.mxu1 %v5105_v45  ;;  %5625 = vmatpush.bf16.msra.mxu3 %v10925_v13 }
 0x390   : > { %5475 = vmatmul.bf16.gmra.mxu2 %v5347_v37  ;;  %v14030_v54 = vadd.f32 %v5433_v44, %v5267_v60  ;;  %v4509_v37 = vsel %vm11461_vm5, %v9977_v30, %v4508_v18  ;;  %v5059_v44 = vsel %vm11429_vm3, %v5054_v57, %v5058_v9  ;;  %v10933_v30 = vld [vmem:[%s15935_s3 + $0x408] sm:$0xff]  ;;  %v16682_v57 = vld [vmem:[#allocation10_spill] sm:$0xff] }
 0x391   : > { %v4690_v55 = vpop.f32.mrf.mxu3  ;;  %v4582_v42 = vunpack.c.l.b16 %v4509_v37  ;;  %v14046_v60 = vunpack.c.l.b16 %v5059_v44  ;;  %v16683_v9 = vunpack.c.l.b16 %v16682_v57  ;;  %5879 = vmatpush.bf16.msra.mxu0 %v10933_v30  ;;  %v11147_v44 = vld [vmem:[%s12846_s20 + $0xf0] sm:$0xf]  ;;  %v11150_v57 = vld [vmem:[%s12846_s20 + $0xfc] sm:$0x1] }
 0x392   : > { %v4764_v32 = vadd.f32 %v4690_v55, %v13467_v8  ;;  %v16138_v8 = vunpack.c.l.b16 %v14040_v26 }
 0x393   : > { %v5436_v35 = vpop.f32.mrf.mxu2  ;;  %v4918_v20 = vpop.f32.mrf.mxu0  ;;  %16681 = vst [vmem:[#allocation42_spill] sm:$0xff] %v14046_v60  ;;  %v14060_v5 = vpack.c.b16 %v4582_v42, %v4581_v58  ;;  %v4828_v13 = vpack.c.b16 %v16139_v52, %v16683_v9  ;;  %v4516_v9 = vrot.slane %v11150_v57, 5 }
 0x394   : > { %v4990_v17 = vadd.f32 %v4916_v38, %v4764_v32  ;;  %v5196_v45 = vpop.f32.mrf.mxu1  ;;  %v10949_v38 = vld [vmem:[%s15935_s3 + $0x488] sm:$0xff]  ;;  %v5348_v32 = vpack.c.b16 %v16138_v8, %v4582_v42  ;;  %v11149_v42 = vld [vmem:[%s12846_s20 + $0xf8] sm:$0xf]  ;;  %v16685_v8 = vld [vmem:[#allocation48_spill] sm:$0xff] }
 0x395   : > { %6379 = vmatpush.bf16.msra.mxu2 %v10949_v38  ;;  %v11148_v38 = vld [vmem:[%s12846_s20 + $0xf4] sm:$0x1] }
 0x396   : > { %v5268_v51 = vadd.f32 %v5194_v33, %v4990_v17  ;;  %v10941_v33 = vld [vmem:[%s15935_s3 + $0x448] sm:$0xff]  ;;  %v4512_v30 = vrot.slane %v11148_v38, 5 }
 0x397   : > { %6097 = vmatpush.bf16.msra.mxu1 %v10941_v33 }
 0x398   : > { %v14048_v19 = vadd.f32 %v5436_v35, %v5268_v51  ;;  %v16684_v35 = vld [vmem:[#allocation84_spill] sm:$0xff]  ;;  %v9978_v51 = vrot.slane %v11147_v44, 9 }
 0x399   : > { %v4692_v31 = vpop.f32.mrf.mxu3 }
 0x39a   : > { %v4765_v18 = vadd.f32 %v4692_v31, %v13502_v1  ;;  %v5106_v1 = vpack.c.b16 %v14046_v60, %v16684_v35  ;;  %v9979_v31 = vrot.slane %v11149_v42, 9 }
 0x39b   : > { %v5438_v34 = vpop.f32.mrf.mxu2  ;;  %v4921_v55 = vpop.f32.mrf.mxu0 }
 0x39c   : > { %v4991_v58 = vadd.f32 %v4918_v20, %v4765_v18  ;;  %v5199_v37 = vpop.f32.mrf.mxu1  ;;  %v11151_v20 = vld [vmem:[%s12846_s20 + $0x100] sm:$0xf]  ;;  %v11152_v18 = vld [vmem:[%s12846_s20 + $0x104] sm:$0x1]  ;;  %v4517_v44 = vsel %vm11461_vm5, %v9979_v31, %v4516_v9  ;;  %v16688_v31 = vunpack.c.l.b16 %v16687_v40  ;;  %v11154_v40 = vld [vmem:[%s12846_s20 + $0x10c] sm:$0x1] }
 0x39d   : > { %v9980_v33 = vrot.slane %v11151_v20, 9  ;;  %v4584_v20 = vunpack.c.l.b16 %v4517_v44 }
 0x39e   : > { %v5269_v17 = vadd.f32 %v5196_v45, %v4991_v58  ;;  %4734 = vmatmul.bf16.gmra.mxu3 %v14060_v5  ;;  %4960 = vmatmul.bf16.gmra.mxu0 %v4828_v13  ;;  %v4520_v45 = vrot.slane %v11152_v18, 5 }
 0x39f   : > { %5238 = vmatmul.bf16.gmra.mxu1 %v5106_v1  ;;  %v4513_v1 = vsel %vm11461_vm5, %v9978_v51, %v4512_v30 }
 0x3a0   : > { %5480 = vmatmul.bf16.gmra.mxu2 %v5348_v32  ;;  %v14075_v35 = vadd.f32 %v5438_v34, %v5269_v17  ;;  %v4521_v34 = vsel %vm11461_vm5, %v9980_v33, %v4520_v45  ;;  %v4583_v57 = vunpack.c.l.b16 %v4513_v1  ;;  %v16691_v45 = vld [vmem:[#allocation45_spill] sm:$0xff] }
 0x3a1   : > { %v4695_v58 = vpop.f32.mrf.mxu3  ;;  %v4585_v18 = vunpack.c.l.b16 %v4521_v34  ;;  %v16692_v1 = vld [vmem:[#allocation57_spill] sm:$0xff] }
 0x3a2   : > { %v4766_v52 = vadd.f32 %v4695_v58, %v16685_v8  ;;  %v16686_v58 = vld [vmem:[#allocation33_spill] sm:$0xff]  ;;  %v4603_v30 = vpack.c.b16 %v4584_v20, %v4583_v57 }
 0x3a3   : > { %v5441_v13 = vpop.f32.mrf.mxu2  ;;  %v4923_v32 = vpop.f32.mrf.mxu0 }
 0x3a4   : > { %v4992_v38 = vadd.f32 %v4921_v55, %v4766_v52  ;;  %v5201_v42 = vpop.f32.mrf.mxu1  ;;  %v16689_v52 = vld [vmem:[#allocation25_spill] sm:$0xff] }
 0x3a5   : > { %v16690_v55 = vunpack.c.l.b16 %v16689_v52 }
 0x3a6   : > { %v5270_v17 = vadd.f32 %v5199_v37, %v4992_v38  ;;  %v5349_v37 = vpack.c.b16 %v4585_v18, %v4584_v20  ;;  %v11156_v20 = vld [vmem:[%s12846_s20 + $0x114] sm:$0x1] }
 0x3a7   : > { %v4829_v9 = vpack.c.b16 %v16690_v55, %v16688_v31  ;;  %v11155_v31 = vld [vmem:[%s12846_s20 + $0x110] sm:$0xf]  ;;  %v4528_v55 = vrot.slane %v11156_v20, 5  ;;  %v10932_v20 = vld [vmem:[%s15935_s3 + $0x400] sm:$0xff] }
 0x3a8   : > { %v14086_v26 = vadd.f32 %v5441_v13, %v5270_v17  ;;  %v5107_v13 = vpack.c.b16 %v16692_v1, %v16691_v45  ;;  %v11153_v17 = vld [vmem:[%s12846_s20 + $0x108] sm:$0xf]  ;;  %v9982_v52 = vrot.slane %v11155_v31, 9  ;;  %v10948_v31 = vld [vmem:[%s15935_s3 + $0x480] sm:$0xff]  ;;  %5880 = vmatpush.bf16.msra.mxu0 %v10932_v20  ;;  %v11158_v20 = vld [vmem:[%s12846_s20 + $0x11c] sm:$0x1] }
 0x3a9   : > { %v4697_v8 = vpop.f32.mrf.mxu3  ;;  %v9981_v57 = vrot.slane %v11153_v17, 9  ;;  %6380 = vmatpush.bf16.msra.mxu2 %v10948_v31 }
 0x3aa   : > { %v4767_v60 = vadd.f32 %v4697_v8, %v16686_v58  ;;  %v4524_v8 = vrot.slane %v11154_v40, 5 }
 0x3ab   : > { %v5443_v51 = vpop.f32.mrf.mxu2  ;;  %v4926_v33 = vpop.f32.mrf.mxu0 }
 0x3ac   : > { %v4993_v44 = vadd.f32 %v4923_v32, %v4767_v60  ;;  %v5204_v38 = vpop.f32.mrf.mxu1  ;;  %v10924_v60 = vld [vmem:[%s15935_s3 + $0x3c0] sm:$0xff]  ;;  %v4525_v45 = vsel %vm11461_vm5, %v9981_v57, %v4524_v8  ;;  %v16695_v8 = vld [vmem:[#allocation77_spill] sm:$0xff] }
 0x3ad   : > { %5626 = vmatpush.bf16.msra.mxu3 %v10924_v60  ;;  %v16697_v60 = vld [vmem:[#allocation28_spill] sm:$0xff] }
 0x3ae   : > { %v5271_v34 = vadd.f32 %v5201_v42, %v4993_v44  ;;  %4739 = vmatmul.bf16.gmra.mxu3 %v4603_v30  ;;  %4965 = vmatmul.bf16.gmra.mxu0 %v4829_v9  ;;  %v16693_v42 = vld [vmem:[#allocation67_spill] sm:$0xff] }
 0x3af   : > { %5243 = vmatmul.bf16.gmra.mxu1 %v5107_v13  ;;  %v4529_v13 = vsel %vm11461_vm5, %v9982_v52, %v4528_v55 }
 0x3b0   : > { %5485 = vmatmul.bf16.gmra.mxu2 %v5349_v37  ;;  %v14097_v58 = vadd.f32 %v5443_v51, %v5271_v34  ;;  %v4586_v34 = vunpack.c.l.b16 %v4525_v45  ;;  %v4587_v17 = vunpack.c.l.b16 %v4529_v13 }
 0x3b1   : > { %v4700_v32 = vpop.f32.mrf.mxu3 }
 0x3b2   : > { %v4768_v30 = vadd.f32 %v4700_v32, %v16693_v42  ;;  %v14121_v55 = vpack.c.b16 %v4586_v34, %v4585_v18  ;;  %v16698_v32 = vunpack.c.l.b16 %v16697_v60  ;;  %v16699_v42 = vunpack.c.l.b16 %v13528_v22  ;;  %v11157_v22 = vld [vmem:[%s12846_s20 + $0x118] sm:$0xf] }
 0x3b3   : > { %v5446_v9 = vpop.f32.mrf.mxu2  ;;  %v4928_v37 = vpop.f32.mrf.mxu0  ;;  %v5350_v45 = vpack.c.b16 %v4587_v17, %v4586_v34  ;;  %v9983_v31 = vrot.slane %v11157_v22, 9  ;;  %v11159_v34 = vld [vmem:[%s12846_s20 + $0x120] sm:$0xf] }
 0x3b4   : > { %v4994_v1 = vadd.f32 %v4926_v33, %v4768_v30  ;;  %v5206_v51 = vpop.f32.mrf.mxu1  ;;  %v10940_v33 = vld [vmem:[%s15935_s3 + $0x440] sm:$0xff]  ;;  %16696 = vst [vmem:[#allocation61_spill] sm:$0xff] %v14121_v55  ;;  %v4830_v30 = vpack.c.b16 %v16699_v42, %v16698_v32  ;;  %v9984_v32 = vrot.slane %v11159_v34, 9 }
 0x3b5   : > { %6098 = vmatpush.bf16.msra.mxu1 %v10940_v33 }
 0x3b6   : > { %v5272_v44 = vadd.f32 %v5204_v38, %v4994_v1  ;;  %v16700_v1 = vld [vmem:[#allocation27_spill] sm:$0xff] }
 0x3b7   : > { %v5108_v13 = vpack.c.b16 %v13603_v48, %v16700_v1  ;;  %v11160_v48 = vld [vmem:[%s12846_s20 + $0x124] sm:$0x1] }
 0x3b8   : > { %v14109_v40 = vadd.f32 %v5446_v9, %v5272_v44  ;;  %v4536_v42 = vrot.slane %v11160_v48, 5 }
 0x3b9   : > { %v4702_v57 = vpop.f32.mrf.mxu3 }
 0x3ba   : > { %16694 = vst [vmem:[#allocation51_spill] sm:$0xff] %v14109_v40  ;;  %v4769_v52 = vadd.f32 %v4702_v57, %v16695_v8  ;;  %v4532_v8 = vrot.slane %v11158_v20, 5 }
 0x3bb   : > { %v5448_v38 = vpop.f32.mrf.mxu2  ;;  %v4931_v9 = vpop.f32.mrf.mxu0 }
 0x3bc   : > { %v4995_v44 = vadd.f32 %v4928_v37, %v4769_v52  ;;  %v5209_v57 = vpop.f32.mrf.mxu1  ;;  %v14137_v37 = vld [vmem:[%s12846_s20 + $0x130] sm:$0xf]  ;;  %v16702_v52 = vld [vmem:[#allocation81_spill] sm:$0xff] }
 0x3bd   : > { %v5064_v22 = vshll.u32 %v14137_v37, 16 }
 0x3be   : > { %v5273_v18 = vadd.f32 %v5206_v51, %v4995_v44  ;;  %4744 = vmatmul.bf16.gmra.mxu3 %v14121_v55  ;;  %4970 = vmatmul.bf16.gmra.mxu0 %v4830_v30  ;;  %v568_v55 = vld [vmem:[%s12846_s20 + $0x134] sm:$0x1] }
 0x3bf   : > { %5248 = vmatmul.bf16.gmra.mxu1 %v5108_v13 }
 0x3c0   : > { %5490 = vmatmul.bf16.gmra.mxu2 %v5350_v45  ;;  %v14132_v60 = vadd.f32 %v5448_v38, %v5273_v18  ;;  %v4533_v45 = vsel %vm11461_vm5, %v9983_v31, %v4532_v8  ;;  %v4537_v38 = vsel %vm11461_vm5, %v9984_v32, %v4536_v42  ;;  %v5061_v18 = vshrl.u32 %v14137_v37, 16  ;;  %v16704_v32 = vld [vmem:[#allocation54_spill] sm:$0xff] }
 0x3c1   : > { %v4705_v33 = vpop.f32.mrf.mxu3  ;;  %v4588_v34 = vunpack.c.l.b16 %v4533_v45  ;;  %v4589_v48 = vunpack.c.l.b16 %v4537_v38  ;;  %v16705_v42 = vunpack.c.l.b16 %v16704_v32 }
 0x3c2   : > { %16701 = vst [vmem:[#allocation58_spill] sm:$0xff] %v14132_v60  ;;  %v4770_v51 = vadd.f32 %v4705_v33, %v16702_v52  ;;  %v5063_v33 = vrot.slane %v5061_v18, 4  ;;  %v5066_v52 = vrot.slane %v5064_v22, 5 }
 0x3c3   : > { %v5451_v1 = vpop.f32.mrf.mxu2  ;;  %v4933_v30 = vpop.f32.mrf.mxu0  ;;  %v14150_v8 = vpack.c.b16 %v4588_v34, %v4587_v17  ;;  %v11161_v17 = vld [vmem:[%s12846_s20 + $0x128] sm:$0xf] }
 0x3c4   : > { %v4996_v13 = vadd.f32 %v4931_v9, %v4770_v51  ;;  %v5211_v44 = vpop.f32.mrf.mxu1  ;;  %v16706_v51 = vunpack.c.l.b16 %v13584_v25  ;;  %v11162_v25 = vld [vmem:[%s12846_s20 + $0x12c] sm:$0x1] }
 0x3c5   : > { %v4540_v32 = vrot.slane %v11162_v25, 5 }
 0x3c6   : > { %v5274_v20 = vadd.f32 %v5209_v57, %v4996_v13  ;;  %v4831_v57 = vpack.c.b16 %v16706_v51, %v16705_v42  ;;  %v5351_v13 = vpack.c.b16 %v4589_v48, %v4588_v34  ;;  %v10133_v42 = vrot.slane %v14137_v37, 9 }
 0x3c7   : > { %v5314_v51 = vrot.slane %v568_v55, 5 }
 0x3c8   : > { %v14146_v60 = vadd.f32 %v5451_v1, %v5274_v20  ;;  %v16707_v1 = vld [vmem:[#allocation79_spill] sm:$0xff]  ;;  %v5067_v20 = vor.u32 %v5066_v52, %v5063_v33 }
 0x3c9   : > { %v4707_v40 = vpop.f32.mrf.mxu3  ;;  %v5109_v38 = vpack.c.b16 %v13644_v29, %v16707_v1 }
 0x3ca   : > { %16703 = vst [vmem:[#allocation44_spill] sm:$0xff] %v14146_v60  ;;  %v4771_v31 = vadd.f32 %v4707_v40, %v13630_v28  ;;  %v5070_v60 = vshll.u32 %v568_v55, 16  ;;  %v9985_v40 = vrot.slane %v11161_v17, 9  ;;  %v5068_v29 = vrot.slane %v5067_v20, 4  ;;  %v10971_v17 = vld [vmem:[%s15935_s3 + $0x538] sm:$0xff] }
 0x3cb   : > { %v5453_v9 = vpop.f32.mrf.mxu2  ;;  %v4936_v45 = vpop.f32.mrf.mxu0  ;;  %v14172_v55 = vsel %vm11461_vm5, %v10133_v42, %v5314_v51  ;;  %v16146_v20 = vunpack.c.l.b16 %v14137_v37  ;;  %7481 = vmatpush.bf16.msrb.mxu0 %v10971_v17 }
 0x3cc   : > { %v4997_v18 = vadd.f32 %v4933_v30, %v4771_v31  ;;  %v5214_v22 = vpop.f32.mrf.mxu1  ;;  %v5072_v30 = vrot.slane %v5070_v60, 5 }
 0x3ce   : > { %v5275_v28 = vadd.f32 %v5211_v44, %v4997_v18  ;;  %4749 = vmatmul.bf16.gmra.mxu3 %v14150_v8  ;;  %4975 = vmatmul.bf16.gmra.mxu0 %v4831_v57  ;;  %v10963_v44 = vld [vmem:[%s15935_s3 + $0x4f8] sm:$0xff]  ;;  %v5073_v60 = vsel %vm11429_vm3, %v5068_v29, %v5072_v30  ;;  %v16708_v29 = vunpack.c.l.b16 %v13587_v63 }
 0x3cf   : > { %5253 = vmatmul.bf16.gmra.mxu1 %v5109_v38  ;;  %7071 = vmatpush.bf16.msrb.mxu3 %v10963_v44 }
 0x3d0   : > { %5495 = vmatmul.bf16.gmra.mxu2 %v5351_v13  ;;  %v14162_v34 = vadd.f32 %v5453_v9, %v5275_v28  ;;  %v4541_v13 = vsel %vm11461_vm5, %v9985_v40, %v4540_v32  ;;  %v14178_v28 = vunpack.c.l.b16 %v5073_v60  ;;  %v10979_v40 = vld [vmem:[%s15935_s3 + $0x578] sm:$0xff]  ;;  %v4832_v30 = vpack.c.b16 %v16146_v20, %v16708_v29 }
 0x3d1   : > { %v4710_v33 = vpop.f32.mrf.mxu3  ;;  %v4590_v18 = vunpack.c.l.b16 %v4541_v13  ;;  %7707 = vmatpush.bf16.msrb.mxu1 %v10979_v40 }
 0x3d2   : > { %v4772_v52 = vadd.f32 %v4710_v33, %v13650_v49  ;;  %v16145_v49 = vunpack.c.l.b16 %v14172_v55 }
 0x3d3   : > { %v5456_v31 = vpop.f32.mrf.mxu2  ;;  %v4938_v57 = vpop.f32.mrf.mxu0  ;;  %v14198_v51 = vpack.c.b16 %v4590_v18, %v4589_v48 }
 0x3d4   : > { %v4998_v1 = vadd.f32 %v4936_v45, %v4772_v52  ;;  %v5216_v9 = vpop.f32.mrf.mxu1  ;;  %v5352_v33 = vpack.c.b16 %v16145_v49, %v4590_v18  ;;  %v5110_v52 = vpack.c.b16 %v14178_v28, %v13646_v59 }
 0x3d6   : > { %v5276_v38 = vadd.f32 %v5214_v22, %v4998_v1  ;;  %v10987_v22 = vld [vmem:[%s15935_s3 + $0x5b8] sm:$0xff] }
 0x3d7   : > { %7985 = vmatpush.bf16.msrb.mxu2 %v10987_v22 }
 0x3d8   : > { %v14186_v45 = vadd.f32 %v5456_v31, %v5276_v38  ;;  %v573_v31 = vld [vmem:[%s14184_s16 + $0x8] sm:$0xf] }
 0x3d9   : > { %v4712_v25 = vpop.f32.mrf.mxu3  ;;  %v6262_v63 = vunpack.c.l.b16 %v573_v31 }
 0x3da   : > { %v4773_v32 = vadd.f32 %v4712_v25, %v13682_v16  ;;  %v575_v16 = vld [vmem:[%s14184_s16 + $0x10] sm:$0xf] }
 0x3db   : > { %v5458_v42 = vpop.f32.mrf.mxu2  ;;  %v4941_v44 = vpop.f32.mrf.mxu0  ;;  %v6263_v60 = vunpack.c.l.b16 %v575_v16 }
 0x3dc   : > { %v4999_v13 = vadd.f32 %v4938_v57, %v4773_v32  ;;  %v5219_v48 = vpop.f32.mrf.mxu1  ;;  %v14217_v32 = vld [vmem:[%s14184_s16] sm:$0xf] }
 0x3dd   : > { %v14213_v18 = vpack.c.b16 %v6263_v60, %v6262_v63  ;;  %v6261_v29 = vunpack.c.l.b16 %v14217_v32 }
 0x3de   : > { %v5277_v1 = vadd.f32 %v5216_v9, %v4999_v13  ;;  %4754 = vmatmul.bf16.gmra.mxu3 %v14198_v51  ;;  %4980 = vmatmul.bf16.gmra.mxu0 %v4832_v30 }
 0x3df   : > { %5258 = vmatmul.bf16.gmra.mxu1 %v5110_v52  ;;  %v6293_v16 = vpack.c.b16 %v6262_v63, %v6261_v29 }
 0x3e0   : > { %5500 = vmatmul.bf16.gmra.mxu2 %v5352_v33  ;;  %v14211_v38 = vadd.f32 %v5458_v42, %v5277_v1 }
 0x3e1   : > { %v4715_v22 = vpop.f32.mrf.mxu3 }
 0x3e2   : > { %v4774_v59 = vadd.f32 %v4715_v22, %v13692_v47  ;;  %v16709_v22 = vld [vmem:[#allocation30_spill] sm:$0xff] }
 0x3e3   : > { %v5461_v17 = vpop.f32.mrf.mxu2  ;;  %v4943_v40 = vpop.f32.mrf.mxu0 }
 0x3e4   : > { %v5000_v57 = vadd.f32 %v4941_v44, %v4774_v59  ;;  %v5221_v25 = vpop.f32.mrf.mxu1  ;;  %v16710_v44 = vld [vmem:[#allocation47_spill] sm:$0xff] }
 0x3e6   : > { %v5278_v9 = vadd.f32 %v5219_v48, %v5000_v57 }
 0x3e8   : > { %v14220_v30 = vadd.f32 %v5461_v17, %v5278_v9  ;;  %v14233_v9 = vld [vmem:[%s14184_s16 + $0x18] sm:$0xf] }
 0x3e9   : > { %v4717_v33 = vpop.f32.mrf.mxu3 }
 0x3ea   : > { %v4775_v42 = vadd.f32 %v4717_v33, %v13701_v6  ;;  %v10962_v6 = vld [vmem:[%s15935_s3 + $0x4f0] sm:$0xff]  ;;  %v16144_v33 = vunpack.c.l.b16 %v14233_v9 }
 0x3eb   : > { %v5463_v52 = vpop.f32.mrf.mxu2  ;;  %v4946_v31 = vpop.f32.mrf.mxu0  ;;  %7072 = vmatpush.bf16.msrb.mxu3 %v10962_v6 }
 0x3ec   : > { %v5001_v13 = vadd.f32 %v4943_v40, %v4775_v42  ;;  %v5224_v47 = vpop.f32.mrf.mxu1  ;;  %v10986_v42 = vld [vmem:[%s15935_s3 + $0x5b0] sm:$0xff] }
 0x3ed   : > { %7986 = vmatpush.bf16.msrb.mxu2 %v10986_v42 }
 0x3ee   : > { %v5279_v1 = vadd.f32 %v5221_v25, %v5001_v13  ;;  %5627 = vmatmul.bf16.vlgmr.msra.gmra.mxu3 %v16709_v22  ;;  %5881 = vmatmul.bf16.vlgmr.msra.gmra.mxu0 %v16710_v44 }
 0x3ef   : > { %6099 = vmatmul.bf16.vlgmr.msra.gmra.mxu1 %v13725_v14 }
 0x3f0   : > { %6381 = vmatmul.bf16.vlgmr.msra.gmra.mxu2 %v6293_v16  ;;  %v14226_v48 = vadd.f32 %v5463_v52, %v5279_v1  ;;  %v10978_v52 = vld [vmem:[%s15935_s3 + $0x570] sm:$0xff]  ;;  %v14250_v1 = vpack.c.b16 %v16144_v33, %v6263_v60 }
 0x3f1   : > { %v4720_v59 = vpop.f32.mrf.mxu3  ;;  %7708 = vmatpush.bf16.msrb.mxu1 %v10978_v52 }
 0x3f2   : > { %v4776_v63 = vadd.f32 %v4720_v59, %v13713_v21  ;;  %v10970_v21 = vld [vmem:[%s15935_s3 + $0x530] sm:$0xff]  ;;  %16711 = vst [vmem:[#allocation49_spill] sm:$0xff] %v14250_v1 }
 0x3f3   : > { %v5466_v17 = vpop.f32.mrf.mxu2  ;;  %v4948_v40 = vpop.f32.mrf.mxu0  ;;  %7482 = vmatpush.bf16.msrb.mxu0 %v10970_v21  ;;  %v16712_v59 = vld [vmem:[#allocation40_spill] sm:$0xff] }
 0x3f4   : > { %v5002_v57 = vadd.f32 %v4946_v31, %v4776_v63  ;;  %v5226_v25 = vpop.f32.mrf.mxu1  ;;  %v16713_v63 = vld [vmem:[#allocation56_spill] sm:$0xff] }
 0x3f6   : > { %v5280_v29 = vadd.f32 %v5224_v47, %v5002_v57 }
 0x3f8   : > { %v14236_v14 = vadd.f32 %v5466_v17, %v5280_v29  ;;  %v14259_v17 = vld [vmem:[%s12846_s20 + $0x48] sm:$0xf] }
 0x3f9   : > { %v4722_v31 = vpop.f32.mrf.mxu3  ;;  %v5744_v42 = vshll.u32 %v14259_v17, 16 }
 0x3fa   : > { %v4777_v16 = vadd.f32 %v4722_v31, %v13736_v24  ;;  %v14265_v31 = vld [vmem:[%s14184_s16 + $0x20] sm:$0xf] }
 0x3fb   : > { %v5468_v13 = vpop.f32.mrf.mxu2  ;;  %v4951_v47 = vpop.f32.mrf.mxu0 }
 0x3fc   : > { %v5003_v22 = vadd.f32 %v4948_v40, %v4777_v16  ;;  %v5229_v44 = vpop.f32.mrf.mxu1  ;;  %v14268_v16 = vld [vmem:[%s14184_s16 + $0x28] sm:$0xf] }
 0x3fd   : > { %16714 = vst [vmem:[#allocation75_spill] sm:$0xff] %v14268_v16 }
 0x3fe   : > { %v5281_v6 = vadd.f32 %v5226_v25, %v5003_v22  ;;  %5632 = vmatmul.bf16.gmra.mxu3 %v16712_v59  ;;  %5886 = vmatmul.bf16.gmra.mxu0 %v16713_v63  ;;  %v5741_v25 = vshrl.u32 %v14259_v17, 16  ;;  %v16148_v22 = vunpack.c.l.b16 %v14268_v16  ;;  %v5746_v59 = vrot.slane %v5744_v42, 5  ;;  %v510_v63 = vld [vmem:[%s12846_s20 + $0x4c] sm:$0x1]  ;;  %v16716_v42 = vld [vmem:[#allocation70_spill] sm:$0xff] }
 0x3ff   : > { %6104 = vmatmul.bf16.gmra.mxu1 %v13754_v50 }
 0x400   : > { %6386 = vmatmul.bf16.gmra.mxu2 %v14250_v1  ;;  %v14256_v24 = vadd.f32 %v5468_v13, %v5281_v6  ;;  %v16149_v13 = vunpack.c.l.b16 %v14265_v31  ;;  %v5743_v6 = vrot.slane %v5741_v25, 4 }
 0x401   : > { %v4725_v60 = vpop.f32.mrf.mxu3 }
 0x402   : > { %v4778_v40 = vadd.f32 %v4725_v60, %v13750_v4 }
 0x403   : > { %v5471_v57 = vpop.f32.mrf.mxu2  ;;  %v4953_v29 = vpop.f32.mrf.mxu0 }
 0x404   : > { %v5004_v21 = vadd.f32 %v4951_v47, %v4778_v40  ;;  %v5231_v52 = vpop.f32.mrf.mxu1  ;;  %v14280_v40 = vpack.c.b16 %v16148_v22, %v16149_v13  ;;  %v5559_v22 = vunpack.c.l.b16 %v14259_v17 }
 0x406   : > { %v5282_v50 = vadd.f32 %v5229_v44, %v5004_v21  ;;  %16715 = vst [vmem:[#allocation65_spill] sm:$0xff] %v14280_v40  ;;  %v5747_v44 = vor.u32 %v5746_v59, %v5743_v6  ;;  %v5750_v21 = vshll.u32 %v510_v63, 16  ;;  %v10278_v6 = vrot.slane %v14259_v17, 9 }
 0x407   : > { %v6000_v59 = vrot.slane %v510_v63, 5 }
 0x408   : > { %v14272_v4 = vadd.f32 %v5471_v57, %v5282_v50  ;;  %v16717_v57 = vld [vmem:[#allocation60_spill] sm:$0xff]  ;;  %v5752_v50 = vrot.slane %v5750_v21, 5 }
 0x409   : > { %v4727_v60 = vpop.f32.mrf.mxu3  ;;  %v6001_v63 = vsel %vm11461_vm5, %v10278_v6, %v6000_v59  ;;  %v16719_v59 = vunpack.c.l.b16 %v13741_v15 }
 0x40a   : > { %v4779_v33 = vadd.f32 %v4727_v60, %v13766_v46  ;;  %v5748_v46 = vrot.slane %v5747_v44, 4 }
 0x40b   : > { %v5473_v49 = vpop.f32.mrf.mxu2  ;;  %v4956_v47 = vpop.f32.mrf.mxu0 }
 0x40c   : > { %v5005_v20 = vadd.f32 %v4953_v29, %v4779_v33  ;;  %v5234_v1 = vpop.f32.mrf.mxu1 }
 0x40e   : > { %v5283_v25 = vadd.f32 %v5231_v52, %v5005_v20  ;;  %5637 = vmatmul.bf16.gmra.mxu3 %v16716_v42  ;;  %5891 = vmatmul.bf16.gmra.mxu0 %v16717_v57  ;;  %v10961_v20 = vld [vmem:[%s15935_s3 + $0x4e8] sm:$0xff] }
 0x40f   : > { %6109 = vmatmul.bf16.gmra.mxu1 %v13796_v11  ;;  %7073 = vmatpush.bf16.msrb.mxu3 %v10961_v20  ;;  %v5753_v11 = vsel %vm11429_vm3, %v5748_v46, %v5752_v50  ;;  %v10969_v46 = vld [vmem:[%s15935_s3 + $0x528] sm:$0xff] }
 0x410   : > { %6391 = vmatmul.bf16.gmra.mxu2 %v14280_v40  ;;  %v14286_v60 = vadd.f32 %v5473_v49, %v5283_v25  ;;  %v14296_v49 = vld [vmem:[%s14184_s16 + $0x30] sm:$0xf]  ;;  %v14299_v25 = vld [vmem:[%s14184_s16 + $0x38] sm:$0xf]  ;;  %v5813_v13 = vunpack.c.l.b16 %v5753_v11  ;;  %7483 = vmatpush.bf16.msrb.mxu0 %v10969_v46 }
 0x411   : > { %v4730_v33 = vpop.f32.mrf.mxu3  ;;  %v16153_v20 = vunpack.c.l.b16 %v14299_v25 }
 0x412   : > { %v4780_v29 = vadd.f32 %v4730_v33, %v13784_v56  ;;  %v16154_v56 = vunpack.c.l.b16 %v14296_v49  ;;  %v6031_v33 = vunpack.c.l.b16 %v6001_v63 }
 0x413   : > { %v5476_v52 = vpop.f32.mrf.mxu2  ;;  %v4958_v42 = vpop.f32.mrf.mxu0 }
 0x414   : > { %v5006_v44 = vadd.f32 %v4956_v47, %v4780_v29  ;;  %v5236_v21 = vpop.f32.mrf.mxu1  ;;  %v10985_v47 = vld [vmem:[%s15935_s3 + $0x5a8] sm:$0xff]  ;;  %v5563_v29 = vpack.c.b16 %v5559_v22, %v16719_v59  ;;  %v14325_v63 = vpack.c.b16 %v16153_v20, %v16154_v56  ;;  %v16736_v56 = vld [vmem:[#allocation9_spill] sm:$0xff] }
 0x415   : > { %7987 = vmatpush.bf16.msrb.mxu2 %v10985_v47 }
 0x416   : > { %v5284_v57 = vadd.f32 %v5234_v1, %v5006_v44  ;;  %v10977_v1 = vld [vmem:[%s15935_s3 + $0x568] sm:$0xff]  ;;  %16721 = vst [vmem:[#allocation63_spill] sm:$0xff] %v14325_v63 }
 0x417   : > { %7709 = vmatpush.bf16.msrb.mxu1 %v10977_v1  ;;  %v14335_v1 = vld [vmem:[%s14184_s16 + $0x58] sm:$0xf] }
 0x418   : > { %v14306_v40 = vadd.f32 %v5476_v52, %v5284_v57  ;;  %v16720_v52 = vld [vmem:[#allocation78_spill] sm:$0xff]  ;;  %16724 = vst [vmem:[#allocation66_spill] sm:$0xff] %v14335_v1 }
 0x419   : > { %v4732_v17 = vpop.f32.mrf.mxu3  ;;  %v5817_v11 = vpack.c.b16 %v5813_v13, %v16720_v52  ;;  %v16722_v57 = vld [vmem:[#allocation18_spill] sm:$0xff] }
 0x41a   : > { %16718 = vst [vmem:[#allocation53_spill] sm:$0xff] %v14306_v40  ;;  %v4781_v50 = vadd.f32 %v4732_v17, %v13811_v23  ;;  %v16723_v40 = vunpack.c.l.b16 %v16722_v57 }
 0x41b   : > { %v5478_v6 = vpop.f32.mrf.mxu2  ;;  %v4961_v44 = vpop.f32.mrf.mxu0 }
 0x41c   : > { %v6035_v16 = vpack.c.b16 %v6031_v33, %v16723_v40  ;;  %v5007_v23 = vadd.f32 %v4958_v42, %v4781_v50  ;;  %v5239_v15 = vpop.f32.mrf.mxu1  ;;  %v591_v33 = vld [vmem:[%s14184_s16 + $0x50] sm:$0xf] }
 0x41d   : > { %v6269_v50 = vunpack.c.l.b16 %v591_v33  ;;  %v10960_v33 = vld [vmem:[%s15935_s3 + $0x4e0] sm:$0xff] }
 0x41e   : > { %v5285_v22 = vadd.f32 %v5236_v21, %v5007_v23  ;;  %5642 = vmatmul.bf16.gmra.mxu3 %v5563_v29  ;;  %5896 = vmatmul.bf16.gmra.mxu0 %v5817_v11  ;;  %v16152_v21 = vunpack.c.l.b16 %v14335_v1 }
 0x41f   : > { %6114 = vmatmul.bf16.gmra.mxu1 %v6035_v16  ;;  %v16725_v16 = vld [vmem:[#allocation26_spill] sm:$0xff]  ;;  %7074 = vmatpush.bf16.msrb.mxu3 %v10960_v33 }
 0x420   : > { %6396 = vmatmul.bf16.gmra.mxu2 %v14325_v63  ;;  %v14330_v13 = vadd.f32 %v5478_v6, %v5285_v22  ;;  %v10976_v33 = vld [vmem:[%s15935_s3 + $0x560] sm:$0xff] }
 0x421   : > { %v4735_v47 = vpop.f32.mrf.mxu3  ;;  %7710 = vmatpush.bf16.msrb.mxu1 %v10976_v33  ;;  %v16737_v63 = vld [vmem:[#allocation6_spill] sm:$0xff] }
 0x422   : > { %v4782_v46 = vadd.f32 %v4735_v47, %v13822_v27  ;;  %v6297_v27 = vpack.c.b16 %v16152_v21, %v6269_v50  ;;  %v16730_v50 = vld [vmem:[#allocation29_spill] sm:$0xff] }
 0x423   : > { %v5481_v17 = vpop.f32.mrf.mxu2  ;;  %v4963_v59 = vpop.f32.mrf.mxu0 }
 0x424   : > { %v5008_v52 = vadd.f32 %v4961_v44, %v4782_v46  ;;  %v5241_v40 = vpop.f32.mrf.mxu1  ;;  %v16726_v46 = vld [vmem:[#allocation7_spill] sm:$0xff] }
 0x426   : > { %v5286_v42 = vadd.f32 %v5239_v15, %v5008_v52  ;;  %v16727_v15 = vld [vmem:[#allocation4_spill] sm:$0xff] }
 0x428   : > { %v14338_v29 = vadd.f32 %v5481_v17, %v5286_v42  ;;  %v16728_v17 = vld [vmem:[#allocation23_spill] sm:$0xff] }
 0x429   : > { %v4737_v11 = vpop.f32.mrf.mxu3 }
 0x42a   : > { %v4783_v6 = vadd.f32 %v4737_v11, %v16725_v16 }
 0x42b   : > { %v5483_v57 = vpop.f32.mrf.mxu2  ;;  %v4966_v23 = vpop.f32.mrf.mxu0 }
 0x42c   : > { %v5009_v22 = vadd.f32 %v4963_v59, %v4783_v6  ;;  %v5244_v44 = vpop.f32.mrf.mxu1 }
 0x42e   : > { %v5287_v47 = vadd.f32 %v5241_v40, %v5009_v22  ;;  %5647 = vmatmul.bf16.gmra.mxu3 %v16726_v46  ;;  %5901 = vmatmul.bf16.gmra.mxu0 %v16727_v15  ;;  %v14353_v22 = vld [vmem:[%s14184_s16 + $0x60] sm:$0xf]  ;;  %v14356_v46 = vld [vmem:[%s14184_s16 + $0x68] sm:$0xf] }
 0x42f   : > { %6119 = vmatmul.bf16.gmra.mxu1 %v16728_v17  ;;  %16731 = vst [vmem:[#allocation3_spill] sm:$0xff] %v14353_v22  ;;  %v10984_v17 = vld [vmem:[%s15935_s3 + $0x5a0] sm:$0xff] }
 0x430   : > { %6401 = vmatmul.bf16.gmra.mxu2 %v6297_v27  ;;  %v14346_v52 = vadd.f32 %v5483_v57, %v5287_v47  ;;  %16732 = vst [vmem:[#allocation59_spill] sm:$0xff] %v14356_v46  ;;  %v16157_v57 = vunpack.c.l.b16 %v14353_v22  ;;  %v16156_v47 = vunpack.c.l.b16 %v14356_v46 }
 0x431   : > { %v4740_v42 = vpop.f32.mrf.mxu3  ;;  %7988 = vmatpush.bf16.msrb.mxu2 %v10984_v17 }
 0x432   : > { %16729 = vst [vmem:[#allocation76_spill] sm:$0xff] %v14346_v52  ;;  %v4784_v59 = vadd.f32 %v4740_v42, %v16730_v50 }
 0x433   : > { %v5486_v11 = vpop.f32.mrf.mxu2  ;;  %v4968_v16 = vpop.f32.mrf.mxu0 }
 0x434   : > { %v5010_v40 = vadd.f32 %v4966_v23, %v4784_v59  ;;  %v5246_v6 = vpop.f32.mrf.mxu1  ;;  %v10968_v23 = vld [vmem:[%s15935_s3 + $0x520] sm:$0xff] }
 0x435   : > { %7484 = vmatpush.bf16.msrb.mxu0 %v10968_v23  ;;  %v14385_v23 = vld [vmem:[%s12846_s20 + $0x98] sm:$0xf] }
 0x436   : > { %v5288_v27 = vadd.f32 %v5244_v44, %v5010_v40  ;;  %v16734_v44 = vld [vmem:[#allocation82_spill] sm:$0xff]  ;;  %v14376_v40 = vpack.c.b16 %v16156_v47, %v16157_v57  ;;  %v14391_v47 = vld [vmem:[%s14184_s16 + $0x70] sm:$0xf]  ;;  %v14394_v57 = vld [vmem:[%s14184_s16 + $0x78] sm:$0xf] }
 0x438   : > { %v14360_v15 = vadd.f32 %v5486_v11, %v5288_v27  ;;  %16735 = vst [vmem:[#allocation2_spill] sm:$0xff] %v14376_v40 }
 0x439   : > { %v4742_v42 = vpop.f32.mrf.mxu3 }
 0x43a   : > { %16733 = vst [vmem:[#allocation69_spill] sm:$0xff] %v14360_v15  ;;  %v4785_v50 = vadd.f32 %v4742_v42, %v16734_v44  ;;  %v16739_v44 = vld [vmem:[#allocation34_spill] sm:$0xff] }
 0x43b   : > { %v5488_v59 = vpop.f32.mrf.mxu2  ;;  %v4971_v11 = vpop.f32.mrf.mxu0 }
 0x43c   : > { %v5011_v27 = vadd.f32 %v4968_v16, %v4785_v50  ;;  %v5249_v21 = vpop.f32.mrf.mxu1 }
 0x43e   : > { %v5289_v20 = vadd.f32 %v5246_v6, %v5011_v27  ;;  %5652 = vmatmul.bf16.gmra.mxu3 %v16736_v56  ;;  %5906 = vmatmul.bf16.gmra.mxu0 %v16737_v63  ;;  %v5755_v6 = vshrl.u32 %v14385_v23, 16  ;;  %v5758_v56 = vshll.u32 %v14385_v23, 16 }
 0x43f   : > { %6124 = vmatmul.bf16.gmra.mxu1 %v13886_v39 }
 0x440   : > { %6406 = vmatmul.bf16.gmra.mxu2 %v14376_v40  ;;  %v14382_v17 = vadd.f32 %v5488_v59, %v5289_v20  ;;  %v16163_v20 = vunpack.c.l.b16 %v14391_v47  ;;  %v16162_v59 = vunpack.c.l.b16 %v14394_v57  ;;  %v5757_v40 = vrot.slane %v5755_v6, 4 }
 0x441   : > { %v4745_v42 = vpop.f32.mrf.mxu3  ;;  %v5760_v46 = vrot.slane %v5758_v56, 5  ;;  %v16741_v56 = vld [vmem:[#allocation72_spill] sm:$0xff] }
 0x442   : > { %16738 = vst [vmem:[#allocation62_spill] sm:$0xff] %v14382_v17  ;;  %v4786_v16 = vadd.f32 %v4745_v42, %v16739_v44  ;;  %v530_v44 = vld [vmem:[%s12846_s20 + $0x9c] sm:$0x1] }
 0x443   : > { %v5491_v33 = vpop.f32.mrf.mxu2  ;;  %v4973_v50 = vpop.f32.mrf.mxu0 }
 0x444   : > { %v5012_v27 = vadd.f32 %v4971_v11, %v4786_v16  ;;  %v5251_v63 = vpop.f32.mrf.mxu1  ;;  %v14406_v16 = vpack.c.b16 %v16162_v59, %v16163_v20  ;;  %v5560_v59 = vunpack.c.l.b16 %v14385_v23 }
 0x446   : > { %v5290_v39 = vadd.f32 %v5249_v21, %v5012_v27  ;;  %16740 = vst [vmem:[#allocation5_spill] sm:$0xff] %v14406_v16  ;;  %v5761_v21 = vor.u32 %v5760_v46, %v5757_v40  ;;  %v5764_v27 = vshll.u32 %v530_v44, 16  ;;  %v10279_v46 = vrot.slane %v14385_v23, 9 }
 0x447   : > { %v6004_v40 = vrot.slane %v530_v44, 5 }
 0x448   : > { %v14398_v42 = vadd.f32 %v5491_v33, %v5290_v39  ;;  %v16742_v33 = vld [vmem:[#allocation64_spill] sm:$0xff] }
 0x449   : > { %v4747_v17 = vpop.f32.mrf.mxu3  ;;  %v6005_v44 = vsel %vm11461_vm5, %v10279_v46, %v6004_v40  ;;  %v16743_v40 = vunpack.c.l.b16 %v13873_v43 }
 0x44a   : > { %v4787_v15 = vadd.f32 %v4747_v17, %v13898_v10  ;;  %v5762_v10 = vrot.slane %v5761_v21, 4  ;;  %v5766_v17 = vrot.slane %v5764_v27, 5 }
 0x44b   : > { %v5493_v22 = vpop.f32.mrf.mxu2  ;;  %v4976_v11 = vpop.f32.mrf.mxu0 }
 0x44c   : > { %v5013_v1 = vadd.f32 %v4973_v50, %v4787_v15  ;;  %v5254_v52 = vpop.f32.mrf.mxu1 }
 0x44e   : > { %v5291_v6 = vadd.f32 %v5251_v63, %v5013_v1  ;;  %5657 = vmatmul.bf16.gmra.mxu3 %v16741_v56  ;;  %5911 = vmatmul.bf16.gmra.mxu0 %v16742_v33  ;;  %v10959_v1 = vld [vmem:[%s15935_s3 + $0x4d8] sm:$0xff] }
 0x44f   : > { %6129 = vmatmul.bf16.gmra.mxu1 %v13928_v62  ;;  %7075 = vmatpush.bf16.msrb.mxu3 %v10959_v1  ;;  %v5767_v62 = vsel %vm11429_vm3, %v5762_v10, %v5766_v17  ;;  %v10967_v10 = vld [vmem:[%s15935_s3 + $0x518] sm:$0xff] }
 0x450   : > { %6411 = vmatmul.bf16.gmra.mxu2 %v14406_v16  ;;  %v14412_v39 = vadd.f32 %v5493_v22, %v5291_v6  ;;  %v14422_v22 = vld [vmem:[%s14184_s16 + $0x80] sm:$0xf]  ;;  %v14425_v6 = vld [vmem:[%s14184_s16 + $0x88] sm:$0xf]  ;;  %v5814_v20 = vunpack.c.l.b16 %v5767_v62  ;;  %7485 = vmatpush.bf16.msrb.mxu0 %v10967_v10 }
 0x451   : > { %v4750_v15 = vpop.f32.mrf.mxu3  ;;  %v16166_v1 = vunpack.c.l.b16 %v14425_v6 }
 0x452   : > { %v4788_v50 = vadd.f32 %v4750_v15, %v13916_v36  ;;  %v16167_v36 = vunpack.c.l.b16 %v14422_v22  ;;  %v6032_v15 = vunpack.c.l.b16 %v6005_v44  ;;  %v16745_v44 = vunpack.c.l.b16 %v13908_v53 }
 0x453   : > { %v5496_v63 = vpop.f32.mrf.mxu2  ;;  %v4978_v56 = vpop.f32.mrf.mxu0 }
 0x454   : > { %v5014_v21 = vadd.f32 %v4976_v11, %v4788_v50  ;;  %v5256_v27 = vpop.f32.mrf.mxu1  ;;  %v10983_v11 = vld [vmem:[%s15935_s3 + $0x598] sm:$0xff]  ;;  %v5564_v50 = vpack.c.b16 %v5560_v59, %v16743_v40  ;;  %v611_v40 = vld [vmem:[%s14184_s16 + $0xa0] sm:$0xf] }
 0x455   : > { %7989 = vmatpush.bf16.msrb.mxu2 %v10983_v11 }
 0x456   : > { %v5292_v33 = vadd.f32 %v5254_v52, %v5014_v21  ;;  %v10975_v52 = vld [vmem:[%s15935_s3 + $0x558] sm:$0xff]  ;;  %v14451_v21 = vpack.c.b16 %v16166_v1, %v16167_v36  ;;  %v16758_v36 = vld [vmem:[#allocation24_spill] sm:$0xff] }
 0x457   : > { %7711 = vmatpush.bf16.msrb.mxu1 %v10975_v52  ;;  %v14461_v52 = vld [vmem:[%s14184_s16 + $0xa8] sm:$0xf] }
 0x458   : > { %v14432_v16 = vadd.f32 %v5496_v63, %v5292_v33  ;;  %v5818_v63 = vpack.c.b16 %v5814_v20, %v13914_v7  ;;  %16744 = vst [vmem:[#allocation74_spill] sm:$0xff] %v14451_v21  ;;  %v6036_v33 = vpack.c.b16 %v6032_v15, %v16745_v44  ;;  %v16747_v44 = vld [vmem:[#allocation41_spill] sm:$0xff] }
 0x459   : > { %v4752_v23 = vpop.f32.mrf.mxu3  ;;  %16746 = vst [vmem:[#allocation37_spill] sm:$0xff] %v14461_v52 }
 0x45a   : > { %v4789_v17 = vadd.f32 %v4752_v23, %v13943_v12 }
 0x45b   : > { %v5498_v46 = vpop.f32.mrf.mxu2  ;;  %v4981_v62 = vpop.f32.mrf.mxu0 }
 0x45c   : > { %v5015_v12 = vadd.f32 %v4978_v56, %v4789_v17  ;;  %v5259_v43 = vpop.f32.mrf.mxu1  ;;  %v6277_v17 = vunpack.c.l.b16 %v611_v40  ;;  %v10958_v40 = vld [vmem:[%s15935_s3 + $0x4d0] sm:$0xff] }
 0x45d   : > { %7076 = vmatpush.bf16.msrb.mxu3 %v10958_v40  ;;  %v10974_v40 = vld [vmem:[%s15935_s3 + $0x550] sm:$0xff] }
 0x45e   : > { %v5293_v59 = vadd.f32 %v5256_v27, %v5015_v12  ;;  %5662 = vmatmul.bf16.gmra.mxu3 %v5564_v50  ;;  %5916 = vmatmul.bf16.gmra.mxu0 %v5818_v63  ;;  %v16165_v27 = vunpack.c.l.b16 %v14461_v52 }
 0x45f   : > { %6134 = vmatmul.bf16.gmra.mxu1 %v6036_v33 }
 0x460   : > { %6416 = vmatmul.bf16.gmra.mxu2 %v14451_v21  ;;  %v14456_v7 = vadd.f32 %v5498_v46, %v5293_v59  ;;  %7712 = vmatpush.bf16.msrb.mxu1 %v10974_v40  ;;  %v16759_v21 = vld [vmem:[#allocation22_spill] sm:$0xff] }
 0x461   : > { %v4755_v20 = vpop.f32.mrf.mxu3 }
 0x462   : > { %v4790_v11 = vadd.f32 %v4755_v20, %v13954_v3  ;;  %v6301_v3 = vpack.c.b16 %v16165_v27, %v6277_v17  ;;  %v16752_v17 = vld [vmem:[#allocation39_spill] sm:$0xff] }
 0x463   : > { %v5501_v10 = vpop.f32.mrf.mxu2  ;;  %v4983_v23 = vpop.f32.mrf.mxu0 }
 0x464   : > { %v5016_v53 = vadd.f32 %v4981_v62, %v4790_v11  ;;  %v5261_v15 = vpop.f32.mrf.mxu1  ;;  %v16748_v11 = vld [vmem:[#allocation14_spill] sm:$0xff] }
 0x466   : > { %v5294_v56 = vadd.f32 %v5259_v43, %v5016_v53  ;;  %v16749_v43 = vld [vmem:[#allocation55_spill] sm:$0xff] }
 0x468   : > { %v14464_v50 = vadd.f32 %v5501_v10, %v5294_v56  ;;  %v16750_v10 = vld [vmem:[#allocation43_spill] sm:$0xff] }
 0x469   : > { %v4757_v63 = vpop.f32.mrf.mxu3 }
 0x46a   : > { %v4791_v46 = vadd.f32 %v4757_v63, %v16747_v44 }
 0x46b   : > { %v5503_v33 = vpop.f32.mrf.mxu2  ;;  %v5882_v12 = vpop.f32.mrf.mxu0 }
 0x46c   : > { %v5017_v59 = vadd.f32 %v4983_v23, %v4791_v46  ;;  %v6100_v62 = vpop.f32.mrf.mxu1 }
 0x46e   : > { %v5295_v20 = vadd.f32 %v5261_v15, %v5017_v59  ;;  %5667 = vmatmul.bf16.gmra.mxu3 %v16748_v11  ;;  %5921 = vmatmul.bf16.gmra.mxu0 %v16749_v43  ;;  %v14479_v59 = vld [vmem:[%s14184_s16 + $0xb0] sm:$0xf]  ;;  %v14482_v11 = vld [vmem:[%s14184_s16 + $0xb8] sm:$0xf] }
 0x46f   : > { %6139 = vmatmul.bf16.gmra.mxu1 %v16750_v10  ;;  %16753 = vst [vmem:[#allocation15_spill] sm:$0xff] %v14479_v59  ;;  %v10982_v10 = vld [vmem:[%s15935_s3 + $0x590] sm:$0xff] }
 0x470   : > { %6421 = vmatmul.bf16.gmra.mxu2 %v6301_v3  ;;  %v14472_v53 = vadd.f32 %v5503_v33, %v5295_v20  ;;  %16754 = vst [vmem:[#allocation46_spill] sm:$0xff] %v14482_v11  ;;  %v16170_v33 = vunpack.c.l.b16 %v14479_v59  ;;  %v16169_v20 = vunpack.c.l.b16 %v14482_v11 }
 0x471   : > { %v5628_v56 = vpop.f32.mrf.mxu3  ;;  %7990 = vmatpush.bf16.msrb.mxu2 %v10982_v10 }
 0x472   : > { %16751 = vst [vmem:[#allocation16_spill] sm:$0xff] %v14472_v53  ;;  %v5708_v23 = vadd.f32 %v5628_v56, %v16752_v17 }
 0x473   : > { %v6382_v63 = vpop.f32.mrf.mxu2  ;;  %v5884_v44 = vpop.f32.mrf.mxu0 }
 0x474   : > { %v5962_v15 = vadd.f32 %v5882_v12, %v5708_v23  ;;  %v6102_v46 = vpop.f32.mrf.mxu1  ;;  %v10966_v12 = vld [vmem:[%s15935_s3 + $0x510] sm:$0xff] }
 0x475   : > { %7486 = vmatpush.bf16.msrb.mxu0 %v10966_v12  ;;  %v14511_v12 = vld [vmem:[%s12846_s20 + $0xe8] sm:$0xf] }
 0x476   : > { %v6180_v3 = vadd.f32 %v6100_v62, %v5962_v15  ;;  %v16756_v62 = vld [vmem:[#allocation32_spill] sm:$0xff]  ;;  %v14502_v15 = vpack.c.b16 %v16169_v20, %v16170_v33  ;;  %v14520_v20 = vld [vmem:[%s14184_s16 + $0xc8] sm:$0xf] }
 0x477   : > { %16762 = vst [vmem:[#allocation8_spill] sm:$0xff] %v14520_v20 }
 0x478   : > { %v14486_v43 = vadd.f32 %v6382_v63, %v6180_v3  ;;  %16757 = vst [vmem:[#allocation20_spill] sm:$0xff] %v14502_v15 }
 0x479   : > { %v5630_v56 = vpop.f32.mrf.mxu3 }
 0x47a   : > { %16755 = vst [vmem:[#allocation13_spill] sm:$0xff] %v14486_v43  ;;  %v5709_v17 = vadd.f32 %v5630_v56, %v16756_v62 }
 0x47b   : > { %v6384_v23 = vpop.f32.mrf.mxu2  ;;  %v5887_v63 = vpop.f32.mrf.mxu0 }
 0x47c   : > { %v5963_v3 = vadd.f32 %v5884_v44, %v5709_v17  ;;  %v6105_v27 = vpop.f32.mrf.mxu1 }
 0x47e   : > { %v6181_v1 = vadd.f32 %v6102_v46, %v5963_v3  ;;  %5672 = vmatmul.bf16.gmra.mxu3 %v16758_v36  ;;  %5926 = vmatmul.bf16.gmra.mxu0 %v16759_v21  ;;  %v5769_v46 = vshrl.u32 %v14511_v12, 16  ;;  %v5772_v36 = vshll.u32 %v14511_v12, 16  ;;  %v14517_v3 = vld [vmem:[%s14184_s16 + $0xc0] sm:$0xf] }
 0x47f   : > { %6144 = vmatmul.bf16.gmra.mxu1 %v14018_v61  ;;  %16761 = vst [vmem:[#allocation21_spill] sm:$0xff] %v14517_v3 }
 0x480   : > { %6426 = vmatmul.bf16.gmra.mxu2 %v14502_v15  ;;  %v14508_v10 = vadd.f32 %v6384_v23, %v6181_v1  ;;  %v16176_v1 = vunpack.c.l.b16 %v14517_v3  ;;  %v16175_v23 = vunpack.c.l.b16 %v14520_v20  ;;  %v5771_v33 = vrot.slane %v5769_v46, 4 }
 0x481   : > { %v5633_v56 = vpop.f32.mrf.mxu3  ;;  %v5774_v15 = vrot.slane %v5772_v36, 5  ;;  %v16765_v36 = vld [vmem:[#allocation38_spill] sm:$0xff] }
 0x482   : > { %16760 = vst [vmem:[#allocation80_spill] sm:$0xff] %v14508_v10  ;;  %v5710_v44 = vadd.f32 %v5633_v56, %v14014_v2  ;;  %v550_v56 = vld [vmem:[%s12846_s20 + $0xec] sm:$0x1] }
 0x483   : > { %v6387_v40 = vpop.f32.mrf.mxu2  ;;  %v5889_v62 = vpop.f32.mrf.mxu0 }
 0x484   : > { %v5964_v17 = vadd.f32 %v5887_v63, %v5710_v44  ;;  %v6107_v21 = vpop.f32.mrf.mxu1  ;;  %v14532_v44 = vpack.c.b16 %v16175_v23, %v16176_v1  ;;  %v5561_v23 = vunpack.c.l.b16 %v14511_v12 }
 0x486   : > { %v6182_v61 = vadd.f32 %v6105_v27, %v5964_v17  ;;  %16764 = vst [vmem:[#allocation12_spill] sm:$0xff] %v14532_v44  ;;  %v5775_v27 = vor.u32 %v5774_v15, %v5771_v33  ;;  %v5778_v17 = vshll.u32 %v550_v56, 16  ;;  %v10280_v33 = vrot.slane %v14511_v12, 9 }
 0x487   : > { %v6008_v15 = vrot.slane %v550_v56, 5 }
 0x488   : > { %v14524_v2 = vadd.f32 %v6387_v40, %v6182_v61  ;;  %v16766_v40 = vld [vmem:[#allocation35_spill] sm:$0xff] }
 0x489   : > { %v5635_v11 = vpop.f32.mrf.mxu3  ;;  %v6009_v56 = vsel %vm11461_vm5, %v10280_v33, %v6008_v15  ;;  %v16771_v15 = vld [vmem:[#allocation52_spill] sm:$0xff] }
 0x48a   : > { %16763 = vst [vmem:[#allocation73_spill] sm:$0xff] %v14524_v2  ;;  %v5711_v10 = vadd.f32 %v5635_v11, %v14030_v54  ;;  %v5776_v54 = vrot.slane %v5775_v27, 4  ;;  %v5780_v11 = vrot.slane %v5778_v17, 5 }
 0x48b   : > { %v6389_v43 = vpop.f32.mrf.mxu2  ;;  %v5892_v63 = vpop.f32.mrf.mxu0 }
 0x48c   : > { %v5965_v59 = vadd.f32 %v5889_v62, %v5711_v10  ;;  %v6110_v52 = vpop.f32.mrf.mxu1 }
 0x48e   : > { %v6183_v46 = vadd.f32 %v6107_v21, %v5965_v59  ;;  %5677 = vmatmul.bf16.gmra.mxu3 %v16765_v36  ;;  %5931 = vmatmul.bf16.gmra.mxu0 %v16766_v40  ;;  %v10957_v59 = vld [vmem:[%s15935_s3 + $0x4c8] sm:$0xff] }
 0x48f   : > { %6149 = vmatmul.bf16.gmra.mxu1 %v14060_v5  ;;  %7077 = vmatpush.bf16.msrb.mxu3 %v10957_v59  ;;  %v5781_v5 = vsel %vm11429_vm3, %v5776_v54, %v5780_v11  ;;  %v10965_v54 = vld [vmem:[%s15935_s3 + $0x508] sm:$0xff] }
 0x490   : > { %6431 = vmatmul.bf16.gmra.mxu2 %v14532_v44  ;;  %v14538_v61 = vadd.f32 %v6389_v43, %v6183_v46  ;;  %v14548_v43 = vld [vmem:[%s14184_s16 + $0xd0] sm:$0xf]  ;;  %v14551_v46 = vld [vmem:[%s14184_s16 + $0xd8] sm:$0xf]  ;;  %v5815_v1 = vunpack.c.l.b16 %v5781_v5  ;;  %v16773_v5 = vld [vmem:[#allocation42_spill] sm:$0xff]  ;;  %7487 = vmatpush.bf16.msrb.mxu0 %v10965_v54 }
 0x491   : > { %v5638_v10 = vpop.f32.mrf.mxu3  ;;  %16768 = vst [vmem:[#allocation17_spill] sm:$0xff] %v14548_v43  ;;  %v16180_v59 = vunpack.c.l.b16 %v14551_v46 }
 0x492   : > { %16767 = vst [vmem:[#allocation19_spill] sm:$0xff] %v14538_v61  ;;  %v5712_v62 = vadd.f32 %v5638_v10, %v14048_v19  ;;  %v16181_v19 = vunpack.c.l.b16 %v14548_v43  ;;  %v6033_v10 = vunpack.c.l.b16 %v6009_v56 }
 0x493   : > { %v6392_v21 = vpop.f32.mrf.mxu2  ;;  %v5894_v36 = vpop.f32.mrf.mxu0  ;;  %16769 = vst [vmem:[#allocation10_spill] sm:$0xff] %v14551_v46 }
 0x494   : > { %v5966_v27 = vadd.f32 %v5892_v63, %v5712_v62  ;;  %v6112_v17 = vpop.f32.mrf.mxu1  ;;  %v10981_v63 = vld [vmem:[%s15935_s3 + $0x588] sm:$0xff]  ;;  %v16772_v62 = vunpack.c.l.b16 %v16771_v15 }
 0x495   : > { %7991 = vmatpush.bf16.msrb.mxu2 %v10981_v63 }
 0x496   : > { %v6184_v40 = vadd.f32 %v6110_v52, %v5966_v27  ;;  %v10973_v52 = vld [vmem:[%s15935_s3 + $0x548] sm:$0xff]  ;;  %v5819_v27 = vpack.c.b16 %v5815_v1, %v16773_v5 }
 0x497   : > { %7713 = vmatpush.bf16.msrb.mxu1 %v10973_v52  ;;  %v14587_v52 = vld [vmem:[%s14184_s16 + $0xf8] sm:$0xf] }
 0x498   : > { %v14558_v44 = vadd.f32 %v6392_v21, %v6184_v40  ;;  %v5565_v21 = vpack.c.b16 %v5561_v23, %v16772_v62  ;;  %v14577_v40 = vpack.c.b16 %v16180_v59, %v16181_v19  ;;  %16778 = vst [vmem:[#allocation85_spill] sm:$0xff] %v14587_v52  ;;  %v16790_v59 = vld [vmem:[#allocation11_spill] sm:$0xff] }
 0x499   : > { %v5640_v12 = vpop.f32.mrf.mxu3  ;;  %v16791_v19 = vld [vmem:[#allocation83_spill] sm:$0xff] }
 0x49a   : > { %16770 = vst [vmem:[#allocation84_spill] sm:$0xff] %v14558_v44  ;;  %v5713_v11 = vadd.f32 %v5640_v12, %v14075_v35  ;;  %v16775_v44 = vld [vmem:[#allocation50_spill] sm:$0xff] }
 0x49b   : > { %v6394_v33 = vpop.f32.mrf.mxu2  ;;  %v5897_v56 = vpop.f32.mrf.mxu0  ;;  %16774 = vst [vmem:[#allocation48_spill] sm:$0xff] %v14577_v40  ;;  %v16776_v20 = vunpack.c.l.b16 %v16775_v44 }
 0x49c   : > { %v5967_v35 = vadd.f32 %v5894_v36, %v5713_v11  ;;  %v6115_v12 = vpop.f32.mrf.mxu1 }
 0x49d   : > { %v6037_v61 = vpack.c.b16 %v6033_v10, %v16776_v20  ;;  %v631_v10 = vld [vmem:[%s14184_s16 + $0xf0] sm:$0xf] }
 0x49e   : > { %v6185_v23 = vadd.f32 %v6112_v17, %v5967_v35  ;;  %5682 = vmatmul.bf16.gmra.mxu3 %v5565_v21  ;;  %5936 = vmatmul.bf16.gmra.mxu0 %v5819_v27  ;;  %v6285_v11 = vunpack.c.l.b16 %v631_v10  ;;  %v16179_v17 = vunpack.c.l.b16 %v14587_v52  ;;  %v16784_v10 = vld [vmem:[#allocation51_spill] sm:$0xff]  ;;  %v16798_v52 = vld [vmem:[#allocation36_spill] sm:$0xff] }
 0x49f   : > { %6154 = vmatmul.bf16.gmra.mxu1 %v6037_v61 }
 0x4a0   : > { %6436 = vmatmul.bf16.gmra.mxu2 %v14577_v40  ;;  %v14582_v1 = vadd.f32 %v6394_v33, %v6185_v23 }
 0x4a1   : > { %v5643_v63 = vpop.f32.mrf.mxu3 }
 0x4a2   : > { %16777 = vst [vmem:[#allocation33_spill] sm:$0xff] %v14582_v1  ;;  %v5714_v54 = vadd.f32 %v5643_v63, %v14086_v26  ;;  %v6305_v26 = vpack.c.b16 %v16179_v17, %v6285_v11  ;;  %v16780_v63 = vld [vmem:[#allocation31_spill] sm:$0xff] }
 0x4a3   : > { %v6397_v15 = vpop.f32.mrf.mxu2  ;;  %v5899_v62 = vpop.f32.mrf.mxu0 }
 0x4a4   : > { %v5968_v44 = vadd.f32 %v5897_v56, %v5714_v54  ;;  %v6117_v20 = vpop.f32.mrf.mxu1  ;;  %v16782_v54 = vld [vmem:[#allocation61_spill] sm:$0xff] }
 0x4a6   : > { %v6186_v36 = vadd.f32 %v6115_v12, %v5968_v44  ;;  %v16781_v12 = vld [vmem:[#allocation71_spill] sm:$0xff] }
 0x4a8   : > { %v14590_v21 = vadd.f32 %v6397_v15, %v6186_v36 }
 0x4a9   : > { %v5645_v5 = vpop.f32.mrf.mxu3 }
 0x4aa   : > { %16779 = vst [vmem:[#allocation25_spill] sm:$0xff] %v14590_v21  ;;  %v5715_v61 = vadd.f32 %v5645_v5, %v14097_v58  ;;  %v10956_v58 = vld [vmem:[%s15935_s3 + $0x4c0] sm:$0xff]  ;;  %v574_v21 = vld [vmem:[%s14184_s16 + $0xc] sm:$0x1] }
 0x4ab   : > { %v6399_v33 = vpop.f32.mrf.mxu2  ;;  %v5902_v27 = vpop.f32.mrf.mxu0  ;;  %7078 = vmatpush.bf16.msrb.mxu3 %v10956_v58  ;;  %v16788_v58 = vld [vmem:[#allocation58_spill] sm:$0xff]  ;;  %v7230_v2 = vrot.slane %v574_v21, 5 }
 0x4ac   : > { %v5969_v35 = vadd.f32 %v5899_v62, %v5715_v61  ;;  %v6120_v56 = vpop.f32.mrf.mxu1  ;;  %v14605_v61 = vld [vmem:[%s14184_s16 + $0x100] sm:$0xf] }
 0x4ad   : > { %16785 = vst [vmem:[#allocation57_spill] sm:$0xff] %v14605_v61 }
 0x4ae   : > { %v6187_v23 = vadd.f32 %v6117_v20, %v5969_v35  ;;  %5687 = vmatmul.bf16.gmra.mxu3 %v16780_v63  ;;  %5941 = vmatmul.bf16.gmra.mxu0 %v16781_v12  ;;  %v14608_v35 = vld [vmem:[%s14184_s16 + $0x108] sm:$0xf]  ;;  %v10980_v12 = vld [vmem:[%s15935_s3 + $0x580] sm:$0xff] }
 0x4af   : > { %6159 = vmatmul.bf16.gmra.mxu1 %v16782_v54  ;;  %16786 = vst [vmem:[#allocation67_spill] sm:$0xff] %v14608_v35  ;;  %v10972_v54 = vld [vmem:[%s15935_s3 + $0x540] sm:$0xff]  ;;  %7992 = vmatpush.bf16.msrb.mxu2 %v10980_v12  ;;  %v14635_v12 = vld [vmem:[%s12846_s20 + $0x138] sm:$0xf] }
 0x4b0   : > { %6441 = vmatmul.bf16.gmra.mxu2 %v6305_v26  ;;  %v14598_v15 = vadd.f32 %v6399_v33, %v6187_v23  ;;  %v16183_v33 = vunpack.c.l.b16 %v14605_v61  ;;  %v16182_v23 = vunpack.c.l.b16 %v14608_v35  ;;  %7714 = vmatpush.bf16.msrb.mxu1 %v10972_v54  ;;  %v16793_v54 = vld [vmem:[#allocation44_spill] sm:$0xff] }
 0x4b1   : > { %v5648_v44 = vpop.f32.mrf.mxu3 }
 0x4b2   : > { %16783 = vst [vmem:[#allocation45_spill] sm:$0xff] %v14598_v15  ;;  %v5716_v62 = vadd.f32 %v5648_v44, %v16784_v10  ;;  %v572_v15 = vld [vmem:[%s14184_s16 + $0x4] sm:$0x1] }
 0x4b3   : > { %v6402_v36 = vpop.f32.mrf.mxu2  ;;  %v5904_v11 = vpop.f32.mrf.mxu0 }
 0x4b4   : > { %v5970_v20 = vadd.f32 %v5902_v27, %v5716_v62  ;;  %v6122_v5 = vpop.f32.mrf.mxu1  ;;  %v10964_v27 = vld [vmem:[%s15935_s3 + $0x500] sm:$0xff] }
 0x4b5   : > { %7488 = vmatpush.bf16.msrb.mxu0 %v10964_v27 }
 0x4b6   : > { %v6188_v26 = vadd.f32 %v6120_v56, %v5970_v20 }
 0x4b8   : > { %v14612_v63 = vadd.f32 %v6402_v36, %v6188_v26  ;;  %v14628_v36 = vpack.c.b16 %v16182_v23, %v16183_v33  ;;  %v14643_v23 = vld [vmem:[%s14184_s16 + $0x110] sm:$0xf]  ;;  %v14646_v33 = vld [vmem:[%s14184_s16 + $0x118] sm:$0xf] }
 0x4b9   : > { %v5650_v56 = vpop.f32.mrf.mxu3  ;;  %16794 = vst [vmem:[#allocation81_spill] sm:$0xff] %v14643_v23  ;;  %v16189_v40 = vunpack.c.l.b16 %v14646_v33 }
 0x4ba   : > { %16787 = vst [vmem:[#allocation77_spill] sm:$0xff] %v14612_v63  ;;  %v5717_v44 = vadd.f32 %v5650_v56, %v16788_v58 }
 0x4bb   : > { %v6404_v10 = vpop.f32.mrf.mxu2  ;;  %v5907_v62 = vpop.f32.mrf.mxu0  ;;  %16789 = vst [vmem:[#allocation28_spill] sm:$0xff] %v14628_v36 }
 0x4bc   : > { %v5971_v20 = vadd.f32 %v5904_v11, %v5717_v44  ;;  %v6125_v26 = vpop.f32.mrf.mxu1  ;;  %v5786_v44 = vshll.u32 %v14635_v12, 16  ;;  %16795 = vst [vmem:[#allocation54_spill] sm:$0xff] %v14646_v33 }
 0x4be   : > { %v6189_v17 = vadd.f32 %v6122_v5, %v5971_v20  ;;  %5692 = vmatmul.bf16.gmra.mxu3 %v16790_v59  ;;  %5946 = vmatmul.bf16.gmra.mxu0 %v16791_v19  ;;  %v5783_v5 = vshrl.u32 %v14635_v12, 16 }
 0x4bf   : > { %6164 = vmatmul.bf16.gmra.mxu1 %v14150_v8 }
 0x4c0   : > { %6446 = vmatmul.bf16.gmra.mxu2 %v14628_v36  ;;  %v14637_v27 = vadd.f32 %v6404_v10, %v6189_v17  ;;  %v5785_v36 = vrot.slane %v5783_v5, 4  ;;  %v5788_v17 = vrot.slane %v5786_v44, 5  ;;  %v16190_v10 = vunpack.c.l.b16 %v14643_v23 }
 0x4c1   : > { %v5653_v56 = vpop.f32.mrf.mxu3 }
 0x4c2   : > { %16792 = vst [vmem:[#allocation27_spill] sm:$0xff] %v14637_v27  ;;  %v5718_v11 = vadd.f32 %v5653_v56, %v16793_v54  ;;  %v570_v56 = vld [vmem:[%s12846_s20 + $0x13c] sm:$0x1] }
 0x4c3   : > { %v6407_v58 = vpop.f32.mrf.mxu2  ;;  %v5909_v59 = vpop.f32.mrf.mxu0 }
 0x4c4   : > { %v5972_v20 = vadd.f32 %v5907_v62, %v5718_v11  ;;  %v6127_v19 = vpop.f32.mrf.mxu1  ;;  %v5789_v62 = vor.u32 %v5788_v17, %v5785_v36  ;;  %v5792_v11 = vshll.u32 %v570_v56, 16  ;;  %v6012_v36 = vrot.slane %v570_v56, 5 }
 0x4c6   : > { %v6190_v8 = vadd.f32 %v6125_v26, %v5972_v20  ;;  %v14658_v26 = vpack.c.b16 %v16189_v40, %v16190_v10  ;;  %v11164_v10 = vld [vmem:[%s14184_s16 + $0x10] sm:$0xf] }
 0x4c8   : > { %v14651_v54 = vadd.f32 %v6407_v58, %v6190_v8  ;;  %16797 = vst [vmem:[#allocation30_spill] sm:$0xff] %v14658_v26  ;;  %v16799_v58 = vld [vmem:[#allocation68_spill] sm:$0xff]  ;;  %v5790_v8 = vrot.slane %v5789_v62, 4 }
 0x4c9   : > { %v5655_v35 = vpop.f32.mrf.mxu3 }
 0x4ca   : > { %16796 = vst [vmem:[#allocation79_spill] sm:$0xff] %v14651_v54  ;;  %v5719_v27 = vadd.f32 %v5655_v35, %v14162_v34  ;;  %v5794_v34 = vrot.slane %v5792_v11, 5  ;;  %v10281_v35 = vrot.slane %v14635_v12, 9 }
 0x4cb   : > { %v6409_v63 = vpop.f32.mrf.mxu2  ;;  %v5912_v61 = vpop.f32.mrf.mxu0 }
 0x4cc   : > { %v5973_v5 = vadd.f32 %v5909_v59, %v5719_v27  ;;  %v6130_v44 = vpop.f32.mrf.mxu1  ;;  %v6495_v59 = vshrl.u32 %v14217_v32, 16 }
 0x4ce   : > { %v6191_v20 = vadd.f32 %v6127_v19, %v5973_v5  ;;  %5697 = vmatmul.bf16.gmra.mxu3 %v16798_v52  ;;  %5951 = vmatmul.bf16.gmra.mxu0 %v16799_v58  ;;  %v10995_v52 = vld [vmem:[%s15935_s3 + $0x5f8] sm:$0xff]  ;;  %v6498_v19 = vshll.u32 %v14217_v32, 16  ;;  %v14679_v5 = vld [vmem:[%s14184_s16 + $0x128] sm:$0xf]  ;;  %v6497_v33 = vrot.slane %v6495_v59, 4 }
 0x4cf   : > { %6169 = vmatmul.bf16.gmra.mxu1 %v14198_v51  ;;  %v5795_v51 = vsel %vm11429_vm3, %v5790_v8, %v5794_v34  ;;  %8227 = vmatpush.bf16.msra.mxu3 %v10995_v52  ;;  %v11163_v58 = vld [vmem:[%s14184_s16 + $0x8] sm:$0xf]  ;;  %v5562_v34 = vunpack.c.l.b16 %v14635_v12  ;;  %v11019_v12 = vld [vmem:[%s15935_s3 + $0x6b8] sm:$0xff] }
 0x4d0   : > { %6451 = vmatmul.bf16.gmra.mxu2 %v14658_v26  ;;  %v14665_v17 = vadd.f32 %v6409_v63, %v6191_v20  ;;  %v14676_v63 = vld [vmem:[%s14184_s16 + $0x120] sm:$0xf]  ;;  %v6013_v20 = vsel %vm11461_vm5, %v10281_v35, %v6012_v36  ;;  %v6509_v40 = vshrl.u32 %v11163_v58, 16  ;;  %v6512_v32 = vshll.u32 %v11163_v58, 16 }
 0x4d1   : > { %v5658_v27 = vpop.f32.mrf.mxu3  ;;  %v5816_v52 = vunpack.c.l.b16 %v5795_v51  ;;  %v16201_v23 = vunpack.c.l.b16 %v14676_v63  ;;  %v16198_v35 = vunpack.c.l.b16 %v14679_v5  ;;  %v6034_v36 = vunpack.c.l.b16 %v6013_v20  ;;  %8901 = vmatpush.bf16.msra.mxu2 %v11019_v12 }
 0x4d2   : > { %16800 = vst [vmem:[#allocation47_spill] sm:$0xff] %v14665_v17  ;;  %v5720_v62 = vadd.f32 %v5658_v27, %v14186_v45  ;;  %v6523_v45 = vshrl.u32 %v11164_v10, 16  ;;  %v6526_v27 = vshll.u32 %v11164_v10, 16  ;;  %v6500_v17 = vrot.slane %v6498_v19, 5 }
 0x4d3   : > { %v6412_v11 = vpop.f32.mrf.mxu2  ;;  %v5914_v56 = vpop.f32.mrf.mxu0  ;;  %v6511_v46 = vrot.slane %v6509_v40, 4  ;;  %v6514_v1 = vrot.slane %v6512_v32, 5  ;;  %v10427_v43 = vrot.slane %v11163_v58, 9  ;;  %v11011_v40 = vld [vmem:[%s15935_s3 + $0x678] sm:$0xff]  ;;  %v16802_v19 = vunpack.c.l.b16 %v14137_v37 }
 0x4d4   : > { %v5974_v26 = vadd.f32 %v5912_v61, %v5720_v62  ;;  %v6132_v8 = vpop.f32.mrf.mxu1  ;;  %v576_v61 = vld [vmem:[%s14184_s16 + $0x14] sm:$0x1]  ;;  %v6525_v62 = vrot.slane %v6523_v45, 4  ;;  %v6528_v3 = vrot.slane %v6526_v27, 5  ;;  %v14710_v45 = vpack.c.b16 %v16198_v35, %v16201_v23  ;;  %8683 = vmatpush.bf16.msra.mxu1 %v11011_v40 }
 0x4d5   : > { %v5566_v51 = vpack.c.b16 %v5562_v34, %v16802_v19  ;;  %v7234_v20 = vrot.slane %v576_v61, 5  ;;  %v16804_v27 = vunpack.c.l.b16 %v14172_v55  ;;  %v6515_v34 = vor.u32 %v6514_v1, %v6511_v46 }
 0x4d6   : > { %v6192_v54 = vadd.f32 %v6130_v44, %v5974_v26  ;;  %v11003_v26 = vld [vmem:[%s15935_s3 + $0x638] sm:$0xff]  ;;  %v10428_v44 = vrot.slane %v11164_v10, 9  ;;  %16803 = vst [vmem:[#allocation56_spill] sm:$0xff] %v14710_v45  ;;  %v6532_v55 = vshll.u32 %v576_v61, 16 }
 0x4d7   : > { %v6038_v10 = vpack.c.b16 %v6034_v36, %v16804_v27  ;;  %8429 = vmatpush.bf16.msra.mxu0 %v11003_v26 }
 0x4d8   : > { %v14691_v53 = vadd.f32 %v6412_v11, %v6192_v54  ;;  %v5820_v54 = vpack.c.b16 %v5816_v52, %v14178_v28  ;;  %v6501_v11 = vor.u32 %v6500_v17, %v6497_v33  ;;  %v6518_v28 = vshll.u32 %v574_v21, 16  ;;  %v11165_v21 = vld [vmem:[%s14184_s16] sm:$0xf] }
 0x4d9   : > { %v5660_v59 = vpop.f32.mrf.mxu3  ;;  %v7231_v33 = vsel %vm11461_vm5, %v10427_v43, %v7230_v2  ;;  %v6529_v17 = vor.u32 %v6528_v3, %v6525_v62  ;;  %v6516_v2 = vrot.slane %v6515_v34, 4  ;;  %v10426_v26 = vrot.slane %v11165_v21, 9  ;;  %v14740_v34 = vld [vmem:[%s14184_s16 + $0x20] sm:$0xf] }
 0x4da   : > { %16801 = vst [vmem:[#allocation40_spill] sm:$0xff] %v14691_v53  ;;  %v5721_v58 = vadd.f32 %v5660_v59, %v14211_v38  ;;  %v6504_v53 = vshll.u32 %v572_v15, 16  ;;  %v14718_v38 = vsel %vm11461_vm5, %v10428_v44, %v7234_v20  ;;  %v6502_v36 = vrot.slane %v6501_v11, 4  ;;  %v11166_v20 = vld [vmem:[%s14184_s16 + $0x18] sm:$0xf] }
 0x4db   : > { %v6414_v32 = vpop.f32.mrf.mxu2  ;;  %v5917_v37 = vpop.f32.mrf.mxu0  ;;  %v7370_v46 = vunpack.c.l.b16 %v7231_v33  ;;  %v7371_v1 = vunpack.c.l.b16 %v14718_v38  ;;  %v6520_v43 = vrot.slane %v6518_v28, 5  ;;  %v7226_v3 = vrot.slane %v572_v15, 5 }
 0x4dc   : > { %v5975_v52 = vadd.f32 %v5914_v56, %v5721_v58  ;;  %v6135_v59 = vpop.f32.mrf.mxu1  ;;  %v6506_v12 = vrot.slane %v6504_v53, 5  ;;  %v6530_v56 = vrot.slane %v6529_v17, 4  ;;  %v6537_v58 = vshrl.u32 %v11166_v20, 16 }
 0x4dd   : > { %v14727_v53 = vpack.c.b16 %v7371_v1, %v7370_v46  ;;  %v6521_v15 = vsel %vm11429_vm3, %v6516_v2, %v6520_v43  ;;  %v7227_v11 = vsel %vm11461_vm5, %v10426_v26, %v7226_v3  ;;  %v6551_v28 = vshrl.u32 %v14740_v34, 16  ;;  %v578_v43 = vld [vmem:[%s14184_s16 + $0x1c] sm:$0x1] }
 0x4de   : > { %v6193_v19 = vadd.f32 %v6132_v8, %v5975_v52  ;;  %5702 = vmatmul.bf16.gmra.mxu3 %v5566_v51  ;;  %5956 = vmatmul.bf16.gmra.mxu0 %v5820_v54  ;;  %v6534_v8 = vrot.slane %v6532_v55, 5  ;;  %v6507_v51 = vsel %vm11429_vm3, %v6502_v36, %v6506_v12  ;;  %v6554_v33 = vshll.u32 %v14740_v34, 16 }
 0x4df   : > { %6174 = vmatmul.bf16.gmra.mxu1 %v6038_v10  ;;  %v6959_v52 = vunpack.c.l.b16 %v6507_v51  ;;  %v6960_v55 = vunpack.c.l.b16 %v6521_v15  ;;  %v7369_v36 = vunpack.c.l.b16 %v7227_v11  ;;  %v6539_v12 = vrot.slane %v6537_v58, 4 }
 0x4e0   : > { %6456 = vmatmul.bf16.gmra.mxu2 %v14710_v45  ;;  %v14723_v62 = vadd.f32 %v6414_v32, %v6193_v19  ;;  %v6540_v32 = vshll.u32 %v11166_v20, 16  ;;  %v6553_v21 = vrot.slane %v6551_v28, 4  ;;  %v6556_v26 = vrot.slane %v6554_v33, 5 }
 0x4e1   : > { %v5663_v61 = vpop.f32.mrf.mxu3 }
 0x4e2   : > { %v5722_v40 = vadd.f32 %v5663_v61, %v14220_v30  ;;  %v6535_v30 = vsel %vm11429_vm3, %v6530_v56, %v6534_v8  ;;  %v6542_v2 = vrot.slane %v6540_v32, 5  ;;  %v14750_v56 = vld [vmem:[%s14184_s16 + $0x24] sm:$0x1] }
 0x4e3   : > { %v6417_v44 = vpop.f32.mrf.mxu2  ;;  %v5919_v54 = vpop.f32.mrf.mxu0  ;;  %v14744_v19 = vunpack.c.l.b16 %v6535_v30  ;;  %v6560_v30 = vshll.u32 %v14750_v56, 16 }
 0x4e4   : > { %v5976_v27 = vadd.f32 %v5917_v37, %v5722_v40  ;;  %v6137_v10 = vpop.f32.mrf.mxu1  ;;  %v6991_v40 = vpack.c.b16 %v6960_v55, %v6959_v52  ;;  %v6543_v11 = vor.u32 %v6542_v2, %v6539_v12 }
 0x4e5   : > { %v7905_v15 = vpack.c.b16 %v14744_v19, %v6960_v55 }
 0x4e6   : > { %v6194_v17 = vadd.f32 %v6135_v59, %v5976_v27  ;;  %v7401_v59 = vpack.c.b16 %v7370_v46, %v7369_v36  ;;  %v6546_v27 = vshll.u32 %v578_v43, 16  ;;  %v10429_v46 = vrot.slane %v11166_v20, 9  ;;  %v10994_v36 = vld [vmem:[%s15935_s3 + $0x5f0] sm:$0xff] }
 0x4e7   : > { %8228 = vmatpush.bf16.msra.mxu3 %v10994_v36 }
 0x4e8   : > { %v14746_v37 = vadd.f32 %v6417_v44, %v6194_v17  ;;  %v6557_v44 = vor.u32 %v6556_v26, %v6553_v21  ;;  %v6548_v33 = vrot.slane %v6546_v27, 5  ;;  %v7238_v17 = vrot.slane %v578_v43, 5 }
 0x4e9   : > { %v5665_v3 = vpop.f32.mrf.mxu3 }
 0x4ea   : > { %v5723_v8 = vadd.f32 %v5665_v3, %v14226_v48  ;;  %v6544_v48 = vrot.slane %v6543_v11, 4  ;;  %v6558_v55 = vrot.slane %v6557_v44, 4  ;;  %v14771_v3 = vsel %vm11461_vm5, %v10429_v46, %v7238_v17  ;;  %v11018_v17 = vld [vmem:[%s15935_s3 + $0x6b0] sm:$0xff] }
 0x4eb   : > { %v6419_v61 = vpop.f32.mrf.mxu2  ;;  %v5922_v51 = vpop.f32.mrf.mxu0  ;;  %8902 = vmatpush.bf16.msra.mxu2 %v11018_v17 }
 0x4ec   : > { %v5977_v58 = vadd.f32 %v5919_v54, %v5723_v8  ;;  %v6140_v32 = vpop.f32.mrf.mxu1  ;;  %v6562_v54 = vrot.slane %v6560_v30, 5  ;;  %v6549_v26 = vsel %vm11429_vm3, %v6544_v48, %v6548_v33  ;;  %v16197_v30 = vunpack.c.l.b16 %v14771_v3 }
 0x4ed   : > { %v6962_v44 = vunpack.c.l.b16 %v6549_v26 }
 0x4ee   : > { %v6195_v28 = vadd.f32 %v6137_v10, %v5977_v58  ;;  %7079 = vmatmul.bf16.vlgmr.msrb.gmra.mxu3 %v6991_v40  ;;  %7489 = vmatmul.bf16.vlgmr.msrb.gmra.mxu0 %v7401_v59  ;;  %v14762_v10 = vld [vmem:[%s14184_s16 + $0x28] sm:$0xf]  ;;  %v6563_v40 = vsel %vm11429_vm3, %v6558_v55, %v6562_v54  ;;  %v14776_v59 = vld [vmem:[%s14184_s16 + $0x30] sm:$0xf]  ;;  %v14806_v26 = vpack.c.b16 %v16197_v30, %v7371_v1 }
 0x4ef   : > { %7715 = vmatmul.bf16.vlgmr.msrb.gmra.mxu1 %v14213_v18  ;;  %v6565_v2 = vshrl.u32 %v14762_v10, 16  ;;  %v6568_v18 = vshll.u32 %v14762_v10, 16  ;;  %v14782_v48 = vunpack.c.l.b16 %v6563_v40  ;;  %v11002_v55 = vld [vmem:[%s15935_s3 + $0x630] sm:$0xff] }
 0x4f0   : > { %7993 = vmatmul.bf16.vlgmr.msrb.gmra.mxu2 %v7905_v15  ;;  %v14756_v52 = vadd.f32 %v6419_v61, %v6195_v28  ;;  %v6582_v15 = vshll.u32 %v14776_v59, 16  ;;  %v582_v28 = vld [vmem:[%s14184_s16 + $0x2c] sm:$0x1]  ;;  %8430 = vmatpush.bf16.msra.mxu0 %v11002_v55 }
 0x4f1   : > { %v5668_v12 = vpop.f32.mrf.mxu3  ;;  %v6567_v11 = vrot.slane %v6565_v2, 4  ;;  %v6570_v27 = vrot.slane %v6568_v18, 5  ;;  %v14796_v2 = vld [vmem:[%s14184_s16 + $0x34] sm:$0x1]  ;;  %v7906_v40 = vpack.c.b16 %v14782_v48, %v6962_v44 }
 0x4f2   : > { %v5724_v21 = vadd.f32 %v5668_v12, %v14236_v14  ;;  %v6579_v14 = vshrl.u32 %v14776_v59, 16  ;;  %v6584_v46 = vrot.slane %v6582_v15, 5  ;;  %v6574_v12 = vshll.u32 %v582_v28, 16 }
 0x4f3   : > { %v6422_v20 = vpop.f32.mrf.mxu2  ;;  %v5924_v43 = vpop.f32.mrf.mxu0  ;;  %v6571_v36 = vor.u32 %v6570_v27, %v6567_v11  ;;  %v16806_v15 = vunpack.c.l.b16 %v14265_v31  ;;  %v6588_v38 = vshll.u32 %v14796_v2, 16  ;;  %v7242_v31 = vrot.slane %v14750_v56, 5 }
 0x4f4   : > { %v5978_v8 = vadd.f32 %v5922_v51, %v5724_v21  ;;  %v6142_v61 = vpop.f32.mrf.mxu1  ;;  %v6581_v33 = vrot.slane %v6579_v14, 4  ;;  %v16805_v14 = vunpack.c.l.b16 %v14233_v9  ;;  %v6576_v1 = vrot.slane %v6574_v12, 5  ;;  %v14832_v12 = vld [vmem:[%s14184_s16 + $0x38] sm:$0xf] }
 0x4f5   : > { %v10430_v9 = vrot.slane %v14740_v34, 9  ;;  %v6590_v17 = vrot.slane %v6588_v38, 5 }
 0x4f6   : > { %v6196_v58 = vadd.f32 %v6140_v32, %v5978_v8  ;;  %v11010_v32 = vld [vmem:[%s15935_s3 + $0x670] sm:$0xff]  ;;  %v6585_v27 = vor.u32 %v6584_v46, %v6581_v33 }
 0x4f7   : > { %8684 = vmatpush.bf16.msra.mxu1 %v11010_v32  ;;  %v14824_v32 = vld [vmem:[%s14184_s16 + $0x40] sm:$0xf]  ;;  %v14829_v56 = vsel %vm11461_vm5, %v10430_v9, %v7242_v31 }
 0x4f8   : > { %v14784_v51 = vadd.f32 %v6422_v20, %v6196_v58  ;;  %v14800_v20 = vpack.c.b16 %v6962_v44, %v14744_v19  ;;  %v6572_v58 = vrot.slane %v6571_v36, 4  ;;  %v7246_v44 = vrot.slane %v582_v28, 5  ;;  %16807 = vst [vmem:[#allocation70_spill] sm:$0xff] %v14824_v32 }
 0x4f9   : > { %v5670_v54 = vpop.f32.mrf.mxu3  ;;  %v6586_v46 = vrot.slane %v6585_v27, 4  ;;  %v6596_v28 = vshll.u32 %v14832_v12, 16  ;;  %v16200_v27 = vunpack.c.l.b16 %v14829_v56 }
 0x4fa   : > { %v5725_v18 = vadd.f32 %v5670_v54, %v14256_v24  ;;  %v7628_v24 = vpack.c.b16 %v16806_v15, %v16805_v14  ;;  %v7829_v15 = vshrl.u32 %v14824_v32, 16 }
 0x4fb   : > { %v6424_v21 = vpop.f32.mrf.mxu2  ;;  %v5927_v8 = vpop.f32.mrf.mxu0 }
 0x4fc   : > { %v5979_v11 = vadd.f32 %v5924_v43, %v5725_v18  ;;  %v6145_v19 = vpop.f32.mrf.mxu1  ;;  %v10431_v43 = vrot.slane %v14762_v10, 9  ;;  %v6593_v10 = vshrl.u32 %v14832_v12, 16 }
 0x4fe   : > { %v6197_v54 = vadd.f32 %v6142_v61, %v5979_v11  ;;  %7084 = vmatmul.bf16.gmra.mxu3 %v14800_v20  ;;  %7494 = vmatmul.bf16.gmra.mxu0 %v14806_v26  ;;  %v6577_v61 = vsel %vm11429_vm3, %v6572_v58, %v6576_v1  ;;  %v6595_v1 = vrot.slane %v6593_v10, 4 }
 0x4ff   : > { %7720 = vmatmul.bf16.gmra.mxu1 %v7628_v24  ;;  %v7832_v24 = vshll.u32 %v14824_v32, 16  ;;  %v6964_v11 = vunpack.c.l.b16 %v6577_v61 }
 0x500   : > { %7998 = vmatmul.bf16.gmra.mxu2 %v7906_v40  ;;  %v14819_v33 = vadd.f32 %v6424_v21, %v6197_v54  ;;  %v14838_v21 = vsel %vm11461_vm5, %v10431_v43, %v7246_v44  ;;  %v6598_v54 = vrot.slane %v6596_v28, 5  ;;  %v7831_v43 = vrot.slane %v7829_v15, 4 }
 0x501   : > { %v5673_v55 = vpop.f32.mrf.mxu3  ;;  %16808 = vst [vmem:[#allocation60_spill] sm:$0xff] %v14838_v21  ;;  %v16199_v58 = vunpack.c.l.b16 %v14838_v21  ;;  %v7834_v44 = vrot.slane %v7832_v24, 5 }
 0x502   : > { %v5726_v36 = vadd.f32 %v5673_v55, %v14272_v4  ;;  %v6591_v4 = vsel %vm11429_vm3, %v6586_v46, %v6590_v17  ;;  %v14852_v17 = vpack.c.b16 %v6964_v11, %v14782_v48  ;;  %v588_v55 = vld [vmem:[%s14184_s16 + $0x44] sm:$0x1]  ;;  %v6599_v10 = vor.u32 %v6598_v54, %v6595_v1 }
 0x503   : > { %v6427_v34 = vpop.f32.mrf.mxu2  ;;  %v5929_v18 = vpop.f32.mrf.mxu0  ;;  %v14846_v9 = vunpack.c.l.b16 %v6591_v4  ;;  %v16810_v4 = vld [vmem:[#allocation75_spill] sm:$0xff]  ;;  %v16812_v48 = vunpack.c.l.b16 %v14296_v49  ;;  %v7250_v49 = vrot.slane %v14796_v2, 5  ;;  %v14883_v2 = vld [vmem:[%s14184_s16 + $0x58] sm:$0xf] }
 0x504   : > { %v5980_v40 = vadd.f32 %v5927_v8, %v5726_v36  ;;  %v6147_v14 = vpop.f32.mrf.mxu1  ;;  %v586_v8 = vld [vmem:[%s14184_s16 + $0x3c] sm:$0x1]  ;;  %v16811_v15 = vunpack.c.l.b16 %v16810_v4  ;;  %v6600_v1 = vrot.slane %v6599_v10, 4  ;;  %v14878_v4 = vld [vmem:[%s14184_s16 + $0x50] sm:$0xf] }
 0x505   : > { %v6602_v28 = vshll.u32 %v586_v8, 16 }
 0x506   : > { %v6198_v38 = vadd.f32 %v6145_v19, %v5980_v40  ;;  %v14860_v19 = vpack.c.b16 %v16199_v58, %v16200_v27  ;;  %v7907_v40 = vpack.c.b16 %v14846_v9, %v6964_v11  ;;  %v7629_v24 = vpack.c.b16 %v16812_v48, %v16811_v15 }
 0x507   : > { %v6604_v54 = vrot.slane %v6602_v28, 5  ;;  %v10432_v11 = vrot.slane %v14776_v59, 9  ;;  %v6607_v28 = vshrl.u32 %v14878_v4, 16  ;;  %v6610_v59 = vshll.u32 %v14878_v4, 16 }
 0x508   : > { %v14849_v31 = vadd.f32 %v6427_v34, %v6198_v38 }
 0x509   : > { %v5675_v46 = vpop.f32.mrf.mxu3  ;;  %v6605_v48 = vsel %vm11429_vm3, %v6600_v1, %v6604_v54  ;;  %v6609_v54 = vrot.slane %v6607_v28, 4 }
 0x50a   : > { %16809 = vst [vmem:[#allocation78_spill] sm:$0xff] %v14849_v31  ;;  %v5727_v61 = vadd.f32 %v5675_v46, %v14286_v60  ;;  %v7835_v60 = vor.u32 %v7834_v44, %v7831_v43  ;;  %v7838_v46 = vshll.u32 %v588_v55, 16  ;;  %v10993_v55 = vld [vmem:[%s15935_s3 + $0x5e8] sm:$0xff]  ;;  %v6966_v23 = vunpack.c.l.b16 %v6605_v48 }
 0x50b   : > { %v6429_v36 = vpop.f32.mrf.mxu2  ;;  %v5932_v34 = vpop.f32.mrf.mxu0  ;;  %8229 = vmatpush.bf16.msra.mxu3 %v10993_v55  ;;  %v14901_v55 = vld [vmem:[%s14184_s16 + $0x60] sm:$0xf] }
 0x50c   : > { %v5981_v38 = vadd.f32 %v5929_v18, %v5727_v61  ;;  %v6150_v30 = vpop.f32.mrf.mxu1  ;;  %v10433_v18 = vrot.slane %v14832_v12, 9  ;;  %v7254_v61 = vrot.slane %v586_v8, 5  ;;  %v7840_v44 = vrot.slane %v7838_v46, 5  ;;  %v16814_v8 = vld [vmem:[#allocation53_spill] sm:$0xff] }
 0x50d   : > { %v6621_v12 = vshrl.u32 %v14883_v2, 16  ;;  %v6638_v1 = vshll.u32 %v14901_v55, 16 }
 0x50e   : > { %v6199_v35 = vadd.f32 %v6147_v14, %v5981_v38  ;;  %7089 = vmatmul.bf16.gmra.mxu3 %v14852_v17  ;;  %7499 = vmatmul.bf16.gmra.mxu0 %v14860_v19  ;;  %v7836_v14 = vrot.slane %v7835_v60, 4  ;;  %v14896_v38 = vsel %vm11461_vm5, %v10433_v18, %v7254_v61  ;;  %v592_v61 = vld [vmem:[%s14184_s16 + $0x54] sm:$0x1] }
 0x50f   : > { %7725 = vmatmul.bf16.gmra.mxu1 %v7629_v24  ;;  %v14892_v24 = vsel %vm11461_vm5, %v10432_v11, %v7250_v49  ;;  %16816 = vst [vmem:[#allocation7_spill] sm:$0xff] %v14896_v38  ;;  %v6612_v11 = vrot.slane %v6610_v59, 5  ;;  %v6623_v49 = vrot.slane %v6621_v12, 4  ;;  %v6640_v28 = vrot.slane %v6638_v1, 5  ;;  %v11001_v59 = vld [vmem:[%s15935_s3 + $0x628] sm:$0xff] }
 0x510   : > { %8003 = vmatmul.bf16.gmra.mxu2 %v7907_v40  ;;  %v14872_v43 = vadd.f32 %v6429_v36, %v6199_v35  ;;  %v6624_v35 = vshll.u32 %v14883_v2, 16  ;;  %16815 = vst [vmem:[#allocation26_spill] sm:$0xff] %v14892_v24  ;;  %v16207_v18 = vunpack.c.l.b16 %v14892_v24  ;;  %v11009_v12 = vld [vmem:[%s15935_s3 + $0x668] sm:$0xff]  ;;  %8431 = vmatpush.bf16.msra.mxu0 %v11001_v59 }
 0x511   : > { %v5678_v10 = vpop.f32.mrf.mxu3  ;;  %v6613_v48 = vor.u32 %v6612_v11, %v6609_v54  ;;  %v16819_v11 = vunpack.c.l.b16 %v14299_v25  ;;  %8685 = vmatpush.bf16.msra.mxu1 %v11009_v12  ;;  %v10434_v25 = vrot.slane %v14878_v4, 9 }
 0x512   : > { %16813 = vst [vmem:[#allocation18_spill] sm:$0xff] %v14872_v43  ;;  %v5728_v36 = vadd.f32 %v5678_v10, %v16814_v8  ;;  %v7841_v10 = vsel %vm11429_vm3, %v7836_v14, %v7840_v44  ;;  %v6635_v8 = vshrl.u32 %v14901_v55, 16  ;;  %v6626_v58 = vrot.slane %v6624_v35, 5 }
 0x513   : > { %v6432_v40 = vpop.f32.mrf.mxu2  ;;  %v5934_v15 = vpop.f32.mrf.mxu0  ;;  %v14909_v14 = vunpack.c.l.b16 %v7841_v10  ;;  %v14928_v44 = vpack.c.b16 %v6966_v23, %v14846_v9  ;;  %v6614_v31 = vrot.slane %v6613_v48, 4 }
 0x514   : > { %v5982_v60 = vadd.f32 %v5932_v34, %v5728_v36  ;;  %v6152_v46 = vpop.f32.mrf.mxu1  ;;  %v16206_v34 = vunpack.c.l.b16 %v14896_v38  ;;  %v594_v36 = vld [vmem:[%s14184_s16 + $0x5c] sm:$0x1]  ;;  %v6637_v21 = vrot.slane %v6635_v8, 4  ;;  %v6627_v10 = vor.u32 %v6626_v58, %v6623_v49 }
 0x515   : > { %16817 = vst [vmem:[#allocation4_spill] sm:$0xff] %v14909_v14  ;;  %v7908_v58 = vpack.c.b16 %v14909_v14, %v6966_v23  ;;  %v16820_v49 = vunpack.c.l.b16 %v14824_v32  ;;  %v7258_v23 = vrot.slane %v592_v61, 5 }
 0x516   : > { %v6200_v27 = vadd.f32 %v6150_v30, %v5982_v60  ;;  %v11017_v30 = vld [vmem:[%s15935_s3 + $0x6a8] sm:$0xff]  ;;  %v6616_v60 = vshll.u32 %v592_v61, 16  ;;  %v6641_v43 = vor.u32 %v6640_v28, %v6637_v21  ;;  %v7262_v21 = vrot.slane %v594_v36, 5 }
 0x517   : > { %8903 = vmatpush.bf16.msra.mxu2 %v11017_v30 }
 0x518   : > { %v14912_v45 = vadd.f32 %v6432_v40, %v6200_v27  ;;  %v6630_v27 = vshll.u32 %v594_v36, 16  ;;  %v14924_v40 = vld [vmem:[%s14184_s16 + $0x64] sm:$0x1]  ;;  %v6618_v38 = vrot.slane %v6616_v60, 5  ;;  %v6642_v59 = vrot.slane %v6641_v43, 4 }
 0x519   : > { %v5680_v35 = vpop.f32.mrf.mxu3  ;;  %v6644_v24 = vshll.u32 %v14924_v40, 16 }
 0x51a   : > { %16818 = vst [vmem:[#allocation23_spill] sm:$0xff] %v14912_v45  ;;  %v5729_v8 = vadd.f32 %v5680_v35, %v14330_v13  ;;  %v14934_v45 = vpack.c.b16 %v16206_v34, %v16207_v18  ;;  %v7630_v13 = vpack.c.b16 %v16820_v49, %v16819_v11  ;;  %v6628_v34 = vrot.slane %v6627_v10, 4 }
 0x51b   : > { %v6434_v1 = vpop.f32.mrf.mxu2  ;;  %v5937_v54 = vpop.f32.mrf.mxu0  ;;  %v6632_v18 = vrot.slane %v6630_v27, 5  ;;  %v6646_v12 = vrot.slane %v6644_v24, 5  ;;  %v7259_v10 = vsel %vm11461_vm5, %v10434_v25, %v7258_v23  ;;  %v598_v25 = vld [vmem:[%s14184_s16 + $0x6c] sm:$0x1] }
 0x51c   : > { %v5983_v35 = vadd.f32 %v5934_v15, %v5729_v8  ;;  %v6155_v9 = vpop.f32.mrf.mxu1  ;;  %v10435_v15 = vrot.slane %v14883_v2, 9  ;;  %v14956_v2 = vld [vmem:[%s14184_s16 + $0x68] sm:$0xf]  ;;  %v7377_v11 = vunpack.c.l.b16 %v7259_v10 }
 0x51d   : > { %v6633_v60 = vsel %vm11429_vm3, %v6628_v34, %v6632_v18  ;;  %v6649_v36 = vshrl.u32 %v14956_v2, 16  ;;  %v6652_v43 = vshll.u32 %v14956_v2, 16  ;;  %v14967_v34 = vld [vmem:[%s14184_s16 + $0x70] sm:$0xf] }
 0x51e   : > { %v6201_v30 = vadd.f32 %v6152_v46, %v5983_v35  ;;  %7094 = vmatmul.bf16.gmra.mxu3 %v14928_v44  ;;  %7504 = vmatmul.bf16.gmra.mxu0 %v14934_v45  ;;  %v6619_v46 = vsel %vm11429_vm3, %v6614_v31, %v6618_v38  ;;  %v14962_v31 = vsel %vm11461_vm5, %v10435_v15, %v7262_v21  ;;  %v6663_v27 = vshrl.u32 %v14967_v34, 16 }
 0x51f   : > { %7730 = vmatmul.bf16.gmra.mxu1 %v7630_v13  ;;  %16821 = vst [vmem:[#allocation29_spill] sm:$0xff] %v14962_v31  ;;  %v6666_v8 = vshll.u32 %v14967_v34, 16  ;;  %v16210_v13 = vunpack.c.l.b16 %v14962_v31  ;;  %v6651_v35 = vrot.slane %v6649_v36, 4  ;;  %v6658_v36 = vshll.u32 %v598_v25, 16 }
 0x520   : > { %8008 = vmatmul.bf16.gmra.mxu2 %v7908_v58  ;;  %v14946_v28 = vadd.f32 %v6434_v1, %v6201_v30  ;;  %v6967_v1 = vunpack.c.l.b16 %v6619_v46  ;;  %v6968_v58 = vunpack.c.l.b16 %v6633_v60  ;;  %v6654_v30 = vrot.slane %v6652_v43, 5 }
 0x521   : > { %v5683_v48 = vpop.f32.mrf.mxu3  ;;  %v6665_v15 = vrot.slane %v6663_v27, 4  ;;  %v6668_v21 = vrot.slane %v6666_v8, 5 }
 0x522   : > { %v5730_v4 = vadd.f32 %v5683_v48, %v14338_v29  ;;  %v6647_v29 = vsel %vm11429_vm3, %v6642_v59, %v6646_v12  ;;  %v6995_v12 = vpack.c.b16 %v6968_v58, %v6967_v1  ;;  %v14978_v48 = vld [vmem:[%s14184_s16 + $0x74] sm:$0x1]  ;;  %v6655_v10 = vor.u32 %v6654_v30, %v6651_v35 }
 0x523   : > { %v6437_v61 = vpop.f32.mrf.mxu2  ;;  %v5939_v24 = vpop.f32.mrf.mxu0  ;;  %v6669_v14 = vor.u32 %v6668_v21, %v6665_v15  ;;  %v6672_v32 = vshll.u32 %v14978_v48, 16  ;;  %v6660_v35 = vrot.slane %v6658_v36, 5  ;;  %v7266_v30 = vrot.slane %v14924_v40, 5  ;;  %v16828_v40 = vld [vmem:[#allocation69_spill] sm:$0xff] }
 0x524   : > { %v5984_v38 = vadd.f32 %v5937_v54, %v5730_v4  ;;  %v6157_v18 = vpop.f32.mrf.mxu1  ;;  %v14972_v54 = vunpack.c.l.b16 %v6647_v29  ;;  %v16823_v4 = vld [vmem:[#allocation76_spill] sm:$0xff]  ;;  %v16824_v29 = vld [vmem:[#allocation66_spill] sm:$0xff] }
 0x525   : > { %v6670_v15 = vrot.slane %v6669_v14, 4  ;;  %v6674_v21 = vrot.slane %v6672_v32, 5 }
 0x526   : > { %v6202_v49 = vadd.f32 %v6155_v9, %v5984_v38  ;;  %v7405_v9 = vpack.c.b16 %v16210_v13, %v7377_v11  ;;  %v7909_v38 = vpack.c.b16 %v14972_v54, %v6968_v58  ;;  %v6656_v11 = vrot.slane %v6655_v10, 4 }
 0x527   : > { %v10436_v58 = vrot.slane %v14901_v55, 9  ;;  %v16834_v13 = vunpack.c.l.b16 %v14391_v47  ;;  %v7274_v47 = vrot.slane %v14978_v48, 5 }
 0x528   : > { %v14975_v23 = vadd.f32 %v6437_v61, %v6202_v49  ;;  %v16825_v61 = vunpack.c.l.b16 %v16824_v29  ;;  %v16826_v49 = vld [vmem:[#allocation3_spill] sm:$0xff]  ;;  %v7270_v29 = vrot.slane %v598_v25, 5  ;;  %v6661_v32 = vsel %vm11429_vm3, %v6656_v11, %v6660_v35 }
 0x529   : > { %v5685_v59 = vpop.f32.mrf.mxu3  ;;  %v16827_v27 = vunpack.c.l.b16 %v16826_v49  ;;  %v15007_v14 = vsel %vm11461_vm5, %v10436_v58, %v7266_v30  ;;  %v6970_v35 = vunpack.c.l.b16 %v6661_v32 }
 0x52a   : > { %16822 = vst [vmem:[#allocation82_spill] sm:$0xff] %v14975_v23  ;;  %v5731_v46 = vadd.f32 %v5685_v59, %v16823_v4  ;;  %v10437_v4 = vrot.slane %v14956_v2, 9  ;;  %v16214_v58 = vunpack.c.l.b16 %v15007_v14 }
 0x52b   : > { %v6439_v60 = vpop.f32.mrf.mxu2  ;;  %v5942_v43 = vpop.f32.mrf.mxu0  ;;  %v7631_v8 = vpack.c.b16 %v16827_v27, %v16825_v61  ;;  %16829 = vst [vmem:[#allocation9_spill] sm:$0xff] %v15007_v14  ;;  %v15016_v61 = vld [vmem:[%s14184_s16 + $0x80] sm:$0xf] }
 0x52c   : > { %v5985_v23 = vadd.f32 %v5939_v24, %v5731_v46  ;;  %v6160_v1 = vpop.f32.mrf.mxu1  ;;  %v6691_v49 = vshrl.u32 %v15016_v61, 16  ;;  %v6694_v27 = vshll.u32 %v15016_v61, 16 }
 0x52e   : > { %v6203_v59 = vadd.f32 %v6157_v18, %v5985_v23  ;;  %7099 = vmatmul.bf16.gmra.mxu3 %v6995_v12  ;;  %7509 = vmatmul.bf16.gmra.mxu0 %v7405_v9  ;;  %v10992_v18 = vld [vmem:[%s15935_s3 + $0x5e0] sm:$0xff]  ;;  %v14998_v12 = vld [vmem:[%s14184_s16 + $0x78] sm:$0xf] }
 0x52f   : > { %7735 = vmatmul.bf16.gmra.mxu1 %v7631_v8  ;;  %v6677_v46 = vshrl.u32 %v14998_v12, 16  ;;  %v6680_v55 = vshll.u32 %v14998_v12, 16  ;;  %8230 = vmatpush.bf16.msra.mxu3 %v10992_v18  ;;  %v11016_v18 = vld [vmem:[%s15935_s3 + $0x6a0] sm:$0xff] }
 0x530   : > { %8013 = vmatmul.bf16.gmra.mxu2 %v7909_v38  ;;  %v14992_v24 = vadd.f32 %v6439_v60, %v6203_v59  ;;  %v15011_v60 = vsel %vm11461_vm5, %v10437_v4, %v7270_v29  ;;  %v6675_v38 = vsel %vm11429_vm3, %v6670_v15, %v6674_v21  ;;  %v6693_v15 = vrot.slane %v6691_v49, 4 }
 0x531   : > { %v5688_v23 = vpop.f32.mrf.mxu3  ;;  %v6679_v8 = vrot.slane %v6677_v46, 4  ;;  %v6682_v59 = vrot.slane %v6680_v55, 5  ;;  %v16213_v30 = vunpack.c.l.b16 %v15011_v60  ;;  %v15023_v4 = vunpack.c.l.b16 %v6675_v38  ;;  %8904 = vmatpush.bf16.msra.mxu2 %v11016_v18 }
 0x532   : > { %v5732_v9 = vadd.f32 %v5688_v23, %v16828_v40  ;;  %v6696_v21 = vrot.slane %v6694_v27, 5  ;;  %v11008_v23 = vld [vmem:[%s15935_s3 + $0x660] sm:$0xff]  ;;  %v15041_v38 = vpack.c.b16 %v6970_v35, %v14972_v54 }
 0x533   : > { %v6442_v2 = vpop.f32.mrf.mxu2  ;;  %v5944_v25 = vpop.f32.mrf.mxu0  ;;  %v6683_v55 = vor.u32 %v6682_v59, %v6679_v8  ;;  %v15047_v49 = vpack.c.b16 %v16213_v30, %v16214_v58  ;;  %v7910_v8 = vpack.c.b16 %v15023_v4, %v6970_v35  ;;  %v16832_v59 = vld [vmem:[#allocation59_spill] sm:$0xff]  ;;  %8686 = vmatpush.bf16.msra.mxu1 %v11008_v23  ;;  %v10438_v35 = vrot.slane %v14967_v34, 9  ;;  %v15065_v23 = vld [vmem:[%s14184_s16 + $0x90] sm:$0xf] }
 0x534   : > { %v5986_v10 = vadd.f32 %v5942_v43, %v5732_v9  ;;  %v6162_v36 = vpop.f32.mrf.mxu1  ;;  %v602_v43 = vld [vmem:[%s14184_s16 + $0x7c] sm:$0x1]  ;;  %v15037_v9 = vld [vmem:[%s14184_s16 + $0x84] sm:$0x1]  ;;  %16835 = vst [vmem:[#allocation34_spill] sm:$0xff] %v15065_v23 }
 0x535   : > { %v6686_v40 = vshll.u32 %v602_v43, 16  ;;  %v6700_v14 = vshll.u32 %v15037_v9, 16  ;;  %v6684_v31 = vrot.slane %v6683_v55, 4  ;;  %v15070_v48 = vsel %vm11461_vm5, %v10438_v35, %v7274_v47 }
 0x536   : > { %v6204_v11 = vadd.f32 %v6160_v1, %v5986_v10  ;;  %v11000_v1 = vld [vmem:[%s15935_s3 + $0x620] sm:$0xff] }
 0x537   : > { %8432 = vmatpush.bf16.msra.mxu0 %v11000_v1  ;;  %v6688_v30 = vrot.slane %v6686_v40, 5  ;;  %v6702_v18 = vrot.slane %v6700_v14, 5  ;;  %v15073_v40 = vld [vmem:[%s14184_s16 + $0x88] sm:$0xf] }
 0x538   : > { %v15025_v29 = vadd.f32 %v6442_v2, %v6204_v11  ;;  %v16831_v2 = vld [vmem:[#allocation62_spill] sm:$0xff]  ;;  %v16833_v11 = vunpack.c.l.b16 %v16832_v59  ;;  %v6708_v14 = vshll.u32 %v15073_v40, 16 }
 0x539   : > { %v5690_v46 = vpop.f32.mrf.mxu3 }
 0x53a   : > { %16830 = vst [vmem:[#allocation6_spill] sm:$0xff] %v15025_v29  ;;  %v5733_v32 = vadd.f32 %v5690_v46, %v16831_v2  ;;  %v7632_v46 = vpack.c.b16 %v16834_v13, %v16833_v11  ;;  %v6697_v29 = vor.u32 %v6696_v21, %v6693_v15  ;;  %v10439_v13 = vrot.slane %v14998_v12, 9 }
 0x53b   : > { %v6444_v10 = vpop.f32.mrf.mxu2  ;;  %v5947_v27 = vpop.f32.mrf.mxu0  ;;  %v6705_v12 = vshrl.u32 %v15073_v40, 16 }
 0x53c   : > { %v5987_v2 = vadd.f32 %v5944_v25, %v5733_v32  ;;  %v6165_v54 = vpop.f32.mrf.mxu1  ;;  %v7278_v25 = vrot.slane %v602_v43, 5  ;;  %v6698_v21 = vrot.slane %v6697_v29, 4  ;;  %v7843_v29 = vshrl.u32 %v15065_v23, 16 }
 0x53d   : > { %v7846_v32 = vshll.u32 %v15065_v23, 16 }
 0x53e   : > { %v6205_v58 = vadd.f32 %v6162_v36, %v5987_v2  ;;  %7104 = vmatmul.bf16.gmra.mxu3 %v15041_v38  ;;  %7514 = vmatmul.bf16.gmra.mxu0 %v15047_v49  ;;  %v6689_v36 = vsel %vm11429_vm3, %v6684_v31, %v6688_v30  ;;  %v15079_v31 = vsel %vm11461_vm5, %v10439_v13, %v7278_v25  ;;  %v6710_v2 = vrot.slane %v6708_v14, 5 }
 0x53f   : > { %7740 = vmatmul.bf16.gmra.mxu1 %v7632_v46  ;;  %16836 = vst [vmem:[#allocation72_spill] sm:$0xff] %v15079_v31  ;;  %v16215_v11 = vunpack.c.l.b16 %v15079_v31  ;;  %v6707_v46 = vrot.slane %v6705_v12, 4  ;;  %v7845_v13 = vrot.slane %v7843_v29, 4  ;;  %v7848_v25 = vrot.slane %v7846_v32, 5 }
 0x540   : > { %8018 = vmatmul.bf16.gmra.mxu2 %v7910_v8  ;;  %v15060_v15 = vadd.f32 %v6444_v10, %v6205_v58  ;;  %v6972_v10 = vunpack.c.l.b16 %v6689_v36  ;;  %v16216_v8 = vunpack.c.l.b16 %v15070_v48 }
 0x541   : > { %v5693_v1 = vpop.f32.mrf.mxu3  ;;  %v6711_v12 = vor.u32 %v6710_v2, %v6707_v46 }
 0x542   : > { %v5734_v55 = vadd.f32 %v5693_v1, %v14398_v42  ;;  %v6703_v42 = vsel %vm11429_vm3, %v6698_v21, %v6702_v18  ;;  %v15093_v18 = vpack.c.b16 %v6972_v10, %v15023_v4  ;;  %v608_v1 = vld [vmem:[%s14184_s16 + $0x94] sm:$0x1]  ;;  %v16841_v4 = vunpack.c.l.b16 %v14422_v22 }
 0x543   : > { %v6447_v34 = vpop.f32.mrf.mxu2  ;;  %v5949_v58 = vpop.f32.mrf.mxu0  ;;  %v15087_v35 = vunpack.c.l.b16 %v6703_v42  ;;  %v16840_v42 = vunpack.c.l.b16 %v14394_v57  ;;  %v6712_v46 = vrot.slane %v6711_v12, 4  ;;  %v10440_v57 = vrot.slane %v15016_v61, 9  ;;  %v15119_v12 = vld [vmem:[%s14184_s16 + $0xa0] sm:$0xf] }
 0x544   : > { %v5988_v30 = vadd.f32 %v5947_v27, %v5734_v55  ;;  %v6167_v43 = vpop.f32.mrf.mxu1  ;;  %v606_v27 = vld [vmem:[%s14184_s16 + $0x8c] sm:$0x1]  ;;  %16838 = vst [vmem:[#allocation41_spill] sm:$0xff] %v15093_v18  ;;  %v7282_v22 = vrot.slane %v15037_v9, 5  ;;  %v6722_v61 = vshll.u32 %v15119_v12, 16 }
 0x545   : > { %v6714_v14 = vshll.u32 %v606_v27, 16  ;;  %v7633_v29 = vpack.c.b16 %v16841_v4, %v16840_v42  ;;  %v15124_v9 = vld [vmem:[%s14184_s16 + $0xa8] sm:$0xf] }
 0x546   : > { %v6206_v59 = vadd.f32 %v6165_v54, %v5988_v30  ;;  %v15101_v54 = vpack.c.b16 %v16215_v11, %v16216_v8  ;;  %v7911_v30 = vpack.c.b16 %v15087_v35, %v6972_v10  ;;  %v7286_v10 = vrot.slane %v606_v27, 5 }
 0x547   : > { %v6716_v2 = vrot.slane %v6714_v14, 5  ;;  %v6719_v14 = vshrl.u32 %v15119_v12, 16  ;;  %v6736_v27 = vshll.u32 %v15124_v9, 16  ;;  %v15133_v4 = vsel %vm11461_vm5, %v10440_v57, %v7282_v22 }
 0x548   : > { %v15090_v47 = vadd.f32 %v6447_v34, %v6206_v59  ;;  %16839 = vst [vmem:[#allocation14_spill] sm:$0xff] %v15101_v54  ;;  %v6724_v57 = vrot.slane %v6722_v61, 5  ;;  %v10999_v61 = vld [vmem:[%s15935_s3 + $0x618] sm:$0xff] }
 0x549   : > { %v5695_v21 = vpop.f32.mrf.mxu3  ;;  %v6717_v42 = vsel %vm11429_vm3, %v6712_v46, %v6716_v2  ;;  %16843 = vst [vmem:[#allocation43_spill] sm:$0xff] %v15133_v4  ;;  %v6721_v2 = vrot.slane %v6719_v14, 4  ;;  %8433 = vmatpush.bf16.msra.mxu0 %v10999_v61 }
 0x54a   : > { %16837 = vst [vmem:[#allocation64_spill] sm:$0xff] %v15090_v47  ;;  %v5735_v36 = vadd.f32 %v5695_v21, %v14412_v39  ;;  %v7849_v39 = vor.u32 %v7848_v25, %v7845_v13  ;;  %v7852_v21 = vshll.u32 %v608_v1, 16  ;;  %v10991_v1 = vld [vmem:[%s15935_s3 + $0x5d8] sm:$0xff]  ;;  %v6974_v8 = vunpack.c.l.b16 %v6717_v42 }
 0x54b   : > { %v6449_v55 = vpop.f32.mrf.mxu2  ;;  %v5952_v34 = vpop.f32.mrf.mxu0  ;;  %8231 = vmatpush.bf16.msra.mxu3 %v10991_v1  ;;  %v6725_v42 = vor.u32 %v6724_v57, %v6721_v2 }
 0x54c   : > { %v5989_v32 = vadd.f32 %v5949_v58, %v5735_v36  ;;  %v6170_v59 = vpop.f32.mrf.mxu1  ;;  %v10441_v58 = vrot.slane %v15073_v40, 9  ;;  %v7854_v25 = vrot.slane %v7852_v21, 5  ;;  %v6733_v40 = vshrl.u32 %v15124_v9, 16  ;;  %v15142_v21 = vld [vmem:[%s14184_s16 + $0xb0] sm:$0xf] }
 0x54d   : > { %v6747_v1 = vshrl.u32 %v15142_v21, 16  ;;  %v6750_v46 = vshll.u32 %v15142_v21, 16 }
 0x54e   : > { %v6207_v47 = vadd.f32 %v6167_v43, %v5989_v32  ;;  %7109 = vmatmul.bf16.gmra.mxu3 %v15093_v18  ;;  %7519 = vmatmul.bf16.gmra.mxu0 %v15101_v54  ;;  %v7850_v43 = vrot.slane %v7849_v39, 4  ;;  %v6735_v22 = vrot.slane %v6733_v40, 4  ;;  %v11007_v40 = vld [vmem:[%s15935_s3 + $0x658] sm:$0xff]  ;;  %v6726_v54 = vrot.slane %v6725_v42, 4 }
 0x54f   : > { %7745 = vmatmul.bf16.gmra.mxu1 %v7633_v29  ;;  %v15137_v29 = vsel %vm11461_vm5, %v10441_v58, %v7286_v10  ;;  %v16223_v58 = vunpack.c.l.b16 %v15133_v4  ;;  %v612_v10 = vld [vmem:[%s14184_s16 + $0xa4] sm:$0x1]  ;;  %v6752_v14 = vrot.slane %v6750_v46, 5 }
 0x550   : > { %8023 = vmatmul.bf16.gmra.mxu2 %v7911_v30  ;;  %v15113_v13 = vadd.f32 %v6449_v55, %v6207_v47  ;;  %16844 = vst [vmem:[#allocation39_spill] sm:$0xff] %v15137_v29  ;;  %8687 = vmatpush.bf16.msra.mxu1 %v11007_v40 }
 0x551   : > { %v5698_v36 = vpop.f32.mrf.mxu3 }
 0x552   : > { %16842 = vst [vmem:[#allocation55_spill] sm:$0xff] %v15113_v13  ;;  %v5736_v47 = vadd.f32 %v5698_v36, %v14432_v16  ;;  %v7855_v16 = vsel %vm11429_vm3, %v7850_v43, %v7854_v25  ;;  %v6738_v36 = vrot.slane %v6736_v27, 5  ;;  %v6749_v13 = vrot.slane %v6747_v1, 4 }
 0x553   : > { %v6452_v55 = vpop.f32.mrf.mxu2  ;;  %v5954_v30 = vpop.f32.mrf.mxu0  ;;  %v15150_v43 = vunpack.c.l.b16 %v7855_v16  ;;  %v15169_v25 = vpack.c.b16 %v6974_v8, %v15087_v35 }
 0x554   : > { %v5990_v32 = vadd.f32 %v5952_v34, %v5736_v47  ;;  %v6172_v39 = vpop.f32.mrf.mxu1  ;;  %v16222_v34 = vunpack.c.l.b16 %v15137_v29  ;;  %v614_v47 = vld [vmem:[%s14184_s16 + $0xac] sm:$0x1]  ;;  %v6739_v16 = vor.u32 %v6738_v36, %v6735_v22  ;;  %v16848_v22 = vunpack.c.l.b16 %v14425_v6 }
 0x555   : > { %16845 = vst [vmem:[#allocation32_spill] sm:$0xff] %v15150_v43  ;;  %v7912_v57 = vpack.c.b16 %v15150_v43, %v6974_v8  ;;  %v16849_v36 = vunpack.c.l.b16 %v15065_v23  ;;  %v6753_v18 = vor.u32 %v6752_v14, %v6749_v13  ;;  %v10442_v6 = vrot.slane %v15119_v12, 9 }
 0x556   : > { %v6208_v11 = vadd.f32 %v6170_v59, %v5990_v32  ;;  %v11015_v59 = vld [vmem:[%s15935_s3 + $0x698] sm:$0xff]  ;;  %v6728_v32 = vshll.u32 %v612_v10, 16  ;;  %16847 = vst [vmem:[#allocation22_spill] sm:$0xff] %v15169_v25  ;;  %v7290_v8 = vrot.slane %v612_v10, 5  ;;  %v7294_v13 = vrot.slane %v614_v47, 5 }
 0x557   : > { %8905 = vmatpush.bf16.msra.mxu2 %v11015_v59  ;;  %v6754_v61 = vrot.slane %v6753_v18, 4 }
 0x558   : > { %v15153_v31 = vadd.f32 %v6452_v55, %v6208_v11  ;;  %v6742_v11 = vshll.u32 %v614_v47, 16  ;;  %v15165_v55 = vld [vmem:[%s14184_s16 + $0xb4] sm:$0x1]  ;;  %v6730_v29 = vrot.slane %v6728_v32, 5 }
 0x559   : > { %v5700_v27 = vpop.f32.mrf.mxu3  ;;  %v6756_v4 = vshll.u32 %v15165_v55, 16 }
 0x55a   : > { %16846 = vst [vmem:[#allocation24_spill] sm:$0xff] %v15153_v31  ;;  %v5737_v1 = vadd.f32 %v5700_v27, %v14456_v7  ;;  %v15175_v31 = vpack.c.b16 %v16222_v34, %v16223_v58  ;;  %v7634_v7 = vpack.c.b16 %v16849_v36, %v16848_v22  ;;  %v6740_v34 = vrot.slane %v6739_v16, 4 }
 0x55b   : > { %v6454_v46 = vpop.f32.mrf.mxu2  ;;  %v5957_v2 = vpop.f32.mrf.mxu0  ;;  %v6744_v58 = vrot.slane %v6742_v11, 5  ;;  %v6758_v40 = vrot.slane %v6756_v4, 5  ;;  %v7291_v16 = vsel %vm11461_vm5, %v10442_v6, %v7290_v8  ;;  %v618_v6 = vld [vmem:[%s14184_s16 + $0xbc] sm:$0x1] }
 0x55c   : > { %v5991_v27 = vadd.f32 %v5954_v30, %v5737_v1  ;;  %v6175_v35 = vpop.f32.mrf.mxu1  ;;  %v10443_v30 = vrot.slane %v15124_v9, 9  ;;  %v15197_v9 = vld [vmem:[%s14184_s16 + $0xb8] sm:$0xf]  ;;  %v7385_v22 = vunpack.c.l.b16 %v7291_v16 }
 0x55d   : > { %v6745_v32 = vsel %vm11429_vm3, %v6740_v34, %v6744_v58  ;;  %v6761_v47 = vshrl.u32 %v15197_v9, 16  ;;  %v6764_v18 = vshll.u32 %v15197_v9, 16  ;;  %v15208_v34 = vld [vmem:[%s14184_s16 + $0xc0] sm:$0xf] }
 0x55e   : > { %v6209_v59 = vadd.f32 %v6172_v39, %v5991_v27  ;;  %7114 = vmatmul.bf16.gmra.mxu3 %v15169_v25  ;;  %7524 = vmatmul.bf16.gmra.mxu0 %v15175_v31  ;;  %v6731_v39 = vsel %vm11429_vm3, %v6726_v54, %v6730_v29  ;;  %v15203_v54 = vsel %vm11461_vm5, %v10443_v30, %v7294_v13  ;;  %v6775_v11 = vshrl.u32 %v15208_v34, 16 }
 0x55f   : > { %7750 = vmatmul.bf16.gmra.mxu1 %v7634_v7  ;;  %16851 = vst [vmem:[#allocation35_spill] sm:$0xff] %v15203_v54  ;;  %v6778_v1 = vshll.u32 %v15208_v34, 16  ;;  %v16226_v7 = vunpack.c.l.b16 %v15203_v54  ;;  %v6763_v27 = vrot.slane %v6761_v47, 4  ;;  %v6770_v47 = vshll.u32 %v618_v6, 16 }
 0x560   : > { %8028 = vmatmul.bf16.gmra.mxu2 %v7912_v57  ;;  %v15187_v14 = vadd.f32 %v6454_v46, %v6209_v59  ;;  %v6975_v46 = vunpack.c.l.b16 %v6731_v39  ;;  %v6976_v57 = vunpack.c.l.b16 %v6745_v32  ;;  %v6766_v59 = vrot.slane %v6764_v18, 5 }
 0x561   : > { %v5703_v42 = vpop.f32.mrf.mxu3  ;;  %v6777_v30 = vrot.slane %v6775_v11, 4  ;;  %v6780_v13 = vrot.slane %v6778_v1, 5 }
 0x562   : > { %16850 = vst [vmem:[#allocation38_spill] sm:$0xff] %v15187_v14  ;;  %v5738_v12 = vadd.f32 %v5703_v42, %v14464_v50  ;;  %v6759_v50 = vsel %vm11429_vm3, %v6754_v61, %v6758_v40  ;;  %v6999_v40 = vpack.c.b16 %v6976_v57, %v6975_v46  ;;  %v15219_v42 = vld [vmem:[%s14184_s16 + $0xc4] sm:$0x1]  ;;  %v6767_v16 = vor.u32 %v6766_v59, %v6763_v27 }
 0x563   : > { %v6457_v10 = vpop.f32.mrf.mxu2  ;;  %v5959_v4 = vpop.f32.mrf.mxu0  ;;  %v6781_v43 = vor.u32 %v6780_v13, %v6777_v30  ;;  %v6784_v23 = vshll.u32 %v15219_v42, 16  ;;  %v6772_v27 = vrot.slane %v6770_v47, 5  ;;  %v7298_v59 = vrot.slane %v15165_v55, 5  ;;  %v16859_v55 = vld [vmem:[#allocation13_spill] sm:$0xff] }
 0x564   : > { %v5992_v29 = vadd.f32 %v5957_v2, %v5738_v12  ;;  %v6177_v58 = vpop.f32.mrf.mxu1  ;;  %v15213_v2 = vunpack.c.l.b16 %v6759_v50  ;;  %v16853_v12 = vld [vmem:[#allocation16_spill] sm:$0xff]  ;;  %v16854_v50 = vld [vmem:[#allocation37_spill] sm:$0xff] }
 0x565   : > { %v6782_v30 = vrot.slane %v6781_v43, 4  ;;  %v6786_v13 = vrot.slane %v6784_v23, 5 }
 0x566   : > { %v6210_v36 = vadd.f32 %v6175_v35, %v5992_v29  ;;  %v7409_v35 = vpack.c.b16 %v16226_v7, %v7385_v22  ;;  %v7913_v29 = vpack.c.b16 %v15213_v2, %v6976_v57  ;;  %v6768_v22 = vrot.slane %v6767_v16, 4  ;;  %v16868_v7 = vld [vmem:[#allocation21_spill] sm:$0xff] }
 0x567   : > { %v10444_v57 = vrot.slane %v15142_v21, 9 }
 0x568   : > { %v15216_v8 = vadd.f32 %v6457_v10, %v6210_v36  ;;  %v16855_v10 = vunpack.c.l.b16 %v16854_v50  ;;  %v16856_v36 = vld [vmem:[#allocation15_spill] sm:$0xff]  ;;  %v7302_v50 = vrot.slane %v618_v6, 5  ;;  %v6773_v23 = vsel %vm11429_vm3, %v6768_v22, %v6772_v27 }
 0x569   : > { %v5705_v61 = vpop.f32.mrf.mxu3  ;;  %v16857_v11 = vunpack.c.l.b16 %v16856_v36  ;;  %v15248_v43 = vsel %vm11461_vm5, %v10444_v57, %v7298_v59  ;;  %v6978_v27 = vunpack.c.l.b16 %v6773_v23 }
 0x56a   : > { %16852 = vst [vmem:[#allocation52_spill] sm:$0xff] %v15216_v8  ;;  %v5739_v39 = vadd.f32 %v5705_v61, %v16853_v12  ;;  %v10445_v12 = vrot.slane %v15197_v9, 9  ;;  %v16230_v57 = vunpack.c.l.b16 %v15248_v43 }
 0x56b   : > { %v6459_v32 = vpop.f32.mrf.mxu2  ;;  %v7490_v18 = vpop.f32.mrf.mxu0  ;;  %v7635_v1 = vpack.c.b16 %v16857_v11, %v16855_v10  ;;  %16860 = vst [vmem:[#allocation50_spill] sm:$0xff] %v15248_v43  ;;  %v15257_v10 = vld [vmem:[%s14184_s16 + $0xd0] sm:$0xf] }
 0x56c   : > { %v5993_v8 = vadd.f32 %v5959_v4, %v5739_v39  ;;  %v7716_v46 = vpop.f32.mrf.mxu1  ;;  %v6803_v36 = vshrl.u32 %v15257_v10, 16  ;;  %v6806_v11 = vshll.u32 %v15257_v10, 16 }
 0x56e   : > { %v6211_v61 = vadd.f32 %v6177_v58, %v5993_v8  ;;  %7119 = vmatmul.bf16.gmra.mxu3 %v6999_v40  ;;  %7529 = vmatmul.bf16.gmra.mxu0 %v7409_v35  ;;  %v10990_v58 = vld [vmem:[%s15935_s3 + $0x5d0] sm:$0xff]  ;;  %v15239_v40 = vld [vmem:[%s14184_s16 + $0xc8] sm:$0xf] }
 0x56f   : > { %7755 = vmatmul.bf16.gmra.mxu1 %v7635_v1  ;;  %v6789_v39 = vshrl.u32 %v15239_v40, 16  ;;  %v6792_v21 = vshll.u32 %v15239_v40, 16  ;;  %8232 = vmatpush.bf16.msra.mxu3 %v10990_v58  ;;  %v11014_v58 = vld [vmem:[%s15935_s3 + $0x690] sm:$0xff] }
 0x570   : > { %8033 = vmatmul.bf16.gmra.mxu2 %v7913_v29  ;;  %v15233_v4 = vadd.f32 %v6459_v32, %v6211_v61  ;;  %v15252_v32 = vsel %vm11461_vm5, %v10445_v12, %v7302_v50  ;;  %v6787_v29 = vsel %vm11429_vm3, %v6782_v30, %v6786_v13  ;;  %v6805_v30 = vrot.slane %v6803_v36, 4 }
 0x571   : > { %v7080_v8 = vpop.f32.mrf.mxu3  ;;  %16861 = vst [vmem:[#allocation31_spill] sm:$0xff] %v15252_v32  ;;  %v6791_v1 = vrot.slane %v6789_v39, 4  ;;  %v6794_v61 = vrot.slane %v6792_v21, 5  ;;  %v16229_v59 = vunpack.c.l.b16 %v15252_v32  ;;  %v15264_v12 = vunpack.c.l.b16 %v6787_v29  ;;  %8906 = vmatpush.bf16.msra.mxu2 %v11014_v58 }
 0x572   : > { %16858 = vst [vmem:[#allocation42_spill] sm:$0xff] %v15233_v4  ;;  %v7160_v35 = vadd.f32 %v7080_v8, %v16859_v55  ;;  %v6808_v13 = vrot.slane %v6806_v11, 5  ;;  %v11006_v8 = vld [vmem:[%s15935_s3 + $0x650] sm:$0xff]  ;;  %v15282_v29 = vpack.c.b16 %v6978_v27, %v15213_v2 }
 0x573   : > { %v7994_v9 = vpop.f32.mrf.mxu2  ;;  %v7492_v6 = vpop.f32.mrf.mxu0  ;;  %v6795_v21 = vor.u32 %v6794_v61, %v6791_v1  ;;  %v15288_v36 = vpack.c.b16 %v16229_v59, %v16230_v57  ;;  %v7914_v1 = vpack.c.b16 %v15264_v12, %v6978_v27  ;;  %v16866_v61 = vld [vmem:[#allocation46_spill] sm:$0xff]  ;;  %8688 = vmatpush.bf16.msra.mxu1 %v11006_v8  ;;  %v10446_v27 = vrot.slane %v15208_v34, 9 }
 0x574   : > { %v7570_v16 = vadd.f32 %v7490_v18, %v7160_v35  ;;  %v7718_v47 = vpop.f32.mrf.mxu1  ;;  %v622_v18 = vld [vmem:[%s14184_s16 + $0xcc] sm:$0x1]  ;;  %v15278_v35 = vld [vmem:[%s14184_s16 + $0xd4] sm:$0x1]  ;;  %16864 = vst [vmem:[#allocation61_spill] sm:$0xff] %v15282_v29  ;;  %v6809_v54 = vor.u32 %v6808_v13, %v6805_v30 }
 0x575   : > { %v6798_v55 = vshll.u32 %v622_v18, 16  ;;  %16865 = vst [vmem:[#allocation51_spill] sm:$0xff] %v15288_v36  ;;  %v6812_v43 = vshll.u32 %v15278_v35, 16  ;;  %v6796_v4 = vrot.slane %v6795_v21, 4  ;;  %v15306_v8 = vld [vmem:[%s14184_s16 + $0xe0] sm:$0xf] }
 0x576   : > { %v7796_v22 = vadd.f32 %v7716_v46, %v7570_v16  ;;  %v10998_v46 = vld [vmem:[%s15935_s3 + $0x610] sm:$0xff]  ;;  %v6810_v13 = vrot.slane %v6809_v54, 4  ;;  %16871 = vst [vmem:[#allocation11_spill] sm:$0xff] %v15306_v8  ;;  %v16872_v21 = vld [vmem:[#allocation73_spill] sm:$0xff] }
 0x577   : > { %8434 = vmatpush.bf16.msra.mxu0 %v10998_v46  ;;  %v6800_v59 = vrot.slane %v6798_v55, 5  ;;  %v6814_v58 = vrot.slane %v6812_v43, 5 }
 0x578   : > { %v15266_v50 = vadd.f32 %v7994_v9, %v7796_v22  ;;  %v16863_v9 = vld [vmem:[#allocation80_spill] sm:$0xff]  ;;  %v16867_v22 = vunpack.c.l.b16 %v16866_v61 }
 0x579   : > { %v7082_v39 = vpop.f32.mrf.mxu3 }
 0x57a   : > { %16862 = vst [vmem:[#allocation71_spill] sm:$0xff] %v15266_v50  ;;  %v7161_v23 = vadd.f32 %v7082_v39, %v16863_v9  ;;  %v16869_v50 = vunpack.c.l.b16 %v16868_v7  ;;  %v7306_v7 = vrot.slane %v15219_v42, 5 }
 0x57b   : > { %v7996_v16 = vpop.f32.mrf.mxu2  ;;  %v7495_v11 = vpop.f32.mrf.mxu0 }
 0x57c   : > { %v7636_v39 = vpack.c.b16 %v16869_v50, %v16867_v22  ;;  %v7571_v9 = vadd.f32 %v7492_v6, %v7161_v23  ;;  %v7721_v2 = vpop.f32.mrf.mxu1  ;;  %v10447_v6 = vrot.slane %v15239_v40, 9  ;;  %v7310_v50 = vrot.slane %v622_v18, 5  ;;  %v15314_v23 = vld [vmem:[%s14184_s16 + $0xd8] sm:$0xf] }
 0x57d   : > { %v15311_v42 = vsel %vm11461_vm5, %v10446_v27, %v7306_v7  ;;  %v6817_v40 = vshrl.u32 %v15314_v23, 16  ;;  %v6820_v54 = vshll.u32 %v15314_v23, 16  ;;  %v6815_v18 = vsel %vm11429_vm3, %v6810_v13, %v6814_v58 }
 0x57e   : > { %v7797_v57 = vadd.f32 %v7718_v47, %v7571_v9  ;;  %7124 = vmatmul.bf16.gmra.mxu3 %v15282_v29  ;;  %7534 = vmatmul.bf16.gmra.mxu0 %v15288_v36  ;;  %v6801_v47 = vsel %vm11429_vm3, %v6796_v4, %v6800_v59  ;;  %16873 = vst [vmem:[#allocation83_spill] sm:$0xff] %v15311_v42 }
 0x57f   : > { %7760 = vmatmul.bf16.gmra.mxu1 %v7636_v39  ;;  %v15320_v4 = vsel %vm11461_vm5, %v10447_v6, %v7310_v50  ;;  %v6980_v61 = vunpack.c.l.b16 %v6801_v47  ;;  %v6819_v27 = vrot.slane %v6817_v40, 4  ;;  %v6822_v7 = vrot.slane %v6820_v54, 5  ;;  %v16877_v47 = vld [vmem:[#allocation19_spill] sm:$0xff] }
 0x580   : > { %8038 = vmatmul.bf16.gmra.mxu2 %v7914_v1  ;;  %v15301_v30 = vadd.f32 %v7996_v16, %v7797_v57  ;;  %16874 = vst [vmem:[#allocation44_spill] sm:$0xff] %v15320_v4  ;;  %v7857_v16 = vshrl.u32 %v15306_v8, 16  ;;  %v7860_v1 = vshll.u32 %v15306_v8, 16  ;;  %v16234_v9 = vunpack.c.l.b16 %v15320_v4 }
 0x581   : > { %v7085_v46 = vpop.f32.mrf.mxu3  ;;  %v15328_v6 = vunpack.c.l.b16 %v6815_v18  ;;  %v6823_v54 = vor.u32 %v6822_v7, %v6819_v27 }
 0x582   : > { %16870 = vst [vmem:[#allocation58_spill] sm:$0xff] %v15301_v30  ;;  %v7162_v55 = vadd.f32 %v7085_v46, %v16872_v21  ;;  %v7859_v46 = vrot.slane %v7857_v16, 4  ;;  %v7862_v13 = vrot.slane %v7860_v1, 5  ;;  %v15334_v21 = vpack.c.b16 %v6980_v61, %v15264_v12  ;;  %v16880_v16 = vld [vmem:[#allocation8_spill] sm:$0xff] }
 0x583   : > { %v7999_v34 = vpop.f32.mrf.mxu2  ;;  %v7497_v43 = vpop.f32.mrf.mxu0  ;;  %v7915_v18 = vpack.c.b16 %v15328_v6, %v6980_v61  ;;  %v16881_v1 = vunpack.c.l.b16 %v16880_v16  ;;  %v6824_v27 = vrot.slane %v6823_v54, 4  ;;  %v10448_v61 = vrot.slane %v15257_v10, 9  ;;  %v15360_v54 = vld [vmem:[%s14184_s16 + $0xf0] sm:$0xf] }
 0x584   : > { %v7572_v57 = vadd.f32 %v7495_v11, %v7162_v55  ;;  %v7723_v59 = vpop.f32.mrf.mxu1  ;;  %v626_v11 = vld [vmem:[%s14184_s16 + $0xdc] sm:$0x1]  ;;  %16876 = vst [vmem:[#allocation68_spill] sm:$0xff] %v15334_v21  ;;  %v628_v55 = vld [vmem:[%s14184_s16 + $0xe4] sm:$0x1]  ;;  %v6834_v10 = vshll.u32 %v15360_v54, 16 }
 0x586   : > { %v7798_v39 = vadd.f32 %v7721_v2, %v7572_v57  ;;  %v16878_v2 = vunpack.c.l.b16 %v15311_v42  ;;  %v6826_v57 = vshll.u32 %v626_v11, 16  ;;  %v16894_v42 = vunpack.c.l.b16 %v15306_v8 }
 0x588   : > { %v15331_v50 = vadd.f32 %v7999_v34, %v7798_v39  ;;  %v15342_v40 = vpack.c.b16 %v16234_v9, %v16878_v2  ;;  %v16882_v39 = vld [vmem:[#allocation17_spill] sm:$0xff]  ;;  %v6828_v7 = vrot.slane %v6826_v57, 5  ;;  %v7314_v2 = vrot.slane %v15278_v35, 5 }
 0x589   : > { %v7087_v58 = vpop.f32.mrf.mxu3  ;;  %v16883_v12 = vunpack.c.l.b16 %v16882_v39  ;;  %v15365_v35 = vld [vmem:[%s14184_s16 + $0xf8] sm:$0xf] }
 0x58a   : > { %16875 = vst [vmem:[#allocation36_spill] sm:$0xff] %v15331_v50  ;;  %v7163_v32 = vadd.f32 %v7087_v58, %v16877_v47  ;;  %v7863_v58 = vor.u32 %v7862_v13, %v7859_v46  ;;  %v7866_v47 = vshll.u32 %v628_v55, 16  ;;  %v10989_v13 = vld [vmem:[%s15935_s3 + $0x5c8] sm:$0xff]  ;;  %v6829_v16 = vsel %vm11429_vm3, %v6824_v27, %v6828_v7 }
 0x58b   : > { %v8001_v22 = vpop.f32.mrf.mxu2  ;;  %16879 = vst [vmem:[#allocation75_spill] sm:$0xff] %v15342_v40  ;;  %v7500_v34 = vpop.f32.mrf.mxu0  ;;  %v7637_v50 = vpack.c.b16 %v16883_v12, %v16881_v1  ;;  %8233 = vmatpush.bf16.msra.mxu3 %v10989_v13  ;;  %v15374_v1 = vsel %vm11461_vm5, %v10448_v61, %v7314_v2  ;;  %v15383_v13 = vld [vmem:[%s14184_s16 + $0x100] sm:$0xf]  ;;  %v6836_v61 = vrot.slane %v6834_v10, 5  ;;  %v6982_v4 = vunpack.c.l.b16 %v6829_v16  ;;  %v10997_v10 = vld [vmem:[%s15935_s3 + $0x608] sm:$0xff] }
 0x58c   : > { %v7573_v30 = vadd.f32 %v7497_v43, %v7163_v32  ;;  %v7726_v29 = vpop.f32.mrf.mxu1  ;;  %v10449_v32 = vrot.slane %v15314_v23, 9  ;;  %v7318_v43 = vrot.slane %v626_v11, 5  ;;  %v6845_v23 = vshrl.u32 %v15365_v35, 16  ;;  %16886 = vst [vmem:[#allocation76_spill] sm:$0xff] %v15374_v1  ;;  %8435 = vmatpush.bf16.msra.mxu0 %v10997_v10 }
 0x58d   : > { %v6862_v27 = vshll.u32 %v15383_v13, 16 }
 0x58e   : > { %v7799_v36 = vadd.f32 %v7723_v59, %v7573_v30  ;;  %7129 = vmatmul.bf16.gmra.mxu3 %v15334_v21  ;;  %7539 = vmatmul.bf16.gmra.mxu0 %v15342_v40  ;;  %v7864_v30 = vrot.slane %v7863_v58, 4  ;;  %v7868_v59 = vrot.slane %v7866_v47, 5  ;;  %v15378_v39 = vsel %vm11461_vm5, %v10449_v32, %v7318_v43  ;;  %v632_v43 = vld [vmem:[%s14184_s16 + $0xf4] sm:$0x1] }
 0x58f   : > { %7765 = vmatmul.bf16.gmra.mxu1 %v7637_v50  ;;  %v6831_v50 = vshrl.u32 %v15360_v54, 16  ;;  %16887 = vst [vmem:[#allocation66_spill] sm:$0xff] %v15378_v39  ;;  %v6847_v2 = vrot.slane %v6845_v23, 4  ;;  %v16242_v32 = vunpack.c.l.b16 %v15374_v1  ;;  %v11005_v23 = vld [vmem:[%s15935_s3 + $0x648] sm:$0xff]  ;;  %v7322_v10 = vrot.slane %v632_v43, 5 }
 0x590   : > { %8043 = vmatmul.bf16.gmra.mxu2 %v7915_v18  ;;  %v15354_v46 = vadd.f32 %v8001_v22, %v7799_v36  ;;  %v6848_v36 = vshll.u32 %v15365_v35, 16  ;;  %v16885_v22 = vld [vmem:[#allocation84_spill] sm:$0xff]  ;;  %v7869_v47 = vsel %vm11429_vm3, %v7864_v30, %v7868_v59  ;;  %8689 = vmatpush.bf16.msra.mxu1 %v11005_v23 }
 0x591   : > { %v7090_v55 = vpop.f32.mrf.mxu3  ;;  %v6833_v7 = vrot.slane %v6831_v50, 4  ;;  %v15391_v30 = vunpack.c.l.b16 %v7869_v47  ;;  %v6864_v50 = vrot.slane %v6862_v27, 5 }
 0x592   : > { %16884 = vst [vmem:[#allocation53_spill] sm:$0xff] %v15354_v46  ;;  %v7164_v11 = vadd.f32 %v7090_v55, %v16885_v22  ;;  %v6859_v55 = vshrl.u32 %v15383_v13, 16  ;;  %v6850_v22 = vrot.slane %v6848_v36, 5 }
 0x593   : > { %v8004_v57 = vpop.f32.mrf.mxu2  ;;  %v7502_v18 = vpop.f32.mrf.mxu0  ;;  %16888 = vst [vmem:[#allocation3_spill] sm:$0xff] %v15391_v30  ;;  %v6837_v16 = vor.u32 %v6836_v61, %v6833_v7  ;;  %v7916_v61 = vpack.c.b16 %v15391_v30, %v6982_v4  ;;  %v16899_v30 = vld [vmem:[#allocation45_spill] sm:$0xff] }
 0x594   : > { %v7574_v12 = vadd.f32 %v7500_v34, %v7164_v11  ;;  %v7728_v58 = vpop.f32.mrf.mxu1  ;;  %v634_v11 = vld [vmem:[%s14184_s16 + $0xfc] sm:$0x1]  ;;  %v6861_v21 = vrot.slane %v6859_v55, 4  ;;  %v6851_v47 = vor.u32 %v6850_v22, %v6847_v2  ;;  %v15410_v34 = vpack.c.b16 %v6982_v4, %v15328_v6  ;;  %v16892_v2 = vld [vmem:[#allocation10_spill] sm:$0xff] }
 0x595   : > { %v16890_v55 = vld [vmem:[#allocation33_spill] sm:$0xff]  ;;  %v16893_v22 = vunpack.c.l.b16 %v16892_v2  ;;  %v6838_v25 = vrot.slane %v6837_v16, 4  ;;  %v10450_v4 = vrot.slane %v15360_v54, 9 }
 0x596   : > { %v7800_v9 = vadd.f32 %v7726_v29, %v7574_v12  ;;  %v11013_v29 = vld [vmem:[%s15935_s3 + $0x688] sm:$0xff]  ;;  %v6840_v12 = vshll.u32 %v632_v43, 16  ;;  %v6865_v14 = vor.u32 %v6864_v50, %v6861_v21  ;;  %v7326_v21 = vrot.slane %v634_v11, 5 }
 0x597   : > { %8907 = vmatpush.bf16.msra.mxu2 %v11013_v29 }
 0x598   : > { %v15394_v46 = vadd.f32 %v8004_v57, %v7800_v9  ;;  %v6854_v9 = vshll.u32 %v634_v11, 16  ;;  %v15406_v57 = vld [vmem:[%s14184_s16 + $0x104] sm:$0x1]  ;;  %v6866_v50 = vrot.slane %v6865_v14, 4 }
 0x599   : > { %v7092_v36 = vpop.f32.mrf.mxu3  ;;  %v6868_v1 = vshll.u32 %v15406_v57, 16 }
 0x59a   : > { %16889 = vst [vmem:[#allocation69_spill] sm:$0xff] %v15394_v46  ;;  %v7165_v27 = vadd.f32 %v7092_v36, %v16890_v55  ;;  %v16891_v46 = vunpack.c.l.b16 %v15378_v39  ;;  %v7638_v36 = vpack.c.b16 %v16894_v42, %v16893_v22  ;;  %v6842_v39 = vrot.slane %v6840_v12, 5 }
 0x59b   : > { %v8006_v59 = vpop.f32.mrf.mxu2  ;;  %v7505_v7 = vpop.f32.mrf.mxu0  ;;  %v10451_v42 = vrot.slane %v15365_v35, 9  ;;  %v6870_v23 = vrot.slane %v6868_v1, 5  ;;  %v15438_v35 = vld [vmem:[%s14184_s16 + $0x108] sm:$0xf] }
 0x59c   : > { %v15416_v40 = vpack.c.b16 %v16891_v46, %v16242_v32  ;;  %v7575_v55 = vadd.f32 %v7502_v18, %v7165_v27  ;;  %v7731_v6 = vpop.f32.mrf.mxu1  ;;  %v6852_v46 = vrot.slane %v6851_v47, 4  ;;  %v6856_v32 = vrot.slane %v6854_v9, 5  ;;  %v16896_v47 = vld [vmem:[#allocation25_spill] sm:$0xff]  ;;  %v15449_v27 = vld [vmem:[%s14184_s16 + $0x110] sm:$0xf] }
 0x59d   : > { %v7323_v9 = vsel %vm11461_vm5, %v10450_v4, %v7322_v10  ;;  %v6873_v11 = vshrl.u32 %v15438_v35, 16  ;;  %v6876_v14 = vshll.u32 %v15438_v35, 16  ;;  %v6890_v2 = vshll.u32 %v15449_v27, 16 }
 0x59e   : > { %v7801_v29 = vadd.f32 %v7728_v58, %v7575_v55  ;;  %7134 = vmatmul.bf16.gmra.mxu3 %v15410_v34  ;;  %7544 = vmatmul.bf16.gmra.mxu0 %v15416_v40  ;;  %v6843_v58 = vsel %vm11429_vm3, %v6838_v25, %v6842_v39  ;;  %v6857_v12 = vsel %vm11429_vm3, %v6852_v46, %v6856_v32  ;;  %v7393_v55 = vunpack.c.l.b16 %v7323_v9 }
 0x59f   : > { %7770 = vmatmul.bf16.gmra.mxu1 %v7638_v36  ;;  %v15444_v25 = vsel %vm11461_vm5, %v10451_v42, %v7326_v21  ;;  %v6983_v22 = vunpack.c.l.b16 %v6843_v58  ;;  %v6984_v36 = vunpack.c.l.b16 %v6857_v12  ;;  %v6875_v4 = vrot.slane %v6873_v11, 4  ;;  %v638_v42 = vld [vmem:[%s14184_s16 + $0x10c] sm:$0x1] }
 0x5a0   : > { %8048 = vmatmul.bf16.gmra.mxu2 %v7916_v61  ;;  %v15428_v18 = vadd.f32 %v8006_v59, %v7801_v29  ;;  %16897 = vst [vmem:[#allocation59_spill] sm:$0xff] %v15444_v25  ;;  %v6871_v59 = vsel %vm11429_vm3, %v6866_v50, %v6870_v23  ;;  %v6887_v61 = vshrl.u32 %v15449_v27, 16  ;;  %v16245_v29 = vunpack.c.l.b16 %v15444_v25 }
 0x5a1   : > { %v7095_v16 = vpop.f32.mrf.mxu3  ;;  %v6878_v10 = vrot.slane %v6876_v14, 5  ;;  %v6892_v23 = vrot.slane %v6890_v2, 5  ;;  %v6882_v11 = vshll.u32 %v638_v42, 16 }
 0x5a2   : > { %16895 = vst [vmem:[#allocation62_spill] sm:$0xff] %v15428_v18  ;;  %v7166_v54 = vadd.f32 %v7095_v16, %v16896_v47  ;;  %v6889_v50 = vrot.slane %v6887_v61, 4  ;;  %v7003_v47 = vpack.c.b16 %v6984_v36, %v6983_v22 }
 0x5a3   : > { %v8009_v43 = vpop.f32.mrf.mxu2  ;;  %v7507_v1 = vpop.f32.mrf.mxu0  ;;  %v6879_v9 = vor.u32 %v6878_v10, %v6875_v4  ;;  %v6884_v4 = vrot.slane %v6882_v11, 5  ;;  %v7330_v10 = vrot.slane %v15406_v57, 5  ;;  %v16905_v57 = vld [vmem:[#allocation77_spill] sm:$0xff] }
 0x5a4   : > { %v7576_v39 = vadd.f32 %v7505_v7, %v7166_v54  ;;  %v7733_v32 = vpop.f32.mrf.mxu1  ;;  %v15454_v7 = vunpack.c.l.b16 %v6871_v59  ;;  %v15460_v54 = vld [vmem:[%s14184_s16 + $0x114] sm:$0x1]  ;;  %v16900_v59 = vld [vmem:[#allocation85_spill] sm:$0xff]  ;;  %v6893_v8 = vor.u32 %v6892_v23, %v6889_v50 }
 0x5a5   : > { %v6896_v18 = vshll.u32 %v15460_v54, 16 }
 0x5a6   : > { %v7802_v46 = vadd.f32 %v7731_v6, %v7576_v39  ;;  %v7413_v6 = vpack.c.b16 %v16245_v29, %v7393_v55  ;;  %v7917_v39 = vpack.c.b16 %v15454_v7, %v6984_v36  ;;  %v6880_v55 = vrot.slane %v6879_v9, 4  ;;  %v16913_v29 = vld [vmem:[#allocation81_spill] sm:$0xff] }
 0x5a7   : > { %v10452_v36 = vrot.slane %v15383_v13, 9  ;;  %v6894_v50 = vrot.slane %v6893_v8, 4  ;;  %v6898_v23 = vrot.slane %v6896_v18, 5 }
 0x5a8   : > { %v15457_v21 = vadd.f32 %v8009_v43, %v7802_v46  ;;  %v16901_v43 = vunpack.c.l.b16 %v16900_v59  ;;  %v16902_v46 = vld [vmem:[#allocation57_spill] sm:$0xff]  ;;  %v7334_v59 = vrot.slane %v638_v42, 5  ;;  %v6885_v8 = vsel %vm11429_vm3, %v6880_v55, %v6884_v4 }
 0x5a9   : > { %v7097_v16 = vpop.f32.mrf.mxu3  ;;  %v16903_v61 = vunpack.c.l.b16 %v16902_v46  ;;  %v15489_v18 = vsel %vm11461_vm5, %v10452_v36, %v7330_v10  ;;  %v6986_v4 = vunpack.c.l.b16 %v6885_v8 }
 0x5aa   : > { %16898 = vst [vmem:[#allocation16_spill] sm:$0xff] %v15457_v21  ;;  %v7167_v58 = vadd.f32 %v7097_v16, %v16899_v30  ;;  %v10453_v16 = vrot.slane %v15438_v35, 9  ;;  %v16249_v36 = vunpack.c.l.b16 %v15489_v18 }
 0x5ab   : > { %v8011_v12 = vpop.f32.mrf.mxu2  ;;  %v7510_v14 = vpop.f32.mrf.mxu0  ;;  %v7639_v2 = vpack.c.b16 %v16903_v61, %v16901_v43  ;;  %16906 = vst [vmem:[#allocation15_spill] sm:$0xff] %v15489_v18  ;;  %v15498_v43 = vld [vmem:[%s14184_s16 + $0x120] sm:$0xf] }
 0x5ac   : > { %v7577_v21 = vadd.f32 %v7507_v1, %v7167_v58  ;;  %v7736_v22 = vpop.f32.mrf.mxu1  ;;  %v6915_v46 = vshrl.u32 %v15498_v43, 16  ;;  %v6918_v61 = vshll.u32 %v15498_v43, 16 }
 0x5ae   : > { %v7803_v30 = vadd.f32 %v7733_v32, %v7577_v21  ;;  %7139 = vmatmul.bf16.gmra.mxu3 %v7003_v47  ;;  %7549 = vmatmul.bf16.gmra.mxu0 %v7413_v6  ;;  %v10988_v32 = vld [vmem:[%s15935_s3 + $0x5c0] sm:$0xff]  ;;  %v15480_v47 = vld [vmem:[%s14184_s16 + $0x118] sm:$0xf] }
 0x5af   : > { %7775 = vmatmul.bf16.gmra.mxu1 %v7639_v2  ;;  %v6901_v58 = vshrl.u32 %v15480_v47, 16  ;;  %v6904_v13 = vshll.u32 %v15480_v47, 16  ;;  %8234 = vmatpush.bf16.msra.mxu3 %v10988_v32  ;;  %v11012_v32 = vld [vmem:[%s15935_s3 + $0x680] sm:$0xff] }
 0x5b0   : > { %8053 = vmatmul.bf16.gmra.mxu2 %v7917_v39  ;;  %v15474_v1 = vadd.f32 %v8011_v12, %v7803_v30  ;;  %v15493_v12 = vsel %vm11461_vm5, %v10453_v16, %v7334_v59  ;;  %v6899_v39 = vsel %vm11429_vm3, %v6894_v50, %v6898_v23  ;;  %v6917_v50 = vrot.slane %v6915_v46, 4 }
 0x5b1   : > { %v7100_v21 = vpop.f32.mrf.mxu3  ;;  %16907 = vst [vmem:[#allocation13_spill] sm:$0xff] %v15493_v12  ;;  %v6903_v2 = vrot.slane %v6901_v58, 4  ;;  %v6906_v30 = vrot.slane %v6904_v13, 5  ;;  %v16248_v10 = vunpack.c.l.b16 %v15493_v12  ;;  %v15505_v16 = vunpack.c.l.b16 %v6899_v39  ;;  %8908 = vmatpush.bf16.msra.mxu2 %v11012_v32 }
 0x5b2   : > { %16904 = vst [vmem:[#allocation37_spill] sm:$0xff] %v15474_v1  ;;  %v7168_v6 = vadd.f32 %v7100_v21, %v16905_v57  ;;  %v6920_v23 = vrot.slane %v6918_v61, 5  ;;  %v11004_v21 = vld [vmem:[%s15935_s3 + $0x640] sm:$0xff]  ;;  %v15523_v39 = vpack.c.b16 %v6986_v4, %v15454_v7 }
 0x5b3   : > { %v8014_v35 = vpop.f32.mrf.mxu2  ;;  %v7512_v42 = vpop.f32.mrf.mxu0  ;;  %v6907_v13 = vor.u32 %v6906_v30, %v6903_v2  ;;  %v15529_v46 = vpack.c.b16 %v16248_v10, %v16249_v36  ;;  %v7918_v2 = vpack.c.b16 %v15505_v16, %v6986_v4  ;;  %v16911_v30 = vld [vmem:[#allocation67_spill] sm:$0xff]  ;;  %8690 = vmatpush.bf16.msra.mxu1 %v11004_v21  ;;  %v10454_v4 = vrot.slane %v15449_v27, 9  ;;  %v15547_v21 = vld [vmem:[%s14184_s16 + $0x130] sm:$0xf] }
 0x5b4   : > { %v7578_v9 = vadd.f32 %v7510_v14, %v7168_v6  ;;  %v7738_v11 = vpop.f32.mrf.mxu1  ;;  %v642_v14 = vld [vmem:[%s14184_s16 + $0x11c] sm:$0x1]  ;;  %v15519_v6 = vld [vmem:[%s14184_s16 + $0x124] sm:$0x1]  ;;  %16910 = vst [vmem:[#allocation46_spill] sm:$0xff] %v15523_v39  ;;  %v6921_v25 = vor.u32 %v6920_v23, %v6917_v50  ;;  %v17021_v41 = vunpack.c.l.b16 %v15547_v21 }
 0x5b5   : > { %v6910_v57 = vshll.u32 %v642_v14, 16  ;;  %v6924_v18 = vshll.u32 %v15519_v6, 16  ;;  %v6908_v1 = vrot.slane %v6907_v13, 4  ;;  %v16916_v13 = vld [vmem:[#allocation79_spill] sm:$0xff] }
 0x5b6   : > { %v7804_v55 = vadd.f32 %v7736_v22, %v7578_v9  ;;  %v10996_v22 = vld [vmem:[%s15935_s3 + $0x600] sm:$0xff]  ;;  %v6922_v23 = vrot.slane %v6921_v25, 4 }
 0x5b7   : > { %8436 = vmatpush.bf16.msra.mxu0 %v10996_v22  ;;  %v6912_v10 = vrot.slane %v6910_v57, 5  ;;  %v6926_v32 = vrot.slane %v6924_v18, 5 }
 0x5b8   : > { %v15507_v59 = vadd.f32 %v8014_v35, %v7804_v55  ;;  %v16909_v35 = vld [vmem:[#allocation27_spill] sm:$0xff]  ;;  %v16912_v55 = vunpack.c.l.b16 %v16911_v30 }
 0x5b9   : > { %v7102_v58 = vpop.f32.mrf.mxu3 }
 0x5ba   : > { %16908 = vst [vmem:[#allocation80_spill] sm:$0xff] %v15507_v59  ;;  %v7169_v8 = vadd.f32 %v7102_v58, %v16909_v35  ;;  %v16914_v59 = vunpack.c.l.b16 %v16913_v29  ;;  %v7338_v29 = vrot.slane %v15460_v54, 5 }
 0x5bb   : > { %v8016_v9 = vpop.f32.mrf.mxu2  ;;  %v7515_v61 = vpop.f32.mrf.mxu0 }
 0x5bc   : > { %v7640_v58 = vpack.c.b16 %v16914_v59, %v16912_v55  ;;  %v7579_v35 = vadd.f32 %v7512_v42, %v7169_v8  ;;  %v7741_v7 = vpop.f32.mrf.mxu1  ;;  %v10455_v42 = vrot.slane %v15480_v47, 9  ;;  %v7342_v59 = vrot.slane %v642_v14, 5  ;;  %v11194_v8 = vld [vmem:[%s14184_s16 + $0x128] sm:$0xf] }
 0x5bd   : > { %v15552_v54 = vsel %vm11461_vm5, %v10454_v4, %v7338_v29  ;;  %v6929_v47 = vshrl.u32 %v11194_v8, 16 }
 0x5be   : > { %v7805_v36 = vadd.f32 %v7738_v11, %v7579_v35  ;;  %7144 = vmatmul.bf16.gmra.mxu3 %v15523_v39  ;;  %7554 = vmatmul.bf16.gmra.mxu0 %v15529_v46  ;;  %v6913_v11 = vsel %vm11429_vm3, %v6908_v1, %v6912_v10  ;;  %v15557_v25 = vsel %vm11461_vm5, %v10455_v42, %v7342_v59  ;;  %v646_v59 = vld [vmem:[%s14184_s16 + $0x12c] sm:$0x1] }
 0x5bf   : > { %7780 = vmatmul.bf16.gmra.mxu1 %v7640_v58  ;;  %v6927_v10 = vsel %vm11429_vm3, %v6922_v23, %v6926_v32  ;;  %v6988_v30 = vunpack.c.l.b16 %v6913_v11  ;;  %v16255_v35 = vunpack.c.l.b16 %v15557_v25  ;;  %v6931_v4 = vrot.slane %v6929_v47, 4  ;;  %v16918_v11 = vld [vmem:[#allocation47_spill] sm:$0xff] }
 0x5c0   : > { %8058 = vmatmul.bf16.gmra.mxu2 %v7918_v2  ;;  %v15542_v50 = vadd.f32 %v8016_v9, %v7805_v36  ;;  %v6932_v36 = vshll.u32 %v11194_v8, 16  ;;  %v7871_v9 = vshrl.u32 %v15547_v21, 16  ;;  %v7874_v2 = vshll.u32 %v15547_v21, 16 }
 0x5c1   : > { %v7105_v22 = vpop.f32.mrf.mxu3  ;;  %v6989_v42 = vunpack.c.l.b16 %v6927_v10  ;;  %v15569_v32 = vpack.c.b16 %v6988_v30, %v15505_v16  ;;  %v16922_v16 = vunpack.c.l.b16 %v14676_v63  ;;  %v10457_v63 = vrot.slane %v11194_v8, 9 }
 0x5c2   : > { %16915 = vst [vmem:[#allocation21_spill] sm:$0xff] %v15542_v50  ;;  %v7170_v57 = vadd.f32 %v7105_v22, %v16916_v13  ;;  %v6934_v29 = vrot.slane %v6932_v36, 5  ;;  %v7873_v22 = vrot.slane %v7871_v9, 4  ;;  %v7876_v13 = vrot.slane %v7874_v2, 5  ;;  %v16920_v9 = vld [vmem:[#allocation54_spill] sm:$0xff] }
 0x5c3   : > { %v8019_v27 = vpop.f32.mrf.mxu2  ;;  %v7517_v14 = vpop.f32.mrf.mxu0  ;;  %v7919_v10 = vpack.c.b16 %v6989_v42, %v6988_v30  ;;  %v16921_v2 = vunpack.c.l.b16 %v16920_v9  ;;  %v10456_v30 = vrot.slane %v15498_v43, 9  ;;  %v7350_v9 = vrot.slane %v646_v59, 5 }
 0x5c4   : > { %v7580_v18 = vadd.f32 %v7515_v61, %v7170_v57  ;;  %v7743_v1 = vpop.f32.mrf.mxu1  ;;  %v15572_v57 = vld [vmem:[%s14184_s16 + $0x134] sm:$0x1]  ;;  %v6935_v36 = vor.u32 %v6934_v29, %v6931_v4  ;;  %v7877_v39 = vor.u32 %v7876_v13, %v7873_v22  ;;  %v7346_v29 = vrot.slane %v15519_v6, 5 }
 0x5c5   : > { %v15601_v43 = vsel %vm11461_vm5, %v10457_v63, %v7350_v9 }
 0x5c6   : > { %v7806_v58 = vadd.f32 %v7741_v7, %v7580_v18  ;;  %v16919_v7 = vunpack.c.l.b16 %v15552_v54 }
 0x5c8   : > { %v15566_v61 = vadd.f32 %v8019_v27, %v7806_v58  ;;  %v15579_v47 = vpack.c.b16 %v16255_v35, %v16919_v7  ;;  %v6938_v27 = vshll.u32 %v646_v59, 16  ;;  %v7641_v58 = vpack.c.b16 %v16922_v16, %v16921_v2 }
 0x5c9   : > { %v7107_v23 = vpop.f32.mrf.mxu3  ;;  %v6936_v7 = vrot.slane %v6935_v36, 4 }
 0x5ca   : > { %16917 = vst [vmem:[#allocation73_spill] sm:$0xff] %v15566_v61  ;;  %v7171_v12 = vadd.f32 %v7107_v23, %v16918_v11  ;;  %v7880_v23 = vshll.u32 %v15572_v57, 16  ;;  %v6940_v4 = vrot.slane %v6938_v27, 5  ;;  %v15597_v27 = vsel %vm11461_vm5, %v10456_v30, %v7346_v29 }
 0x5cb   : > { %v8021_v55 = vpop.f32.mrf.mxu2  ;;  %v7520_v18 = vpop.f32.mrf.mxu0 }
 0x5cc   : > { %v7581_v61 = vadd.f32 %v7517_v14, %v7171_v12  ;;  %v7746_v50 = vpop.f32.mrf.mxu1  ;;  %v7878_v14 = vrot.slane %v7877_v39, 4  ;;  %v7882_v22 = vrot.slane %v7880_v23, 5  ;;  %v6941_v36 = vsel %vm11429_vm3, %v6936_v7, %v6940_v4 }
 0x5cd   : > { %v6990_v59 = vunpack.c.l.b16 %v6941_v36 }
 0x5ce   : > { %v7807_v11 = vadd.f32 %v7743_v1, %v7581_v61  ;;  %7149 = vmatmul.bf16.gmra.mxu3 %v15569_v32  ;;  %7559 = vmatmul.bf16.gmra.mxu0 %v15579_v47  ;;  %v16923_v1 = vld [vmem:[#allocation40_spill] sm:$0xff]  ;;  %v7883_v39 = vsel %vm11429_vm3, %v7878_v14, %v7882_v22  ;;  %v16924_v14 = vunpack.c.l.b16 %v14679_v5 }
 0x5cf   : > { %7785 = vmatmul.bf16.gmra.mxu1 %v7641_v58  ;;  %v16253_v58 = vunpack.c.l.b16 %v15601_v43  ;;  %v15607_v23 = vunpack.c.l.b16 %v7883_v39  ;;  %v15613_v29 = vpack.c.b16 %v6990_v59, %v6989_v42 }
 0x5d0   : > { %8063 = vmatmul.bf16.gmra.mxu2 %v7919_v10  ;;  %v15590_v12 = vadd.f32 %v8021_v55, %v7807_v11  ;;  %v16254_v10 = vunpack.c.l.b16 %v15597_v27  ;;  %v16252_v11 = vunpack.c.l.b16 %v15547_v21 }
 0x5d1   : > { %v7110_v13 = vpop.f32.mrf.mxu3  ;;  %v7920_v9 = vpack.c.b16 %v15607_v23, %v6990_v59 }
 0x5d2   : > { %v7172_v61 = vadd.f32 %v7110_v13, %v16923_v1  ;;  %v7642_v22 = vpack.c.b16 %v16252_v11, %v16924_v14 }
 0x5d3   : > { %v8024_v2 = vpop.f32.mrf.mxu2  ;;  %v7522_v16 = vpop.f32.mrf.mxu0 }
 0x5d4   : > { %v7582_v6 = vadd.f32 %v7520_v18, %v7172_v61  ;;  %v7748_v8 = vpop.f32.mrf.mxu1 }
 0x5d6   : > { %v7808_v55 = vadd.f32 %v7746_v50, %v7582_v6  ;;  %v15619_v50 = vpack.c.b16 %v16253_v58, %v16254_v10 }
 0x5d8   : > { %v15610_v7 = vadd.f32 %v8024_v2, %v7808_v55 }
 0x5d9   : > { %v7112_v4 = vpop.f32.mrf.mxu3 }
 0x5da   : > { %v7173_v30 = vadd.f32 %v7112_v4, %v14723_v62 }
 0x5db   : > { %v8026_v18 = vpop.f32.mrf.mxu2  ;;  %v7525_v63 = vpop.f32.mrf.mxu0 }
 0x5dc   : > { %v7583_v13 = vadd.f32 %v7522_v16, %v7173_v30  ;;  %v7751_v1 = vpop.f32.mrf.mxu1 }
 0x5de   : > { %v7809_v62 = vadd.f32 %v7748_v8, %v7583_v13  ;;  %7154 = vmatmul.bf16.gmra.mxu3 %v15613_v29  ;;  %7564 = vmatmul.bf16.gmra.mxu0 %v15619_v50 }
 0x5df   : > { %7790 = vmatmul.bf16.gmra.mxu1 %v7642_v22 }
 0x5e0   : > { %8068 = vmatmul.bf16.gmra.mxu2 %v7920_v9  ;;  %v15628_v42 = vadd.f32 %v8026_v18, %v7809_v62  ;;  %v16925_v18 = vld [vmem:[#allocation49_spill] sm:$0xff] }
 0x5e1   : > { %v7115_v61 = vpop.f32.mrf.mxu3 }
 0x5e2   : > { %v7174_v2 = vadd.f32 %v7115_v61, %v14746_v37 }
 0x5e3   : > { %v8029_v36 = vpop.f32.mrf.mxu2  ;;  %v7527_v6 = vpop.f32.mrf.mxu0 }
 0x5e4   : > { %v7584_v5 = vadd.f32 %v7525_v63, %v7174_v2  ;;  %v7753_v39 = vpop.f32.mrf.mxu1 }
 0x5e6   : > { %v7810_v55 = vadd.f32 %v7751_v1, %v7584_v5 }
 0x5e8   : > { %v15631_v59 = vadd.f32 %v8029_v36, %v7810_v55 }
 0x5e9   : > { %v7117_v16 = vpop.f32.mrf.mxu3 }
 0x5ea   : > { %v7175_v8 = vadd.f32 %v7117_v16, %v14756_v52 }
 0x5eb   : > { %v8031_v4 = vpop.f32.mrf.mxu2  ;;  %v7530_v30 = vpop.f32.mrf.mxu0 }
 0x5ec   : > { %v7585_v14 = vadd.f32 %v7527_v6, %v7175_v8  ;;  %v7756_v9 = vpop.f32.mrf.mxu1 }
 0x5ee   : > { %v7811_v22 = vadd.f32 %v7753_v39, %v7585_v14  ;;  %8235 = vmatmul.bf16.vlgmr.msra.gmra.mxu3 %v14727_v53  ;;  %8437 = vmatmul.bf16.vlgmr.msra.gmra.mxu0 %v16925_v18  ;;  %v589_v14 = vld [vmem:[%s14184_s16 + $0x48] sm:$0xf] }
 0x5ef   : > { %8691 = vmatmul.bf16.vlgmr.msra.gmra.mxu1 %v14800_v20  ;;  %v16927_v20 = vunpack.c.l.b16 %v14829_v56 }
 0x5f0   : > { %8909 = vmatmul.bf16.vlgmr.msra.gmra.mxu2 %v14806_v26  ;;  %v15638_v37 = vadd.f32 %v8031_v4, %v7811_v22  ;;  %v16926_v26 = vunpack.c.l.b16 %v14771_v3  ;;  %v16928_v4 = vld [vmem:[#allocation65_spill] sm:$0xff]  ;;  %v16929_v3 = vld [vmem:[#allocation78_spill] sm:$0xff] }
 0x5f1   : > { %v7120_v63 = vpop.f32.mrf.mxu3 }
 0x5f2   : > { %v7176_v13 = vadd.f32 %v7120_v63, %v14784_v51  ;;  %v8148_v39 = vpack.c.b16 %v16927_v20, %v16926_v26  ;;  %v16931_v26 = vld [vmem:[#allocation60_spill] sm:$0xff] }
 0x5f3   : > { %v8034_v1 = vpop.f32.mrf.mxu2  ;;  %v7532_v52 = vpop.f32.mrf.mxu0  ;;  %v16932_v20 = vunpack.c.l.b16 %v16931_v26 }
 0x5f4   : > { %v7586_v62 = vadd.f32 %v7530_v30, %v7176_v13  ;;  %v7758_v61 = vpop.f32.mrf.mxu1  ;;  %v8551_v13 = vshrl.u32 %v589_v14, 16 }
 0x5f6   : > { %v7812_v2 = vadd.f32 %v7756_v9, %v7586_v62 }
 0x5f8   : > { %v15641_v36 = vadd.f32 %v8034_v1, %v7812_v2  ;;  %v8554_v1 = vshll.u32 %v589_v14, 16  ;;  %v590_v2 = vld [vmem:[%s14184_s16 + $0x4c] sm:$0x1] }
 0x5f9   : > { %v7122_v53 = vpop.f32.mrf.mxu3  ;;  %v8810_v26 = vrot.slane %v590_v2, 5 }
 0x5fa   : > { %v7177_v6 = vadd.f32 %v7122_v53, %v14819_v33  ;;  %v16930_v53 = vld [vmem:[#allocation18_spill] sm:$0xff] }
 0x5fb   : > { %v8036_v5 = vpop.f32.mrf.mxu2  ;;  %v7535_v55 = vpop.f32.mrf.mxu0 }
 0x5fc   : > { %v7587_v16 = vadd.f32 %v7532_v52, %v7177_v6  ;;  %v7761_v51 = vpop.f32.mrf.mxu1 }
 0x5fe   : > { %v7813_v8 = vadd.f32 %v7758_v61, %v7587_v16  ;;  %8240 = vmatmul.bf16.gmra.mxu3 %v8148_v39  ;;  %8442 = vmatmul.bf16.gmra.mxu0 %v16928_v4  ;;  %v8553_v61 = vrot.slane %v8551_v13, 4  ;;  %v16933_v39 = vld [vmem:[#allocation26_spill] sm:$0xff] }
 0x5ff   : > { %8696 = vmatmul.bf16.gmra.mxu1 %v14852_v17  ;;  %v16934_v16 = vunpack.c.l.b16 %v16933_v39 }
 0x600   : > { %8914 = vmatmul.bf16.gmra.mxu2 %v14860_v19  ;;  %v15651_v30 = vadd.f32 %v8036_v5, %v7813_v8  ;;  %v8556_v19 = vrot.slane %v8554_v1, 5  ;;  %v11196_v1 = vld [vmem:[%s14184_s16 + $0x44] sm:$0x1] }
 0x601   : > { %v7125_v33 = vpop.f32.mrf.mxu3 }
 0x602   : > { %v7178_v9 = vadd.f32 %v7125_v33, %v16929_v3  ;;  %v8560_v3 = vshll.u32 %v590_v2, 16 }
 0x603   : > { %v8039_v56 = vpop.f32.mrf.mxu2  ;;  %v7537_v22 = vpop.f32.mrf.mxu0 }
 0x604   : > { %v7588_v18 = vadd.f32 %v7535_v55, %v7178_v9  ;;  %v7763_v63 = vpop.f32.mrf.mxu1  ;;  %v8149_v55 = vpack.c.b16 %v16934_v16, %v16932_v20 }
 0x606   : > { %v7814_v52 = vadd.f32 %v7761_v51, %v7588_v18  ;;  %v8557_v51 = vor.u32 %v8556_v19, %v8553_v61  ;;  %v11195_v18 = vld [vmem:[%s14184_s16 + $0x40] sm:$0xf]  ;;  %v16936_v19 = vld [vmem:[#allocation23_spill] sm:$0xff] }
 0x607   : > { %v10602_v13 = vrot.slane %v11195_v18, 9 }
 0x608   : > { %v15655_v62 = vadd.f32 %v8039_v56, %v7814_v52  ;;  %v16935_v56 = vld [vmem:[#allocation63_spill] sm:$0xff]  ;;  %v8112_v52 = vrot.slane %v11196_v1, 5 }
 0x609   : > { %v7127_v17 = vpop.f32.mrf.mxu3 }
 0x60a   : > { %v7179_v6 = vadd.f32 %v7127_v17, %v16930_v53  ;;  %v10750_v17 = vrot.slane %v589_v14, 9 }
 0x60b   : > { %v8041_v5 = vpop.f32.mrf.mxu2  ;;  %v7540_v8 = vpop.f32.mrf.mxu0 }
 0x60c   : > { %v7589_v4 = vadd.f32 %v7537_v22, %v7179_v6  ;;  %v7766_v33 = vpop.f32.mrf.mxu1  ;;  %v8558_v22 = vrot.slane %v8557_v51, 4  ;;  %v8562_v6 = vrot.slane %v8560_v3, 5  ;;  %v8369_v51 = vunpack.c.l.b16 %v589_v14 }
 0x60e   : > { %v7815_v9 = vadd.f32 %v7763_v63, %v7589_v4  ;;  %8245 = vmatmul.bf16.gmra.mxu3 %v8149_v55  ;;  %8447 = vmatmul.bf16.gmra.mxu0 %v16935_v56  ;;  %v8811_v55 = vsel %vm11461_vm5, %v10750_v17, %v8810_v26 }
 0x60f   : > { %8701 = vmatmul.bf16.gmra.mxu1 %v14928_v44  ;;  %v8841_v3 = vunpack.c.l.b16 %v8811_v55 }
 0x610   : > { %8919 = vmatmul.bf16.gmra.mxu2 %v14934_v45  ;;  %v15668_v53 = vadd.f32 %v8041_v5, %v7815_v9  ;;  %v8113_v45 = vsel %vm11461_vm5, %v10602_v13, %v8112_v52  ;;  %v8563_v5 = vsel %vm11429_vm3, %v8558_v22, %v8562_v6  ;;  %v16937_v13 = vld [vmem:[#allocation7_spill] sm:$0xff]  ;;  %v16941_v22 = vld [vmem:[#allocation4_spill] sm:$0xff] }
 0x611   : > { %v7130_v61 = vpop.f32.mrf.mxu3  ;;  %v8143_v2 = vunpack.c.l.b16 %v8113_v45  ;;  %v8623_v9 = vunpack.c.l.b16 %v8563_v5 }
 0x612   : > { %v7180_v63 = vadd.f32 %v7130_v61, %v16936_v19  ;;  %v16939_v19 = vld [vmem:[#allocation70_spill] sm:$0xff] }
 0x613   : > { %v8044_v20 = vpop.f32.mrf.mxu2  ;;  %v7542_v39 = vpop.f32.mrf.mxu0  ;;  %v8845_v11 = vpack.c.b16 %v8841_v3, %v8143_v2 }
 0x614   : > { %v7590_v16 = vadd.f32 %v7540_v8, %v7180_v63  ;;  %v7768_v44 = vpop.f32.mrf.mxu1  ;;  %v16938_v8 = vunpack.c.l.b16 %v16937_v13  ;;  %v16940_v63 = vunpack.c.l.b16 %v16939_v19 }
 0x616   : > { %v7816_v4 = vadd.f32 %v7766_v33, %v7590_v16  ;;  %v8150_v52 = vpack.c.b16 %v8143_v2, %v16938_v8  ;;  %v8373_v17 = vpack.c.b16 %v8369_v51, %v16940_v63  ;;  %v8627_v33 = vpack.c.b16 %v8623_v9, %v16941_v22  ;;  %v16942_v16 = vld [vmem:[#allocation82_spill] sm:$0xff]  ;;  %v16943_v9 = vld [vmem:[#allocation29_spill] sm:$0xff] }
 0x617   : > { %v16947_v22 = vld [vmem:[#allocation2_spill] sm:$0xff] }
 0x618   : > { %v15677_v56 = vadd.f32 %v8044_v20, %v7816_v4 }
 0x619   : > { %v7132_v18 = vpop.f32.mrf.mxu3 }
 0x61a   : > { %v7181_v1 = vadd.f32 %v7132_v18, %v14946_v28 }
 0x61b   : > { %v8046_v61 = vpop.f32.mrf.mxu2  ;;  %v7545_v26 = vpop.f32.mrf.mxu0 }
 0x61c   : > { %v7591_v6 = vadd.f32 %v7542_v39, %v7181_v1  ;;  %v7771_v14 = vpop.f32.mrf.mxu1  ;;  %v16944_v1 = vunpack.c.l.b16 %v16943_v9 }
 0x61e   : > { %v7817_v45 = vadd.f32 %v7768_v44, %v7591_v6  ;;  %8250 = vmatmul.bf16.gmra.mxu3 %v8150_v52  ;;  %8452 = vmatmul.bf16.gmra.mxu0 %v8373_v17 }
 0x61f   : > { %8706 = vmatmul.bf16.gmra.mxu1 %v8627_v33  ;;  %v16948_v33 = vld [vmem:[#allocation6_spill] sm:$0xff] }
 0x620   : > { %8924 = vmatmul.bf16.gmra.mxu2 %v8845_v11  ;;  %v15685_v20 = vadd.f32 %v8046_v61, %v7817_v45  ;;  %v16945_v11 = vld [vmem:[#allocation9_spill] sm:$0xff] }
 0x621   : > { %v7135_v28 = vpop.f32.mrf.mxu3  ;;  %v16946_v8 = vunpack.c.l.b16 %v16945_v11  ;;  %v16952_v11 = vld [vmem:[#allocation14_spill] sm:$0xff] }
 0x622   : > { %v7182_v55 = vadd.f32 %v7135_v28, %v16942_v16 }
 0x623   : > { %v8049_v5 = vpop.f32.mrf.mxu2  ;;  %v7547_v4 = vpop.f32.mrf.mxu0  ;;  %v8151_v61 = vpack.c.b16 %v16946_v8, %v16944_v1  ;;  %v16951_v1 = vld [vmem:[#allocation5_spill] sm:$0xff] }
 0x624   : > { %v7592_v18 = vadd.f32 %v7545_v26, %v7182_v55  ;;  %v7773_v51 = vpop.f32.mrf.mxu1  ;;  %v16953_v8 = vld [vmem:[#allocation41_spill] sm:$0xff] }
 0x626   : > { %v7818_v13 = vadd.f32 %v7771_v14, %v7592_v18 }
 0x628   : > { %v15688_v2 = vadd.f32 %v8049_v5, %v7818_v13 }
 0x629   : > { %v7137_v3 = vpop.f32.mrf.mxu3 }
 0x62a   : > { %v7183_v39 = vadd.f32 %v7137_v3, %v14992_v24 }
 0x62b   : > { %v8051_v44 = vpop.f32.mrf.mxu2  ;;  %v7550_v52 = vpop.f32.mrf.mxu0 }
 0x62c   : > { %v7593_v19 = vadd.f32 %v7547_v4, %v7183_v39  ;;  %v7776_v63 = vpop.f32.mrf.mxu1 }
 0x62e   : > { %v7819_v17 = vadd.f32 %v7773_v51, %v7593_v19  ;;  %8255 = vmatmul.bf16.gmra.mxu3 %v8151_v61  ;;  %8457 = vmatmul.bf16.gmra.mxu0 %v16947_v22 }
 0x62f   : > { %8711 = vmatmul.bf16.gmra.mxu1 %v15041_v38  ;;  %v16950_v38 = vunpack.c.l.b16 %v15070_v48 }
 0x630   : > { %8929 = vmatmul.bf16.gmra.mxu2 %v15047_v49  ;;  %v15698_v26 = vadd.f32 %v8051_v44, %v7819_v17  ;;  %v16949_v49 = vunpack.c.l.b16 %v15011_v60  ;;  %v16954_v60 = vld [vmem:[#allocation64_spill] sm:$0xff] }
 0x631   : > { %v7140_v24 = vpop.f32.mrf.mxu3 }
 0x632   : > { %v7184_v6 = vadd.f32 %v7140_v24, %v16948_v33  ;;  %v8152_v13 = vpack.c.b16 %v16950_v38, %v16949_v49  ;;  %v16956_v49 = vld [vmem:[#allocation72_spill] sm:$0xff] }
 0x633   : > { %v8054_v14 = vpop.f32.mrf.mxu2  ;;  %v7552_v45 = vpop.f32.mrf.mxu0  ;;  %v16957_v38 = vunpack.c.l.b16 %v16956_v49 }
 0x634   : > { %v7594_v28 = vadd.f32 %v7550_v52, %v7184_v6  ;;  %v7778_v16 = vpop.f32.mrf.mxu1  ;;  %v609_v52 = vld [vmem:[%s14184_s16 + $0x98] sm:$0xf] }
 0x635   : > { %v8565_v24 = vshrl.u32 %v609_v52, 16  ;;  %v8568_v33 = vshll.u32 %v609_v52, 16 }
 0x636   : > { %v7820_v55 = vadd.f32 %v7776_v63, %v7594_v28 }
 0x637   : > { %v8570_v28 = vrot.slane %v8568_v33, 5 }
 0x638   : > { %v15701_v5 = vadd.f32 %v8054_v14, %v7820_v55  ;;  %v610_v55 = vld [vmem:[%s14184_s16 + $0x9c] sm:$0x1] }
 0x639   : > { %v7142_v4 = vpop.f32.mrf.mxu3 }
 0x63a   : > { %v7185_v18 = vadd.f32 %v7142_v4, %v15060_v15  ;;  %v16955_v4 = vld [vmem:[#allocation55_spill] sm:$0xff] }
 0x63b   : > { %v8056_v51 = vpop.f32.mrf.mxu2  ;;  %v7555_v3 = vpop.f32.mrf.mxu0 }
 0x63c   : > { %v7595_v39 = vadd.f32 %v7552_v45, %v7185_v18  ;;  %v7781_v44 = vpop.f32.mrf.mxu1  ;;  %v8567_v45 = vrot.slane %v8565_v24, 4  ;;  %v11198_v24 = vld [vmem:[%s14184_s16 + $0x94] sm:$0x1] }
 0x63d   : > { %v8116_v33 = vrot.slane %v11198_v24, 5 }
 0x63e   : > { %v7821_v9 = vadd.f32 %v7778_v16, %v7595_v39  ;;  %8260 = vmatmul.bf16.gmra.mxu3 %v8152_v13  ;;  %8462 = vmatmul.bf16.gmra.mxu0 %v16951_v1  ;;  %v16958_v13 = vld [vmem:[#allocation43_spill] sm:$0xff] }
 0x63f   : > { %8716 = vmatmul.bf16.gmra.mxu1 %v16953_v8  ;;  %v16959_v39 = vunpack.c.l.b16 %v16958_v13  ;;  %v8574_v8 = vshll.u32 %v610_v55, 16 }
 0x640   : > { %8934 = vmatmul.bf16.gmra.mxu2 %v16952_v11  ;;  %v15711_v61 = vadd.f32 %v8056_v51, %v7821_v9 }
 0x641   : > { %v7145_v15 = vpop.f32.mrf.mxu3 }
 0x642   : > { %v7186_v19 = vadd.f32 %v7145_v15, %v16954_v60  ;;  %v16960_v60 = vld [vmem:[#allocation74_spill] sm:$0xff] }
 0x643   : > { %v8059_v48 = vpop.f32.mrf.mxu2  ;;  %v7557_v63 = vpop.f32.mrf.mxu0 }
 0x644   : > { %v7596_v17 = vadd.f32 %v7555_v3, %v7186_v19  ;;  %v7783_v22 = vpop.f32.mrf.mxu1  ;;  %v8153_v3 = vpack.c.b16 %v16959_v39, %v16957_v38  ;;  %v16961_v19 = vld [vmem:[#allocation22_spill] sm:$0xff] }
 0x646   : > { %v7822_v6 = vadd.f32 %v7781_v44, %v7596_v17  ;;  %v8571_v44 = vor.u32 %v8570_v28, %v8567_v45  ;;  %v16962_v28 = vld [vmem:[#allocation24_spill] sm:$0xff] }
 0x648   : > { %v15715_v14 = vadd.f32 %v8059_v48, %v7822_v6  ;;  %v11197_v48 = vld [vmem:[%s14184_s16 + $0x90] sm:$0xf]  ;;  %v10751_v6 = vrot.slane %v609_v52, 9 }
 0x649   : > { %v7147_v16 = vpop.f32.mrf.mxu3  ;;  %v10603_v17 = vrot.slane %v11197_v48, 9  ;;  %v16963_v48 = vld [vmem:[#allocation38_spill] sm:$0xff] }
 0x64a   : > { %v7187_v18 = vadd.f32 %v7147_v16, %v16955_v4  ;;  %v8814_v4 = vrot.slane %v610_v55, 5 }
 0x64b   : > { %v8061_v51 = vpop.f32.mrf.mxu2  ;;  %v7560_v9 = vpop.f32.mrf.mxu0 }
 0x64c   : > { %v7597_v1 = vadd.f32 %v7557_v63, %v7187_v18  ;;  %v7786_v11 = vpop.f32.mrf.mxu1  ;;  %v8572_v63 = vrot.slane %v8571_v44, 4  ;;  %v8576_v18 = vrot.slane %v8574_v8, 5  ;;  %v8370_v44 = vunpack.c.l.b16 %v609_v52 }
 0x64e   : > { %v7823_v15 = vadd.f32 %v7783_v22, %v7597_v1  ;;  %8265 = vmatmul.bf16.gmra.mxu3 %v8153_v3  ;;  %8467 = vmatmul.bf16.gmra.mxu0 %v16960_v60  ;;  %v8815_v3 = vsel %vm11461_vm5, %v10751_v6, %v8814_v4 }
 0x64f   : > { %8721 = vmatmul.bf16.gmra.mxu1 %v16961_v19  ;;  %v8842_v8 = vunpack.c.l.b16 %v8815_v3  ;;  %v16969_v3 = vld [vmem:[#allocation52_spill] sm:$0xff] }
 0x650   : > { %8939 = vmatmul.bf16.gmra.mxu2 %v15175_v31  ;;  %v15728_v16 = vadd.f32 %v8061_v51, %v7823_v15  ;;  %v8117_v31 = vsel %vm11461_vm5, %v10603_v17, %v8116_v33  ;;  %v8577_v51 = vsel %vm11429_vm3, %v8572_v63, %v8576_v18  ;;  %v16964_v17 = vld [vmem:[#allocation39_spill] sm:$0xff]  ;;  %v16968_v63 = vld [vmem:[#allocation32_spill] sm:$0xff] }
 0x651   : > { %v7150_v45 = vpop.f32.mrf.mxu3  ;;  %v8144_v55 = vunpack.c.l.b16 %v8117_v31  ;;  %v8624_v15 = vunpack.c.l.b16 %v8577_v51 }
 0x652   : > { %v7188_v22 = vadd.f32 %v7150_v45, %v16962_v28  ;;  %v16966_v28 = vld [vmem:[#allocation34_spill] sm:$0xff] }
 0x653   : > { %v8064_v49 = vpop.f32.mrf.mxu2  ;;  %v7562_v38 = vpop.f32.mrf.mxu0  ;;  %v8846_v58 = vpack.c.b16 %v8842_v8, %v8144_v55 }
 0x654   : > { %v7598_v13 = vadd.f32 %v7560_v9, %v7188_v22  ;;  %v7788_v39 = vpop.f32.mrf.mxu1  ;;  %v16965_v9 = vunpack.c.l.b16 %v16964_v17  ;;  %v16967_v22 = vunpack.c.l.b16 %v16966_v28 }
 0x656   : > { %v7824_v1 = vadd.f32 %v7786_v11, %v7598_v13  ;;  %v8154_v33 = vpack.c.b16 %v8144_v55, %v16965_v9  ;;  %v8374_v6 = vpack.c.b16 %v8370_v44, %v16967_v22  ;;  %v8628_v11 = vpack.c.b16 %v8624_v15, %v16968_v63 }
 0x658   : > { %v15737_v60 = vadd.f32 %v8064_v49, %v7824_v1 }
 0x659   : > { %v7152_v19 = vpop.f32.mrf.mxu3 }
 0x65a   : > { %v7189_v24 = vadd.f32 %v7152_v19, %v16963_v48 }
 0x65b   : > { %v8066_v45 = vpop.f32.mrf.mxu2  ;;  %v7565_v4 = vpop.f32.mrf.mxu0 }
 0x65c   : > { %v7599_v18 = vadd.f32 %v7562_v38, %v7189_v24  ;;  %v7791_v52 = vpop.f32.mrf.mxu1 }
 0x65e   : > { %v7825_v31 = vadd.f32 %v7788_v39, %v7599_v18  ;;  %8270 = vmatmul.bf16.gmra.mxu3 %v8154_v33  ;;  %8472 = vmatmul.bf16.gmra.mxu0 %v8374_v6  ;;  %v16970_v39 = vld [vmem:[#allocation42_spill] sm:$0xff]  ;;  %v16977_v18 = vld [vmem:[#allocation61_spill] sm:$0xff] }
 0x65f   : > { %8726 = vmatmul.bf16.gmra.mxu1 %v8628_v11  ;;  %v16975_v11 = vld [vmem:[#allocation20_spill] sm:$0xff] }
 0x660   : > { %8944 = vmatmul.bf16.gmra.mxu2 %v8846_v58  ;;  %v15745_v49 = vadd.f32 %v8066_v45, %v7825_v31  ;;  %v16971_v58 = vld [vmem:[#allocation35_spill] sm:$0xff]  ;;  %v16973_v45 = vld [vmem:[#allocation50_spill] sm:$0xff] }
 0x661   : > { %v7155_v13 = vpop.f32.mrf.mxu3  ;;  %v16972_v17 = vunpack.c.l.b16 %v16971_v58  ;;  %v16974_v9 = vunpack.c.l.b16 %v16973_v45  ;;  %v16981_v58 = vld [vmem:[#allocation31_spill] sm:$0xff] }
 0x662   : > { %v7190_v51 = vadd.f32 %v7155_v13, %v16969_v3  ;;  %v16979_v13 = vld [vmem:[#allocation71_spill] sm:$0xff] }
 0x663   : > { %v8069_v1 = vpop.f32.mrf.mxu2  ;;  %v7567_v19 = vpop.f32.mrf.mxu0  ;;  %v8155_v33 = vpack.c.b16 %v16974_v9, %v16972_v17  ;;  %v16982_v17 = vunpack.c.l.b16 %v16981_v58  ;;  %v16983_v45 = vld [vmem:[#allocation83_spill] sm:$0xff] }
 0x664   : > { %v7600_v44 = vadd.f32 %v7565_v4, %v7190_v51  ;;  %v7793_v55 = vpop.f32.mrf.mxu1  ;;  %v16976_v4 = vld [vmem:[#allocation51_spill] sm:$0xff]  ;;  %v16984_v9 = vunpack.c.l.b16 %v16983_v45 }
 0x666   : > { %v7826_v8 = vadd.f32 %v7791_v52, %v7600_v44 }
 0x668   : > { %v15748_v15 = vadd.f32 %v8069_v1, %v7826_v8 }
 0x669   : > { %v7157_v38 = vpop.f32.mrf.mxu3 }
 0x66a   : > { %v7191_v48 = vadd.f32 %v7157_v38, %v16970_v39  ;;  %v16980_v39 = vld [vmem:[#allocation58_spill] sm:$0xff] }
 0x66b   : > { %v8071_v24 = vpop.f32.mrf.mxu2  ;;  %v8438_v28 = vpop.f32.mrf.mxu0 }
 0x66c   : > { %v7601_v22 = vadd.f32 %v7567_v19, %v7191_v48  ;;  %v8692_v6 = vpop.f32.mrf.mxu1 }
 0x66e   : > { %v7827_v63 = vadd.f32 %v7793_v55, %v7601_v22  ;;  %8275 = vmatmul.bf16.gmra.mxu3 %v8155_v33  ;;  %8477 = vmatmul.bf16.gmra.mxu0 %v16975_v11  ;;  %v8156_v33 = vpack.c.b16 %v16984_v9, %v16982_v17  ;;  %v16985_v11 = vld [vmem:[#allocation12_spill] sm:$0xff] }
 0x66f   : > { %8731 = vmatmul.bf16.gmra.mxu1 %v16977_v18  ;;  %v16987_v18 = vld [vmem:[#allocation68_spill] sm:$0xff] }
 0x670   : > { %8949 = vmatmul.bf16.gmra.mxu2 %v16976_v4  ;;  %v15760_v52 = vadd.f32 %v8071_v24, %v7827_v63  ;;  %v16986_v4 = vld [vmem:[#allocation75_spill] sm:$0xff] }
 0x671   : > { %v8236_v31 = vpop.f32.mrf.mxu3 }
 0x672   : > { %16978 = vst [vmem:[#allocation19_spill] sm:$0xff] %v15760_v52  ;;  %v8316_v3 = vadd.f32 %v8236_v31, %v16979_v13 }
 0x673   : > { %v8910_v51 = vpop.f32.mrf.mxu2  ;;  %v8440_v1 = vpop.f32.mrf.mxu0 }
 0x674   : > { %v8518_v19 = vadd.f32 %v8438_v28, %v8316_v3  ;;  %v8694_v44 = vpop.f32.mrf.mxu1  ;;  %v15778_v3 = vld [vmem:[%s14184_s16 + $0xe8] sm:$0xf] }
 0x675   : > { %v8579_v45 = vshrl.u32 %v15778_v3, 16 }
 0x676   : > { %v8772_v55 = vadd.f32 %v8692_v6, %v8518_v19 }
 0x678   : > { %v8990_v8 = vadd.f32 %v8910_v51, %v8772_v55 }
 0x679   : > { %v8238_v38 = vpop.f32.mrf.mxu3 }
 0x67a   : > { %9022 = vst [vmem:[%s15766_s10] sm:$0xff] %v8990_v8  ;;  %v8317_v48 = vadd.f32 %v8238_v38, %v16980_v39  ;;  %v9092_v51 = vmul.f32 %v8990_v8, %v8990_v8 }
 0x67b   : > { %v8912_v24 = vpop.f32.mrf.mxu2  ;;  %v8443_v28 = vpop.f32.mrf.mxu0 }
 0x67c   : > { %v8519_v22 = vadd.f32 %v8440_v1, %v8317_v48  ;;  %v8697_v6 = vpop.f32.mrf.mxu1  ;;  %v16988_v1 = vld [vmem:[#allocation36_spill] sm:$0xff] }
 0x67e   : > { %v8773_v63 = vadd.f32 %v8694_v44, %v8519_v22  ;;  %8280 = vmatmul.bf16.gmra.mxu3 %v8156_v33  ;;  %8482 = vmatmul.bf16.gmra.mxu0 %v16985_v11  ;;  %v8581_v22 = vrot.slane %v8579_v45, 4 }
 0x67f   : > { %8736 = vmatmul.bf16.gmra.mxu1 %v16987_v18 }
 0x680   : > { %8954 = vmatmul.bf16.gmra.mxu2 %v16986_v4  ;;  %v8991_v31 = vadd.f32 %v8912_v24, %v8773_v63  ;;  %v8582_v24 = vshll.u32 %v15778_v3, 16  ;;  %v630_v4 = vld [vmem:[%s14184_s16 + $0xec] sm:$0x1] }
 0x681   : > { %v8241_v13 = vpop.f32.mrf.mxu3 }
 0x682   : > { %9023 = vst [vmem:[%s15766_s10 + $0x8] sm:$0xff] %v8991_v31  ;;  %v9054_v19 = vadd.f32 %v8991_v31, %v8990_v8  ;;  %v9093_v55 = vmul.f32 %v8991_v31, %v8991_v31  ;;  %v8318_v38 = vadd.f32 %v8241_v13, %v16988_v1  ;;  %v8584_v63 = vrot.slane %v8582_v24, 5  ;;  %v16989_v31 = vld [vmem:[#allocation53_spill] sm:$0xff]  ;;  %v16992_v1 = vld [vmem:[#allocation76_spill] sm:$0xff] }
 0x683   : > { %v8915_v44 = vpop.f32.mrf.mxu2  ;;  %v8445_v39 = vpop.f32.mrf.mxu0  ;;  %v8588_v24 = vshll.u32 %v630_v4, 16 }
 0x684   : > { %v9124_v48 = vadd.f32 %v9093_v55, %v9092_v51  ;;  %v8520_v58 = vadd.f32 %v8443_v28, %v8318_v38  ;;  %v8699_v17 = vpop.f32.mrf.mxu1  ;;  %v16990_v28 = vld [vmem:[#allocation44_spill] sm:$0xff]  ;;  %v16993_v38 = vunpack.c.l.b16 %v16992_v1  ;;  %v8585_v45 = vor.u32 %v8584_v63, %v8581_v22 }
 0x685   : > { %v16991_v55 = vunpack.c.l.b16 %v16990_v28  ;;  %v10752_v28 = vrot.slane %v15778_v3, 9  ;;  %v8590_v22 = vrot.slane %v8588_v24, 5  ;;  %v8371_v24 = vunpack.c.l.b16 %v15778_v3  ;;  %v17001_v3 = vld [vmem:[#allocation3_spill] sm:$0xff] }
 0x686   : > { %v8774_v9 = vadd.f32 %v8697_v6, %v8520_v58 }
 0x687   : > { %v8157_v10 = vpack.c.b16 %v16993_v38, %v16991_v55 }
 0x688   : > { %v8992_v33 = vadd.f32 %v8915_v44, %v8774_v9 }
 0x689   : > { %v8243_v11 = vpop.f32.mrf.mxu3 }
 0x68a   : > { %9024 = vst [vmem:[%s15766_s10 + $0x10] sm:$0xff] %v8992_v33  ;;  %v9055_v8 = vadd.f32 %v9054_v19, %v8992_v33  ;;  %v9094_v18 = vmul.f32 %v8992_v33, %v8992_v33  ;;  %v8319_v13 = vadd.f32 %v8243_v11, %v16989_v31  ;;  %v16994_v19 = vld [vmem:[#allocation48_spill] sm:$0xff]  ;;  %v11199_v33 = vld [vmem:[%s14184_s16 + $0xe0] sm:$0xf]  ;;  %v11200_v11 = vld [vmem:[%s14184_s16 + $0xe4] sm:$0x1] }
 0x68b   : > { %v8917_v51 = vpop.f32.mrf.mxu2  ;;  %v8448_v35 = vpop.f32.mrf.mxu0  ;;  %v10604_v52 = vrot.slane %v11199_v33, 9  ;;  %v8120_v31 = vrot.slane %v11200_v11, 5 }
 0x68c   : > { %v9125_v6 = vadd.f32 %v9124_v48, %v9094_v18  ;;  %v8521_v44 = vadd.f32 %v8445_v39, %v8319_v13  ;;  %v8702_v58 = vpop.f32.mrf.mxu1  ;;  %v8818_v39 = vrot.slane %v630_v4, 5  ;;  %v8586_v18 = vrot.slane %v8585_v45, 4  ;;  %v16995_v13 = vld [vmem:[#allocation69_spill] sm:$0xff] }
 0x68d   : > { %v8121_v38 = vsel %vm11461_vm5, %v10604_v52, %v8120_v31 }
 0x68e   : > { %v8775_v9 = vadd.f32 %v8699_v17, %v8521_v44  ;;  %8285 = vmatmul.bf16.gmra.mxu3 %v8157_v10  ;;  %8487 = vmatmul.bf16.gmra.mxu0 %v16994_v19  ;;  %v8819_v4 = vsel %vm11461_vm5, %v10752_v28, %v8818_v39  ;;  %v8145_v45 = vunpack.c.l.b16 %v8121_v38  ;;  %v16999_v39 = vld [vmem:[#allocation11_spill] sm:$0xff] }
 0x68f   : > { %8741 = vmatmul.bf16.gmra.mxu1 %v15410_v34 }
 0x690   : > { %8959 = vmatmul.bf16.gmra.mxu2 %v15416_v40  ;;  %v8993_v48 = vadd.f32 %v8917_v51, %v8775_v9  ;;  %v8591_v51 = vsel %vm11429_vm3, %v8586_v18, %v8590_v22  ;;  %v8843_v9 = vunpack.c.l.b16 %v8819_v4  ;;  %v17000_v18 = vunpack.c.l.b16 %v16999_v39 }
 0x691   : > { %v8246_v63 = vpop.f32.mrf.mxu3  ;;  %v8625_v33 = vunpack.c.l.b16 %v8591_v51 }
 0x692   : > { %9025 = vst [vmem:[%s15766_s10 + $0x18] sm:$0xff] %v8993_v48  ;;  %v9056_v17 = vadd.f32 %v9055_v8, %v8993_v48  ;;  %v9095_v10 = vmul.f32 %v8993_v48, %v8993_v48  ;;  %v8320_v55 = vadd.f32 %v8246_v63, %v16995_v13  ;;  %v16996_v63 = vld [vmem:[#allocation66_spill] sm:$0xff]  ;;  %v8375_v22 = vpack.c.b16 %v8371_v24, %v17000_v18  ;;  %v17004_v18 = vld [vmem:[#allocation59_spill] sm:$0xff] }
 0x693   : > { %v8920_v1 = vpop.f32.mrf.mxu2  ;;  %v8450_v40 = vpop.f32.mrf.mxu0  ;;  %v16997_v52 = vunpack.c.l.b16 %v16996_v63  ;;  %v8629_v38 = vpack.c.b16 %v8625_v33, %v17001_v3  ;;  %v17002_v63 = vld [vmem:[#allocation16_spill] sm:$0xff] }
 0x694   : > { %v9126_v44 = vadd.f32 %v9125_v6, %v9095_v10  ;;  %v8522_v34 = vadd.f32 %v8448_v35, %v8320_v55  ;;  %v8704_v19 = vpop.f32.mrf.mxu1  ;;  %v16998_v10 = vld [vmem:[#allocation62_spill] sm:$0xff]  ;;  %v8847_v55 = vpack.c.b16 %v8843_v9, %v8145_v45 }
 0x695   : > { %v8158_v31 = vpack.c.b16 %v8145_v45, %v16997_v52 }
 0x696   : > { %v8776_v8 = vadd.f32 %v8702_v58, %v8522_v34 }
 0x698   : > { %v8994_v11 = vadd.f32 %v8920_v1, %v8776_v8 }
 0x699   : > { %v8248_v48 = vpop.f32.mrf.mxu3 }
 0x69a   : > { %9026 = vst [vmem:[%s15766_s10 + $0x20] sm:$0xff] %v8994_v11  ;;  %v9057_v35 = vadd.f32 %v9056_v17, %v8994_v11  ;;  %v9096_v6 = vmul.f32 %v8994_v11, %v8994_v11  ;;  %v8321_v13 = vadd.f32 %v8248_v48, %v16998_v10 }
 0x69b   : > { %v8922_v28 = vpop.f32.mrf.mxu2  ;;  %v8453_v58 = vpop.f32.mrf.mxu0 }
 0x69c   : > { %v9127_v34 = vadd.f32 %v9126_v44, %v9096_v6  ;;  %v8523_v1 = vadd.f32 %v8450_v40, %v8321_v13  ;;  %v8707_v4 = vpop.f32.mrf.mxu1  ;;  %v17003_v13 = vld [vmem:[#allocation37_spill] sm:$0xff] }
 0x69e   : > { %v8777_v51 = vadd.f32 %v8704_v19, %v8523_v1  ;;  %8290 = vmatmul.bf16.gmra.mxu3 %v8158_v31  ;;  %8492 = vmatmul.bf16.gmra.mxu0 %v8375_v22  ;;  %v17006_v22 = vld [vmem:[#allocation15_spill] sm:$0xff] }
 0x69f   : > { %8746 = vmatmul.bf16.gmra.mxu1 %v8629_v38 }
 0x6a0   : > { %8964 = vmatmul.bf16.gmra.mxu2 %v8847_v55  ;;  %v8995_v17 = vadd.f32 %v8922_v28, %v8777_v51  ;;  %v17007_v55 = vunpack.c.l.b16 %v17006_v22  ;;  %v17014_v22 = vunpack.c.l.b16 %v15552_v54 }
 0x6a1   : > { %v8251_v8 = vpop.f32.mrf.mxu3 }
 0x6a2   : > { %9027 = vst [vmem:[%s15766_s10 + $0x28] sm:$0xff] %v8995_v17  ;;  %v9058_v11 = vadd.f32 %v9057_v35, %v8995_v17  ;;  %v9097_v48 = vmul.f32 %v8995_v17, %v8995_v17  ;;  %v8322_v24 = vadd.f32 %v8251_v8, %v17002_v63  ;;  %v17005_v35 = vunpack.c.l.b16 %v17004_v18  ;;  %v17009_v17 = vld [vmem:[#allocation46_spill] sm:$0xff] }
 0x6a3   : > { %v8925_v52 = vpop.f32.mrf.mxu2  ;;  %v8455_v45 = vpop.f32.mrf.mxu0 }
 0x6a4   : > { %v9128_v9 = vadd.f32 %v9127_v34, %v9097_v48  ;;  %v8524_v33 = vadd.f32 %v8453_v58, %v8322_v24  ;;  %v8709_v44 = vpop.f32.mrf.mxu1  ;;  %v8159_v3 = vpack.c.b16 %v17007_v55, %v17005_v35  ;;  %v17010_v24 = vld [vmem:[#allocation80_spill] sm:$0xff] }
 0x6a6   : > { %v8778_v40 = vadd.f32 %v8707_v4, %v8524_v33  ;;  %v17008_v4 = vld [vmem:[#allocation28_spill] sm:$0xff] }
 0x6a8   : > { %v8996_v6 = vadd.f32 %v8925_v52, %v8778_v40 }
 0x6a9   : > { %v8253_v19 = vpop.f32.mrf.mxu3 }
 0x6aa   : > { %9028 = vst [vmem:[%s15766_s10 + $0x30] sm:$0xff] %v8996_v6  ;;  %v9059_v31 = vadd.f32 %v9058_v11, %v8996_v6  ;;  %v9098_v10 = vmul.f32 %v8996_v6, %v8996_v6  ;;  %v8323_v28 = vadd.f32 %v8253_v19, %v17003_v13 }
 0x6ab   : > { %v8927_v39 = vpop.f32.mrf.mxu2  ;;  %v8458_v38 = vpop.f32.mrf.mxu0 }
 0x6ac   : > { %v9129_v1 = vadd.f32 %v9128_v9, %v9098_v10  ;;  %v8525_v34 = vadd.f32 %v8455_v45, %v8323_v28  ;;  %v8712_v58 = vpop.f32.mrf.mxu1  ;;  %v17011_v28 = vld [vmem:[#allocation21_spill] sm:$0xff] }
 0x6ae   : > { %v8779_v51 = vadd.f32 %v8709_v44, %v8525_v34  ;;  %8295 = vmatmul.bf16.gmra.mxu3 %v8159_v3  ;;  %8497 = vmatmul.bf16.gmra.mxu0 %v17008_v4 }
 0x6af   : > { %8751 = vmatmul.bf16.gmra.mxu1 %v17009_v17 }
 0x6b0   : > { %8969 = vmatmul.bf16.gmra.mxu2 %v15529_v46  ;;  %v8997_v8 = vadd.f32 %v8927_v39, %v8779_v51  ;;  %v17015_v51 = vld [vmem:[#allocation30_spill] sm:$0xff] }
 0x6b1   : > { %v8256_v11 = vpop.f32.mrf.mxu3 }
 0x6b2   : > { %9029 = vst [vmem:[%s15766_s10 + $0x38] sm:$0xff] %v8997_v8  ;;  %v9060_v48 = vadd.f32 %v9059_v31, %v8997_v8  ;;  %v9099_v63 = vmul.f32 %v8997_v8, %v8997_v8  ;;  %v8324_v52 = vadd.f32 %v8256_v11, %v17010_v24  ;;  %v17012_v31 = vld [vmem:[#allocation13_spill] sm:$0xff] }
 0x6b3   : > { %v8930_v33 = vpop.f32.mrf.mxu2  ;;  %v8460_v9 = vpop.f32.mrf.mxu0  ;;  %v17013_v35 = vunpack.c.l.b16 %v17012_v31  ;;  %v15836_v8 = vld [vmem:[%s14184_s16 + $0x138] sm:$0xf]  ;;  %v17017_v31 = vunpack.c.l.b16 %v15557_v25 }
 0x6b4   : > { %v9130_v45 = vadd.f32 %v9129_v1, %v9099_v63  ;;  %v8526_v40 = vadd.f32 %v8458_v38, %v8324_v52  ;;  %v8714_v44 = vpop.f32.mrf.mxu1  ;;  %v10753_v25 = vrot.slane %v15836_v8, 9 }
 0x6b5   : > { %v8160_v55 = vpack.c.b16 %v17014_v22, %v17013_v35  ;;  %v17018_v35 = vunpack.c.l.b16 %v15597_v27 }
 0x6b6   : > { %v8780_v6 = vadd.f32 %v8712_v58, %v8526_v40 }
 0x6b7   : > { %v8161_v22 = vpack.c.b16 %v17018_v35, %v17017_v31 }
 0x6b8   : > { %v8998_v19 = vadd.f32 %v8930_v33, %v8780_v6 }
 0x6b9   : > { %v8258_v10 = vpop.f32.mrf.mxu3 }
 0x6ba   : > { %9030 = vst [vmem:[%s15766_s10 + $0x40] sm:$0xff] %v8998_v19  ;;  %v9061_v46 = vadd.f32 %v9060_v48, %v8998_v19  ;;  %v9100_v13 = vmul.f32 %v8998_v19, %v8998_v19  ;;  %v8325_v39 = vadd.f32 %v8258_v10, %v17011_v28  ;;  %v17016_v48 = vld [vmem:[#allocation73_spill] sm:$0xff] }
 0x6bb   : > { %v8932_v18 = vpop.f32.mrf.mxu2  ;;  %v8463_v3 = vpop.f32.mrf.mxu0 }
 0x6bc   : > { %v9131_v1 = vadd.f32 %v9130_v45, %v9100_v13  ;;  %v8527_v38 = vadd.f32 %v8460_v9, %v8325_v39  ;;  %v8717_v34 = vpop.f32.mrf.mxu1  ;;  %v650_v13 = vld [vmem:[%s14184_s16 + $0x13c] sm:$0x1] }
 0x6be   : > { %v8781_v58 = vadd.f32 %v8714_v44, %v8527_v38  ;;  %8300 = vmatmul.bf16.gmra.mxu3 %v8160_v55  ;;  %8502 = vmatmul.bf16.gmra.mxu0 %v17015_v51 }
 0x6bf   : > { %8756 = vmatmul.bf16.gmra.mxu1 %v15569_v32  ;;  %v8596_v32 = vshll.u32 %v15836_v8, 16 }
 0x6c0   : > { %8974 = vmatmul.bf16.gmra.mxu2 %v15579_v47  ;;  %v8999_v4 = vadd.f32 %v8932_v18, %v8781_v58  ;;  %v8593_v47 = vshrl.u32 %v15836_v8, 16  ;;  %v8602_v58 = vshll.u32 %v650_v13, 16 }
 0x6c1   : > { %v8261_v17 = vpop.f32.mrf.mxu3  ;;  %v8598_v19 = vrot.slane %v8596_v32, 5 }
 0x6c2   : > { %9031 = vst [vmem:[%s15766_s10 + $0x48] sm:$0xff] %v8999_v4  ;;  %v9062_v54 = vadd.f32 %v9061_v46, %v8999_v4  ;;  %v9101_v11 = vmul.f32 %v8999_v4, %v8999_v4  ;;  %v8326_v63 = vadd.f32 %v8261_v17, %v17016_v48  ;;  %v8595_v6 = vrot.slane %v8593_v47, 4  ;;  %v17019_v4 = vld [vmem:[#allocation56_spill] sm:$0xff] }
 0x6c3   : > { %v8935_v24 = vpop.f32.mrf.mxu2  ;;  %v8465_v52 = vpop.f32.mrf.mxu0  ;;  %v11201_v17 = vld [vmem:[%s14184_s16 + $0x130] sm:$0xf]  ;;  %s9400_s16 = sshll.u32 %s17034_s22, 1 }
 0x6c4   : > { %v9132_v33 = vadd.f32 %v9131_v1, %v9101_v11  ;;  %v8528_v9 = vadd.f32 %v8463_v3, %v8326_v63  ;;  %v8719_v45 = vpop.f32.mrf.mxu1  ;;  %v8822_v11 = vrot.slane %v650_v13, 5  ;;  %v8604_v63 = vrot.slane %v8602_v58, 5  ;;  %s402_s18 = sadd.s32 %s9400_s16, %s17038_s21 }
 0x6c5   : > { %s403_s29 = scalar_lea.vmem %s15937_s5, %s402_s18  ;;  %s410_s9 = scalar_lea.vmem %s15938_s6, %s402_s18 }
 0x6c6   : > { %v8782_v40 = vadd.f32 %v8717_v34, %v8528_v9  ;;  %v8599_v34 = vor.u32 %v8598_v19, %v8595_v6 }
 0x6c8   : > { %v9000_v44 = vadd.f32 %v8935_v24, %v8782_v40  ;;  %v8600_v48 = vrot.slane %v8599_v34, 4  ;;  %v8823_v40 = vsel %vm11461_vm5, %v10753_v25, %v8822_v11 }
 0x6c9   : > { %v8263_v10 = vpop.f32.mrf.mxu3 }
 0x6ca   : > { %9032 = vst [vmem:[%s15766_s10 + $0x50] sm:$0xff] %v9000_v44  ;;  %v9063_v46 = vadd.f32 %v9062_v54, %v9000_v44  ;;  %v9102_v28 = vmul.f32 %v9000_v44, %v9000_v44  ;;  %v8327_v39 = vadd.f32 %v8263_v10, %v15590_v12  ;;  %v10605_v54 = vrot.slane %v11201_v17, 9 }
 0x6cb   : > { %v8937_v18 = vpop.f32.mrf.mxu2  ;;  %v8468_v55 = vpop.f32.mrf.mxu0  ;;  %v8124_v12 = vrot.slane %v15572_v57, 5  ;;  %v8605_v44 = vsel %vm11429_vm3, %v8600_v48, %v8604_v63  ;;  %v8372_v10 = vunpack.c.l.b16 %v15836_v8 }
 0x6cc   : > { %v9133_v3 = vadd.f32 %v9132_v33, %v9102_v28  ;;  %v8529_v1 = vadd.f32 %v8465_v52, %v8327_v39  ;;  %v8722_v38 = vpop.f32.mrf.mxu1  ;;  %v8626_v13 = vunpack.c.l.b16 %v8605_v44  ;;  %v17020_v39 = vunpack.c.l.b16 %v15601_v43 }
 0x6cd   : > { %v8125_v57 = vsel %vm11461_vm5, %v10605_v54, %v8124_v12 }
 0x6ce   : > { %v8783_v51 = vadd.f32 %v8719_v45, %v8529_v1  ;;  %8305 = vmatmul.bf16.gmra.mxu3 %v8161_v22  ;;  %8507 = vmatmul.bf16.gmra.mxu0 %v17019_v4  ;;  %v8146_v6 = vunpack.c.l.b16 %v8125_v57  ;;  %v8630_v8 = vpack.c.b16 %v8626_v13, %v15607_v23 }
 0x6cf   : > { %8761 = vmatmul.bf16.gmra.mxu1 %v15613_v29 }
 0x6d0   : > { %8979 = vmatmul.bf16.gmra.mxu2 %v15619_v50  ;;  %v9001_v27 = vadd.f32 %v8937_v18, %v8783_v51  ;;  %v8162_v18 = vpack.c.b16 %v8146_v6, %v17020_v39 }
 0x6d1   : > { %v8266_v24 = vpop.f32.mrf.mxu3 }
 0x6d2   : > { %9033 = vst [vmem:[%s15766_s10 + $0x58] sm:$0xff] %v9001_v27  ;;  %v9064_v52 = vadd.f32 %v9063_v46, %v9001_v27  ;;  %v9103_v33 = vmul.f32 %v9001_v27, %v9001_v27  ;;  %v8328_v9 = vadd.f32 %v8266_v24, %v15610_v7  ;;  %v8844_v7 = vunpack.c.l.b16 %v8823_v40 }
 0x6d3   : > { %v8940_v45 = vpop.f32.mrf.mxu2  ;;  %v8470_v50 = vpop.f32.mrf.mxu0 }
 0x6d4   : > { %v9134_v47 = vadd.f32 %v9133_v3, %v9103_v33  ;;  %v8530_v29 = vadd.f32 %v8468_v55, %v8328_v9  ;;  %v8724_v32 = vpop.f32.mrf.mxu1  ;;  %v8376_v55 = vpack.c.b16 %v8372_v10, %v17021_v41  ;;  %v8848_v1 = vpack.c.b16 %v8844_v7, %v8146_v6 }
 0x6d6   : > { %v8784_v19 = vadd.f32 %v8722_v38, %v8530_v29 }
 0x6d8   : > { %v9002_v46 = vadd.f32 %v8940_v45, %v8784_v19 }
 0x6d9   : > { %v8268_v28 = vpop.f32.mrf.mxu3 }
 0x6da   : > { %9034 = vst [vmem:[%s15766_s10 + $0x60] sm:$0xff] %v9002_v46  ;;  %v9065_v31 = vadd.f32 %v9064_v52, %v9002_v46  ;;  %v9104_v35 = vmul.f32 %v9002_v46, %v9002_v46  ;;  %v8329_v0 = vadd.f32 %v8268_v28, %v15628_v42 }
 0x6db   : > { %v8942_v22 = vpop.f32.mrf.mxu2  ;;  %v8473_v3 = vpop.f32.mrf.mxu0 }
 0x6dc   : > { %v9135_v38 = vadd.f32 %v9134_v47, %v9104_v35  ;;  %v8531_v34 = vadd.f32 %v8470_v50, %v8329_v0  ;;  %v8727_v58 = vpop.f32.mrf.mxu1 }
 0x6de   : > { %v8785_v51 = vadd.f32 %v8724_v32, %v8531_v34  ;;  %8310 = vmatmul.bf16.gmra.mxu3 %v8162_v18  ;;  %8512 = vmatmul.bf16.gmra.mxu0 %v8376_v55 }
 0x6df   : > { %8766 = vmatmul.bf16.gmra.mxu1 %v8630_v8 }
 0x6e0   : > { %8984 = vmatmul.bf16.gmra.mxu2 %v8848_v1  ;;  %v9003_v43 = vadd.f32 %v8942_v22, %v8785_v51 }
 0x6e1   : > { %v8271_v42 = vpop.f32.mrf.mxu3 }
 0x6e2   : > { %9035 = vst [vmem:[%s15766_s10 + $0x68] sm:$0xff] %v9003_v43  ;;  %v9066_v4 = vadd.f32 %v9065_v31, %v9003_v43  ;;  %v9105_v17 = vmul.f32 %v9003_v43, %v9003_v43  ;;  %v8330_v21 = vadd.f32 %v8271_v42, %v15631_v59 }
 0x6e3   : > { %v8945_v54 = vpop.f32.mrf.mxu2  ;;  %v8475_v12 = vpop.f32.mrf.mxu0 }
 0x6e4   : > { %v9136_v25 = vadd.f32 %v9135_v38, %v9105_v17  ;;  %v8532_v23 = vadd.f32 %v8473_v3, %v8330_v21  ;;  %v8729_v27 = vpop.f32.mrf.mxu1 }
 0x6e6   : > { %v8786_v11 = vadd.f32 %v8727_v58, %v8532_v23 }
 0x6e8   : > { %v9004_v48 = vadd.f32 %v8945_v54, %v8786_v11 }
 0x6e9   : > { %v8273_v63 = vpop.f32.mrf.mxu3 }
 0x6ea   : > { %9036 = vst [vmem:[%s15766_s10 + $0x70] sm:$0xff] %v9004_v48  ;;  %v9067_v24 = vadd.f32 %v9066_v4, %v9004_v48  ;;  %v9106_v52 = vmul.f32 %v9004_v48, %v9004_v48  ;;  %v8331_v33 = vadd.f32 %v8273_v63, %v15638_v37 }
 0x6eb   : > { %v8947_v9 = vpop.f32.mrf.mxu2  ;;  %v8478_v45 = vpop.f32.mrf.mxu0 }
 0x6ec   : > { %v9137_v57 = vadd.f32 %v9136_v25, %v9106_v52  ;;  %v8533_v50 = vadd.f32 %v8475_v12, %v8331_v33  ;;  %v8732_v47 = vpop.f32.mrf.mxu1 }
 0x6ee   : > { %v8787_v59 = vadd.f32 %v8729_v27, %v8533_v50 }
 0x6f0   : > { %v9005_v29 = vadd.f32 %v8947_v9, %v8787_v59 }
 0x6f1   : > { %v8276_v32 = vpop.f32.mrf.mxu3 }
 0x6f2   : > { %9037 = vst [vmem:[%s15766_s10 + $0x78] sm:$0xff] %v9005_v29  ;;  %v9068_v40 = vadd.f32 %v9067_v24, %v9005_v29  ;;  %v9107_v44 = vmul.f32 %v9005_v29, %v9005_v29  ;;  %v8332_v6 = vadd.f32 %v8276_v32, %v15641_v36 }
 0x6f3   : > { %v8950_v19 = vpop.f32.mrf.mxu2  ;;  %v8480_v10 = vpop.f32.mrf.mxu0 }
 0x6f4   : > { %v9138_v7 = vadd.f32 %v9137_v57, %v9107_v44  ;;  %v8534_v13 = vadd.f32 %v8478_v45, %v8332_v6  ;;  %v8734_v46 = vpop.f32.mrf.mxu1 }
 0x6f6   : > { %v8788_v37 = vadd.f32 %v8732_v47, %v8534_v13 }
 0x6f8   : > { %v9006_v28 = vadd.f32 %v8950_v19, %v8788_v37 }
 0x6f9   : > { %v8278_v39 = vpop.f32.mrf.mxu3 }
 0x6fa   : > { %9038 = vst [vmem:[%s15766_s10 + $0x80] sm:$0xff] %v9006_v28  ;;  %v9069_v18 = vadd.f32 %v9068_v40, %v9006_v28  ;;  %v9108_v31 = vmul.f32 %v9006_v28, %v9006_v28  ;;  %v8333_v35 = vadd.f32 %v8278_v39, %v15651_v30 }
 0x6fb   : > { %v8952_v0 = vpop.f32.mrf.mxu2  ;;  %v8483_v22 = vpop.f32.mrf.mxu0 }
 0x6fc   : > { %v9139_v41 = vadd.f32 %v9138_v7, %v9108_v31  ;;  %v8535_v55 = vadd.f32 %v8480_v10, %v8333_v35  ;;  %v8737_v3 = vpop.f32.mrf.mxu1 }
 0x6fe   : > { %v8789_v36 = vadd.f32 %v8734_v46, %v8535_v55 }
 0x700   : > { %v9007_v1 = vadd.f32 %v8952_v0, %v8789_v36 }
 0x701   : > { %v8281_v8 = vpop.f32.mrf.mxu3 }
 0x702   : > { %9039 = vst [vmem:[%s15766_s10 + $0x88] sm:$0xff] %v9007_v1  ;;  %v9070_v38 = vadd.f32 %v9069_v18, %v9007_v1  ;;  %v9109_v34 = vmul.f32 %v9007_v1, %v9007_v1  ;;  %v8334_v58 = vadd.f32 %v8281_v8, %v15655_v62 }
 0x703   : > { %v8955_v51 = vpop.f32.mrf.mxu2  ;;  %v8485_v43 = vpop.f32.mrf.mxu0 }
 0x704   : > { %v9140_v42 = vadd.f32 %v9139_v41, %v9109_v34  ;;  %v8536_v4 = vadd.f32 %v8483_v22, %v8334_v58  ;;  %v8739_v17 = vpop.f32.mrf.mxu1 }
 0x706   : > { %v8790_v30 = vadd.f32 %v8737_v3, %v8536_v4 }
 0x708   : > { %v9008_v21 = vadd.f32 %v8955_v51, %v8790_v30 }
 0x709   : > { %v8283_v54 = vpop.f32.mrf.mxu3 }
 0x70a   : > { %9040 = vst [vmem:[%s15766_s10 + $0x90] sm:$0xff] %v9008_v21  ;;  %v9071_v12 = vadd.f32 %v9070_v38, %v9008_v21  ;;  %v9110_v25 = vmul.f32 %v9008_v21, %v9008_v21  ;;  %v8335_v23 = vadd.f32 %v8283_v54, %v15668_v53 }
 0x70b   : > { %v8957_v27 = vpop.f32.mrf.mxu2  ;;  %v8488_v11 = vpop.f32.mrf.mxu0 }
 0x70c   : > { %v9141_v48 = vadd.f32 %v9140_v42, %v9110_v25  ;;  %v8537_v63 = vadd.f32 %v8485_v43, %v8335_v23  ;;  %v8742_v24 = vpop.f32.mrf.mxu1 }
 0x70e   : > { %v8791_v62 = vadd.f32 %v8739_v17, %v8537_v63 }
 0x710   : > { %v9009_v52 = vadd.f32 %v8957_v27, %v8791_v62 }
 0x711   : > { %v8286_v33 = vpop.f32.mrf.mxu3 }
 0x712   : > { %9041 = vst [vmem:[%s15766_s10 + $0x98] sm:$0xff] %v9009_v52  ;;  %v9072_v9 = vadd.f32 %v9071_v12, %v9009_v52  ;;  %v9111_v45 = vmul.f32 %v9009_v52, %v9009_v52  ;;  %v8336_v57 = vadd.f32 %v8286_v33, %v15677_v56 }
 0x713   : > { %v8960_v50 = vpop.f32.mrf.mxu2  ;;  %v8490_v47 = vpop.f32.mrf.mxu0 }
 0x714   : > { %v9142_v59 = vadd.f32 %v9141_v48, %v9111_v45  ;;  %v8538_v29 = vadd.f32 %v8488_v11, %v8336_v57  ;;  %v8744_v32 = vpop.f32.mrf.mxu1 }
 0x716   : > { %v8792_v53 = vadd.f32 %v8742_v24, %v8538_v29 }
 0x718   : > { %v9010_v40 = vadd.f32 %v8960_v50, %v8792_v53 }
 0x719   : > { %v8288_v44 = vpop.f32.mrf.mxu3 }
 0x71a   : > { %9042 = vst [vmem:[%s15766_s10 + $0xa0] sm:$0xff] %v9010_v40  ;;  %v9073_v6 = vadd.f32 %v9072_v9, %v9010_v40  ;;  %v9112_v19 = vmul.f32 %v9010_v40, %v9010_v40  ;;  %v8337_v10 = vadd.f32 %v8288_v44, %v15685_v20 }
 0x71b   : > { %v8962_v7 = vpop.f32.mrf.mxu2  ;;  %v8493_v13 = vpop.f32.mrf.mxu0 }
 0x71c   : > { %v9143_v46 = vadd.f32 %v9142_v59, %v9112_v19  ;;  %v8539_v37 = vadd.f32 %v8490_v47, %v8337_v10  ;;  %v8747_v28 = vpop.f32.mrf.mxu1 }
 0x71e   : > { %v8793_v56 = vadd.f32 %v8744_v32, %v8539_v37 }
 0x720   : > { %v9011_v39 = vadd.f32 %v8962_v7, %v8793_v56 }
 0x721   : > { %v8291_v18 = vpop.f32.mrf.mxu3 }
 0x722   : > { %9043 = vst [vmem:[%s15766_s10 + $0xa8] sm:$0xff] %v9011_v39  ;;  %v9074_v31 = vadd.f32 %v9073_v6, %v9011_v39  ;;  %v9113_v35 = vmul.f32 %v9011_v39, %v9011_v39  ;;  %v8338_v0 = vadd.f32 %v8291_v18, %v15688_v2 }
 0x723   : > { %v8965_v22 = vpop.f32.mrf.mxu2  ;;  %v8495_v41 = vpop.f32.mrf.mxu0 }
 0x724   : > { %v9144_v55 = vadd.f32 %v9143_v46, %v9113_v35  ;;  %v8540_v3 = vadd.f32 %v8493_v13, %v8338_v0  ;;  %v8749_v36 = vpop.f32.mrf.mxu1 }
 0x726   : > { %v8794_v20 = vadd.f32 %v8747_v28, %v8540_v3 }
 0x728   : > { %v9012_v1 = vadd.f32 %v8965_v22, %v8794_v20 }
 0x729   : > { %v8293_v8 = vpop.f32.mrf.mxu3 }
 0x72a   : > { %9044 = vst [vmem:[%s15766_s10 + $0xb0] sm:$0xff] %v9012_v1  ;;  %v9075_v38 = vadd.f32 %v9074_v31, %v9012_v1  ;;  %v9114_v34 = vmul.f32 %v9012_v1, %v9012_v1  ;;  %v8339_v58 = vadd.f32 %v8293_v8, %v15698_v26 }
 0x72b   : > { %v8967_v51 = vpop.f32.mrf.mxu2  ;;  %v8498_v43 = vpop.f32.mrf.mxu0 }
 0x72c   : > { %v9145_v42 = vadd.f32 %v9144_v55, %v9114_v34  ;;  %v8541_v4 = vadd.f32 %v8495_v41, %v8339_v58  ;;  %v8752_v17 = vpop.f32.mrf.mxu1 }
 0x72e   : > { %v8795_v2 = vadd.f32 %v8749_v36, %v8541_v4 }
 0x730   : > { %v9013_v30 = vadd.f32 %v8967_v51, %v8795_v2 }
 0x731   : > { %v8296_v21 = vpop.f32.mrf.mxu3 }
 0x732   : > { %9045 = vst [vmem:[%s15766_s10 + $0xb8] sm:$0xff] %v9013_v30  ;;  %v9076_v54 = vadd.f32 %v9075_v38, %v9013_v30  ;;  %v9115_v12 = vmul.f32 %v9013_v30, %v9013_v30  ;;  %v8340_v25 = vadd.f32 %v8296_v21, %v15701_v5 }
 0x733   : > { %v8970_v23 = vpop.f32.mrf.mxu2  ;;  %v8500_v27 = vpop.f32.mrf.mxu0 }
 0x734   : > { %v9146_v11 = vadd.f32 %v9145_v42, %v9115_v12  ;;  %v8542_v48 = vadd.f32 %v8498_v43, %v8340_v25  ;;  %v8754_v63 = vpop.f32.mrf.mxu1 }
 0x736   : > { %v8796_v26 = vadd.f32 %v8752_v17, %v8542_v48 }
 0x738   : > { %v9014_v24 = vadd.f32 %v8970_v23, %v8796_v26 }
 0x739   : > { %v8298_v62 = vpop.f32.mrf.mxu3 }
 0x73a   : > { %9046 = vst [vmem:[%s15766_s10 + $0xc0] sm:$0xff] %v9014_v24  ;;  %v9077_v52 = vadd.f32 %v9076_v54, %v9014_v24  ;;  %v9116_v33 = vmul.f32 %v9014_v24, %v9014_v24  ;;  %v8341_v9 = vadd.f32 %v8298_v62, %v15711_v61 }
 0x73b   : > { %v8972_v45 = vpop.f32.mrf.mxu2  ;;  %v8503_v57 = vpop.f32.mrf.mxu0 }
 0x73c   : > { %v9147_v50 = vadd.f32 %v9146_v11, %v9116_v33  ;;  %v8543_v47 = vadd.f32 %v8500_v27, %v8341_v9  ;;  %v8757_v59 = vpop.f32.mrf.mxu1 }
 0x73e   : > { %v8797_v5 = vadd.f32 %v8754_v63, %v8543_v47 }
 0x740   : > { %v9015_v29 = vadd.f32 %v8972_v45, %v8797_v5  ;;  %v17022_v45 = vld [vmem:[#allocation19_spill] sm:$0xff] }
 0x741   : > { %v8301_v32 = vpop.f32.mrf.mxu3 }
 0x742   : > { %9047 = vst [vmem:[%s15766_s10 + $0xc8] sm:$0xff] %v9015_v29  ;;  %v9078_v53 = vadd.f32 %v9077_v52, %v9015_v29  ;;  %v9117_v40 = vmul.f32 %v9015_v29, %v9015_v29  ;;  %v8342_v44 = vadd.f32 %v8301_v32, %v15715_v14 }
 0x743   : > { %v8975_v6 = vpop.f32.mrf.mxu2  ;;  %v8505_v19 = vpop.f32.mrf.mxu0 }
 0x744   : > { %v9148_v10 = vadd.f32 %v9147_v50, %v9117_v40  ;;  %v8544_v7 = vadd.f32 %v8503_v57, %v8342_v44  ;;  %v8759_v13 = vpop.f32.mrf.mxu1 }
 0x746   : > { %v8798_v61 = vadd.f32 %v8757_v59, %v8544_v7 }
 0x748   : > { %v9016_v46 = vadd.f32 %v8975_v6, %v8798_v61 }
 0x749   : > { %v8303_v37 = vpop.f32.mrf.mxu3 }
 0x74a   : > { %9048 = vst [vmem:[%s15766_s10 + $0xd0] sm:$0xff] %v9016_v46  ;;  %v9079_v28 = vadd.f32 %v9078_v53, %v9016_v46  ;;  %v9118_v56 = vmul.f32 %v9016_v46, %v9016_v46  ;;  %v8343_v39 = vadd.f32 %v8303_v37, %v15728_v16 }
 0x74b   : > { %v8977_v18 = vpop.f32.mrf.mxu2  ;;  %v8508_v0 = vpop.f32.mrf.mxu0 }
 0x74c   : > { %v9149_v31 = vadd.f32 %v9148_v10, %v9118_v56  ;;  %v8545_v35 = vadd.f32 %v8505_v19, %v8343_v39  ;;  %v8762_v14 = vpop.f32.mrf.mxu1 }
 0x74e   : > { %v8799_v22 = vadd.f32 %v8759_v13, %v8545_v35 }
 0x750   : > { %v9017_v41 = vadd.f32 %v8977_v18, %v8799_v22 }
 0x751   : > { %v8306_v55 = vpop.f32.mrf.mxu3 }
 0x752   : > { %9049 = vst [vmem:[%s15766_s10 + $0xd8] sm:$0xff] %v9017_v41  ;;  %v9080_v3 = vadd.f32 %v9079_v28, %v9017_v41  ;;  %v9119_v36 = vmul.f32 %v9017_v41, %v9017_v41  ;;  %v8344_v20 = vadd.f32 %v8306_v55, %v15737_v60 }
 0x753   : > { %v8980_v1 = vpop.f32.mrf.mxu2  ;;  %v8510_v16 = vpop.f32.mrf.mxu0 }
 0x754   : > { %v9150_v8 = vadd.f32 %v9149_v31, %v9119_v36  ;;  %v8546_v38 = vadd.f32 %v8508_v0, %v8344_v20  ;;  %v8764_v51 = vpop.f32.mrf.mxu1 }
 0x756   : > { %v8800_v34 = vadd.f32 %v8762_v14, %v8546_v38 }
 0x758   : > { %v9018_v58 = vadd.f32 %v8980_v1, %v8800_v34 }
 0x759   : > { %v8308_v43 = vpop.f32.mrf.mxu3 }
 0x75a   : > { %9050 = vst [vmem:[%s15766_s10 + $0xe0] sm:$0xff] %v9018_v58  ;;  %v9081_v42 = vadd.f32 %v9080_v3, %v9018_v58  ;;  %v9120_v4 = vmul.f32 %v9018_v58, %v9018_v58  ;;  %v8345_v17 = vadd.f32 %v8308_v43, %v15745_v49 }
 0x75b   : > { %v8982_v2 = vpop.f32.mrf.mxu2  ;;  %v8513_v12 = vpop.f32.mrf.mxu0 }
 0x75c   : > { %v9151_v30 = vadd.f32 %v9150_v8, %v9120_v4  ;;  %v8547_v21 = vadd.f32 %v8510_v16, %v8345_v17  ;;  %v8767_v48 = vpop.f32.mrf.mxu1 }
 0x75e   : > { %v8801_v54 = vadd.f32 %v8764_v51, %v8547_v21 }
 0x760   : > { %v9019_v60 = vadd.f32 %v8982_v2, %v8801_v54 }
 0x761   : > { %v8311_v25 = vpop.f32.mrf.mxu3 }
 0x762   : > { %9051 = vst [vmem:[%s15766_s10 + $0xe8] sm:$0xff] %v9019_v60  ;;  %v9082_v23 = vadd.f32 %v9081_v42, %v9019_v60  ;;  %v9121_v27 = vmul.f32 %v9019_v60, %v9019_v60  ;;  %v8346_v11 = vadd.f32 %v8311_v25, %v15748_v15 }
 0x763   : > { %v8985_v24 = vpop.f32.mrf.mxu2  ;;  %v8515_v50 = vpop.f32.mrf.mxu0 }
 0x764   : > { %v9152_v63 = vadd.f32 %v9151_v30, %v9121_v27  ;;  %v8548_v26 = vadd.f32 %v8513_v12, %v8346_v11  ;;  %v8769_v15 = vpop.f32.mrf.mxu1 }
 0x766   : > { %v8802_v49 = vadd.f32 %v8767_v48, %v8548_v26 }
 0x768   : > { %v9020_v62 = vadd.f32 %v8985_v24, %v8802_v49 }
 0x769   : > { %v8313_v52 = vpop.f32.mrf.mxu3 }
 0x76a   : > { %9052 = vst [vmem:[%s15766_s10 + $0xf0] sm:$0xff] %v9020_v62  ;;  %v9083_v33 = vadd.f32 %v9082_v23, %v9020_v62  ;;  %v9122_v9 = vmul.f32 %v9020_v62, %v9020_v62  ;;  %v8347_v57 = vadd.f32 %v8313_v52, %v17022_v45 }
 0x76b   : > { %v8987_v29 = vpop.f32.mrf.mxu2 }
 0x76c   : > { %v9153_v47 = vadd.f32 %v9152_v63, %v9122_v9  ;;  %v8549_v59 = vadd.f32 %v8515_v50, %v8347_v57 }
 0x76e   : > { %v8803_v5 = vadd.f32 %v8769_v15, %v8549_v59 }
 0x770   : > { %v9021_v32 = vadd.f32 %v8987_v29, %v8803_v5 }
 0x772   : > { %9053 = vst [vmem:[%s15766_s10 + $0xf8] sm:$0xff] %v9021_v32  ;;  %v9084_v53 = vadd.f32 %v9083_v33, %v9021_v32  ;;  %v9123_v40 = vmul.f32 %v9021_v32, %v9021_v32 }
 0x774   : > { %v9085_v44 = vrot.slane %v9084_v53, 4  ;;  %v9154_v6 = vadd.f32 %v9153_v47, %v9123_v40 }
 0x776   : > { %v9086_v19 = vadd.f32 %v9085_v44, %v9084_v53  ;;  %v9155_v10 = vrot.slane %v9154_v6, 4 }
 0x778   : > { %v9087_v7 = vrot.slane %v9086_v19, 2  ;;  %v9156_v13 = vadd.f32 %v9155_v10, %v9154_v6 }
 0x77a   : > { %v9088_v61 = vadd.f32 %v9087_v7, %v9086_v19  ;;  %v9157_v46 = vrot.slane %v9156_v13, 2 }
 0x77c   : > { %v9089_v37 = vrot.slane %v9088_v61, 1  ;;  %v9158_v28 = vadd.f32 %v9157_v46, %v9156_v13 }
 0x77e   : > { %v9090_v56 = vadd.f32 %v9089_v37, %v9088_v61  ;;  %v9159_v39 = vrot.slane %v9158_v28, 1 }
 0x780   : > { %9091 = vst [vmem:[%s403_s29] sm:$0x1] %v9090_v56  ;;  %v9160_v18 = vadd.f32 %v9159_v39, %v9158_v28 }
 0x782   : > { %9161 = vst [vmem:[%s410_s9] sm:$0x1] %v9160_v18 }
 0x783 PF: > { %s17_s25 = sadd.s32 1, %s11240_s25   ;;  %s17023_s21 = smov %s11232_s23 }
 0x784   : > { %p14_p8 = scmp.ge.s32.totalorder %s17_s25, 6   ;;  %s17024_s22 = smov %s11236_s24 }
 0x785   : > { %s17025_s23 = smov %s17028_s26  ;;  %s17026_s24 = smov %s17032_s27 }
 0x786   :  { %16 = sbr.rel (!%p14_p8) target bundleno = 3 (0x3), region = 122 }

</bundles_post_ra>
